<compile_context>
chip_gen: v7x
topology: tpu7x:2x2x1
jax: 0.10.0
libtpu: 0.0.40
codegen_flags: <defaults>
</compile_context>

<pallas_src>
import jax
import jax.numpy as jnp
from jax.experimental import pallas as pl
from jax.experimental.pallas import tpu as pltpu


def _round_up(v, m):
    return (v + m - 1) // m * m


# ----------------------------- fused Pallas kernel -----------------------------

def _conv_relu_pool(x_val, w_ref, c_ref):
    """Conv1d(stride=1, pad=0, bias=False) + ReLU + MaxPool1d(2, stride=2).

    x_val : (L_in, C_in) f32 value (channels-last)
    w_ref : (K, C_in, C_out) VMEM ref (tap-major weights)
    c_ref : (>=L_out, C_out) VMEM scratch holding the pre-pool activation so
            pooling can use sublane-strided reads.
    Returns the pooled (L_out // 2, C_out) value.
    """
    k, _, c_out = w_ref.shape
    l_out = x_val.shape[0] - k + 1
    l_pool = l_out // 2

    acc = jnp.zeros((l_out, c_out), jnp.float32)
    for kk in range(k):                       # static unroll: in-kernel "im2col"
        acc = acc + jnp.dot(x_val[kk:kk + l_out, :], w_ref[kk],
                            preferred_element_type=jnp.float32)

    c_ref[pl.ds(0, l_out), :] = jnp.maximum(acc, 0.0)        # fused ReLU
    even = c_ref[pl.ds(0, l_pool, stride=2), :]               # MaxPool(2,2)
    odd = c_ref[pl.ds(1, l_pool, stride=2), :]
    return jnp.maximum(even, odd)


def _network11_kernel(x_ref, w1_ref, w2_ref, w3_ref, w4_ref,
                      f1w_ref, f1b_ref, f2w_ref, f2b_ref, f3w_ref, f3b_ref,
                      o_ref, c1_ref, c2_ref, c3_ref, c4_ref):
    # One batch element per grid step.
    p = x_ref[0]                              # (L, C_in) channels-last
    p = _conv_relu_pool(p, w1_ref, c1_ref)
    p = _conv_relu_pool(p, w2_ref, c2_ref)
    p = _conv_relu_pool(p, w3_ref, c3_ref)
    p = _conv_relu_pool(p, w4_ref, c4_ref)    # (13, 10)

    # fc1 as tap-accumulation over the 13 positions.  The fc1 weight was
    # pre-permuted to (pos, chan, hidden) so this matches PyTorch's
    # channel-major .view(N, -1) flatten exactly.
    n_pos = f1w_ref.shape[0]
    h = f1b_ref[...]                          # (1, 30)
    for l in range(n_pos):
        h = h + jnp.dot(p[l:l + 1, :], f1w_ref[l],
                        preferred_element_type=jnp.float32)
    h = jnp.maximum(h, 0.0)

    h = jnp.maximum(
        jnp.dot(h, f2w_ref[...], preferred_element_type=jnp.float32)
        + f2b_ref[...], 0.0)                  # (1, 10)
    y = jnp.dot(h, f3w_ref[...],
                preferred_element_type=jnp.float32) + f3b_ref[...]
    o_ref[0] = y                              # (1, num_classes) row for this element


# ------------------------------ wrappers ------------------------------

def prepare_params(raw):
    """One-time (hoisted) weight preprocessing; NOT in the forward hot path."""
    h1, flat = raw["fc1_w"].shape
    c_last = raw["w4"].shape[0]               # channels of last conv (10)
    l_last = flat // c_last                   # flattened positions (13)
    return dict(
        # conv weights: (Cout, Cin, K) -> tap-major (K, Cin, Cout)
        w1=jnp.transpose(raw["w1"], (2, 1, 0)),
        w2=jnp.transpose(raw["w2"], (2, 1, 0)),
        w3=jnp.transpose(raw["w3"], (2, 1, 0)),
        w4=jnp.transpose(raw["w4"], (2, 1, 0)),
        # fc1: (H, C*Lp) -> (Lp, C, H), absorbing PyTorch channel-major flatten
        f1w=jnp.transpose(raw["fc1_w"].reshape(h1, c_last, l_last), (2, 1, 0)),
        f1b=raw["fc1_b"].reshape(1, -1),
        f2w=raw["fc2_w"].T,
        f2b=raw["fc2_b"].reshape(1, -1),
        f3w=raw["fc3_w"].T,
        f3b=raw["fc3_b"].reshape(1, -1),
    )


def _resident_spec(arr):
    """Whole-array VMEM block with a constant index map (stays resident)."""
    if arr.ndim == 2:
        return pl.BlockSpec(arr.shape, lambda b: (0, 0))
    return pl.BlockSpec(arr.shape, lambda b: (0, 0, 0))


@jax.jit
def network11_forward(prep, x_ncl):
    n, c_in, l = x_ncl.shape
    x_nlc = jnp.transpose(x_ncl, (0, 2, 1)).astype(jnp.float32)  # single boundary transpose

    k1, k2, k3, k4 = (prep["w1"].shape[0], prep["w2"].shape[0],
                      prep["w3"].shape[0], prep["w4"].shape[0])
    c1, c2, c3, c4 = (prep["w1"].shape[2], prep["w2"].shape[2],
                      prep["w3"].shape[2], prep["w4"].shape[2])
    l1 = l - k1 + 1
    l2 = l1 // 2 - k2 + 1
    l3 = l2 // 2 - k3 + 1
    l4 = l3 // 2 - k4 + 1
    num_classes = prep["f3b"].shape[1]

    weights = (prep["w1"], prep["w2"], prep["w3"], prep["w4"],
               prep["f1w"], prep["f1b"], prep["f2w"], prep["f2b"],
               prep["f3w"], prep["f3b"])

    out = pl.pallas_call(
        _network11_kernel,
        out_shape=jax.ShapeDtypeStruct((n, 1, num_classes), jnp.float32),
        grid=(n,),
        in_specs=[pl.BlockSpec((1, l, c_in), lambda b: (b, 0, 0))]
                 + [_resident_spec(w) for w in weights],
        out_specs=pl.BlockSpec((1, 1, num_classes), lambda b: (b, 0, 0)),
        scratch_shapes=[
            pltpu.VMEM((_round_up(l1, 8), c1), jnp.float32),
            pltpu.VMEM((_round_up(l2, 8), c2), jnp.float32),
            pltpu.VMEM((_round_up(l3, 8), c3), jnp.float32),
            pltpu.VMEM((_round_up(l4, 8), c4), jnp.float32),
        ],
        compiler_params=pltpu.CompilerParams(
            dimension_semantics=("parallel",)),
    )(x_nlc, *weights)
    return out.reshape(n, num_classes)


# ------------------------------ pure-JAX reference ------------------------------

def _ref_forward(raw, x_ncl):
    hp = jax.lax.Precision.HIGHEST

    def conv_relu_pool(x, w):                 # x: (N, Cin, L), w: (Cout, Cin, K)
        k = w.shape[2]
        l_out = x.shape[2] - k + 1
        patches = jnp.stack([x[:, :, kk:kk + l_out] for kk in range(k)], axis=2)
        y = jnp.einsum("nckl,ock->nol", patches, w, precision=hp)
        y = jnp.maximum(y, 0.0)
        lp = l_out // 2
        return jnp.maximum(y[:, :, 0:2 * lp:2], y[:, :, 1:2 * lp:2])

    y = conv_relu_pool(x_ncl, raw["w1"])
    y = conv_relu_pool(y, raw["w2"])
    y = conv_relu_pool(y, raw["w3"])
    y = conv_relu_pool(y, raw["w4"])
    y = y.reshape(y.shape[0], -1)             # channel-major flatten (PyTorch view)
    y = jnp.maximum(jnp.dot(y, raw["fc1_w"].T, precision=hp) + raw["fc1_b"], 0.0)
    y = jnp.maximum(jnp.dot(y, raw["fc2_w"].T, precision=hp) + raw["fc2_b"], 0.0)
    return jnp.dot(y, raw["fc3_w"].T, precision=hp) + raw["fc3_b"]


# ------------------------------ main ------------------------------

if __name__ == "__main__":
    # L must satisfy the architecture's flatten constraint (final 13*10 = 130
    # features before fc1); L = 300 is the smallest "natural" choice here.
    N, C, L, NUM_CLASSES = 2, 4, 300, 5
    key = jax.random.PRNGKey(0)
    ks = jax.random.split(key, 11)
    raw = dict(
        w1=jax.random.normal(ks[0], (3, C, 27), jnp.float32) * 0.1,
        w2=jax.random.normal(ks[1], (10, 3, 14), jnp.float32) * 0.1,
        w3=jax.random.normal(ks[2], (10, 10, 3), jnp.float32) * 0.1,
        w4=jax.random.normal(ks[3], (10, 10, 4), jnp.float32) * 0.1,
        fc1_w=jax.random.normal(ks[4], (30, 130), jnp.float32) * 0.1,
        fc1_b=jax.random.normal(ks[5], (30,), jnp.float32) * 0.1,
        fc2_w=jax.random.normal(ks[6], (10, 30), jnp.float32) * 0.1,
        fc2_b=jax.random.normal(ks[7], (10,), jnp.float32) * 0.1,
        fc3_w=jax.random.normal(ks[8], (NUM_CLASSES, 10), jnp.float32) * 0.1,
        fc3_b=jax.random.normal(ks[9], (NUM_CLASSES,), jnp.float32) * 0.1,
    )
    x = jax.random.normal(ks[10], (N, C, L), jnp.float32)   # PyTorch NCL input

    prep = prepare_params(raw)                # hoisted, one-time
    out = network11_forward(prep, x)
    out = jax.block_until_ready(out)
    assert out.shape == (N, NUM_CLASSES), out.shape

    ref = _ref_forward(raw, x)
    max_err = float(jnp.max(jnp.abs(out - ref)))
    assert jnp.allclose(out, ref, rtol=1e-2, atol=1e-2), max_err
    print("KERNEL_OK")
</pallas_src>

<mosaic_0001>
module attributes {stable_mosaic.version = 11 : i64} {
  func.func @_network11_kernel(%arg0: i32, %arg1: memref<1x300x4xf32, #tpu.memory_space<vmem>>, %arg2: memref<27x4x3xf32, #tpu.memory_space<vmem>>, %arg3: memref<14x3x10xf32, #tpu.memory_space<vmem>>, %arg4: memref<3x10x10xf32, #tpu.memory_space<vmem>>, %arg5: memref<4x10x10xf32, #tpu.memory_space<vmem>>, %arg6: memref<13x10x30xf32, #tpu.memory_space<vmem>>, %arg7: memref<1x30xf32, #tpu.memory_space<vmem>>, %arg8: memref<30x10xf32, #tpu.memory_space<vmem>>, %arg9: memref<1x10xf32, #tpu.memory_space<vmem>>, %arg10: memref<10x5xf32, #tpu.memory_space<vmem>>, %arg11: memref<1x5xf32, #tpu.memory_space<vmem>>, %arg12: memref<1x1x5xf32, #tpu.memory_space<vmem>>, %arg13: memref<280x3xf32, #tpu.memory_space<vmem>>, %arg14: memref<128x10xf32, #tpu.memory_space<vmem>>, %arg15: memref<64x10xf32, #tpu.memory_space<vmem>>, %arg16: memref<32x10xf32, #tpu.memory_space<vmem>>) attributes {dimension_semantics = [#tpu.dimension_semantics<parallel>], iteration_bounds = array<i64: 2>, scalar_prefetch = 0 : i64, scratch_operands = 4 : i64, tpu.core_type = #tpu.core_type<tc>, window_params = [{transform_indices = @transform_0, window_bounds = array<i64: 1, 300, 4>}, {pipeline_mode = #tpu.pipeline_mode<synchronous>, transform_indices = @transform_1, window_bounds = array<i64: 27, 4, 3>}, {pipeline_mode = #tpu.pipeline_mode<synchronous>, transform_indices = @transform_2, window_bounds = array<i64: 14, 3, 10>}, {pipeline_mode = #tpu.pipeline_mode<synchronous>, transform_indices = @transform_3, window_bounds = array<i64: 3, 10, 10>}, {pipeline_mode = #tpu.pipeline_mode<synchronous>, transform_indices = @transform_4, window_bounds = array<i64: 4, 10, 10>}, {pipeline_mode = #tpu.pipeline_mode<synchronous>, transform_indices = @transform_5, window_bounds = array<i64: 13, 10, 30>}, {pipeline_mode = #tpu.pipeline_mode<synchronous>, transform_indices = @transform_6, window_bounds = array<i64: 1, 30>}, {pipeline_mode = #tpu.pipeline_mode<synchronous>, transform_indices = @transform_7, window_bounds = array<i64: 30, 10>}, {pipeline_mode = #tpu.pipeline_mode<synchronous>, transform_indices = @transform_8, window_bounds = array<i64: 1, 10>}, {pipeline_mode = #tpu.pipeline_mode<synchronous>, transform_indices = @transform_9, window_bounds = array<i64: 10, 5>}, {pipeline_mode = #tpu.pipeline_mode<synchronous>, transform_indices = @transform_10, window_bounds = array<i64: 1, 5>}, {transform_indices = @transform_11, window_bounds = array<i64: 1, 1, 5>}]} {
    %c0 = arith.constant 0 : index
    %c0_0 = arith.constant 0 : index
    %c0_1 = arith.constant 0 : index
    %0 = vector.load %arg1[%c0, %c0_0, %c0_1] : memref<1x300x4xf32, #tpu.memory_space<vmem>>, vector<1x300x4xf32>
    %1 = vector.shape_cast %0 : vector<1x300x4xf32> to vector<300x4xf32>
    %cst = arith.constant 0.000000e+00 : f32
    %2 = vector.broadcast %cst : f32 to vector<274x3xf32>
    %3 = vector.extract_strided_slice %1 {offsets = [0, 0], sizes = [274, 4], strides = [1, 1]} : vector<300x4xf32> to vector<274x4xf32>
    %c0_2 = arith.constant 0 : index
    %c0_3 = arith.constant 0 : index
    %c0_4 = arith.constant 0 : index
    %4 = vector.load %arg2[%c0_2, %c0_3, %c0_4] : memref<27x4x3xf32, #tpu.memory_space<vmem>>, vector<1x4x3xf32>
    %5 = vector.shape_cast %4 : vector<1x4x3xf32> to vector<4x3xf32>
    %cst_5 = arith.constant dense<0.000000e+00> : vector<274x3xf32>
    %6 = tpu.matmul %3, %5, %cst_5 {dimension_numbers = #tpu.dot_dimension_numbers<[1], [0], [0], [1], [0, 0, 1, 1], [], []>} : vector<274x4xf32>, vector<4x3xf32>, vector<274x3xf32> -> vector<274x3xf32>
    %7 = arith.addf %2, %6 : vector<274x3xf32>
    %8 = vector.extract_strided_slice %1 {offsets = [1, 0], sizes = [274, 4], strides = [1, 1]} : vector<300x4xf32> to vector<274x4xf32>
    %c1 = arith.constant 1 : index
    %c0_6 = arith.constant 0 : index
    %c0_7 = arith.constant 0 : index
    %9 = vector.load %arg2[%c1, %c0_6, %c0_7] : memref<27x4x3xf32, #tpu.memory_space<vmem>>, vector<1x4x3xf32>
    %10 = vector.shape_cast %9 : vector<1x4x3xf32> to vector<4x3xf32>
    %cst_8 = arith.constant dense<0.000000e+00> : vector<274x3xf32>
    %11 = tpu.matmul %8, %10, %cst_8 {dimension_numbers = #tpu.dot_dimension_numbers<[1], [0], [0], [1], [0, 0, 1, 1], [], []>} : vector<274x4xf32>, vector<4x3xf32>, vector<274x3xf32> -> vector<274x3xf32>
    %12 = arith.addf %7, %11 : vector<274x3xf32>
    %13 = vector.extract_strided_slice %1 {offsets = [2, 0], sizes = [274, 4], strides = [1, 1]} : vector<300x4xf32> to vector<274x4xf32>
    %c2 = arith.constant 2 : index
    %c0_9 = arith.constant 0 : index
    %c0_10 = arith.constant 0 : index
    %14 = vector.load %arg2[%c2, %c0_9, %c0_10] : memref<27x4x3xf32, #tpu.memory_space<vmem>>, vector<1x4x3xf32>
    %15 = vector.shape_cast %14 : vector<1x4x3xf32> to vector<4x3xf32>
    %cst_11 = arith.constant dense<0.000000e+00> : vector<274x3xf32>
    %16 = tpu.matmul %13, %15, %cst_11 {dimension_numbers = #tpu.dot_dimension_numbers<[1], [0], [0], [1], [0, 0, 1, 1], [], []>} : vector<274x4xf32>, vector<4x3xf32>, vector<274x3xf32> -> vector<274x3xf32>
    %17 = arith.addf %12, %16 : vector<274x3xf32>
    %18 = vector.extract_strided_slice %1 {offsets = [3, 0], sizes = [274, 4], strides = [1, 1]} : vector<300x4xf32> to vector<274x4xf32>
    %c3 = arith.constant 3 : index
    %c0_12 = arith.constant 0 : index
    %c0_13 = arith.constant 0 : index
    %19 = vector.load %arg2[%c3, %c0_12, %c0_13] : memref<27x4x3xf32, #tpu.memory_space<vmem>>, vector<1x4x3xf32>
    %20 = vector.shape_cast %19 : vector<1x4x3xf32> to vector<4x3xf32>
    %cst_14 = arith.constant dense<0.000000e+00> : vector<274x3xf32>
    %21 = tpu.matmul %18, %20, %cst_14 {dimension_numbers = #tpu.dot_dimension_numbers<[1], [0], [0], [1], [0, 0, 1, 1], [], []>} : vector<274x4xf32>, vector<4x3xf32>, vector<274x3xf32> -> vector<274x3xf32>
    %22 = arith.addf %17, %21 : vector<274x3xf32>
    %23 = vector.extract_strided_slice %1 {offsets = [4, 0], sizes = [274, 4], strides = [1, 1]} : vector<300x4xf32> to vector<274x4xf32>
    %c4 = arith.constant 4 : index
    %c0_15 = arith.constant 0 : index
    %c0_16 = arith.constant 0 : index
    %24 = vector.load %arg2[%c4, %c0_15, %c0_16] : memref<27x4x3xf32, #tpu.memory_space<vmem>>, vector<1x4x3xf32>
    %25 = vector.shape_cast %24 : vector<1x4x3xf32> to vector<4x3xf32>
    %cst_17 = arith.constant dense<0.000000e+00> : vector<274x3xf32>
    %26 = tpu.matmul %23, %25, %cst_17 {dimension_numbers = #tpu.dot_dimension_numbers<[1], [0], [0], [1], [0, 0, 1, 1], [], []>} : vector<274x4xf32>, vector<4x3xf32>, vector<274x3xf32> -> vector<274x3xf32>
    %27 = arith.addf %22, %26 : vector<274x3xf32>
    %28 = vector.extract_strided_slice %1 {offsets = [5, 0], sizes = [274, 4], strides = [1, 1]} : vector<300x4xf32> to vector<274x4xf32>
    %c5 = arith.constant 5 : index
    %c0_18 = arith.constant 0 : index
    %c0_19 = arith.constant 0 : index
    %29 = vector.load %arg2[%c5, %c0_18, %c0_19] : memref<27x4x3xf32, #tpu.memory_space<vmem>>, vector<1x4x3xf32>
    %30 = vector.shape_cast %29 : vector<1x4x3xf32> to vector<4x3xf32>
    %cst_20 = arith.constant dense<0.000000e+00> : vector<274x3xf32>
    %31 = tpu.matmul %28, %30, %cst_20 {dimension_numbers = #tpu.dot_dimension_numbers<[1], [0], [0], [1], [0, 0, 1, 1], [], []>} : vector<274x4xf32>, vector<4x3xf32>, vector<274x3xf32> -> vector<274x3xf32>
    %32 = arith.addf %27, %31 : vector<274x3xf32>
    %33 = vector.extract_strided_slice %1 {offsets = [6, 0], sizes = [274, 4], strides = [1, 1]} : vector<300x4xf32> to vector<274x4xf32>
    %c6 = arith.constant 6 : index
    %c0_21 = arith.constant 0 : index
    %c0_22 = arith.constant 0 : index
    %34 = vector.load %arg2[%c6, %c0_21, %c0_22] : memref<27x4x3xf32, #tpu.memory_space<vmem>>, vector<1x4x3xf32>
    %35 = vector.shape_cast %34 : vector<1x4x3xf32> to vector<4x3xf32>
    %cst_23 = arith.constant dense<0.000000e+00> : vector<274x3xf32>
    %36 = tpu.matmul %33, %35, %cst_23 {dimension_numbers = #tpu.dot_dimension_numbers<[1], [0], [0], [1], [0, 0, 1, 1], [], []>} : vector<274x4xf32>, vector<4x3xf32>, vector<274x3xf32> -> vector<274x3xf32>
    %37 = arith.addf %32, %36 : vector<274x3xf32>
    %38 = vector.extract_strided_slice %1 {offsets = [7, 0], sizes = [274, 4], strides = [1, 1]} : vector<300x4xf32> to vector<274x4xf32>
    %c7 = arith.constant 7 : index
    %c0_24 = arith.constant 0 : index
    %c0_25 = arith.constant 0 : index
    %39 = vector.load %arg2[%c7, %c0_24, %c0_25] : memref<27x4x3xf32, #tpu.memory_space<vmem>>, vector<1x4x3xf32>
    %40 = vector.shape_cast %39 : vector<1x4x3xf32> to vector<4x3xf32>
    %cst_26 = arith.constant dense<0.000000e+00> : vector<274x3xf32>
    %41 = tpu.matmul %38, %40, %cst_26 {dimension_numbers = #tpu.dot_dimension_numbers<[1], [0], [0], [1], [0, 0, 1, 1], [], []>} : vector<274x4xf32>, vector<4x3xf32>, vector<274x3xf32> -> vector<274x3xf32>
    %42 = arith.addf %37, %41 : vector<274x3xf32>
    %43 = vector.extract_strided_slice %1 {offsets = [8, 0], sizes = [274, 4], strides = [1, 1]} : vector<300x4xf32> to vector<274x4xf32>
    %c8 = arith.constant 8 : index
    %c0_27 = arith.constant 0 : index
    %c0_28 = arith.constant 0 : index
    %44 = vector.load %arg2[%c8, %c0_27, %c0_28] : memref<27x4x3xf32, #tpu.memory_space<vmem>>, vector<1x4x3xf32>
    %45 = vector.shape_cast %44 : vector<1x4x3xf32> to vector<4x3xf32>
    %cst_29 = arith.constant dense<0.000000e+00> : vector<274x3xf32>
    %46 = tpu.matmul %43, %45, %cst_29 {dimension_numbers = #tpu.dot_dimension_numbers<[1], [0], [0], [1], [0, 0, 1, 1], [], []>} : vector<274x4xf32>, vector<4x3xf32>, vector<274x3xf32> -> vector<274x3xf32>
    %47 = arith.addf %42, %46 : vector<274x3xf32>
    %48 = vector.extract_strided_slice %1 {offsets = [9, 0], sizes = [274, 4], strides = [1, 1]} : vector<300x4xf32> to vector<274x4xf32>
    %c9 = arith.constant 9 : index
    %c0_30 = arith.constant 0 : index
    %c0_31 = arith.constant 0 : index
    %49 = vector.load %arg2[%c9, %c0_30, %c0_31] : memref<27x4x3xf32, #tpu.memory_space<vmem>>, vector<1x4x3xf32>
    %50 = vector.shape_cast %49 : vector<1x4x3xf32> to vector<4x3xf32>
    %cst_32 = arith.constant dense<0.000000e+00> : vector<274x3xf32>
    %51 = tpu.matmul %48, %50, %cst_32 {dimension_numbers = #tpu.dot_dimension_numbers<[1], [0], [0], [1], [0, 0, 1, 1], [], []>} : vector<274x4xf32>, vector<4x3xf32>, vector<274x3xf32> -> vector<274x3xf32>
    %52 = arith.addf %47, %51 : vector<274x3xf32>
    %53 = vector.extract_strided_slice %1 {offsets = [10, 0], sizes = [274, 4], strides = [1, 1]} : vector<300x4xf32> to vector<274x4xf32>
    %c10 = arith.constant 10 : index
    %c0_33 = arith.constant 0 : index
    %c0_34 = arith.constant 0 : index
    %54 = vector.load %arg2[%c10, %c0_33, %c0_34] : memref<27x4x3xf32, #tpu.memory_space<vmem>>, vector<1x4x3xf32>
    %55 = vector.shape_cast %54 : vector<1x4x3xf32> to vector<4x3xf32>
    %cst_35 = arith.constant dense<0.000000e+00> : vector<274x3xf32>
    %56 = tpu.matmul %53, %55, %cst_35 {dimension_numbers = #tpu.dot_dimension_numbers<[1], [0], [0], [1], [0, 0, 1, 1], [], []>} : vector<274x4xf32>, vector<4x3xf32>, vector<274x3xf32> -> vector<274x3xf32>
    %57 = arith.addf %52, %56 : vector<274x3xf32>
    %58 = vector.extract_strided_slice %1 {offsets = [11, 0], sizes = [274, 4], strides = [1, 1]} : vector<300x4xf32> to vector<274x4xf32>
    %c11 = arith.constant 11 : index
    %c0_36 = arith.constant 0 : index
    %c0_37 = arith.constant 0 : index
    %59 = vector.load %arg2[%c11, %c0_36, %c0_37] : memref<27x4x3xf32, #tpu.memory_space<vmem>>, vector<1x4x3xf32>
    %60 = vector.shape_cast %59 : vector<1x4x3xf32> to vector<4x3xf32>
    %cst_38 = arith.constant dense<0.000000e+00> : vector<274x3xf32>
    %61 = tpu.matmul %58, %60, %cst_38 {dimension_numbers = #tpu.dot_dimension_numbers<[1], [0], [0], [1], [0, 0, 1, 1], [], []>} : vector<274x4xf32>, vector<4x3xf32>, vector<274x3xf32> -> vector<274x3xf32>
    %62 = arith.addf %57, %61 : vector<274x3xf32>
    %63 = vector.extract_strided_slice %1 {offsets = [12, 0], sizes = [274, 4], strides = [1, 1]} : vector<300x4xf32> to vector<274x4xf32>
    %c12 = arith.constant 12 : index
    %c0_39 = arith.constant 0 : index
    %c0_40 = arith.constant 0 : index
    %64 = vector.load %arg2[%c12, %c0_39, %c0_40] : memref<27x4x3xf32, #tpu.memory_space<vmem>>, vector<1x4x3xf32>
    %65 = vector.shape_cast %64 : vector<1x4x3xf32> to vector<4x3xf32>
    %cst_41 = arith.constant dense<0.000000e+00> : vector<274x3xf32>
    %66 = tpu.matmul %63, %65, %cst_41 {dimension_numbers = #tpu.dot_dimension_numbers<[1], [0], [0], [1], [0, 0, 1, 1], [], []>} : vector<274x4xf32>, vector<4x3xf32>, vector<274x3xf32> -> vector<274x3xf32>
    %67 = arith.addf %62, %66 : vector<274x3xf32>
    %68 = vector.extract_strided_slice %1 {offsets = [13, 0], sizes = [274, 4], strides = [1, 1]} : vector<300x4xf32> to vector<274x4xf32>
    %c13 = arith.constant 13 : index
    %c0_42 = arith.constant 0 : index
    %c0_43 = arith.constant 0 : index
    %69 = vector.load %arg2[%c13, %c0_42, %c0_43] : memref<27x4x3xf32, #tpu.memory_space<vmem>>, vector<1x4x3xf32>
    %70 = vector.shape_cast %69 : vector<1x4x3xf32> to vector<4x3xf32>
    %cst_44 = arith.constant dense<0.000000e+00> : vector<274x3xf32>
    %71 = tpu.matmul %68, %70, %cst_44 {dimension_numbers = #tpu.dot_dimension_numbers<[1], [0], [0], [1], [0, 0, 1, 1], [], []>} : vector<274x4xf32>, vector<4x3xf32>, vector<274x3xf32> -> vector<274x3xf32>
    %72 = arith.addf %67, %71 : vector<274x3xf32>
    %73 = vector.extract_strided_slice %1 {offsets = [14, 0], sizes = [274, 4], strides = [1, 1]} : vector<300x4xf32> to vector<274x4xf32>
    %c14 = arith.constant 14 : index
    %c0_45 = arith.constant 0 : index
    %c0_46 = arith.constant 0 : index
    %74 = vector.load %arg2[%c14, %c0_45, %c0_46] : memref<27x4x3xf32, #tpu.memory_space<vmem>>, vector<1x4x3xf32>
    %75 = vector.shape_cast %74 : vector<1x4x3xf32> to vector<4x3xf32>
    %cst_47 = arith.constant dense<0.000000e+00> : vector<274x3xf32>
    %76 = tpu.matmul %73, %75, %cst_47 {dimension_numbers = #tpu.dot_dimension_numbers<[1], [0], [0], [1], [0, 0, 1, 1], [], []>} : vector<274x4xf32>, vector<4x3xf32>, vector<274x3xf32> -> vector<274x3xf32>
    %77 = arith.addf %72, %76 : vector<274x3xf32>
    %78 = vector.extract_strided_slice %1 {offsets = [15, 0], sizes = [274, 4], strides = [1, 1]} : vector<300x4xf32> to vector<274x4xf32>
    %c15 = arith.constant 15 : index
    %c0_48 = arith.constant 0 : index
    %c0_49 = arith.constant 0 : index
    %79 = vector.load %arg2[%c15, %c0_48, %c0_49] : memref<27x4x3xf32, #tpu.memory_space<vmem>>, vector<1x4x3xf32>
    %80 = vector.shape_cast %79 : vector<1x4x3xf32> to vector<4x3xf32>
    %cst_50 = arith.constant dense<0.000000e+00> : vector<274x3xf32>
    %81 = tpu.matmul %78, %80, %cst_50 {dimension_numbers = #tpu.dot_dimension_numbers<[1], [0], [0], [1], [0, 0, 1, 1], [], []>} : vector<274x4xf32>, vector<4x3xf32>, vector<274x3xf32> -> vector<274x3xf32>
    %82 = arith.addf %77, %81 : vector<274x3xf32>
    %83 = vector.extract_strided_slice %1 {offsets = [16, 0], sizes = [274, 4], strides = [1, 1]} : vector<300x4xf32> to vector<274x4xf32>
    %c16 = arith.constant 16 : index
    %c0_51 = arith.constant 0 : index
    %c0_52 = arith.constant 0 : index
    %84 = vector.load %arg2[%c16, %c0_51, %c0_52] : memref<27x4x3xf32, #tpu.memory_space<vmem>>, vector<1x4x3xf32>
    %85 = vector.shape_cast %84 : vector<1x4x3xf32> to vector<4x3xf32>
    %cst_53 = arith.constant dense<0.000000e+00> : vector<274x3xf32>
    %86 = tpu.matmul %83, %85, %cst_53 {dimension_numbers = #tpu.dot_dimension_numbers<[1], [0], [0], [1], [0, 0, 1, 1], [], []>} : vector<274x4xf32>, vector<4x3xf32>, vector<274x3xf32> -> vector<274x3xf32>
    %87 = arith.addf %82, %86 : vector<274x3xf32>
    %88 = vector.extract_strided_slice %1 {offsets = [17, 0], sizes = [274, 4], strides = [1, 1]} : vector<300x4xf32> to vector<274x4xf32>
    %c17 = arith.constant 17 : index
    %c0_54 = arith.constant 0 : index
    %c0_55 = arith.constant 0 : index
    %89 = vector.load %arg2[%c17, %c0_54, %c0_55] : memref<27x4x3xf32, #tpu.memory_space<vmem>>, vector<1x4x3xf32>
    %90 = vector.shape_cast %89 : vector<1x4x3xf32> to vector<4x3xf32>
    %cst_56 = arith.constant dense<0.000000e+00> : vector<274x3xf32>
    %91 = tpu.matmul %88, %90, %cst_56 {dimension_numbers = #tpu.dot_dimension_numbers<[1], [0], [0], [1], [0, 0, 1, 1], [], []>} : vector<274x4xf32>, vector<4x3xf32>, vector<274x3xf32> -> vector<274x3xf32>
    %92 = arith.addf %87, %91 : vector<274x3xf32>
    %93 = vector.extract_strided_slice %1 {offsets = [18, 0], sizes = [274, 4], strides = [1, 1]} : vector<300x4xf32> to vector<274x4xf32>
    %c18 = arith.constant 18 : index
    %c0_57 = arith.constant 0 : index
    %c0_58 = arith.constant 0 : index
    %94 = vector.load %arg2[%c18, %c0_57, %c0_58] : memref<27x4x3xf32, #tpu.memory_space<vmem>>, vector<1x4x3xf32>
    %95 = vector.shape_cast %94 : vector<1x4x3xf32> to vector<4x3xf32>
    %cst_59 = arith.constant dense<0.000000e+00> : vector<274x3xf32>
    %96 = tpu.matmul %93, %95, %cst_59 {dimension_numbers = #tpu.dot_dimension_numbers<[1], [0], [0], [1], [0, 0, 1, 1], [], []>} : vector<274x4xf32>, vector<4x3xf32>, vector<274x3xf32> -> vector<274x3xf32>
    %97 = arith.addf %92, %96 : vector<274x3xf32>
    %98 = vector.extract_strided_slice %1 {offsets = [19, 0], sizes = [274, 4], strides = [1, 1]} : vector<300x4xf32> to vector<274x4xf32>
    %c19 = arith.constant 19 : index
    %c0_60 = arith.constant 0 : index
    %c0_61 = arith.constant 0 : index
    %99 = vector.load %arg2[%c19, %c0_60, %c0_61] : memref<27x4x3xf32, #tpu.memory_space<vmem>>, vector<1x4x3xf32>
    %100 = vector.shape_cast %99 : vector<1x4x3xf32> to vector<4x3xf32>
    %cst_62 = arith.constant dense<0.000000e+00> : vector<274x3xf32>
    %101 = tpu.matmul %98, %100, %cst_62 {dimension_numbers = #tpu.dot_dimension_numbers<[1], [0], [0], [1], [0, 0, 1, 1], [], []>} : vector<274x4xf32>, vector<4x3xf32>, vector<274x3xf32> -> vector<274x3xf32>
    %102 = arith.addf %97, %101 : vector<274x3xf32>
    %103 = vector.extract_strided_slice %1 {offsets = [20, 0], sizes = [274, 4], strides = [1, 1]} : vector<300x4xf32> to vector<274x4xf32>
    %c20 = arith.constant 20 : index
    %c0_63 = arith.constant 0 : index
    %c0_64 = arith.constant 0 : index
    %104 = vector.load %arg2[%c20, %c0_63, %c0_64] : memref<27x4x3xf32, #tpu.memory_space<vmem>>, vector<1x4x3xf32>
    %105 = vector.shape_cast %104 : vector<1x4x3xf32> to vector<4x3xf32>
    %cst_65 = arith.constant dense<0.000000e+00> : vector<274x3xf32>
    %106 = tpu.matmul %103, %105, %cst_65 {dimension_numbers = #tpu.dot_dimension_numbers<[1], [0], [0], [1], [0, 0, 1, 1], [], []>} : vector<274x4xf32>, vector<4x3xf32>, vector<274x3xf32> -> vector<274x3xf32>
    %107 = arith.addf %102, %106 : vector<274x3xf32>
    %108 = vector.extract_strided_slice %1 {offsets = [21, 0], sizes = [274, 4], strides = [1, 1]} : vector<300x4xf32> to vector<274x4xf32>
    %c21 = arith.constant 21 : index
    %c0_66 = arith.constant 0 : index
    %c0_67 = arith.constant 0 : index
    %109 = vector.load %arg2[%c21, %c0_66, %c0_67] : memref<27x4x3xf32, #tpu.memory_space<vmem>>, vector<1x4x3xf32>
    %110 = vector.shape_cast %109 : vector<1x4x3xf32> to vector<4x3xf32>
    %cst_68 = arith.constant dense<0.000000e+00> : vector<274x3xf32>
    %111 = tpu.matmul %108, %110, %cst_68 {dimension_numbers = #tpu.dot_dimension_numbers<[1], [0], [0], [1], [0, 0, 1, 1], [], []>} : vector<274x4xf32>, vector<4x3xf32>, vector<274x3xf32> -> vector<274x3xf32>
    %112 = arith.addf %107, %111 : vector<274x3xf32>
    %113 = vector.extract_strided_slice %1 {offsets = [22, 0], sizes = [274, 4], strides = [1, 1]} : vector<300x4xf32> to vector<274x4xf32>
    %c22 = arith.constant 22 : index
    %c0_69 = arith.constant 0 : index
    %c0_70 = arith.constant 0 : index
    %114 = vector.load %arg2[%c22, %c0_69, %c0_70] : memref<27x4x3xf32, #tpu.memory_space<vmem>>, vector<1x4x3xf32>
    %115 = vector.shape_cast %114 : vector<1x4x3xf32> to vector<4x3xf32>
    %cst_71 = arith.constant dense<0.000000e+00> : vector<274x3xf32>
    %116 = tpu.matmul %113, %115, %cst_71 {dimension_numbers = #tpu.dot_dimension_numbers<[1], [0], [0], [1], [0, 0, 1, 1], [], []>} : vector<274x4xf32>, vector<4x3xf32>, vector<274x3xf32> -> vector<274x3xf32>
    %117 = arith.addf %112, %116 : vector<274x3xf32>
    %118 = vector.extract_strided_slice %1 {offsets = [23, 0], sizes = [274, 4], strides = [1, 1]} : vector<300x4xf32> to vector<274x4xf32>
    %c23 = arith.constant 23 : index
    %c0_72 = arith.constant 0 : index
    %c0_73 = arith.constant 0 : index
    %119 = vector.load %arg2[%c23, %c0_72, %c0_73] : memref<27x4x3xf32, #tpu.memory_space<vmem>>, vector<1x4x3xf32>
    %120 = vector.shape_cast %119 : vector<1x4x3xf32> to vector<4x3xf32>
    %cst_74 = arith.constant dense<0.000000e+00> : vector<274x3xf32>
    %121 = tpu.matmul %118, %120, %cst_74 {dimension_numbers = #tpu.dot_dimension_numbers<[1], [0], [0], [1], [0, 0, 1, 1], [], []>} : vector<274x4xf32>, vector<4x3xf32>, vector<274x3xf32> -> vector<274x3xf32>
    %122 = arith.addf %117, %121 : vector<274x3xf32>
    %123 = vector.extract_strided_slice %1 {offsets = [24, 0], sizes = [274, 4], strides = [1, 1]} : vector<300x4xf32> to vector<274x4xf32>
    %c24 = arith.constant 24 : index
    %c0_75 = arith.constant 0 : index
    %c0_76 = arith.constant 0 : index
    %124 = vector.load %arg2[%c24, %c0_75, %c0_76] : memref<27x4x3xf32, #tpu.memory_space<vmem>>, vector<1x4x3xf32>
    %125 = vector.shape_cast %124 : vector<1x4x3xf32> to vector<4x3xf32>
    %cst_77 = arith.constant dense<0.000000e+00> : vector<274x3xf32>
    %126 = tpu.matmul %123, %125, %cst_77 {dimension_numbers = #tpu.dot_dimension_numbers<[1], [0], [0], [1], [0, 0, 1, 1], [], []>} : vector<274x4xf32>, vector<4x3xf32>, vector<274x3xf32> -> vector<274x3xf32>
    %127 = arith.addf %122, %126 : vector<274x3xf32>
    %128 = vector.extract_strided_slice %1 {offsets = [25, 0], sizes = [274, 4], strides = [1, 1]} : vector<300x4xf32> to vector<274x4xf32>
    %c25 = arith.constant 25 : index
    %c0_78 = arith.constant 0 : index
    %c0_79 = arith.constant 0 : index
    %129 = vector.load %arg2[%c25, %c0_78, %c0_79] : memref<27x4x3xf32, #tpu.memory_space<vmem>>, vector<1x4x3xf32>
    %130 = vector.shape_cast %129 : vector<1x4x3xf32> to vector<4x3xf32>
    %cst_80 = arith.constant dense<0.000000e+00> : vector<274x3xf32>
    %131 = tpu.matmul %128, %130, %cst_80 {dimension_numbers = #tpu.dot_dimension_numbers<[1], [0], [0], [1], [0, 0, 1, 1], [], []>} : vector<274x4xf32>, vector<4x3xf32>, vector<274x3xf32> -> vector<274x3xf32>
    %132 = arith.addf %127, %131 : vector<274x3xf32>
    %133 = vector.extract_strided_slice %1 {offsets = [26, 0], sizes = [274, 4], strides = [1, 1]} : vector<300x4xf32> to vector<274x4xf32>
    %c26 = arith.constant 26 : index
    %c0_81 = arith.constant 0 : index
    %c0_82 = arith.constant 0 : index
    %134 = vector.load %arg2[%c26, %c0_81, %c0_82] : memref<27x4x3xf32, #tpu.memory_space<vmem>>, vector<1x4x3xf32>
    %135 = vector.shape_cast %134 : vector<1x4x3xf32> to vector<4x3xf32>
    %cst_83 = arith.constant dense<0.000000e+00> : vector<274x3xf32>
    %136 = tpu.matmul %133, %135, %cst_83 {dimension_numbers = #tpu.dot_dimension_numbers<[1], [0], [0], [1], [0, 0, 1, 1], [], []>} : vector<274x4xf32>, vector<4x3xf32>, vector<274x3xf32> -> vector<274x3xf32>
    %137 = arith.addf %132, %136 : vector<274x3xf32>
    %cst_84 = arith.constant 0.000000e+00 : f32
    %138 = vector.broadcast %cst_84 : f32 to vector<274x3xf32>
    %139 = arith.maximumf %137, %138 : vector<274x3xf32>
    %c0_85 = arith.constant 0 : index
    %c0_86 = arith.constant 0 : index
    %140 = vector.load %arg13[%c0_85, %c0_86] : memref<280x3xf32, #tpu.memory_space<vmem>>, vector<274x3xf32>
    tpu.vector_store %arg13[%c0_85, %c0_86], %139 {strides = array<i32>} : memref<280x3xf32, #tpu.memory_space<vmem>>, vector<274x3xf32>,
    %c0_87 = arith.constant 0 : index
    %c0_88 = arith.constant 0 : index
    %141 = tpu.strided_load %arg13[%c0_87, %c0_88] {strides = array<i32: 2, 1>} : memref<280x3xf32, #tpu.memory_space<vmem>>, vector<137x3xf32>
    %c1_89 = arith.constant 1 : index
    %c0_90 = arith.constant 0 : index
    %142 = tpu.strided_load %arg13[%c1_89, %c0_90] {strides = array<i32: 2, 1>} : memref<280x3xf32, #tpu.memory_space<vmem>>, vector<137x3xf32>
    %143 = arith.maximumf %141, %142 : vector<137x3xf32>
    %cst_91 = arith.constant 0.000000e+00 : f32
    %144 = vector.broadcast %cst_91 : f32 to vector<124x10xf32>
    %145 = vector.extract_strided_slice %143 {offsets = [0, 0], sizes = [124, 3], strides = [1, 1]} : vector<137x3xf32> to vector<124x3xf32>
    %c0_92 = arith.constant 0 : index
    %c0_93 = arith.constant 0 : index
    %c0_94 = arith.constant 0 : index
    %146 = vector.load %arg3[%c0_92, %c0_93, %c0_94] : memref<14x3x10xf32, #tpu.memory_space<vmem>>, vector<1x3x10xf32>
    %147 = vector.shape_cast %146 : vector<1x3x10xf32> to vector<3x10xf32>
    %cst_95 = arith.constant dense<0.000000e+00> : vector<124x10xf32>
    %148 = tpu.matmul %145, %147, %cst_95 {dimension_numbers = #tpu.dot_dimension_numbers<[1], [0], [0], [1], [0, 0, 1, 1], [], []>} : vector<124x3xf32>, vector<3x10xf32>, vector<124x10xf32> -> vector<124x10xf32>
    %149 = arith.addf %144, %148 : vector<124x10xf32>
    %150 = vector.extract_strided_slice %143 {offsets = [1, 0], sizes = [124, 3], strides = [1, 1]} : vector<137x3xf32> to vector<124x3xf32>
    %c1_96 = arith.constant 1 : index
    %c0_97 = arith.constant 0 : index
    %c0_98 = arith.constant 0 : index
    %151 = vector.load %arg3[%c1_96, %c0_97, %c0_98] : memref<14x3x10xf32, #tpu.memory_space<vmem>>, vector<1x3x10xf32>
    %152 = vector.shape_cast %151 : vector<1x3x10xf32> to vector<3x10xf32>
    %cst_99 = arith.constant dense<0.000000e+00> : vector<124x10xf32>
    %153 = tpu.matmul %150, %152, %cst_99 {dimension_numbers = #tpu.dot_dimension_numbers<[1], [0], [0], [1], [0, 0, 1, 1], [], []>} : vector<124x3xf32>, vector<3x10xf32>, vector<124x10xf32> -> vector<124x10xf32>
    %154 = arith.addf %149, %153 : vector<124x10xf32>
    %155 = vector.extract_strided_slice %143 {offsets = [2, 0], sizes = [124, 3], strides = [1, 1]} : vector<137x3xf32> to vector<124x3xf32>
    %c2_100 = arith.constant 2 : index
    %c0_101 = arith.constant 0 : index
    %c0_102 = arith.constant 0 : index
    %156 = vector.load %arg3[%c2_100, %c0_101, %c0_102] : memref<14x3x10xf32, #tpu.memory_space<vmem>>, vector<1x3x10xf32>
    %157 = vector.shape_cast %156 : vector<1x3x10xf32> to vector<3x10xf32>
    %cst_103 = arith.constant dense<0.000000e+00> : vector<124x10xf32>
    %158 = tpu.matmul %155, %157, %cst_103 {dimension_numbers = #tpu.dot_dimension_numbers<[1], [0], [0], [1], [0, 0, 1, 1], [], []>} : vector<124x3xf32>, vector<3x10xf32>, vector<124x10xf32> -> vector<124x10xf32>
    %159 = arith.addf %154, %158 : vector<124x10xf32>
    %160 = vector.extract_strided_slice %143 {offsets = [3, 0], sizes = [124, 3], strides = [1, 1]} : vector<137x3xf32> to vector<124x3xf32>
    %c3_104 = arith.constant 3 : index
    %c0_105 = arith.constant 0 : index
    %c0_106 = arith.constant 0 : index
    %161 = vector.load %arg3[%c3_104, %c0_105, %c0_106] : memref<14x3x10xf32, #tpu.memory_space<vmem>>, vector<1x3x10xf32>
    %162 = vector.shape_cast %161 : vector<1x3x10xf32> to vector<3x10xf32>
    %cst_107 = arith.constant dense<0.000000e+00> : vector<124x10xf32>
    %163 = tpu.matmul %160, %162, %cst_107 {dimension_numbers = #tpu.dot_dimension_numbers<[1], [0], [0], [1], [0, 0, 1, 1], [], []>} : vector<124x3xf32>, vector<3x10xf32>, vector<124x10xf32> -> vector<124x10xf32>
    %164 = arith.addf %159, %163 : vector<124x10xf32>
    %165 = vector.extract_strided_slice %143 {offsets = [4, 0], sizes = [124, 3], strides = [1, 1]} : vector<137x3xf32> to vector<124x3xf32>
    %c4_108 = arith.constant 4 : index
    %c0_109 = arith.constant 0 : index
    %c0_110 = arith.constant 0 : index
    %166 = vector.load %arg3[%c4_108, %c0_109, %c0_110] : memref<14x3x10xf32, #tpu.memory_space<vmem>>, vector<1x3x10xf32>
    %167 = vector.shape_cast %166 : vector<1x3x10xf32> to vector<3x10xf32>
    %cst_111 = arith.constant dense<0.000000e+00> : vector<124x10xf32>
    %168 = tpu.matmul %165, %167, %cst_111 {dimension_numbers = #tpu.dot_dimension_numbers<[1], [0], [0], [1], [0, 0, 1, 1], [], []>} : vector<124x3xf32>, vector<3x10xf32>, vector<124x10xf32> -> vector<124x10xf32>
    %169 = arith.addf %164, %168 : vector<124x10xf32>
    %170 = vector.extract_strided_slice %143 {offsets = [5, 0], sizes = [124, 3], strides = [1, 1]} : vector<137x3xf32> to vector<124x3xf32>
    %c5_112 = arith.constant 5 : index
    %c0_113 = arith.constant 0 : index
    %c0_114 = arith.constant 0 : index
    %171 = vector.load %arg3[%c5_112, %c0_113, %c0_114] : memref<14x3x10xf32, #tpu.memory_space<vmem>>, vector<1x3x10xf32>
    %172 = vector.shape_cast %171 : vector<1x3x10xf32> to vector<3x10xf32>
    %cst_115 = arith.constant dense<0.000000e+00> : vector<124x10xf32>
    %173 = tpu.matmul %170, %172, %cst_115 {dimension_numbers = #tpu.dot_dimension_numbers<[1], [0], [0], [1], [0, 0, 1, 1], [], []>} : vector<124x3xf32>, vector<3x10xf32>, vector<124x10xf32> -> vector<124x10xf32>
    %174 = arith.addf %169, %173 : vector<124x10xf32>
    %175 = vector.extract_strided_slice %143 {offsets = [6, 0], sizes = [124, 3], strides = [1, 1]} : vector<137x3xf32> to vector<124x3xf32>
    %c6_116 = arith.constant 6 : index
    %c0_117 = arith.constant 0 : index
    %c0_118 = arith.constant 0 : index
    %176 = vector.load %arg3[%c6_116, %c0_117, %c0_118] : memref<14x3x10xf32, #tpu.memory_space<vmem>>, vector<1x3x10xf32>
    %177 = vector.shape_cast %176 : vector<1x3x10xf32> to vector<3x10xf32>
    %cst_119 = arith.constant dense<0.000000e+00> : vector<124x10xf32>
    %178 = tpu.matmul %175, %177, %cst_119 {dimension_numbers = #tpu.dot_dimension_numbers<[1], [0], [0], [1], [0, 0, 1, 1], [], []>} : vector<124x3xf32>, vector<3x10xf32>, vector<124x10xf32> -> vector<124x10xf32>
    %179 = arith.addf %174, %178 : vector<124x10xf32>
    %180 = vector.extract_strided_slice %143 {offsets = [7, 0], sizes = [124, 3], strides = [1, 1]} : vector<137x3xf32> to vector<124x3xf32>
    %c7_120 = arith.constant 7 : index
    %c0_121 = arith.constant 0 : index
    %c0_122 = arith.constant 0 : index
    %181 = vector.load %arg3[%c7_120, %c0_121, %c0_122] : memref<14x3x10xf32, #tpu.memory_space<vmem>>, vector<1x3x10xf32>
    %182 = vector.shape_cast %181 : vector<1x3x10xf32> to vector<3x10xf32>
    %cst_123 = arith.constant dense<0.000000e+00> : vector<124x10xf32>
    %183 = tpu.matmul %180, %182, %cst_123 {dimension_numbers = #tpu.dot_dimension_numbers<[1], [0], [0], [1], [0, 0, 1, 1], [], []>} : vector<124x3xf32>, vector<3x10xf32>, vector<124x10xf32> -> vector<124x10xf32>
    %184 = arith.addf %179, %183 : vector<124x10xf32>
    %185 = vector.extract_strided_slice %143 {offsets = [8, 0], sizes = [124, 3], strides = [1, 1]} : vector<137x3xf32> to vector<124x3xf32>
    %c8_124 = arith.constant 8 : index
    %c0_125 = arith.constant 0 : index
    %c0_126 = arith.constant 0 : index
    %186 = vector.load %arg3[%c8_124, %c0_125, %c0_126] : memref<14x3x10xf32, #tpu.memory_space<vmem>>, vector<1x3x10xf32>
    %187 = vector.shape_cast %186 : vector<1x3x10xf32> to vector<3x10xf32>
    %cst_127 = arith.constant dense<0.000000e+00> : vector<124x10xf32>
    %188 = tpu.matmul %185, %187, %cst_127 {dimension_numbers = #tpu.dot_dimension_numbers<[1], [0], [0], [1], [0, 0, 1, 1], [], []>} : vector<124x3xf32>, vector<3x10xf32>, vector<124x10xf32> -> vector<124x10xf32>
    %189 = arith.addf %184, %188 : vector<124x10xf32>
    %190 = vector.extract_strided_slice %143 {offsets = [9, 0], sizes = [124, 3], strides = [1, 1]} : vector<137x3xf32> to vector<124x3xf32>
    %c9_128 = arith.constant 9 : index
    %c0_129 = arith.constant 0 : index
    %c0_130 = arith.constant 0 : index
    %191 = vector.load %arg3[%c9_128, %c0_129, %c0_130] : memref<14x3x10xf32, #tpu.memory_space<vmem>>, vector<1x3x10xf32>
    %192 = vector.shape_cast %191 : vector<1x3x10xf32> to vector<3x10xf32>
    %cst_131 = arith.constant dense<0.000000e+00> : vector<124x10xf32>
    %193 = tpu.matmul %190, %192, %cst_131 {dimension_numbers = #tpu.dot_dimension_numbers<[1], [0], [0], [1], [0, 0, 1, 1], [], []>} : vector<124x3xf32>, vector<3x10xf32>, vector<124x10xf32> -> vector<124x10xf32>
    %194 = arith.addf %189, %193 : vector<124x10xf32>
    %195 = vector.extract_strided_slice %143 {offsets = [10, 0], sizes = [124, 3], strides = [1, 1]} : vector<137x3xf32> to vector<124x3xf32>
    %c10_132 = arith.constant 10 : index
    %c0_133 = arith.constant 0 : index
    %c0_134 = arith.constant 0 : index
    %196 = vector.load %arg3[%c10_132, %c0_133, %c0_134] : memref<14x3x10xf32, #tpu.memory_space<vmem>>, vector<1x3x10xf32>
    %197 = vector.shape_cast %196 : vector<1x3x10xf32> to vector<3x10xf32>
    %cst_135 = arith.constant dense<0.000000e+00> : vector<124x10xf32>
    %198 = tpu.matmul %195, %197, %cst_135 {dimension_numbers = #tpu.dot_dimension_numbers<[1], [0], [0], [1], [0, 0, 1, 1], [], []>} : vector<124x3xf32>, vector<3x10xf32>, vector<124x10xf32> -> vector<124x10xf32>
    %199 = arith.addf %194, %198 : vector<124x10xf32>
    %200 = vector.extract_strided_slice %143 {offsets = [11, 0], sizes = [124, 3], strides = [1, 1]} : vector<137x3xf32> to vector<124x3xf32>
    %c11_136 = arith.constant 11 : index
    %c0_137 = arith.constant 0 : index
    %c0_138 = arith.constant 0 : index
    %201 = vector.load %arg3[%c11_136, %c0_137, %c0_138] : memref<14x3x10xf32, #tpu.memory_space<vmem>>, vector<1x3x10xf32>
    %202 = vector.shape_cast %201 : vector<1x3x10xf32> to vector<3x10xf32>
    %cst_139 = arith.constant dense<0.000000e+00> : vector<124x10xf32>
    %203 = tpu.matmul %200, %202, %cst_139 {dimension_numbers = #tpu.dot_dimension_numbers<[1], [0], [0], [1], [0, 0, 1, 1], [], []>} : vector<124x3xf32>, vector<3x10xf32>, vector<124x10xf32> -> vector<124x10xf32>
    %204 = arith.addf %199, %203 : vector<124x10xf32>
    %205 = vector.extract_strided_slice %143 {offsets = [12, 0], sizes = [124, 3], strides = [1, 1]} : vector<137x3xf32> to vector<124x3xf32>
    %c12_140 = arith.constant 12 : index
    %c0_141 = arith.constant 0 : index
    %c0_142 = arith.constant 0 : index
    %206 = vector.load %arg3[%c12_140, %c0_141, %c0_142] : memref<14x3x10xf32, #tpu.memory_space<vmem>>, vector<1x3x10xf32>
    %207 = vector.shape_cast %206 : vector<1x3x10xf32> to vector<3x10xf32>
    %cst_143 = arith.constant dense<0.000000e+00> : vector<124x10xf32>
    %208 = tpu.matmul %205, %207, %cst_143 {dimension_numbers = #tpu.dot_dimension_numbers<[1], [0], [0], [1], [0, 0, 1, 1], [], []>} : vector<124x3xf32>, vector<3x10xf32>, vector<124x10xf32> -> vector<124x10xf32>
    %209 = arith.addf %204, %208 : vector<124x10xf32>
    %210 = vector.extract_strided_slice %143 {offsets = [13, 0], sizes = [124, 3], strides = [1, 1]} : vector<137x3xf32> to vector<124x3xf32>
    %c13_144 = arith.constant 13 : index
    %c0_145 = arith.constant 0 : index
    %c0_146 = arith.constant 0 : index
    %211 = vector.load %arg3[%c13_144, %c0_145, %c0_146] : memref<14x3x10xf32, #tpu.memory_space<vmem>>, vector<1x3x10xf32>
    %212 = vector.shape_cast %211 : vector<1x3x10xf32> to vector<3x10xf32>
    %cst_147 = arith.constant dense<0.000000e+00> : vector<124x10xf32>
    %213 = tpu.matmul %210, %212, %cst_147 {dimension_numbers = #tpu.dot_dimension_numbers<[1], [0], [0], [1], [0, 0, 1, 1], [], []>} : vector<124x3xf32>, vector<3x10xf32>, vector<124x10xf32> -> vector<124x10xf32>
    %214 = arith.addf %209, %213 : vector<124x10xf32>
    %cst_148 = arith.constant 0.000000e+00 : f32
    %215 = vector.broadcast %cst_148 : f32 to vector<124x10xf32>
    %216 = arith.maximumf %214, %215 : vector<124x10xf32>
    %c0_149 = arith.constant 0 : index
    %c0_150 = arith.constant 0 : index
    %217 = vector.load %arg14[%c0_149, %c0_150] : memref<128x10xf32, #tpu.memory_space<vmem>>, vector<124x10xf32>
    tpu.vector_store %arg14[%c0_149, %c0_150], %216 {strides = array<i32>} : memref<128x10xf32, #tpu.memory_space<vmem>>, vector<124x10xf32>,
    %c0_151 = arith.constant 0 : index
    %c0_152 = arith.constant 0 : index
    %218 = tpu.strided_load %arg14[%c0_151, %c0_152] {strides = array<i32: 2, 1>} : memref<128x10xf32, #tpu.memory_space<vmem>>, vector<62x10xf32>
    %c1_153 = arith.constant 1 : index
    %c0_154 = arith.constant 0 : index
    %219 = tpu.strided_load %arg14[%c1_153, %c0_154] {strides = array<i32: 2, 1>} : memref<128x10xf32, #tpu.memory_space<vmem>>, vector<62x10xf32>
    %220 = arith.maximumf %218, %219 : vector<62x10xf32>
    %cst_155 = arith.constant 0.000000e+00 : f32
    %221 = vector.broadcast %cst_155 : f32 to vector<60x10xf32>
    %222 = vector.extract_strided_slice %220 {offsets = [0, 0], sizes = [60, 10], strides = [1, 1]} : vector<62x10xf32> to vector<60x10xf32>
    %c0_156 = arith.constant 0 : index
    %c0_157 = arith.constant 0 : index
    %c0_158 = arith.constant 0 : index
    %223 = vector.load %arg4[%c0_156, %c0_157, %c0_158] : memref<3x10x10xf32, #tpu.memory_space<vmem>>, vector<1x10x10xf32>
    %224 = vector.shape_cast %223 : vector<1x10x10xf32> to vector<10x10xf32>
    %cst_159 = arith.constant dense<0.000000e+00> : vector<60x10xf32>
    %225 = tpu.matmul %222, %224, %cst_159 {dimension_numbers = #tpu.dot_dimension_numbers<[1], [0], [0], [1], [0, 0, 1, 1], [], []>} : vector<60x10xf32>, vector<10x10xf32>, vector<60x10xf32> -> vector<60x10xf32>
    %226 = arith.addf %221, %225 : vector<60x10xf32>
    %227 = vector.extract_strided_slice %220 {offsets = [1, 0], sizes = [60, 10], strides = [1, 1]} : vector<62x10xf32> to vector<60x10xf32>
    %c1_160 = arith.constant 1 : index
    %c0_161 = arith.constant 0 : index
    %c0_162 = arith.constant 0 : index
    %228 = vector.load %arg4[%c1_160, %c0_161, %c0_162] : memref<3x10x10xf32, #tpu.memory_space<vmem>>, vector<1x10x10xf32>
    %229 = vector.shape_cast %228 : vector<1x10x10xf32> to vector<10x10xf32>
    %cst_163 = arith.constant dense<0.000000e+00> : vector<60x10xf32>
    %230 = tpu.matmul %227, %229, %cst_163 {dimension_numbers = #tpu.dot_dimension_numbers<[1], [0], [0], [1], [0, 0, 1, 1], [], []>} : vector<60x10xf32>, vector<10x10xf32>, vector<60x10xf32> -> vector<60x10xf32>
    %231 = arith.addf %226, %230 : vector<60x10xf32>
    %232 = vector.extract_strided_slice %220 {offsets = [2, 0], sizes = [60, 10], strides = [1, 1]} : vector<62x10xf32> to vector<60x10xf32>
    %c2_164 = arith.constant 2 : index
    %c0_165 = arith.constant 0 : index
    %c0_166 = arith.constant 0 : index
    %233 = vector.load %arg4[%c2_164, %c0_165, %c0_166] : memref<3x10x10xf32, #tpu.memory_space<vmem>>, vector<1x10x10xf32>
    %234 = vector.shape_cast %233 : vector<1x10x10xf32> to vector<10x10xf32>
    %cst_167 = arith.constant dense<0.000000e+00> : vector<60x10xf32>
    %235 = tpu.matmul %232, %234, %cst_167 {dimension_numbers = #tpu.dot_dimension_numbers<[1], [0], [0], [1], [0, 0, 1, 1], [], []>} : vector<60x10xf32>, vector<10x10xf32>, vector<60x10xf32> -> vector<60x10xf32>
    %236 = arith.addf %231, %235 : vector<60x10xf32>
    %cst_168 = arith.constant 0.000000e+00 : f32
    %237 = vector.broadcast %cst_168 : f32 to vector<60x10xf32>
    %238 = arith.maximumf %236, %237 : vector<60x10xf32>
    %c0_169 = arith.constant 0 : index
    %c0_170 = arith.constant 0 : index
    %239 = vector.load %arg15[%c0_169, %c0_170] : memref<64x10xf32, #tpu.memory_space<vmem>>, vector<60x10xf32>
    tpu.vector_store %arg15[%c0_169, %c0_170], %238 {strides = array<i32>} : memref<64x10xf32, #tpu.memory_space<vmem>>, vector<60x10xf32>,
    %c0_171 = arith.constant 0 : index
    %c0_172 = arith.constant 0 : index
    %240 = tpu.strided_load %arg15[%c0_171, %c0_172] {strides = array<i32: 2, 1>} : memref<64x10xf32, #tpu.memory_space<vmem>>, vector<30x10xf32>
    %c1_173 = arith.constant 1 : index
    %c0_174 = arith.constant 0 : index
    %241 = tpu.strided_load %arg15[%c1_173, %c0_174] {strides = array<i32: 2, 1>} : memref<64x10xf32, #tpu.memory_space<vmem>>, vector<30x10xf32>
    %242 = arith.maximumf %240, %241 : vector<30x10xf32>
    %cst_175 = arith.constant 0.000000e+00 : f32
    %243 = vector.broadcast %cst_175 : f32 to vector<27x10xf32>
    %244 = vector.extract_strided_slice %242 {offsets = [0, 0], sizes = [27, 10], strides = [1, 1]} : vector<30x10xf32> to vector<27x10xf32>
    %c0_176 = arith.constant 0 : index
    %c0_177 = arith.constant 0 : index
    %c0_178 = arith.constant 0 : index
    %245 = vector.load %arg5[%c0_176, %c0_177, %c0_178] : memref<4x10x10xf32, #tpu.memory_space<vmem>>, vector<1x10x10xf32>
    %246 = vector.shape_cast %245 : vector<1x10x10xf32> to vector<10x10xf32>
    %cst_179 = arith.constant dense<0.000000e+00> : vector<27x10xf32>
    %247 = tpu.matmul %244, %246, %cst_179 {dimension_numbers = #tpu.dot_dimension_numbers<[1], [0], [0], [1], [0, 0, 1, 1], [], []>} : vector<27x10xf32>, vector<10x10xf32>, vector<27x10xf32> -> vector<27x10xf32>
    %248 = arith.addf %243, %247 : vector<27x10xf32>
    %249 = vector.extract_strided_slice %242 {offsets = [1, 0], sizes = [27, 10], strides = [1, 1]} : vector<30x10xf32> to vector<27x10xf32>
    %c1_180 = arith.constant 1 : index
    %c0_181 = arith.constant 0 : index
    %c0_182 = arith.constant 0 : index
    %250 = vector.load %arg5[%c1_180, %c0_181, %c0_182] : memref<4x10x10xf32, #tpu.memory_space<vmem>>, vector<1x10x10xf32>
    %251 = vector.shape_cast %250 : vector<1x10x10xf32> to vector<10x10xf32>
    %cst_183 = arith.constant dense<0.000000e+00> : vector<27x10xf32>
    %252 = tpu.matmul %249, %251, %cst_183 {dimension_numbers = #tpu.dot_dimension_numbers<[1], [0], [0], [1], [0, 0, 1, 1], [], []>} : vector<27x10xf32>, vector<10x10xf32>, vector<27x10xf32> -> vector<27x10xf32>
    %253 = arith.addf %248, %252 : vector<27x10xf32>
    %254 = vector.extract_strided_slice %242 {offsets = [2, 0], sizes = [27, 10], strides = [1, 1]} : vector<30x10xf32> to vector<27x10xf32>
    %c2_184 = arith.constant 2 : index
    %c0_185 = arith.constant 0 : index
    %c0_186 = arith.constant 0 : index
    %255 = vector.load %arg5[%c2_184, %c0_185, %c0_186] : memref<4x10x10xf32, #tpu.memory_space<vmem>>, vector<1x10x10xf32>
    %256 = vector.shape_cast %255 : vector<1x10x10xf32> to vector<10x10xf32>
    %cst_187 = arith.constant dense<0.000000e+00> : vector<27x10xf32>
    %257 = tpu.matmul %254, %256, %cst_187 {dimension_numbers = #tpu.dot_dimension_numbers<[1], [0], [0], [1], [0, 0, 1, 1], [], []>} : vector<27x10xf32>, vector<10x10xf32>, vector<27x10xf32> -> vector<27x10xf32>
    %258 = arith.addf %253, %257 : vector<27x10xf32>
    %259 = vector.extract_strided_slice %242 {offsets = [3, 0], sizes = [27, 10], strides = [1, 1]} : vector<30x10xf32> to vector<27x10xf32>
    %c3_188 = arith.constant 3 : index
    %c0_189 = arith.constant 0 : index
    %c0_190 = arith.constant 0 : index
    %260 = vector.load %arg5[%c3_188, %c0_189, %c0_190] : memref<4x10x10xf32, #tpu.memory_space<vmem>>, vector<1x10x10xf32>
    %261 = vector.shape_cast %260 : vector<1x10x10xf32> to vector<10x10xf32>
    %cst_191 = arith.constant dense<0.000000e+00> : vector<27x10xf32>
    %262 = tpu.matmul %259, %261, %cst_191 {dimension_numbers = #tpu.dot_dimension_numbers<[1], [0], [0], [1], [0, 0, 1, 1], [], []>} : vector<27x10xf32>, vector<10x10xf32>, vector<27x10xf32> -> vector<27x10xf32>
    %263 = arith.addf %258, %262 : vector<27x10xf32>
    %cst_192 = arith.constant 0.000000e+00 : f32
    %264 = vector.broadcast %cst_192 : f32 to vector<27x10xf32>
    %265 = arith.maximumf %263, %264 : vector<27x10xf32>
    %c0_193 = arith.constant 0 : index
    %c0_194 = arith.constant 0 : index
    %266 = vector.load %arg16[%c0_193, %c0_194] : memref<32x10xf32, #tpu.memory_space<vmem>>, vector<27x10xf32>
    tpu.vector_store %arg16[%c0_193, %c0_194], %265 {strides = array<i32>} : memref<32x10xf32, #tpu.memory_space<vmem>>, vector<27x10xf32>,
    %c0_195 = arith.constant 0 : index
    %c0_196 = arith.constant 0 : index
    %267 = tpu.strided_load %arg16[%c0_195, %c0_196] {strides = array<i32: 2, 1>} : memref<32x10xf32, #tpu.memory_space<vmem>>, vector<13x10xf32>
    %c1_197 = arith.constant 1 : index
    %c0_198 = arith.constant 0 : index
    %268 = tpu.strided_load %arg16[%c1_197, %c0_198] {strides = array<i32: 2, 1>} : memref<32x10xf32, #tpu.memory_space<vmem>>, vector<13x10xf32>
    %269 = arith.maximumf %267, %268 : vector<13x10xf32>
    %c0_199 = arith.constant 0 : index
    %c0_200 = arith.constant 0 : index
    %270 = vector.load %arg7[%c0_199, %c0_200] : memref<1x30xf32, #tpu.memory_space<vmem>>, vector<1x30xf32>
    %271 = vector.extract_strided_slice %269 {offsets = [0, 0], sizes = [1, 10], strides = [1, 1]} : vector<13x10xf32> to vector<1x10xf32>
    %c0_201 = arith.constant 0 : index
    %c0_202 = arith.constant 0 : index
    %c0_203 = arith.constant 0 : index
    %272 = vector.load %arg6[%c0_201, %c0_202, %c0_203] : memref<13x10x30xf32, #tpu.memory_space<vmem>>, vector<1x10x30xf32>
    %273 = vector.shape_cast %272 : vector<1x10x30xf32> to vector<10x30xf32>
    %cst_204 = arith.constant dense<0.000000e+00> : vector<1x30xf32>
    %274 = tpu.matmul %271, %273, %cst_204 {dimension_numbers = #tpu.dot_dimension_numbers<[1], [0], [0], [1], [0, 0, 1, 1], [], []>} : vector<1x10xf32>, vector<10x30xf32>, vector<1x30xf32> -> vector<1x30xf32>
    %275 = arith.addf %270, %274 : vector<1x30xf32>
    %276 = vector.extract_strided_slice %269 {offsets = [1, 0], sizes = [1, 10], strides = [1, 1]} : vector<13x10xf32> to vector<1x10xf32>
    %c1_205 = arith.constant 1 : index
    %c0_206 = arith.constant 0 : index
    %c0_207 = arith.constant 0 : index
    %277 = vector.load %arg6[%c1_205, %c0_206, %c0_207] : memref<13x10x30xf32, #tpu.memory_space<vmem>>, vector<1x10x30xf32>
    %278 = vector.shape_cast %277 : vector<1x10x30xf32> to vector<10x30xf32>
    %cst_208 = arith.constant dense<0.000000e+00> : vector<1x30xf32>
    %279 = tpu.matmul %276, %278, %cst_208 {dimension_numbers = #tpu.dot_dimension_numbers<[1], [0], [0], [1], [0, 0, 1, 1], [], []>} : vector<1x10xf32>, vector<10x30xf32>, vector<1x30xf32> -> vector<1x30xf32>
    %280 = arith.addf %275, %279 : vector<1x30xf32>
    %281 = vector.extract_strided_slice %269 {offsets = [2, 0], sizes = [1, 10], strides = [1, 1]} : vector<13x10xf32> to vector<1x10xf32>
    %c2_209 = arith.constant 2 : index
    %c0_210 = arith.constant 0 : index
    %c0_211 = arith.constant 0 : index
    %282 = vector.load %arg6[%c2_209, %c0_210, %c0_211] : memref<13x10x30xf32, #tpu.memory_space<vmem>>, vector<1x10x30xf32>
    %283 = vector.shape_cast %282 : vector<1x10x30xf32> to vector<10x30xf32>
    %cst_212 = arith.constant dense<0.000000e+00> : vector<1x30xf32>
    %284 = tpu.matmul %281, %283, %cst_212 {dimension_numbers = #tpu.dot_dimension_numbers<[1], [0], [0], [1], [0, 0, 1, 1], [], []>} : vector<1x10xf32>, vector<10x30xf32>, vector<1x30xf32> -> vector<1x30xf32>
    %285 = arith.addf %280, %284 : vector<1x30xf32>
    %286 = vector.extract_strided_slice %269 {offsets = [3, 0], sizes = [1, 10], strides = [1, 1]} : vector<13x10xf32> to vector<1x10xf32>
    %c3_213 = arith.constant 3 : index
    %c0_214 = arith.constant 0 : index
    %c0_215 = arith.constant 0 : index
    %287 = vector.load %arg6[%c3_213, %c0_214, %c0_215] : memref<13x10x30xf32, #tpu.memory_space<vmem>>, vector<1x10x30xf32>
    %288 = vector.shape_cast %287 : vector<1x10x30xf32> to vector<10x30xf32>
    %cst_216 = arith.constant dense<0.000000e+00> : vector<1x30xf32>
    %289 = tpu.matmul %286, %288, %cst_216 {dimension_numbers = #tpu.dot_dimension_numbers<[1], [0], [0], [1], [0, 0, 1, 1], [], []>} : vector<1x10xf32>, vector<10x30xf32>, vector<1x30xf32> -> vector<1x30xf32>
    %290 = arith.addf %285, %289 : vector<1x30xf32>
    %291 = vector.extract_strided_slice %269 {offsets = [4, 0], sizes = [1, 10], strides = [1, 1]} : vector<13x10xf32> to vector<1x10xf32>
    %c4_217 = arith.constant 4 : index
    %c0_218 = arith.constant 0 : index
    %c0_219 = arith.constant 0 : index
    %292 = vector.load %arg6[%c4_217, %c0_218, %c0_219] : memref<13x10x30xf32, #tpu.memory_space<vmem>>, vector<1x10x30xf32>
    %293 = vector.shape_cast %292 : vector<1x10x30xf32> to vector<10x30xf32>
    %cst_220 = arith.constant dense<0.000000e+00> : vector<1x30xf32>
    %294 = tpu.matmul %291, %293, %cst_220 {dimension_numbers = #tpu.dot_dimension_numbers<[1], [0], [0], [1], [0, 0, 1, 1], [], []>} : vector<1x10xf32>, vector<10x30xf32>, vector<1x30xf32> -> vector<1x30xf32>
    %295 = arith.addf %290, %294 : vector<1x30xf32>
    %296 = vector.extract_strided_slice %269 {offsets = [5, 0], sizes = [1, 10], strides = [1, 1]} : vector<13x10xf32> to vector<1x10xf32>
    %c5_221 = arith.constant 5 : index
    %c0_222 = arith.constant 0 : index
    %c0_223 = arith.constant 0 : index
    %297 = vector.load %arg6[%c5_221, %c0_222, %c0_223] : memref<13x10x30xf32, #tpu.memory_space<vmem>>, vector<1x10x30xf32>
    %298 = vector.shape_cast %297 : vector<1x10x30xf32> to vector<10x30xf32>
    %cst_224 = arith.constant dense<0.000000e+00> : vector<1x30xf32>
    %299 = tpu.matmul %296, %298, %cst_224 {dimension_numbers = #tpu.dot_dimension_numbers<[1], [0], [0], [1], [0, 0, 1, 1], [], []>} : vector<1x10xf32>, vector<10x30xf32>, vector<1x30xf32> -> vector<1x30xf32>
    %300 = arith.addf %295, %299 : vector<1x30xf32>
    %301 = vector.extract_strided_slice %269 {offsets = [6, 0], sizes = [1, 10], strides = [1, 1]} : vector<13x10xf32> to vector<1x10xf32>
    %c6_225 = arith.constant 6 : index
    %c0_226 = arith.constant 0 : index
    %c0_227 = arith.constant 0 : index
    %302 = vector.load %arg6[%c6_225, %c0_226, %c0_227] : memref<13x10x30xf32, #tpu.memory_space<vmem>>, vector<1x10x30xf32>
    %303 = vector.shape_cast %302 : vector<1x10x30xf32> to vector<10x30xf32>
    %cst_228 = arith.constant dense<0.000000e+00> : vector<1x30xf32>
    %304 = tpu.matmul %301, %303, %cst_228 {dimension_numbers = #tpu.dot_dimension_numbers<[1], [0], [0], [1], [0, 0, 1, 1], [], []>} : vector<1x10xf32>, vector<10x30xf32>, vector<1x30xf32> -> vector<1x30xf32>
    %305 = arith.addf %300, %304 : vector<1x30xf32>
    %306 = vector.extract_strided_slice %269 {offsets = [7, 0], sizes = [1, 10], strides = [1, 1]} : vector<13x10xf32> to vector<1x10xf32>
    %c7_229 = arith.constant 7 : index
    %c0_230 = arith.constant 0 : index
    %c0_231 = arith.constant 0 : index
    %307 = vector.load %arg6[%c7_229, %c0_230, %c0_231] : memref<13x10x30xf32, #tpu.memory_space<vmem>>, vector<1x10x30xf32>
    %308 = vector.shape_cast %307 : vector<1x10x30xf32> to vector<10x30xf32>
    %cst_232 = arith.constant dense<0.000000e+00> : vector<1x30xf32>
    %309 = tpu.matmul %306, %308, %cst_232 {dimension_numbers = #tpu.dot_dimension_numbers<[1], [0], [0], [1], [0, 0, 1, 1], [], []>} : vector<1x10xf32>, vector<10x30xf32>, vector<1x30xf32> -> vector<1x30xf32>
    %310 = arith.addf %305, %309 : vector<1x30xf32>
    %311 = vector.extract_strided_slice %269 {offsets = [8, 0], sizes = [1, 10], strides = [1, 1]} : vector<13x10xf32> to vector<1x10xf32>
    %c8_233 = arith.constant 8 : index
    %c0_234 = arith.constant 0 : index
    %c0_235 = arith.constant 0 : index
    %312 = vector.load %arg6[%c8_233, %c0_234, %c0_235] : memref<13x10x30xf32, #tpu.memory_space<vmem>>, vector<1x10x30xf32>
    %313 = vector.shape_cast %312 : vector<1x10x30xf32> to vector<10x30xf32>
    %cst_236 = arith.constant dense<0.000000e+00> : vector<1x30xf32>
    %314 = tpu.matmul %311, %313, %cst_236 {dimension_numbers = #tpu.dot_dimension_numbers<[1], [0], [0], [1], [0, 0, 1, 1], [], []>} : vector<1x10xf32>, vector<10x30xf32>, vector<1x30xf32> -> vector<1x30xf32>
    %315 = arith.addf %310, %314 : vector<1x30xf32>
    %316 = vector.extract_strided_slice %269 {offsets = [9, 0], sizes = [1, 10], strides = [1, 1]} : vector<13x10xf32> to vector<1x10xf32>
    %c9_237 = arith.constant 9 : index
    %c0_238 = arith.constant 0 : index
    %c0_239 = arith.constant 0 : index
    %317 = vector.load %arg6[%c9_237, %c0_238, %c0_239] : memref<13x10x30xf32, #tpu.memory_space<vmem>>, vector<1x10x30xf32>
    %318 = vector.shape_cast %317 : vector<1x10x30xf32> to vector<10x30xf32>
    %cst_240 = arith.constant dense<0.000000e+00> : vector<1x30xf32>
    %319 = tpu.matmul %316, %318, %cst_240 {dimension_numbers = #tpu.dot_dimension_numbers<[1], [0], [0], [1], [0, 0, 1, 1], [], []>} : vector<1x10xf32>, vector<10x30xf32>, vector<1x30xf32> -> vector<1x30xf32>
    %320 = arith.addf %315, %319 : vector<1x30xf32>
    %321 = vector.extract_strided_slice %269 {offsets = [10, 0], sizes = [1, 10], strides = [1, 1]} : vector<13x10xf32> to vector<1x10xf32>
    %c10_241 = arith.constant 10 : index
    %c0_242 = arith.constant 0 : index
    %c0_243 = arith.constant 0 : index
    %322 = vector.load %arg6[%c10_241, %c0_242, %c0_243] : memref<13x10x30xf32, #tpu.memory_space<vmem>>, vector<1x10x30xf32>
    %323 = vector.shape_cast %322 : vector<1x10x30xf32> to vector<10x30xf32>
    %cst_244 = arith.constant dense<0.000000e+00> : vector<1x30xf32>
    %324 = tpu.matmul %321, %323, %cst_244 {dimension_numbers = #tpu.dot_dimension_numbers<[1], [0], [0], [1], [0, 0, 1, 1], [], []>} : vector<1x10xf32>, vector<10x30xf32>, vector<1x30xf32> -> vector<1x30xf32>
    %325 = arith.addf %320, %324 : vector<1x30xf32>
    %326 = vector.extract_strided_slice %269 {offsets = [11, 0], sizes = [1, 10], strides = [1, 1]} : vector<13x10xf32> to vector<1x10xf32>
    %c11_245 = arith.constant 11 : index
    %c0_246 = arith.constant 0 : index
    %c0_247 = arith.constant 0 : index
    %327 = vector.load %arg6[%c11_245, %c0_246, %c0_247] : memref<13x10x30xf32, #tpu.memory_space<vmem>>, vector<1x10x30xf32>
    %328 = vector.shape_cast %327 : vector<1x10x30xf32> to vector<10x30xf32>
    %cst_248 = arith.constant dense<0.000000e+00> : vector<1x30xf32>
    %329 = tpu.matmul %326, %328, %cst_248 {dimension_numbers = #tpu.dot_dimension_numbers<[1], [0], [0], [1], [0, 0, 1, 1], [], []>} : vector<1x10xf32>, vector<10x30xf32>, vector<1x30xf32> -> vector<1x30xf32>
    %330 = arith.addf %325, %329 : vector<1x30xf32>
    %331 = vector.extract_strided_slice %269 {offsets = [12, 0], sizes = [1, 10], strides = [1, 1]} : vector<13x10xf32> to vector<1x10xf32>
    %c12_249 = arith.constant 12 : index
    %c0_250 = arith.constant 0 : index
    %c0_251 = arith.constant 0 : index
    %332 = vector.load %arg6[%c12_249, %c0_250, %c0_251] : memref<13x10x30xf32, #tpu.memory_space<vmem>>, vector<1x10x30xf32>
    %333 = vector.shape_cast %332 : vector<1x10x30xf32> to vector<10x30xf32>
    %cst_252 = arith.constant dense<0.000000e+00> : vector<1x30xf32>
    %334 = tpu.matmul %331, %333, %cst_252 {dimension_numbers = #tpu.dot_dimension_numbers<[1], [0], [0], [1], [0, 0, 1, 1], [], []>} : vector<1x10xf32>, vector<10x30xf32>, vector<1x30xf32> -> vector<1x30xf32>
    %335 = arith.addf %330, %334 : vector<1x30xf32>
    %cst_253 = arith.constant 0.000000e+00 : f32
    %336 = vector.broadcast %cst_253 : f32 to vector<1x30xf32>
    %337 = arith.maximumf %335, %336 : vector<1x30xf32>
    %c0_254 = arith.constant 0 : index
    %c0_255 = arith.constant 0 : index
    %338 = vector.load %arg8[%c0_254, %c0_255] : memref<30x10xf32, #tpu.memory_space<vmem>>, vector<30x10xf32>
    %cst_256 = arith.constant dense<0.000000e+00> : vector<1x10xf32>
    %339 = tpu.matmul %337, %338, %cst_256 {dimension_numbers = #tpu.dot_dimension_numbers<[1], [0], [0], [1], [0, 0, 1, 1], [], []>} : vector<1x30xf32>, vector<30x10xf32>, vector<1x10xf32> -> vector<1x10xf32>
    %c0_257 = arith.constant 0 : index
    %c0_258 = arith.constant 0 : index
    %340 = vector.load %arg9[%c0_257, %c0_258] : memref<1x10xf32, #tpu.memory_space<vmem>>, vector<1x10xf32>
    %341 = arith.addf %339, %340 : vector<1x10xf32>
    %cst_259 = arith.constant 0.000000e+00 : f32
    %342 = vector.broadcast %cst_259 : f32 to vector<1x10xf32>
    %343 = arith.maximumf %341, %342 : vector<1x10xf32>
    %c0_260 = arith.constant 0 : index
    %c0_261 = arith.constant 0 : index
    %344 = vector.load %arg10[%c0_260, %c0_261] : memref<10x5xf32, #tpu.memory_space<vmem>>, vector<10x5xf32>
    %cst_262 = arith.constant dense<0.000000e+00> : vector<1x5xf32>
    %345 = tpu.matmul %343, %344, %cst_262 {dimension_numbers = #tpu.dot_dimension_numbers<[1], [0], [0], [1], [0, 0, 1, 1], [], []>} : vector<1x10xf32>, vector<10x5xf32>, vector<1x5xf32> -> vector<1x5xf32>
    %c0_263 = arith.constant 0 : index
    %c0_264 = arith.constant 0 : index
    %346 = vector.load %arg11[%c0_263, %c0_264] : memref<1x5xf32, #tpu.memory_space<vmem>>, vector<1x5xf32>
    %347 = arith.addf %345, %346 : vector<1x5xf32>
    %c0_265 = arith.constant 0 : index
    %c0_266 = arith.constant 0 : index
    %c0_267 = arith.constant 0 : index
    %348 = vector.load %arg12[%c0_265, %c0_266, %c0_267] : memref<1x1x5xf32, #tpu.memory_space<vmem>>, vector<1x1x5xf32>
    %349 = vector.shape_cast %348 : vector<1x1x5xf32> to vector<1x5xf32>
    %350 = vector.shape_cast %347 : vector<1x5xf32> to vector<1x1x5xf32>
    tpu.vector_store %arg12[%c0_265, %c0_266, %c0_267], %350 {strides = array<i32>} : memref<1x1x5xf32, #tpu.memory_space<vmem>>, vector<1x1x5xf32>,
    return
  }
  func.func @transform_0(%arg0: i32) -> (i32, i32, i32) {
    %c0_i32 = arith.constant 0 : i32
    %c0_i32_0 = arith.constant 0 : i32
    %c0_i32_1 = arith.constant 0 : i32
    return %arg0, %c0_i32, %c0_i32_0 : i32, i32, i32
  }
  func.func @transform_1(%arg0: i32) -> (i32, i32, i32) {
    %c0_i32 = arith.constant 0 : i32
    %c0_i32_0 = arith.constant 0 : i32
    %c0_i32_1 = arith.constant 0 : i32
    %c0_i32_2 = arith.constant 0 : i32
    return %c0_i32, %c0_i32_0, %c0_i32_1 : i32, i32, i32
  }
  func.func @transform_2(%arg0: i32) -> (i32, i32, i32) {
    %c0_i32 = arith.constant 0 : i32
    %c0_i32_0 = arith.constant 0 : i32
    %c0_i32_1 = arith.constant 0 : i32
    %c0_i32_2 = arith.constant 0 : i32
    return %c0_i32, %c0_i32_0, %c0_i32_1 : i32, i32, i32
  }
  func.func @transform_3(%arg0: i32) -> (i32, i32, i32) {
    %c0_i32 = arith.constant 0 : i32
    %c0_i32_0 = arith.constant 0 : i32
    %c0_i32_1 = arith.constant 0 : i32
    %c0_i32_2 = arith.constant 0 : i32
    return %c0_i32, %c0_i32_0, %c0_i32_1 : i32, i32, i32
  }
  func.func @transform_4(%arg0: i32) -> (i32, i32, i32) {
    %c0_i32 = arith.constant 0 : i32
    %c0_i32_0 = arith.constant 0 : i32
    %c0_i32_1 = arith.constant 0 : i32
    %c0_i32_2 = arith.constant 0 : i32
    return %c0_i32, %c0_i32_0, %c0_i32_1 : i32, i32, i32
  }
  func.func @transform_5(%arg0: i32) -> (i32, i32, i32) {
    %c0_i32 = arith.constant 0 : i32
    %c0_i32_0 = arith.constant 0 : i32
    %c0_i32_1 = arith.constant 0 : i32
    %c0_i32_2 = arith.constant 0 : i32
    return %c0_i32, %c0_i32_0, %c0_i32_1 : i32, i32, i32
  }
  func.func @transform_6(%arg0: i32) -> (i32, i32) {
    %c0_i32 = arith.constant 0 : i32
    %c0_i32_0 = arith.constant 0 : i32
    %c0_i32_1 = arith.constant 0 : i32
    return %c0_i32, %c0_i32_0 : i32, i32
  }
  func.func @transform_7(%arg0: i32) -> (i32, i32) {
    %c0_i32 = arith.constant 0 : i32
    %c0_i32_0 = arith.constant 0 : i32
    %c0_i32_1 = arith.constant 0 : i32
    return %c0_i32, %c0_i32_0 : i32, i32
  }
  func.func @transform_8(%arg0: i32) -> (i32, i32) {
    %c0_i32 = arith.constant 0 : i32
    %c0_i32_0 = arith.constant 0 : i32
    %c0_i32_1 = arith.constant 0 : i32
    return %c0_i32, %c0_i32_0 : i32, i32
  }
  func.func @transform_9(%arg0: i32) -> (i32, i32) {
    %c0_i32 = arith.constant 0 : i32
    %c0_i32_0 = arith.constant 0 : i32
    %c0_i32_1 = arith.constant 0 : i32
    return %c0_i32, %c0_i32_0 : i32, i32
  }
  func.func @transform_10(%arg0: i32) -> (i32, i32) {
    %c0_i32 = arith.constant 0 : i32
    %c0_i32_0 = arith.constant 0 : i32
    %c0_i32_1 = arith.constant 0 : i32
    return %c0_i32, %c0_i32_0 : i32, i32
  }
  func.func @transform_11(%arg0: i32) -> (i32, i32, i32) {
    %c0_i32 = arith.constant 0 : i32
    %c0_i32_0 = arith.constant 0 : i32
    %c0_i32_1 = arith.constant 0 : i32
    return %arg0, %c0_i32, %c0_i32_0 : i32, i32, i32
  }
}

</mosaic_0001>

<bundles_post_ra>
// kernel: network11_forward.1
= control target key start
LH: loop header
LB: loop body
LE: loop exit
PB: predicated region body
PF: predicated region fallthrough
CT: control target
= control target key end

     0   :  { %s29718_s0 = inlined_call_operand.vmem [shape: f32[2,300,4], index: 0, kind: input, shape index: {}]   ;;  %s29719_s1 = inlined_call_operand.vmem [shape: f32[27,4,3], index: 1, kind: input, shape index: {}]   ;;  %s29720_s2 = inlined_call_operand.vmem [shape: f32[14,3,10], index: 2, kind: input, shape index: {}]   ;;  %s29721_s3 = inlined_call_operand.vmem [shape: f32[3,10,10], index: 3, kind: input, shape index: {}]   ;;  %s29722_s4 = inlined_call_operand.vmem [shape: f32[4,10,10], index: 4, kind: input, shape index: {}]   ;;  %s29723_s5 = inlined_call_operand.vmem [shape: f32[13,10,30], index: 5, kind: input, shape index: {}]   ;;  %s29724_s6 = inlined_call_operand.vmem [shape: f32[1,30], index: 6, kind: input, shape index: {}]   ;;  %s29725_s7 = inlined_call_operand.vmem [shape: f32[30,10], index: 7, kind: input, shape index: {}]   ;;  %s29726_s8 = inlined_call_operand.vmem [shape: f32[1,10], index: 8, kind: input, shape index: {}]   ;;  %s29727_s9 = inlined_call_operand.vmem [shape: f32[10,5], index: 9, kind: input, shape index: {}]   ;;  %s29728_s10 = inlined_call_operand.vmem [shape: f32[1,5], index: 10, kind: input, shape index: {}]   ;;  %s29729_s11 = inlined_call_operand.hbm [shape: f32[2,1,5], index: 11, kind: output, shape index: {}]  }
   0x1   :  { %30214 = sst [smem:[#allocation269_spill]] %s29718_s0 }
   0x2   :  { %16 = vsyncpa [#allocation7], 0 }
   0x3   :  { %18 = vsyncpa [#allocation7 + $0x1], 0  ;;  %s22904_s17 = smov 0   ;;  %s22906_s18 = smov 0  }
   0x4   :  { %s22908_s19 = smov 0   ;;  %s22910_s20 = smov 0  }
   0x5 LB: > { %s22925_s21 = sadd.s32 4294967295, %s22837_s20   ;;  %s14332_s22 = sadd.s32 4294967294, %s22837_s20   ;;  %s22837_s20 = sphi %s22910_s20, %s31030_s20   ;;  %s22833_s19 = sphi %s22908_s19, %s31029_s19   ;;  %s22829_s18 = sphi %s22906_s18, %s31028_s18   ;;  %s22825_s17 = sphi %s22904_s17, %s31027_s17  }
   0x6   : > { %s22929_s23 = sadd.s32 1, %s22837_s20   ;;  %s267_s24 = sadd.s32 1, %s22833_s19 }
   0x7   : > { %s264_s25 = ssub.s32 %s22837_s20, %s22929_s23  ;;  %p277_p0 = scmp.ne.s32.totalorder %s22833_s19, %s22829_s18 }
   0x8   : > { %p265_p1 = scmp.eq.s32.totalorder %s264_s25, 0  ;;  %p278_p2 = scmp.eq.s32.totalorder %s22925_s21, 1 }
   0x9   : > { %p283_p3 = scmp.ne.s32.totalorder %s22829_s18, %s22825_s17  ;;  %p284_p4 = scmp.eq.s32.totalorder %s14332_s22, 1 }
   0xa   : > { %s22940_s26 = scalar_select %p265_p1, %s22833_s19, %s267_s24  }
   0xb   : > { %p22942_p5 = por %p278_p2, %p277_p0  ;;  %p22946_p6 = por %p284_p4, %p283_p3 }
   0xc   : > { %p14335_p7 = scmp.ge.s32.totalorder %s22837_s20, 1  ;;  %p340_p8 = scmp.lt.s32.totalorder %s22837_s20, 3 }
   0xe   : > { %p341_p9 = pnand %p14335_p7, %p340_p8 }
  0x10   : > { %344 = sbr.rel (%p341_p9) target bundleno = 4344 (0x10f8), region = 64 }
  0x17   : > { %vm601_vm0 = vcmask 1043456   ;;  %v14743_v0 = vld [vmem:[%s29719_s1 + $0x2c] sm:$0xf]  ;;  %v14337_v1 = vld [vmem:[%s29719_s1 + $0x4] sm:$0xf]  ;;  %v30171_v2 = vmov 0.0  }
  0x18   : > { %18188 = vmatprep.subr.mxu0 %v30171_v2  ;;  %17011 = vmatprep.subr.mxu1 %v30171_v2  ;;  %p379_p10 = scmp.lt.s32.totalorder %s22925_s21, 1  ;;  %vm22840_vm1 = vmmov 0   ;;  %s30217_s0 = sld [smem:[#allocation269_spill]]  ;;  %vm460_vm2 = vcmask 1046528   ;;  %vm530_vm3 = vcmask 31744   ;;  %vm1580_vm4 = vcmask 1044480  }
  0x19   : > { %18189 = vmatpush3.msk.msra.mxu0 %vm601_vm0, %v14743_v0  ;;  %17012 = vmatpush3.msk.msra.mxu1 %vm601_vm0, %v14337_v1  ;;  %v14780_v11 = vld [vmem:[%s29719_s1 + $0x30] sm:$0xf]  ;;  %v422_v27 = vld [vmem:[%s29719_s1] sm:$0xf]  ;;  %vm2419_vm5 = vcmask 1042432   ;;  %vm1160_vm6 = vcmask 1045504  }
  0x1a   : > { %17013 = vmatprep.mubr.msk.f32.mxu1 %vm22840_vm1, %v30171_v2  ;;  %18190 = vmatprep.mubr.msk.f32.mxu0 %vm22840_vm1, %v30171_v2  ;;  %s380_s14 = scalar_select %p379_p10, %s22925_s21, 1  ;;  %vm2839_vm7 = vcmask 1041408   ;;  %vm3260_vm8 = vcmask 1040384   ;;  %vm9135_vm9 = vcmask 23552   ;;  %vm9170_vm10 = vcmask 17408  }
  0x1b   : > { %18295 = vmatprep.subr.mxu0 %v30171_v2  ;;  %17118 = vmatprep.subr.mxu1 %v30171_v2  ;;  %vm22841_vm11 = vmmov 1   ;;  %vm12095_vm13 = vcmask 80896   ;;  %vm12111_vm14 = vcmask 76800   ;;  %vm13048_vm15 = vcmask 75776   ;;  %s377_s29 = sand.u32 1, %s22829_s18   ;;  %s15697_s13 = sshll.u32 %s22925_s21, 4 }
  0x1c   : > { %s22614_s15 = smul.u32 304, %s380_s14  ;;  %vm29294_vm12 = vmpackc.low %vm2839_vm7, %vm22841_vm11  ;;  %s378_s14 = scalar_lea.vmem [#allocation6], %s377_s29 }
  0x1d   : > { %s29676_s22 = scalar_lea.hbm %s29729_s11, %s15697_s13  ;;  %s14265_s25 = scalar_lea.sflag [#allocation7], %s377_s29 }
  0x1e   : > { %s22973_s24 = scalar_lea.vmem %s30217_s0, %s22614_s15  ;;  %s14277_s15 = sshll.u32 %s378_s14, 4  ;;  %s29678_s15 = int_to_ptr.vmem [resolvable:$true] %s14277_s15 }
  0x1f   : > { %v22976_v3 = vld [vmem:[%s22973_s24] sm:$0xff]  ;;  %v22979_v4 = vld [vmem:[%s22973_s24 + $0x8] sm:$0xff]  ;;  %v22982_v5 = vld [vmem:[%s22973_s24 + $0x10] sm:$0xff]  ;;  %s22775_s30 = scalar_lea.vmem %s29678_s15, 16  ;;  %s22843_s21 = smov [#allocation6]  }
  0x20   : > { %v461_v6 = vrot.slane %v22976_v3, 1  ;;  %v462_v7 = vrot.slane %v22979_v4, 1  ;;  %v29730_v8 = vrot.slane %v22979_v4, 3  ;;  %v1584_v9 = vrot.slane %v22982_v5, 3  ;;  %v22989_v10 = vld [vmem:[%s22973_s24 + $0x18] sm:$0xff]  ;;  %v22997_v14 = vld [vmem:[%s22973_s24 + $0x20] sm:$0xff]  ;;  %p22776_p11 = scmp.ne.s32.totalorder %s29678_s15, %s22775_s30 }
  0x21   : > { %v464_v12 = vrot.slane %v22982_v5, 1  ;;  %v1586_v13 = vrot.slane %v22989_v10, 3  ;;  %v466_v19 = vrot.slane %v22989_v10, 1  ;;  %v1588_v20 = vrot.slane %v22997_v14, 3  ;;  %v23022_v21 = vld [vmem:[%s22973_s24 + $0x28] sm:$0xff]  ;;  %v23042_v26 = vld [vmem:[%s22973_s24 + $0x30] sm:$0xff] }
  0x22   : > { %v463_v15 = vsel %vm460_vm2, %v461_v6, %v462_v7  ;;  %v23003_v16 = vsel %vm1580_vm4, %v29730_v8, %v1584_v9  ;;  %v468_v24 = vrot.slane %v22997_v14, 1  ;;  %v1590_v25 = vrot.slane %v23022_v21, 3  ;;  %v23064_v32 = vld [vmem:[%s22973_s24 + $0x38] sm:$0xff]  ;;  %v23085_v37 = vld [vmem:[%s22973_s24 + $0x40] sm:$0xff]  ;;  %v23104_v42 = vld [vmem:[%s22973_s24 + $0x48] sm:$0xff]  ;;  %p22777_p12 = pnand %p22776_p11, %p22942_p5  ;;  %s22779_s12 = sshll.u32 %s22843_s21, 4  ;;  %s22780_s12 = int_to_ptr.vmem [resolvable:$false] %s22779_s12 }
  0x23   : > { %17014 = vmatmul.mubr.msk.f32.vlgmr.msra.gmra.mrb[0].mxu1 %vm530_vm3, %v463_v15  ;;  %18191 = vmatmul.mubr.msk.f32.vlgmr.msra.gmra.mrb[0].mxu0 %vm530_vm3, %v23003_v16  ;;  %v23012_v17 = vsel %vm460_vm2, %v462_v7, %v464_v12  ;;  %v23015_v18 = vsel %vm1580_vm4, %v1584_v9, %v1586_v13  ;;  %v23034_v22 = vsel %vm460_vm2, %v464_v12, %v466_v19  ;;  %v470_v30 = vrot.slane %v23022_v21, 1  ;;  %v23123_v47 = vld [vmem:[%s22973_s24 + $0x50] sm:$0xff]  ;;  %v23142_v52 = vld [vmem:[%s22973_s24 + $0x58] sm:$0xff]  ;;  %v23161_v57 = vld [vmem:[%s22973_s24 + $0x60] sm:$0xff]  ;;  %s22781_s0 = scalar_lea.vmem %s22780_s12, 32  ;;  %p22782_p0 = scmp.lt.s32.totalorder %s29678_s15, %s22780_s12 }
  0x24   : > { %18296 = vmatpush3.msk.msra.mxu0 %vm601_vm0, %v14780_v11  ;;  %17016 = vmatprep.mubr.msk.f32.mxu1 %vm22840_vm1, %v30171_v2  ;;  %30218 = vst [vmem:[#allocation9_spill] sm:$0xff] %v23012_v17  ;;  %30219 = vst [vmem:[#allocation10_spill] sm:$0xff] %v23015_v18  ;;  %v23037_v23 = vsel %vm1580_vm4, %v1586_v13, %v1588_v20  ;;  %v23056_v28 = vsel %vm460_vm2, %v466_v19, %v468_v24  ;;  %v1592_v31 = vrot.slane %v23042_v26, 3  ;;  %v23180_v62 = vld [vmem:[%s22973_s24 + $0x68] sm:$0xff]  ;;  %v23199_v7 = vld [vmem:[%s22973_s24 + $0x70] sm:$0xff]  ;;  %p22778_p13 = pneg %p22777_p12  ;;  %p22783_p1 = scmp.lt.s32.totalorder %s22781_s0, %s22775_s30 }
  0x25   : > { %18193 = vmatprep.mubr.msk.f32.mxu0 %vm22840_vm1, %v30171_v2  ;;  %18402 = vmatprep.subr.mxu0 %v30171_v2  ;;  %30220 = vst [vmem:[#allocation11_spill] sm:$0xff] %v23034_v22  ;;  %30221 = vst [vmem:[#allocation12_spill] sm:$0xff] %v23037_v23  ;;  %v23059_v29 = vsel %vm1580_vm4, %v1588_v20, %v1590_v25  ;;  %v23077_v33 = vsel %vm460_vm2, %v468_v24, %v470_v30  ;;  %v472_v35 = vrot.slane %v23042_v26, 1  ;;  %v23218_v15 = vld [vmem:[%s22973_s24 + $0x78] sm:$0xff]  ;;  %v23332_v8 = vld [vmem:[%s22973_s24 + $0xa8] sm:$0xff] }
  0x26   : > { %30222 = vst [vmem:[#allocation13_spill] sm:$0xff] %v23056_v28  ;;  %30223 = vst [vmem:[#allocation14_spill] sm:$0xff] %v23059_v29  ;;  %17119 = vmatpush3.msk.msra.mxu1 %vm601_vm0, %v422_v27  ;;  %v23080_v34 = vsel %vm1580_vm4, %v1590_v25, %v1592_v31  ;;  %v1594_v36 = vrot.slane %v23064_v32, 3  ;;  %v474_v40 = vrot.slane %v23064_v32, 1  ;;  %v1596_v41 = vrot.slane %v23085_v37, 3  ;;  %v23237_v27 = vld [vmem:[%s22973_s24 + $0x80] sm:$0xff]  ;;  %p22784_p2 = por %p22783_p1, %p22782_p0 }
  0x27   : > { %17017 = vmatmul.mubr.msk.f32.gmra.mrb[2].mxu1 %vm530_vm3, %v23012_v17  ;;  %18194 = vmatmul.mubr.msk.f32.gmra.mrb[2].mxu0 %vm530_vm3, %v23015_v18  ;;  %30224 = vst [vmem:[#allocation15_spill] sm:$0xff] %v23077_v33  ;;  %30225 = vst [vmem:[#allocation16_spill] sm:$0xff] %v23080_v34  ;;  %v23096_v38 = vsel %vm460_vm2, %v470_v30, %v472_v35  ;;  %v476_v45 = vrot.slane %v23085_v37, 1  ;;  %v1598_v46 = vrot.slane %v23104_v42, 3  ;;  %v478_v50 = vrot.slane %v23104_v42, 1 }
  0x28   : > { %17019 = vmatprep.mubr.msk.f32.mxu1 %vm22840_vm1, %v30171_v2  ;;  %18196 = vmatprep.mubr.msk.f32.mxu0 %vm22840_vm1, %v30171_v2  ;;  %30226 = vst [vmem:[#allocation17_spill] sm:$0xff] %v23096_v38  ;;  %v23099_v39 = vsel %vm1580_vm4, %v1592_v31, %v1594_v36  ;;  %v23115_v43 = vsel %vm460_vm2, %v472_v35, %v474_v40  ;;  %v1600_v51 = vrot.slane %v23123_v47, 3  ;;  %v480_v55 = vrot.slane %v23123_v47, 1  ;;  %p22785_p3 = pnand %p22784_p2, %p22778_p13 }
  0x29   : > { %17225 = vmatprep.subr.mxu1 %v30171_v2  ;;  %30227 = vst [vmem:[#allocation18_spill] sm:$0xff] %v23099_v39  ;;  %30228 = vst [vmem:[#allocation19_spill] sm:$0xff] %v23115_v43  ;;  %v23118_v44 = vsel %vm1580_vm4, %v1594_v36, %v1596_v41  ;;  %v23134_v48 = vsel %vm460_vm2, %v474_v40, %v476_v45  ;;  %v23137_v49 = vsel %vm1580_vm4, %v1596_v41, %v1598_v46  ;;  %v23256_v40 = vld [vmem:[%s22973_s24 + $0x88] sm:$0xff] }
  0x2a   : > { %30229 = vst [vmem:[#allocation20_spill] sm:$0xff] %v23118_v44  ;;  %30230 = vst [vmem:[#allocation21_spill] sm:$0xff] %v23134_v48  ;;  %v23153_v53 = vsel %vm460_vm2, %v476_v45, %v478_v50  ;;  %v23156_v54 = vsel %vm1580_vm4, %v1598_v46, %v1600_v51  ;;  %v1602_v56 = vrot.slane %v23142_v52, 3  ;;  %v23172_v58 = vsel %vm460_vm2, %v478_v50, %v480_v55 }
  0x2b   : > { %17020 = vmatmul.mubr.msk.f32.gmra.mrb[4].mxu1 %vm530_vm3, %v23034_v22  ;;  %18197 = vmatmul.mubr.msk.f32.gmra.mrb[4].mxu0 %vm530_vm3, %v23037_v23  ;;  %30231 = vst [vmem:[#allocation22_spill] sm:$0xff] %v23137_v49  ;;  %30232 = vst [vmem:[#allocation23_spill] sm:$0xff] %v23153_v53  ;;  %v482_v60 = vrot.slane %v23142_v52, 1  ;;  %v1604_v61 = vrot.slane %v23161_v57, 3  ;;  %v484_v1 = vrot.slane %v23161_v57, 1  ;;  %v1606_v6 = vrot.slane %v23180_v62, 3 }
  0x2c   : > { %17022 = vmatprep.mubr.msk.f32.mxu1 %vm22840_vm1, %v30171_v2  ;;  %18199 = vmatprep.mubr.msk.f32.mxu0 %vm22840_vm1, %v30171_v2  ;;  %30233 = vst [vmem:[#allocation24_spill] sm:$0xff] %v23156_v54  ;;  %30234 = vst [vmem:[#allocation25_spill] sm:$0xff] %v23172_v58  ;;  %v23175_v59 = vsel %vm1580_vm4, %v1600_v51, %v1602_v56  ;;  %v486_v12 = vrot.slane %v23180_v62, 1  ;;  %v1608_v13 = vrot.slane %v23199_v7, 3  ;;  %v488_v24 = vrot.slane %v23199_v7, 1  ;;  %v23275_v51 = vld [vmem:[%s22973_s24 + $0x90] sm:$0xff] }
  0x2d   : > { %30235 = vst [vmem:[#allocation26_spill] sm:$0xff] %v23175_v59  ;;  %v23191_v63 = vsel %vm460_vm2, %v480_v55, %v482_v60  ;;  %v23194_v0 = vsel %vm1580_vm4, %v1602_v56, %v1604_v61  ;;  %v23210_v9 = vsel %vm460_vm2, %v482_v60, %v484_v1  ;;  %v23213_v11 = vsel %vm1580_vm4, %v1604_v61, %v1606_v6 }
  0x2e   : > { %30236 = vst [vmem:[#allocation27_spill] sm:$0xff] %v23191_v63  ;;  %30237 = vst [vmem:[#allocation28_spill] sm:$0xff] %v23194_v0  ;;  %v23229_v19 = vsel %vm460_vm2, %v484_v1, %v486_v12  ;;  %v23232_v20 = vsel %vm1580_vm4, %v1606_v6, %v1608_v13  ;;  %v1610_v25 = vrot.slane %v23218_v15, 3  ;;  %v23248_v30 = vsel %vm460_vm2, %v486_v12, %v488_v24  ;;  %v23294_v1 = vld [vmem:[%s22973_s24 + $0x98] sm:$0xff] }
  0x2f   : > { %17023 = vmatmul.mubr.msk.f32.gmra.mrb[6].mxu1 %vm530_vm3, %v23056_v28  ;;  %18200 = vmatmul.mubr.msk.f32.gmra.mrb[6].mxu0 %vm530_vm3, %v23059_v29  ;;  %30238 = vst [vmem:[#allocation29_spill] sm:$0xff] %v23210_v9  ;;  %30239 = vst [vmem:[#allocation30_spill] sm:$0xff] %v23213_v11  ;;  %v490_v35 = vrot.slane %v23218_v15, 1  ;;  %v1612_v36 = vrot.slane %v23237_v27, 3  ;;  %v492_v46 = vrot.slane %v23237_v27, 1  ;;  %v1614_v50 = vrot.slane %v23256_v40, 3 }
  0x30   : > { %17025 = vmatprep.mubr.msk.f32.mxu1 %vm22840_vm1, %v30171_v2  ;;  %18202 = vmatprep.mubr.msk.f32.mxu0 %vm22840_vm1, %v30171_v2  ;;  %30240 = vst [vmem:[#allocation31_spill] sm:$0xff] %v23229_v19  ;;  %30241 = vst [vmem:[#allocation32_spill] sm:$0xff] %v23232_v20  ;;  %v23251_v31 = vsel %vm1580_vm4, %v1608_v13, %v1610_v25  ;;  %v494_v60 = vrot.slane %v23256_v40, 1  ;;  %v1616_v61 = vrot.slane %v23275_v51, 3  ;;  %v496_v13 = vrot.slane %v23275_v51, 1  ;;  %v23491_v28 = vld [vmem:[%s22973_s24 + $0xe0] sm:$0xff] }
  0x31   : > { %30242 = vst [vmem:[#allocation33_spill] sm:$0xff] %v23248_v30  ;;  %30243 = vst [vmem:[#allocation34_spill] sm:$0xff] %v23251_v31  ;;  %v23267_v41 = vsel %vm460_vm2, %v488_v24, %v490_v35  ;;  %v23270_v45 = vsel %vm1580_vm4, %v1610_v25, %v1612_v36  ;;  %v23286_v55 = vsel %vm460_vm2, %v490_v35, %v492_v46  ;;  %v1618_v24 = vrot.slane %v23294_v1, 3  ;;  %v23313_v25 = vld [vmem:[%s22973_s24 + $0xa0] sm:$0xff] }
  0x32   : > { %30244 = vst [vmem:[#allocation35_spill] sm:$0xff] %v23267_v41  ;;  %30245 = vst [vmem:[#allocation36_spill] sm:$0xff] %v23270_v45  ;;  %v23289_v56 = vsel %vm1580_vm4, %v1612_v36, %v1614_v50  ;;  %v23305_v6 = vsel %vm460_vm2, %v492_v46, %v494_v60  ;;  %v23308_v12 = vsel %vm1580_vm4, %v1614_v50, %v1616_v61  ;;  %v498_v46 = vrot.slane %v23294_v1, 1 }
  0x33   : > { %17026 = vmatmul.mubr.msk.f32.gmra.mrb[8].mxu1 %vm530_vm3, %v23077_v33  ;;  %18203 = vmatmul.mubr.msk.f32.gmra.mrb[8].mxu0 %vm530_vm3, %v23080_v34  ;;  %30246 = vst [vmem:[#allocation37_spill] sm:$0xff] %v23286_v55  ;;  %30247 = vst [vmem:[#allocation38_spill] sm:$0xff] %v23289_v56  ;;  %v23324_v35 = vsel %vm460_vm2, %v494_v60, %v496_v13  ;;  %v23327_v36 = vsel %vm1580_vm4, %v1616_v61, %v1618_v24  ;;  %v1620_v50 = vrot.slane %v23313_v25, 3 }
  0x34   : > { %17028 = vmatprep.mubr.msk.f32.mxu1 %vm22840_vm1, %v30171_v2  ;;  %18205 = vmatprep.mubr.msk.f32.mxu0 %vm22840_vm1, %v30171_v2  ;;  %30248 = vst [vmem:[#allocation39_spill] sm:$0xff] %v23305_v6  ;;  %30249 = vst [vmem:[#allocation40_spill] sm:$0xff] %v23308_v12  ;;  %v23343_v60 = vsel %vm460_vm2, %v496_v13, %v498_v46  ;;  %v500_v17 = vrot.slane %v23313_v25, 1  ;;  %v516_v22 = vrot.slane %v23491_v28, 1 }
  0x35   : > { %30250 = vst [vmem:[#allocation41_spill] sm:$0xff] %v23324_v35  ;;  %30251 = vst [vmem:[#allocation42_spill] sm:$0xff] %v23327_v36  ;;  %v23346_v61 = vsel %vm1580_vm4, %v1618_v24, %v1620_v50 }
  0x36   : > { %30252 = vst [vmem:[#allocation43_spill] sm:$0xff] %v23343_v60  ;;  %30253 = vst [vmem:[#allocation44_spill] sm:$0xff] %v23346_v61  ;;  %v23362_v13 = vsel %vm460_vm2, %v498_v46, %v500_v17 }
  0x37   : > { %17029 = vmatmul.mubr.msk.f32.gmra.mrb[10].mxu1 %vm530_vm3, %v23096_v38  ;;  %18206 = vmatmul.mubr.msk.f32.gmra.mrb[10].mxu0 %vm530_vm3, %v23099_v39  ;;  %30254 = vst [vmem:[#allocation45_spill] sm:$0xff] %v23362_v13  ;;  %v23472_v38 = vld [vmem:[%s22973_s24 + $0xd8] sm:$0xff] }
  0x38   : > { %17031 = vmatprep.mubr.msk.f32.mxu1 %vm22840_vm1, %v30171_v2  ;;  %18208 = vmatprep.mubr.msk.f32.mxu0 %vm22840_vm1, %v30171_v2  ;;  %v514_v33 = vrot.slane %v23472_v38, 1 }
  0x3b   : > { %17032 = vmatmul.mubr.msk.f32.gmra.mrb[12].mxu1 %vm530_vm3, %v23115_v43  ;;  %18209 = vmatmul.mubr.msk.f32.gmra.mrb[12].mxu0 %vm530_vm3, %v23118_v44  ;;  %v2007_v43 = vrot.slane %v22997_v14, 4 }
  0x3c   : > { %17034 = vmatprep.mubr.msk.f32.mxu1 %vm22840_vm1, %v30171_v2  ;;  %18211 = vmatprep.mubr.msk.f32.mxu0 %vm22840_vm1, %v30171_v2 }
  0x3f   : > { %17035 = vmatmul.mubr.msk.f32.gmra.mrb[14].mxu1 %vm530_vm3, %v23134_v48  ;;  %18212 = vmatmul.mubr.msk.f32.gmra.mrb[14].mxu0 %vm530_vm3, %v23137_v49 }
  0x40   : > { %17037 = vmatprep.mubr.msk.f32.mxu1 %vm22840_vm1, %v30171_v2  ;;  %18214 = vmatprep.mubr.msk.f32.mxu0 %vm22840_vm1, %v30171_v2 }
  0x43   : > { %17038 = vmatmul.mubr.msk.f32.gmra.mrb[16].mxu1 %vm530_vm3, %v23153_v53  ;;  %18215 = vmatmul.mubr.msk.f32.gmra.mrb[16].mxu0 %vm530_vm3, %v23156_v54  ;;  %v23432_v53 = vld [vmem:[%s22973_s24 + $0xc8] sm:$0xff] }
  0x44   : > { %17040 = vmatprep.mubr.msk.f32.mxu1 %vm22840_vm1, %v30171_v2  ;;  %18217 = vmatprep.mubr.msk.f32.mxu0 %vm22840_vm1, %v30171_v2  ;;  %v510_v48 = vrot.slane %v23432_v53, 1 }
  0x47   : > { %17041 = vmatmul.mubr.msk.f32.gmra.mrb[18].mxu1 %vm530_vm3, %v23172_v58  ;;  %18218 = vmatmul.mubr.msk.f32.gmra.mrb[18].mxu0 %vm530_vm3, %v23175_v59  ;;  %v14817_v58 = vld [vmem:[%s29719_s1 + $0x34] sm:$0xf] }
  0x48   : > { %17043 = vmatprep.mubr.msk.f32.mxu1 %vm22840_vm1, %v30171_v2  ;;  %18220 = vmatprep.mubr.msk.f32.mxu0 %vm22840_vm1, %v30171_v2 }
  0x4b   : > { %17044 = vmatmul.mubr.msk.f32.gmra.mrb[20].mxu1 %vm530_vm3, %v23191_v63  ;;  %18221 = vmatmul.mubr.msk.f32.gmra.mrb[20].mxu0 %vm530_vm3, %v23194_v0  ;;  %v23408_v63 = vld [vmem:[%s22973_s24 + $0xc0] sm:$0xff] }
  0x4c   : > { %17046 = vmatprep.mubr.msk.f32.mxu1 %vm22840_vm1, %v30171_v2  ;;  %18223 = vmatprep.mubr.msk.f32.mxu0 %vm22840_vm1, %v30171_v2 }
  0x4f   : > { %17047 = vmatmul.mubr.msk.f32.gmra.mrb[22].mxu1 %vm530_vm3, %v23210_v9  ;;  %18224 = vmatmul.mubr.msk.f32.gmra.mrb[22].mxu0 %vm530_vm3, %v23213_v11  ;;  %v2003_v9 = vrot.slane %v22982_v5, 4 }
  0x50   : > { %17049 = vmatprep.mubr.msk.f32.mxu1 %vm22840_vm1, %v30171_v2  ;;  %18226 = vmatprep.mubr.msk.f32.mxu0 %vm22840_vm1, %v30171_v2 }
  0x53   : > { %17050 = vmatmul.mubr.msk.f32.gmra.mrb[24].mxu1 %vm530_vm3, %v23229_v19  ;;  %18227 = vmatmul.mubr.msk.f32.gmra.mrb[24].mxu0 %vm530_vm3, %v23232_v20 }
  0x54   : > { %17052 = vmatprep.mubr.msk.f32.mxu1 %vm22840_vm1, %v30171_v2  ;;  %18229 = vmatprep.mubr.msk.f32.mxu0 %vm22840_vm1, %v30171_v2 }
  0x57   : > { %17053 = vmatmul.mubr.msk.f32.gmra.mrb[26].mxu1 %vm530_vm3, %v23248_v30  ;;  %18230 = vmatmul.mubr.msk.f32.gmra.mrb[26].mxu0 %vm530_vm3, %v23251_v31 }
  0x58   : > { %17055 = vmatprep.mubr.msk.f32.mxu1 %vm22840_vm1, %v30171_v2  ;;  %18232 = vmatprep.mubr.msk.f32.mxu0 %vm22840_vm1, %v30171_v2 }
  0x5b   : > { %17056 = vmatmul.mubr.msk.f32.gmra.mrb[28].mxu1 %vm530_vm3, %v23267_v41  ;;  %18233 = vmatmul.mubr.msk.f32.gmra.mrb[28].mxu0 %vm530_vm3, %v23270_v45 }
  0x5c   : > { %17058 = vmatprep.mubr.msk.f32.mxu1 %vm22840_vm1, %v30171_v2  ;;  %18235 = vmatprep.mubr.msk.f32.mxu0 %vm22840_vm1, %v30171_v2 }
  0x5f   : > { %17059 = vmatmul.mubr.msk.f32.gmra.mrb[30].mxu1 %vm530_vm3, %v23286_v55  ;;  %18236 = vmatmul.mubr.msk.f32.gmra.mrb[30].mxu0 %vm530_vm3, %v23289_v56  ;;  %v502_v55 = vrot.slane %v23332_v8, 1 }
  0x60   : > { %17061 = vmatprep.mubr.msk.f32.mxu1 %vm22840_vm1, %v30171_v2  ;;  %18238 = vmatprep.mubr.msk.f32.mxu0 %vm22840_vm1, %v30171_v2 }
  0x61   : > { %v23381_v46 = vsel %vm460_vm2, %v500_v17, %v502_v55 }
  0x62   : > { %30256 = vst [vmem:[#allocation47_spill] sm:$0xff] %v23381_v46 }
  0x63   : > { %17062 = vmatmul.mubr.msk.f32.gmra.mrb[32].mxu1 %vm530_vm3, %v23305_v6  ;;  %18239 = vmatmul.mubr.msk.f32.gmra.mrb[32].mxu0 %vm530_vm3, %v23308_v12  ;;  %v23351_v6 = vld [vmem:[%s22973_s24 + $0xb0] sm:$0xff] }
  0x64   : > { %17064 = vmatprep.mubr.msk.f32.mxu1 %vm22840_vm1, %v30171_v2  ;;  %18241 = vmatprep.mubr.msk.f32.mxu0 %vm22840_vm1, %v30171_v2  ;;  %v1624_v41 = vrot.slane %v23351_v6, 3  ;;  %v504_v30 = vrot.slane %v23351_v6, 1 }
  0x66   : > { %v23398_v17 = vsel %vm460_vm2, %v502_v55, %v504_v30 }
  0x67   : > { %17065 = vmatmul.mubr.msk.f32.gmra.mrb[34].mxu1 %vm530_vm3, %v23324_v35  ;;  %18242 = vmatmul.mubr.msk.f32.gmra.mrb[34].mxu0 %vm530_vm3, %v23327_v36  ;;  %v1622_v35 = vrot.slane %v23332_v8, 3  ;;  %30258 = vst [vmem:[#allocation49_spill] sm:$0xff] %v23398_v17 }
  0x68   : > { %17067 = vmatprep.mubr.msk.f32.mxu1 %vm22840_vm1, %v30171_v2  ;;  %18244 = vmatprep.mubr.msk.f32.mxu0 %vm22840_vm1, %v30171_v2 }
  0x69   : > { %v23365_v24 = vsel %vm1580_vm4, %v1620_v50, %v1622_v35  ;;  %v23384_v50 = vsel %vm1580_vm4, %v1622_v35, %v1624_v41 }
  0x6a   : > { %30255 = vst [vmem:[#allocation46_spill] sm:$0xff] %v23365_v24  ;;  %30257 = vst [vmem:[#allocation48_spill] sm:$0xff] %v23384_v50 }
  0x6b   : > { %17068 = vmatmul.mubr.msk.f32.gmra.mrb[36].mxu1 %vm530_vm3, %v23343_v60  ;;  %18245 = vmatmul.mubr.msk.f32.gmra.mrb[36].mxu0 %vm530_vm3, %v23346_v61  ;;  %v23370_v60 = vld [vmem:[%s22973_s24 + $0xb8] sm:$0xff] }
  0x6c   : > { %17070 = vmatprep.mubr.msk.f32.mxu1 %vm22840_vm1, %v30171_v2  ;;  %18247 = vmatprep.mubr.msk.f32.mxu0 %vm22840_vm1, %v30171_v2  ;;  %v506_v19 = vrot.slane %v23370_v60, 1 }
  0x6f   : > { %17071 = vmatmul.mubr.msk.f32.gmra.mrb[38].mxu1 %vm530_vm3, %v23362_v13  ;;  %18248 = vmatmul.mubr.msk.f32.gmra.mrb[38].mxu0 %vm530_vm3, %v23365_v24  ;;  %v29754_v13 = vrot.slane %v23370_v60, 3  ;;  %v2023_v24 = vrot.slane %v23161_v57, 4 }
  0x70   : > { %17073 = vmatprep.mubr.msk.f32.mxu1 %vm22840_vm1, %v30171_v2  ;;  %18250 = vmatprep.mubr.msk.f32.mxu0 %vm22840_vm1, %v30171_v2 }
  0x71   : > { %v23403_v35 = vsel %vm1580_vm4, %v1624_v41, %v29754_v13  ;;  %v23419_v41 = vsel %vm460_vm2, %v504_v30, %v506_v19  ;;  %v508_v13 = vrot.slane %v23408_v63, 1 }
  0x72   : > { %30259 = vst [vmem:[#allocation50_spill] sm:$0xff] %v23403_v35  ;;  %30260 = vst [vmem:[#allocation51_spill] sm:$0xff] %v23419_v41 }
  0x73   : > { %17074 = vmatmul.mubr.msk.f32.gmra.mrb[40].mxu1 %vm530_vm3, %v23381_v46  ;;  %18251 = vmatmul.mubr.msk.f32.gmra.mrb[40].mxu0 %vm530_vm3, %v23384_v50  ;;  %v29761_v46 = vrot.slane %v22979_v4, 4  ;;  %v23442_v30 = vsel %vm460_vm2, %v506_v19, %v508_v13  ;;  %v23586_v50 = vld [vmem:[%s22973_s24 + $0x108] sm:$0xff] }
  0x74   : > { %17076 = vmatprep.mubr.msk.f32.mxu1 %vm22840_vm1, %v30171_v2  ;;  %18253 = vmatprep.mubr.msk.f32.mxu0 %vm22840_vm1, %v30171_v2  ;;  %30262 = vst [vmem:[#allocation53_spill] sm:$0xff] %v23442_v30 }
  0x75   : > { %v23424_v55 = vsel %vm601_vm0, %v29761_v46, %v2003_v9 }
  0x76   : > { %30261 = vst [vmem:[#allocation52_spill] sm:$0xff] %v23424_v55 }
  0x77   : > { %17077 = vmatmul.mubr.msk.f32.gmra.mrb[42].mxu1 %vm530_vm3, %v23398_v17  ;;  %18254 = vmatmul.mubr.msk.f32.gmra.mrb[42].mxu0 %vm530_vm3, %v23403_v35  ;;  %v2005_v17 = vrot.slane %v22989_v10, 4  ;;  %v23567_v35 = vld [vmem:[%s22973_s24 + $0x100] sm:$0xff] }
  0x78   : > { %17079 = vmatprep.mubr.msk.f32.mxu1 %vm22840_vm1, %v30171_v2  ;;  %18297 = vmatprep.mubr.msk.f32.mxu0 %vm22840_vm1, %v30171_v2 }
  0x79   : > { %v23445_v46 = vsel %vm601_vm0, %v2003_v9, %v2005_v17  ;;  %v23467_v9 = vsel %vm601_vm0, %v2005_v17, %v2007_v43 }
  0x7a   : > { %30263 = vst [vmem:[#allocation54_spill] sm:$0xff] %v23445_v46  ;;  %30265 = vst [vmem:[#allocation56_spill] sm:$0xff] %v23467_v9 }
  0x7b   : > { %17080 = vmatmul.mubr.msk.f32.gmra.mrb[44].mxu1 %vm530_vm3, %v23419_v41  ;;  %18298 = vmatmul.mubr.msk.f32.vlgmr.msra.gmra.mrb[0].mxu0 %vm530_vm3, %v23424_v55  ;;  %v23452_v41 = vld [vmem:[%s22973_s24 + $0xd0] sm:$0xff]  ;;  %v23548_v55 = vld [vmem:[%s22973_s24 + $0xf8] sm:$0xff] }
  0x7c   : > { %18403 = vmatpush3.msk.msra.mxu0 %vm601_vm0, %v14817_v58  ;;  %17082 = vmatprep.mubr.msk.f32.mxu1 %vm22840_vm1, %v30171_v2  ;;  %v23464_v58 = vsel %vm460_vm2, %v508_v13, %v510_v48  ;;  %v512_v19 = vrot.slane %v23452_v41, 1 }
  0x7d   : > { %18300 = vmatprep.mubr.msk.f32.mxu0 %vm22840_vm1, %v30171_v2  ;;  %18509 = vmatprep.subr.mxu0 %v30171_v2  ;;  %30264 = vst [vmem:[#allocation55_spill] sm:$0xff] %v23464_v58 }
  0x7e   : > { %v23483_v13 = vsel %vm460_vm2, %v510_v48, %v512_v19 }
  0x7f   : > { %17083 = vmatmul.mubr.msk.f32.gmra.mrb[46].mxu1 %vm530_vm3, %v23442_v30  ;;  %18301 = vmatmul.mubr.msk.f32.gmra.mrb[2].mxu0 %vm530_vm3, %v23445_v46  ;;  %v2009_v30 = vrot.slane %v23022_v21, 4  ;;  %30266 = vst [vmem:[#allocation57_spill] sm:$0xff] %v23483_v13  ;;  %v23529_v46 = vld [vmem:[%s22973_s24 + $0xf0] sm:$0xff] }
  0x80   : > { %17085 = vmatprep.mubr.msk.f32.mxu1 %vm22840_vm1, %v30171_v2  ;;  %18303 = vmatprep.mubr.msk.f32.mxu0 %vm22840_vm1, %v30171_v2 }
  0x81   : > { %v23486_v17 = vsel %vm601_vm0, %v2007_v43, %v2009_v30  ;;  %v23502_v43 = vsel %vm460_vm2, %v512_v19, %v514_v33 }
  0x82   : > { %30267 = vst [vmem:[#allocation58_spill] sm:$0xff] %v23486_v17  ;;  %30268 = vst [vmem:[#allocation59_spill] sm:$0xff] %v23502_v43 }
  0x83   : > { %17086 = vmatmul.mubr.msk.f32.gmra.mrb[48].mxu1 %vm530_vm3, %v23464_v58  ;;  %18304 = vmatmul.mubr.msk.f32.gmra.mrb[4].mxu0 %vm530_vm3, %v23467_v9  ;;  %v2011_v58 = vrot.slane %v23042_v26, 4  ;;  %v23510_v9 = vld [vmem:[%s22973_s24 + $0xe8] sm:$0xff] }
  0x84   : > { %17088 = vmatprep.mubr.msk.f32.mxu1 %vm22840_vm1, %v30171_v2  ;;  %18306 = vmatprep.mubr.msk.f32.mxu0 %vm22840_vm1, %v30171_v2 }
  0x85   : > { %v23505_v48 = vsel %vm601_vm0, %v2009_v30, %v2011_v58  ;;  %v23521_v30 = vsel %vm460_vm2, %v514_v33, %v516_v22 }
  0x86   : > { %30269 = vst [vmem:[#allocation60_spill] sm:$0xff] %v23505_v48  ;;  %30270 = vst [vmem:[#allocation61_spill] sm:$0xff] %v23521_v30 }
  0x87   : > { %17089 = vmatmul.mubr.msk.f32.gmra.mrb[50].mxu1 %vm530_vm3, %v23483_v13  ;;  %18307 = vmatmul.mubr.msk.f32.gmra.mrb[6].mxu0 %vm530_vm3, %v23486_v17  ;;  %v2013_v13 = vrot.slane %v23064_v32, 4  ;;  %v518_v17 = vrot.slane %v23510_v9, 1 }
  0x88   : > { %17091 = vmatprep.mubr.msk.f32.mxu1 %vm22840_vm1, %v30171_v2  ;;  %18309 = vmatprep.mubr.msk.f32.mxu0 %vm22840_vm1, %v30171_v2 }
  0x89   : > { %v23524_v19 = vsel %vm601_vm0, %v2011_v58, %v2013_v13  ;;  %v23540_v33 = vsel %vm460_vm2, %v516_v22, %v518_v17 }
  0x8a   : > { %30271 = vst [vmem:[#allocation62_spill] sm:$0xff] %v23524_v19  ;;  %30272 = vst [vmem:[#allocation63_spill] sm:$0xff] %v23540_v33 }
  0x8b   : > { %17092 = vmatmul.mubr.msk.f32.gmra.mrb[52].mxu1 %vm530_vm3, %v23502_v43  ;;  %18310 = vmatmul.mubr.msk.f32.gmra.mrb[8].mxu0 %vm530_vm3, %v23505_v48  ;;  %v2015_v43 = vrot.slane %v23085_v37, 4  ;;  %v520_v48 = vrot.slane %v23529_v46, 1 }
  0x8c   : > { %17094 = vmatprep.mubr.msk.f32.mxu1 %vm22840_vm1, %v30171_v2  ;;  %18312 = vmatprep.mubr.msk.f32.mxu0 %vm22840_vm1, %v30171_v2 }
  0x8d   : > { %v23543_v58 = vsel %vm601_vm0, %v2013_v13, %v2015_v43  ;;  %v23559_v22 = vsel %vm460_vm2, %v518_v17, %v520_v48 }
  0x8e   : > { %30273 = vst [vmem:[#allocation64_spill] sm:$0xff] %v23543_v58  ;;  %30274 = vst [vmem:[#allocation65_spill] sm:$0xff] %v23559_v22 }
  0x8f   : > { %17095 = vmatmul.mubr.msk.f32.gmra.mrb[54].mxu1 %vm530_vm3, %v23521_v30  ;;  %18313 = vmatmul.mubr.msk.f32.gmra.mrb[10].mxu0 %vm530_vm3, %v23524_v19  ;;  %v2017_v30 = vrot.slane %v23104_v42, 4  ;;  %v522_v19 = vrot.slane %v23548_v55, 1 }
  0x90   : > { %17097 = vmatprep.mubr.msk.f32.mxu1 %vm22840_vm1, %v30171_v2  ;;  %18315 = vmatprep.mubr.msk.f32.mxu0 %vm22840_vm1, %v30171_v2 }
  0x91   : > { %v23562_v13 = vsel %vm601_vm0, %v2015_v43, %v2017_v30  ;;  %v23578_v17 = vsel %vm460_vm2, %v520_v48, %v522_v19 }
  0x92   : > { %30275 = vst [vmem:[#allocation66_spill] sm:$0xff] %v23562_v13  ;;  %30276 = vst [vmem:[#allocation67_spill] sm:$0xff] %v23578_v17 }
  0x93   : > { %17098 = vmatmul.mubr.msk.f32.gmra.mrb[56].mxu1 %vm530_vm3, %v23540_v33  ;;  %18316 = vmatmul.mubr.msk.f32.gmra.mrb[12].mxu0 %vm530_vm3, %v23543_v58  ;;  %v2019_v33 = vrot.slane %v23123_v47, 4  ;;  %v524_v58 = vrot.slane %v23567_v35, 1 }
  0x94   : > { %17100 = vmatprep.mubr.msk.f32.mxu1 %vm22840_vm1, %v30171_v2  ;;  %18318 = vmatprep.mubr.msk.f32.mxu0 %vm22840_vm1, %v30171_v2 }
  0x95   : > { %v23581_v43 = vsel %vm601_vm0, %v2017_v30, %v2019_v33  ;;  %v23597_v48 = vsel %vm460_vm2, %v522_v19, %v524_v58 }
  0x96   : > { %30277 = vst [vmem:[#allocation68_spill] sm:$0xff] %v23581_v43  ;;  %30278 = vst [vmem:[#allocation69_spill] sm:$0xff] %v23597_v48 }
  0x97   : > { %17101 = vmatmul.mubr.msk.f32.gmra.mrb[58].mxu1 %vm530_vm3, %v23559_v22  ;;  %18319 = vmatmul.mubr.msk.f32.gmra.mrb[14].mxu0 %vm530_vm3, %v23562_v13  ;;  %v2021_v22 = vrot.slane %v23142_v52, 4  ;;  %v526_v13 = vrot.slane %v23586_v50, 1 }
  0x98   : > { %17103 = vmatprep.mubr.msk.f32.mxu1 %vm22840_vm1, %v30171_v2  ;;  %18321 = vmatprep.mubr.msk.f32.mxu0 %vm22840_vm1, %v30171_v2 }
  0x99   : > { %v23600_v30 = vsel %vm601_vm0, %v2019_v33, %v2021_v22  ;;  %v23616_v19 = vsel %vm460_vm2, %v524_v58, %v526_v13  ;;  %v23619_v33 = vsel %vm601_vm0, %v2021_v22, %v2023_v24 }
  0x9a   : > { %30279 = vst [vmem:[#allocation70_spill] sm:$0xff] %v23600_v30  ;;  %30280 = vst [vmem:[#allocation71_spill] sm:$0xff] %v23616_v19 }
  0x9b   : > { %17104 = vmatmul.mubr.msk.f32.gmra.mrb[60].mxu1 %vm530_vm3, %v23578_v17  ;;  %18322 = vmatmul.mubr.msk.f32.gmra.mrb[16].mxu0 %vm530_vm3, %v23581_v43  ;;  %v23605_v17 = vld [vmem:[%s22973_s24 + $0x110] sm:$0xff]  ;;  %30281 = vst [vmem:[#allocation72_spill] sm:$0xff] %v23619_v33 }
  0x9c   : > { %17106 = vmatprep.mubr.msk.f32.mxu1 %vm22840_vm1, %v30171_v2  ;;  %18324 = vmatprep.mubr.msk.f32.mxu0 %vm22840_vm1, %v30171_v2  ;;  %v23622_v43 = vrot.slane %v23605_v17, 1 }
  0x9e   : > { %30282 = vst [vmem:[#allocation73_spill] sm:$0xff] %v23622_v43  ;;  %v23635_v58 = vsel %vm460_vm2, %v526_v13, %v23622_v43 }
  0x9f   : > { %17107 = vmatmul.mubr.msk.f32.gmra.mrb[62].mxu1 %vm530_vm3, %v23597_v48  ;;  %18325 = vmatmul.mubr.msk.f32.gmra.mrb[18].mxu0 %vm530_vm3, %v23600_v30  ;;  %v2025_v48 = vrot.slane %v23180_v62, 4  ;;  %30283 = vst [vmem:[#allocation74_spill] sm:$0xff] %v23635_v58  ;;  %v2027_v30 = vrot.slane %v23199_v7, 4 }
  0xa0   : > { %17109 = vmatprep.mubr.msk.f32.mxu1 %vm22840_vm1, %v30171_v2  ;;  %18327 = vmatprep.mubr.msk.f32.mxu0 %vm22840_vm1, %v30171_v2 }
  0xa1   : > { %v23638_v22 = vsel %vm601_vm0, %v2023_v24, %v2025_v48  ;;  %v23650_v13 = vsel %vm601_vm0, %v2025_v48, %v2027_v30  ;;  %v2029_v24 = vrot.slane %v23218_v15, 4  ;;  %v2031_v48 = vrot.slane %v23237_v27, 4 }
  0xa2   : > { %30284 = vst [vmem:[#allocation75_spill] sm:$0xff] %v23638_v22  ;;  %30285 = vst [vmem:[#allocation76_spill] sm:$0xff] %v23650_v13 }
  0xa3   : > { %17110 = vmatmul.mubr.msk.f32.gmra.mrb[64].mxu1 %vm530_vm3, %v23616_v19  ;;  %18328 = vmatmul.mubr.msk.f32.gmra.mrb[20].mxu0 %vm530_vm3, %v23619_v33  ;;  %v14410_v19 = vld [vmem:[%s29719_s1 + $0x8] sm:$0xf] }
  0xa4   : > { %17112 = vmatprep.mubr.msk.f32.mxu1 %vm22840_vm1, %v30171_v2  ;;  %18330 = vmatprep.mubr.msk.f32.mxu0 %vm22840_vm1, %v30171_v2 }
  0xa7   : > { %17113 = vmatmul.mubr.msk.f32.gmra.mrb[66].mxu1 %vm530_vm3, %v23635_v58  ;;  %18331 = vmatmul.mubr.msk.f32.gmra.mrb[22].mxu0 %vm530_vm3, %v23638_v22  ;;  %v23662_v58 = vsel %vm601_vm0, %v2027_v30, %v2029_v24  ;;  %v2033_v30 = vrot.slane %v23256_v40, 4 }
  0xa8   : > { %17115 = vmatprep.mubr.msk.f32.mxu1 %vm22840_vm1, %v30171_v2  ;;  %18333 = vmatprep.mubr.msk.f32.mxu0 %vm22840_vm1, %v30171_v2  ;;  %30286 = vst [vmem:[#allocation77_spill] sm:$0xff] %v23662_v58 }
  0xab   : > { %17116 = vmatmul.mubr.msk.f32.gmra.mrb[68].mxu1 %vm530_vm3, %v23622_v43  ;;  %18334 = vmatmul.mubr.msk.f32.gmra.mrb[24].mxu0 %vm530_vm3, %v23650_v13  ;;  %v23674_v43 = vsel %vm601_vm0, %v2029_v24, %v2031_v48  ;;  %v2035_v24 = vrot.slane %v23275_v51, 4 }
  0xac   : > { %17120 = vmatprep.mubr.msk.f32.mxu1 %vm22840_vm1, %v30171_v2  ;;  %18336 = vmatprep.mubr.msk.f32.mxu0 %vm22840_vm1, %v30171_v2  ;;  %30287 = vst [vmem:[#allocation78_spill] sm:$0xff] %v23674_v43 }
  0xaf   : > { %17121 = vmatmul.mubr.msk.f32.vlgmr.msra.gmra.mrb[0].mxu1 %vm530_vm3, %v22976_v3  ;;  %18337 = vmatmul.mubr.msk.f32.gmra.mrb[26].mxu0 %vm530_vm3, %v23662_v58  ;;  %v23686_v3 = vsel %vm601_vm0, %v2031_v48, %v2033_v30  ;;  %v23701_v48 = vsel %vm601_vm0, %v2033_v30, %v2035_v24 }
  0xb0   : > { %17123 = vmatprep.mubr.msk.f32.mxu1 %vm22840_vm1, %v30171_v2  ;;  %18339 = vmatprep.mubr.msk.f32.mxu0 %vm22840_vm1, %v30171_v2  ;;  %30288 = vst [vmem:[#allocation79_spill] sm:$0xff] %v23686_v3  ;;  %30289 = vst [vmem:[#allocation80_spill] sm:$0xff] %v23701_v48 }
  0xb1   : > { %17226 = vmatpush3.msk.msra.mxu1 %vm601_vm0, %v14410_v19 }
  0xb2   : > { %17332 = vmatprep.subr.mxu1 %v30171_v2 }
  0xb3   : > { %17124 = vmatmul.mubr.msk.f32.gmra.mrb[2].mxu1 %vm530_vm3, %v22979_v4  ;;  %18340 = vmatmul.mubr.msk.f32.gmra.mrb[28].mxu0 %vm530_vm3, %v23674_v43  ;;  %v2037_v43 = vrot.slane %v23294_v1, 4 }
  0xb4   : > { %17126 = vmatprep.mubr.msk.f32.mxu1 %vm22840_vm1, %v30171_v2  ;;  %18342 = vmatprep.mubr.msk.f32.mxu0 %vm22840_vm1, %v30171_v2 }
  0xb5   : > { %v23715_v30 = vsel %vm601_vm0, %v2035_v24, %v2037_v43  ;;  %v2041_v24 = vrot.slane %v23332_v8, 4 }
  0xb6   : > { %30290 = vst [vmem:[#allocation81_spill] sm:$0xff] %v23715_v30 }
  0xb7   : > { %17127 = vmatmul.mubr.msk.f32.gmra.mrb[4].mxu1 %vm530_vm3, %v22982_v5  ;;  %18343 = vmatmul.mubr.msk.f32.gmra.mrb[30].mxu0 %vm530_vm3, %v23686_v3  ;;  %v2039_v3 = vrot.slane %v23313_v25, 4 }
  0xb8   : > { %17129 = vmatprep.mubr.msk.f32.mxu1 %vm22840_vm1, %v30171_v2  ;;  %18345 = vmatprep.mubr.msk.f32.mxu0 %vm22840_vm1, %v30171_v2 }
  0xb9   : > { %v23727_v19 = vsel %vm601_vm0, %v2037_v43, %v2039_v3  ;;  %v2043_v43 = vrot.slane %v23351_v6, 4 }
  0xba   : > { %30291 = vst [vmem:[#allocation82_spill] sm:$0xff] %v23727_v19 }
  0xbb   : > { %17130 = vmatmul.mubr.msk.f32.gmra.mrb[6].mxu1 %vm530_vm3, %v22989_v10  ;;  %18346 = vmatmul.mubr.msk.f32.gmra.mrb[32].mxu0 %vm530_vm3, %v23701_v48  ;;  %v23889_v48 = vld [vmem:[%s22973_s24 + $0x118] sm:$0xff] }
  0xbc   : > { %17132 = vmatprep.mubr.msk.f32.mxu1 %vm22840_vm1, %v30171_v2  ;;  %18348 = vmatprep.mubr.msk.f32.mxu0 %vm22840_vm1, %v30171_v2 }
  0xbf   : > { %17133 = vmatmul.mubr.msk.f32.gmra.mrb[8].mxu1 %vm530_vm3, %v22997_v14  ;;  %18349 = vmatmul.mubr.msk.f32.gmra.mrb[34].mxu0 %vm530_vm3, %v23715_v30  ;;  %v23739_v30 = vsel %vm601_vm0, %v2039_v3, %v2041_v24  ;;  %v2045_v3 = vrot.slane %v23370_v60, 4 }
  0xc0   : > { %17135 = vmatprep.mubr.msk.f32.mxu1 %vm22840_vm1, %v30171_v2  ;;  %18351 = vmatprep.mubr.msk.f32.mxu0 %vm22840_vm1, %v30171_v2  ;;  %30292 = vst [vmem:[#allocation83_spill] sm:$0xff] %v23739_v30 }
  0xc3   : > { %17136 = vmatmul.mubr.msk.f32.gmra.mrb[10].mxu1 %vm530_vm3, %v23022_v21  ;;  %18352 = vmatmul.mubr.msk.f32.gmra.mrb[36].mxu0 %vm530_vm3, %v23727_v19  ;;  %v23751_v19 = vsel %vm601_vm0, %v2041_v24, %v2043_v43  ;;  %v2047_v24 = vrot.slane %v23408_v63, 4 }
  0xc4   : > { %17138 = vmatprep.mubr.msk.f32.mxu1 %vm22840_vm1, %v30171_v2  ;;  %18354 = vmatprep.mubr.msk.f32.mxu0 %vm22840_vm1, %v30171_v2  ;;  %30293 = vst [vmem:[#allocation84_spill] sm:$0xff] %v23751_v19 }
  0xc7   : > { %17139 = vmatmul.mubr.msk.f32.gmra.mrb[12].mxu1 %vm530_vm3, %v23042_v26  ;;  %18355 = vmatmul.mubr.msk.f32.gmra.mrb[38].mxu0 %vm530_vm3, %v23739_v30  ;;  %v23763_v30 = vsel %vm601_vm0, %v2043_v43, %v2045_v3  ;;  %v2049_v43 = vrot.slane %v23432_v53, 4 }
  0xc8   : > { %17141 = vmatprep.mubr.msk.f32.mxu1 %vm22840_vm1, %v30171_v2  ;;  %18357 = vmatprep.mubr.msk.f32.mxu0 %vm22840_vm1, %v30171_v2  ;;  %30294 = vst [vmem:[#allocation85_spill] sm:$0xff] %v23763_v30 }
  0xcb   : > { %17142 = vmatmul.mubr.msk.f32.gmra.mrb[14].mxu1 %vm530_vm3, %v23064_v32  ;;  %18358 = vmatmul.mubr.msk.f32.gmra.mrb[40].mxu0 %vm530_vm3, %v23751_v19  ;;  %v23775_v19 = vsel %vm601_vm0, %v2045_v3, %v2047_v24  ;;  %v2051_v3 = vrot.slane %v23452_v41, 4 }
  0xcc   : > { %17144 = vmatprep.mubr.msk.f32.mxu1 %vm22840_vm1, %v30171_v2  ;;  %18360 = vmatprep.mubr.msk.f32.mxu0 %vm22840_vm1, %v30171_v2  ;;  %30295 = vst [vmem:[#allocation86_spill] sm:$0xff] %v23775_v19 }
  0xcf   : > { %17145 = vmatmul.mubr.msk.f32.gmra.mrb[16].mxu1 %vm530_vm3, %v23085_v37  ;;  %18361 = vmatmul.mubr.msk.f32.gmra.mrb[42].mxu0 %vm530_vm3, %v23763_v30  ;;  %v23787_v30 = vsel %vm601_vm0, %v2047_v24, %v2049_v43  ;;  %v2053_v24 = vrot.slane %v23472_v38, 4 }
  0xd0   : > { %17147 = vmatprep.mubr.msk.f32.mxu1 %vm22840_vm1, %v30171_v2  ;;  %18363 = vmatprep.mubr.msk.f32.mxu0 %vm22840_vm1, %v30171_v2  ;;  %30296 = vst [vmem:[#allocation87_spill] sm:$0xff] %v23787_v30 }
  0xd3   : > { %17148 = vmatmul.mubr.msk.f32.gmra.mrb[18].mxu1 %vm530_vm3, %v23104_v42  ;;  %18364 = vmatmul.mubr.msk.f32.gmra.mrb[44].mxu0 %vm530_vm3, %v23775_v19  ;;  %v23799_v19 = vsel %vm601_vm0, %v2049_v43, %v2051_v3  ;;  %v2055_v43 = vrot.slane %v23491_v28, 4 }
  0xd4   : > { %17150 = vmatprep.mubr.msk.f32.mxu1 %vm22840_vm1, %v30171_v2  ;;  %18366 = vmatprep.mubr.msk.f32.mxu0 %vm22840_vm1, %v30171_v2  ;;  %30297 = vst [vmem:[#allocation88_spill] sm:$0xff] %v23799_v19 }
  0xd7   : > { %17151 = vmatmul.mubr.msk.f32.gmra.mrb[20].mxu1 %vm530_vm3, %v23123_v47  ;;  %18367 = vmatmul.mubr.msk.f32.gmra.mrb[46].mxu0 %vm530_vm3, %v23787_v30  ;;  %v23811_v30 = vsel %vm601_vm0, %v2051_v3, %v2053_v24  ;;  %v2057_v3 = vrot.slane %v23510_v9, 4 }
  0xd8   : > { %17153 = vmatprep.mubr.msk.f32.mxu1 %vm22840_vm1, %v30171_v2  ;;  %18369 = vmatprep.mubr.msk.f32.mxu0 %vm22840_vm1, %v30171_v2  ;;  %30298 = vst [vmem:[#allocation89_spill] sm:$0xff] %v23811_v30 }
  0xdb   : > { %17154 = vmatmul.mubr.msk.f32.gmra.mrb[22].mxu1 %vm530_vm3, %v23142_v52  ;;  %18370 = vmatmul.mubr.msk.f32.gmra.mrb[48].mxu0 %vm530_vm3, %v23799_v19  ;;  %v23823_v19 = vsel %vm601_vm0, %v2053_v24, %v2055_v43  ;;  %v2059_v24 = vrot.slane %v23529_v46, 4 }
  0xdc   : > { %17156 = vmatprep.mubr.msk.f32.mxu1 %vm22840_vm1, %v30171_v2  ;;  %18372 = vmatprep.mubr.msk.f32.mxu0 %vm22840_vm1, %v30171_v2  ;;  %30299 = vst [vmem:[#allocation90_spill] sm:$0xff] %v23823_v19 }
  0xdf   : > { %17157 = vmatmul.mubr.msk.f32.gmra.mrb[24].mxu1 %vm530_vm3, %v23161_v57  ;;  %18373 = vmatmul.mubr.msk.f32.gmra.mrb[50].mxu0 %vm530_vm3, %v23811_v30  ;;  %v23835_v30 = vsel %vm601_vm0, %v2055_v43, %v2057_v3  ;;  %v2061_v43 = vrot.slane %v23548_v55, 4 }
  0xe0   : > { %17159 = vmatprep.mubr.msk.f32.mxu1 %vm22840_vm1, %v30171_v2  ;;  %18375 = vmatprep.mubr.msk.f32.mxu0 %vm22840_vm1, %v30171_v2  ;;  %30300 = vst [vmem:[#allocation91_spill] sm:$0xff] %v23835_v30 }
  0xe3   : > { %17160 = vmatmul.mubr.msk.f32.gmra.mrb[26].mxu1 %vm530_vm3, %v23180_v62  ;;  %18376 = vmatmul.mubr.msk.f32.gmra.mrb[52].mxu0 %vm530_vm3, %v23823_v19  ;;  %v23847_v19 = vsel %vm601_vm0, %v2057_v3, %v2059_v24  ;;  %v2063_v3 = vrot.slane %v23567_v35, 4 }
  0xe4   : > { %17162 = vmatprep.mubr.msk.f32.mxu1 %vm22840_vm1, %v30171_v2  ;;  %18378 = vmatprep.mubr.msk.f32.mxu0 %vm22840_vm1, %v30171_v2  ;;  %30301 = vst [vmem:[#allocation92_spill] sm:$0xff] %v23847_v19 }
  0xe7   : > { %17163 = vmatmul.mubr.msk.f32.gmra.mrb[28].mxu1 %vm530_vm3, %v23199_v7  ;;  %18379 = vmatmul.mubr.msk.f32.gmra.mrb[54].mxu0 %vm530_vm3, %v23835_v30  ;;  %v23859_v30 = vsel %vm601_vm0, %v2059_v24, %v2061_v43  ;;  %v2065_v24 = vrot.slane %v23586_v50, 4 }
  0xe8   : > { %17165 = vmatprep.mubr.msk.f32.mxu1 %vm22840_vm1, %v30171_v2  ;;  %18381 = vmatprep.mubr.msk.f32.mxu0 %vm22840_vm1, %v30171_v2  ;;  %30302 = vst [vmem:[#allocation93_spill] sm:$0xff] %v23859_v30 }
  0xeb   : > { %17166 = vmatmul.mubr.msk.f32.gmra.mrb[30].mxu1 %vm530_vm3, %v23218_v15  ;;  %18382 = vmatmul.mubr.msk.f32.gmra.mrb[56].mxu0 %vm530_vm3, %v23847_v19  ;;  %v23871_v19 = vsel %vm601_vm0, %v2061_v43, %v2063_v3  ;;  %v23886_v43 = vrot.slane %v23605_v17, 4 }
  0xec   : > { %17168 = vmatprep.mubr.msk.f32.mxu1 %vm22840_vm1, %v30171_v2  ;;  %18384 = vmatprep.mubr.msk.f32.mxu0 %vm22840_vm1, %v30171_v2  ;;  %30303 = vst [vmem:[#allocation94_spill] sm:$0xff] %v23871_v19 }
  0xed   : > { %30305 = vst [vmem:[#allocation96_spill] sm:$0xff] %v23886_v43 }
  0xef   : > { %17169 = vmatmul.mubr.msk.f32.gmra.mrb[32].mxu1 %vm530_vm3, %v23237_v27  ;;  %18385 = vmatmul.mubr.msk.f32.gmra.mrb[58].mxu0 %vm530_vm3, %v23859_v30  ;;  %v23883_v30 = vsel %vm601_vm0, %v2063_v3, %v2065_v24  ;;  %v23901_v3 = vsel %vm601_vm0, %v2065_v24, %v23886_v43 }
  0xf0   : > { %17171 = vmatprep.mubr.msk.f32.mxu1 %vm22840_vm1, %v30171_v2  ;;  %18387 = vmatprep.mubr.msk.f32.mxu0 %vm22840_vm1, %v30171_v2  ;;  %30304 = vst [vmem:[#allocation95_spill] sm:$0xff] %v23883_v30  ;;  %30306 = vst [vmem:[#allocation97_spill] sm:$0xff] %v23901_v3 }
  0xf3   : > { %17172 = vmatmul.mubr.msk.f32.gmra.mrb[34].mxu1 %vm530_vm3, %v23256_v40  ;;  %18388 = vmatmul.mubr.msk.f32.gmra.mrb[60].mxu0 %vm530_vm3, %v23871_v19  ;;  %v23904_v19 = vrot.slane %v23889_v48, 4 }
  0xf4   : > { %17174 = vmatprep.mubr.msk.f32.mxu1 %vm22840_vm1, %v30171_v2  ;;  %18390 = vmatprep.mubr.msk.f32.mxu0 %vm22840_vm1, %v30171_v2 }
  0xf5   : > { %30307 = vst [vmem:[#allocation98_spill] sm:$0xff] %v23904_v19  ;;  %v23917_v24 = vsel %vm601_vm0, %v23886_v43, %v23904_v19  ;;  %v14854_v43 = vld [vmem:[%s29719_s1 + $0x38] sm:$0xf] }
  0xf6   : > { %30308 = vst [vmem:[#allocation99_spill] sm:$0xff] %v23917_v24 }
  0xf7   : > { %17175 = vmatmul.mubr.msk.f32.gmra.mrb[36].mxu1 %vm530_vm3, %v23275_v51  ;;  %18391 = vmatmul.mubr.msk.f32.gmra.mrb[62].mxu0 %vm530_vm3, %v23883_v30  ;;  %v2423_v30 = vrot.slane %v22982_v5, 5  ;;  %v2425_v5 = vrot.slane %v22989_v10, 5  ;;  %v2427_v10 = vrot.slane %v22997_v14, 5  ;;  %v2429_v14 = vrot.slane %v23022_v21, 5 }
  0xf8   : > { %17177 = vmatprep.mubr.msk.f32.mxu1 %vm22840_vm1, %v30171_v2  ;;  %18393 = vmatprep.mubr.msk.f32.mxu0 %vm22840_vm1, %v30171_v2 }
  0xfb   : > { %17178 = vmatmul.mubr.msk.f32.gmra.mrb[38].mxu1 %vm530_vm3, %v23294_v1  ;;  %18394 = vmatmul.mubr.msk.f32.gmra.mrb[64].mxu0 %vm530_vm3, %v23901_v3  ;;  %v29864_v3 = vrot.slane %v22979_v4, 5 }
  0xfc   : > { %17180 = vmatprep.mubr.msk.f32.mxu1 %vm22840_vm1, %v30171_v2  ;;  %18396 = vmatprep.mubr.msk.f32.mxu0 %vm22840_vm1, %v30171_v2 }
  0xff   : > { %17181 = vmatmul.mubr.msk.f32.gmra.mrb[40].mxu1 %vm530_vm3, %v23313_v25  ;;  %18397 = vmatmul.mubr.msk.f32.gmra.mrb[66].mxu0 %vm530_vm3, %v23917_v24  ;;  %v23940_v24 = vsel %vm2419_vm5, %v29864_v3, %v2423_v30  ;;  %v23954_v3 = vsel %vm2419_vm5, %v2423_v30, %v2425_v5  ;;  %v23969_v30 = vsel %vm2419_vm5, %v2425_v5, %v2427_v10  ;;  %v2431_v5 = vrot.slane %v23042_v26, 5 }
 0x100   : > { %17183 = vmatprep.mubr.msk.f32.mxu1 %vm22840_vm1, %v30171_v2  ;;  %18399 = vmatprep.mubr.msk.f32.mxu0 %vm22840_vm1, %v30171_v2  ;;  %30309 = vst [vmem:[#allocation100_spill] sm:$0xff] %v23940_v24  ;;  %30310 = vst [vmem:[#allocation101_spill] sm:$0xff] %v23954_v3 }
 0x101   : > { %30311 = vst [vmem:[#allocation102_spill] sm:$0xff] %v23969_v30  ;;  %v23993_v21 = vsel %vm2419_vm5, %v2429_v14, %v2431_v5 }
 0x102   : > { %30313 = vst [vmem:[#allocation104_spill] sm:$0xff] %v23993_v21 }
 0x103   : > { %17184 = vmatmul.mubr.msk.f32.gmra.mrb[42].mxu1 %vm530_vm3, %v23332_v8  ;;  %18400 = vmatmul.mubr.msk.f32.gmra.mrb[68].mxu0 %vm530_vm3, %v23904_v19  ;;  %v24096_v19 = vld [vmem:[%s22973_s24 + $0x8] sm:$0xff] }
 0x104   : > { %17186 = vmatprep.mubr.msk.f32.mxu1 %vm22840_vm1, %v30171_v2  ;;  %18404 = vmatprep.mubr.msk.f32.mxu0 %vm22840_vm1, %v30171_v2 }
 0x107   : > { %17187 = vmatmul.mubr.msk.f32.gmra.mrb[44].mxu1 %vm530_vm3, %v23351_v6  ;;  %18405 = vmatmul.mubr.msk.f32.vlgmr.msra.gmra.mrb[0].mxu0 %vm530_vm3, %v23940_v24  ;;  %v24562_v24 = vld [vmem:[%s22973_s24 + $0xc8] sm:$0xff] }
 0x108   : > { %18510 = vmatpush3.msk.msra.mxu0 %vm601_vm0, %v14854_v43  ;;  %17189 = vmatprep.mubr.msk.f32.mxu1 %vm22840_vm1, %v30171_v2  ;;  %v23981_v43 = vsel %vm2419_vm5, %v2427_v10, %v2429_v14  ;;  %v2433_v10 = vrot.slane %v23064_v32, 5  ;;  %v2435_v14 = vrot.slane %v23085_v37, 5  ;;  %v1210_v58 = vrot.slane %v24562_v24, 2 }
 0x109   : > { %18407 = vmatprep.mubr.msk.f32.mxu0 %vm22840_vm1, %v30171_v2  ;;  %18616 = vmatprep.subr.mxu0 %v30171_v2  ;;  %30312 = vst [vmem:[#allocation103_spill] sm:$0xff] %v23981_v43 }
 0x10a   : > { %v24005_v26 = vsel %vm2419_vm5, %v2431_v5, %v2433_v10  ;;  %v24017_v32 = vsel %vm2419_vm5, %v2433_v10, %v2435_v14  ;;  %v2437_v5 = vrot.slane %v23104_v42, 5  ;;  %v2439_v10 = vrot.slane %v23123_v47, 5 }
 0x10b   : > { %17190 = vmatmul.mubr.msk.f32.gmra.mrb[46].mxu1 %vm530_vm3, %v23370_v60  ;;  %18408 = vmatmul.mubr.msk.f32.gmra.mrb[2].mxu0 %vm530_vm3, %v23954_v3  ;;  %30314 = vst [vmem:[#allocation105_spill] sm:$0xff] %v24005_v26  ;;  %30315 = vst [vmem:[#allocation106_spill] sm:$0xff] %v24017_v32  ;;  %v14891_v3 = vld [vmem:[%s29719_s1 + $0x3c] sm:$0xf] }
 0x10c   : > { %17192 = vmatprep.mubr.msk.f32.mxu1 %vm22840_vm1, %v30171_v2  ;;  %18410 = vmatprep.mubr.msk.f32.mxu0 %vm22840_vm1, %v30171_v2  ;;  %v24029_v37 = vsel %vm2419_vm5, %v2435_v14, %v2437_v5  ;;  %v24041_v42 = vsel %vm2419_vm5, %v2437_v5, %v2439_v10  ;;  %v2441_v14 = vrot.slane %v23142_v52, 5  ;;  %v2443_v5 = vrot.slane %v23161_v57, 5 }
 0x10d   : > { %30316 = vst [vmem:[#allocation107_spill] sm:$0xff] %v24029_v37  ;;  %30317 = vst [vmem:[#allocation108_spill] sm:$0xff] %v24041_v42 }
 0x10e   : > { %v24053_v47 = vsel %vm2419_vm5, %v2439_v10, %v2441_v14  ;;  %v24065_v52 = vsel %vm2419_vm5, %v2441_v14, %v2443_v5  ;;  %v2445_v10 = vrot.slane %v23180_v62, 5  ;;  %v2447_v14 = vrot.slane %v23199_v7, 5 }
 0x10f   : > { %17193 = vmatmul.mubr.msk.f32.gmra.mrb[48].mxu1 %vm530_vm3, %v23408_v63  ;;  %18411 = vmatmul.mubr.msk.f32.gmra.mrb[4].mxu0 %vm530_vm3, %v23969_v30  ;;  %30318 = vst [vmem:[#allocation109_spill] sm:$0xff] %v24053_v47  ;;  %30319 = vst [vmem:[#allocation110_spill] sm:$0xff] %v24065_v52  ;;  %v24541_v30 = vld [vmem:[%s22973_s24 + $0xc0] sm:$0xff] }
 0x110   : > { %17195 = vmatprep.mubr.msk.f32.mxu1 %vm22840_vm1, %v30171_v2  ;;  %18413 = vmatprep.mubr.msk.f32.mxu0 %vm22840_vm1, %v30171_v2  ;;  %v24077_v57 = vsel %vm2419_vm5, %v2443_v5, %v2445_v10  ;;  %v24089_v62 = vsel %vm2419_vm5, %v2445_v10, %v2447_v14  ;;  %v24092_v5 = vld [vmem:[%s22973_s24] sm:$0xff] }
 0x111   : > { %30320 = vst [vmem:[#allocation111_spill] sm:$0xff] %v24077_v57  ;;  %30321 = vst [vmem:[#allocation112_spill] sm:$0xff] %v24089_v62  ;;  %v1161_v7 = vrot.slane %v24092_v5, 2 }
 0x113   : > { %17196 = vmatmul.mubr.msk.f32.gmra.mrb[50].mxu1 %vm530_vm3, %v23432_v53  ;;  %18414 = vmatmul.mubr.msk.f32.gmra.mrb[6].mxu0 %vm530_vm3, %v23981_v43  ;;  %v29974_v43 = vrot.slane %v24096_v19, 6 }
 0x114   : > { %17198 = vmatprep.mubr.msk.f32.mxu1 %vm22840_vm1, %v30171_v2  ;;  %18416 = vmatprep.mubr.msk.f32.mxu0 %vm22840_vm1, %v30171_v2 }
 0x117   : > { %17199 = vmatmul.mubr.msk.f32.gmra.mrb[52].mxu1 %vm530_vm3, %v23452_v41  ;;  %18417 = vmatmul.mubr.msk.f32.gmra.mrb[8].mxu0 %vm530_vm3, %v23993_v21  ;;  %v24504_v21 = vld [vmem:[%s22973_s24 + $0xb0] sm:$0xff] }
 0x118   : > { %17201 = vmatprep.mubr.msk.f32.mxu1 %vm22840_vm1, %v30171_v2  ;;  %18419 = vmatprep.mubr.msk.f32.mxu0 %vm22840_vm1, %v30171_v2 }
 0x11b   : > { %17202 = vmatmul.mubr.msk.f32.gmra.mrb[54].mxu1 %vm530_vm3, %v23472_v38  ;;  %18420 = vmatmul.mubr.msk.f32.gmra.mrb[10].mxu0 %vm530_vm3, %v24005_v26 }
 0x11c   : > { %17204 = vmatprep.mubr.msk.f32.mxu1 %vm22840_vm1, %v30171_v2  ;;  %18422 = vmatprep.mubr.msk.f32.mxu0 %vm22840_vm1, %v30171_v2 }
 0x11f   : > { %17205 = vmatmul.mubr.msk.f32.gmra.mrb[56].mxu1 %vm530_vm3, %v23491_v28  ;;  %18423 = vmatmul.mubr.msk.f32.gmra.mrb[12].mxu0 %vm530_vm3, %v24017_v32 }
 0x120   : > { %17207 = vmatprep.mubr.msk.f32.mxu1 %vm22840_vm1, %v30171_v2  ;;  %18425 = vmatprep.mubr.msk.f32.mxu0 %vm22840_vm1, %v30171_v2 }
 0x123   : > { %17208 = vmatmul.mubr.msk.f32.gmra.mrb[58].mxu1 %vm530_vm3, %v23510_v9  ;;  %18426 = vmatmul.mubr.msk.f32.gmra.mrb[14].mxu0 %vm530_vm3, %v24029_v37  ;;  %v2451_v37 = vrot.slane %v23237_v27, 5 }
 0x124   : > { %17210 = vmatprep.mubr.msk.f32.mxu1 %vm22840_vm1, %v30171_v2  ;;  %18428 = vmatprep.mubr.msk.f32.mxu0 %vm22840_vm1, %v30171_v2 }
 0x127   : > { %17211 = vmatmul.mubr.msk.f32.gmra.mrb[60].mxu1 %vm530_vm3, %v23529_v46  ;;  %18429 = vmatmul.mubr.msk.f32.gmra.mrb[16].mxu0 %vm530_vm3, %v24041_v42 }
 0x128   : > { %17213 = vmatprep.mubr.msk.f32.mxu1 %vm22840_vm1, %v30171_v2  ;;  %18431 = vmatprep.mubr.msk.f32.mxu0 %vm22840_vm1, %v30171_v2 }
 0x12b   : > { %17214 = vmatmul.mubr.msk.f32.gmra.mrb[62].mxu1 %vm530_vm3, %v23548_v55  ;;  %18432 = vmatmul.mubr.msk.f32.gmra.mrb[18].mxu0 %vm530_vm3, %v24053_v47 }
 0x12c   : > { %17216 = vmatprep.mubr.msk.f32.mxu1 %vm22840_vm1, %v30171_v2  ;;  %18434 = vmatprep.mubr.msk.f32.mxu0 %vm22840_vm1, %v30171_v2 }
 0x12f   : > { %17217 = vmatmul.mubr.msk.f32.gmra.mrb[64].mxu1 %vm530_vm3, %v23567_v35  ;;  %18435 = vmatmul.mubr.msk.f32.gmra.mrb[20].mxu0 %vm530_vm3, %v24065_v52  ;;  %v1162_v52 = vrot.slane %v24096_v19, 2 }
 0x130   : > { %17219 = vmatprep.mubr.msk.f32.mxu1 %vm22840_vm1, %v30171_v2  ;;  %18437 = vmatprep.mubr.msk.f32.mxu0 %vm22840_vm1, %v30171_v2 }
 0x131   : > { %v1163_v10 = vsel %vm1160_vm6, %v1161_v7, %v1162_v52 }
 0x133   : > { %17220 = vmatmul.mubr.msk.f32.gmra.mrb[66].mxu1 %vm530_vm3, %v23586_v50  ;;  %18438 = vmatmul.mubr.msk.f32.gmra.mrb[22].mxu0 %vm530_vm3, %v24077_v57  ;;  %v2449_v57 = vrot.slane %v23218_v15, 5  ;;  %v24113_v15 = vld [vmem:[%s22973_s24 + $0x10] sm:$0xff] }
 0x134   : > { %17222 = vmatprep.mubr.msk.f32.mxu1 %vm22840_vm1, %v30171_v2  ;;  %18440 = vmatprep.mubr.msk.f32.mxu0 %vm22840_vm1, %v30171_v2  ;;  %v1164_v42 = vrot.slane %v24113_v15, 2 }
 0x135   : > { %v24110_v47 = vsel %vm2419_vm5, %v2447_v14, %v2449_v57  ;;  %v24128_v7 = vsel %vm2419_vm5, %v2449_v57, %v2451_v37 }
 0x136   : > { %30322 = vst [vmem:[#allocation113_spill] sm:$0xff] %v24110_v47  ;;  %v24125_v14 = vsel %vm1160_vm6, %v1162_v52, %v1164_v42  ;;  %30324 = vst [vmem:[#allocation115_spill] sm:$0xff] %v24128_v7 }
 0x137   : > { %17223 = vmatmul.mubr.msk.f32.gmra.mrb[68].mxu1 %vm530_vm3, %v23605_v17  ;;  %18441 = vmatmul.mubr.msk.f32.gmra.mrb[24].mxu0 %vm530_vm3, %v24089_v62  ;;  %30323 = vst [vmem:[#allocation114_spill] sm:$0xff] %v24125_v14  ;;  %v24131_v62 = vld [vmem:[%s22973_s24 + $0x18] sm:$0xff] }
 0x138   : > { %17227 = vmatprep.mubr.msk.f32.mxu1 %vm22840_vm1, %v30171_v2  ;;  %18443 = vmatprep.mubr.msk.f32.mxu0 %vm22840_vm1, %v30171_v2  ;;  %v1166_v27 = vrot.slane %v24131_v62, 2 }
 0x13a   : > { %v24144_v52 = vsel %vm1160_vm6, %v1164_v42, %v1166_v27  ;;  %v14447_v42 = vld [vmem:[%s29719_s1 + $0xc] sm:$0xf] }
 0x13b   : > { %17228 = vmatmul.mubr.msk.f32.vlgmr.msra.gmra.mrb[0].mxu1 %vm530_vm3, %v1163_v10  ;;  %18444 = vmatmul.mubr.msk.f32.gmra.mrb[26].mxu0 %vm530_vm3, %v24110_v47  ;;  %v2453_v10 = vrot.slane %v23256_v40, 5  ;;  %30325 = vst [vmem:[#allocation116_spill] sm:$0xff] %v24144_v52  ;;  %v24150_v40 = vld [vmem:[%s22973_s24 + $0x20] sm:$0xff]  ;;  %v2455_v47 = vrot.slane %v23275_v51, 5 }
 0x13c   : > { %17230 = vmatprep.mubr.msk.f32.mxu1 %vm22840_vm1, %v30171_v2  ;;  %18446 = vmatprep.mubr.msk.f32.mxu0 %vm22840_vm1, %v30171_v2 }
 0x13d   : > { %v24147_v57 = vsel %vm2419_vm5, %v2451_v37, %v2453_v10  ;;  %v24169_v51 = vsel %vm2419_vm5, %v2453_v10, %v2455_v47  ;;  %17333 = vmatpush3.msk.msra.mxu1 %vm601_vm0, %v14447_v42  ;;  %v24193_v10 = vld [vmem:[%s22973_s24 + $0x30] sm:$0xff] }
 0x13e   : > { %30326 = vst [vmem:[#allocation117_spill] sm:$0xff] %v24147_v57  ;;  %30328 = vst [vmem:[#allocation119_spill] sm:$0xff] %v24169_v51  ;;  %17439 = vmatprep.subr.mxu1 %v30171_v2  ;;  %v1172_v42 = vrot.slane %v24193_v10, 2 }
 0x13f   : > { %17231 = vmatmul.mubr.msk.f32.gmra.mrb[2].mxu1 %vm530_vm3, %v24125_v14  ;;  %18447 = vmatmul.mubr.msk.f32.gmra.mrb[28].mxu0 %vm530_vm3, %v24128_v7  ;;  %v1168_v14 = vrot.slane %v24150_v40, 2  ;;  %v2457_v7 = vrot.slane %v23294_v1, 5 }
 0x140   : > { %17233 = vmatprep.mubr.msk.f32.mxu1 %vm22840_vm1, %v30171_v2  ;;  %18449 = vmatprep.mubr.msk.f32.mxu0 %vm22840_vm1, %v30171_v2 }
 0x141   : > { %v24166_v37 = vsel %vm1160_vm6, %v1166_v27, %v1168_v14  ;;  %v24190_v1 = vsel %vm2419_vm5, %v2455_v47, %v2457_v7 }
 0x142   : > { %30327 = vst [vmem:[#allocation118_spill] sm:$0xff] %v24166_v37  ;;  %30330 = vst [vmem:[#allocation121_spill] sm:$0xff] %v24190_v1 }
 0x143   : > { %17234 = vmatmul.mubr.msk.f32.gmra.mrb[4].mxu1 %vm530_vm3, %v24144_v52  ;;  %18450 = vmatmul.mubr.msk.f32.gmra.mrb[30].mxu0 %vm530_vm3, %v24147_v57  ;;  %v24172_v52 = vld [vmem:[%s22973_s24 + $0x28] sm:$0xff] }
 0x144   : > { %17236 = vmatprep.mubr.msk.f32.mxu1 %vm22840_vm1, %v30171_v2  ;;  %18452 = vmatprep.mubr.msk.f32.mxu0 %vm22840_vm1, %v30171_v2  ;;  %v1170_v57 = vrot.slane %v24172_v52, 2 }
 0x146   : > { %v24187_v27 = vsel %vm1160_vm6, %v1168_v14, %v1170_v57  ;;  %v24206_v47 = vsel %vm1160_vm6, %v1170_v57, %v1172_v42 }
 0x147   : > { %17237 = vmatmul.mubr.msk.f32.gmra.mrb[6].mxu1 %vm530_vm3, %v24166_v37  ;;  %18453 = vmatmul.mubr.msk.f32.gmra.mrb[32].mxu0 %vm530_vm3, %v24169_v51  ;;  %30329 = vst [vmem:[#allocation120_spill] sm:$0xff] %v24187_v27  ;;  %v2459_v37 = vrot.slane %v23313_v25, 5  ;;  %30331 = vst [vmem:[#allocation122_spill] sm:$0xff] %v24206_v47  ;;  %v24212_v25 = vld [vmem:[%s22973_s24 + $0x38] sm:$0xff] }
 0x148   : > { %17239 = vmatprep.mubr.msk.f32.mxu1 %vm22840_vm1, %v30171_v2  ;;  %18455 = vmatprep.mubr.msk.f32.mxu0 %vm22840_vm1, %v30171_v2  ;;  %v1174_v51 = vrot.slane %v24212_v25, 2 }
 0x149   : > { %v24209_v14 = vsel %vm2419_vm5, %v2457_v7, %v2459_v37 }
 0x14a   : > { %30332 = vst [vmem:[#allocation123_spill] sm:$0xff] %v24209_v14  ;;  %v24225_v7 = vsel %vm1160_vm6, %v1172_v42, %v1174_v51 }
 0x14b   : > { %17240 = vmatmul.mubr.msk.f32.gmra.mrb[8].mxu1 %vm530_vm3, %v24187_v27  ;;  %18456 = vmatmul.mubr.msk.f32.gmra.mrb[34].mxu0 %vm530_vm3, %v24190_v1  ;;  %v2461_v27 = vrot.slane %v23332_v8, 5  ;;  %30333 = vst [vmem:[#allocation124_spill] sm:$0xff] %v24225_v7  ;;  %v24231_v8 = vld [vmem:[%s22973_s24 + $0x40] sm:$0xff] }
 0x14c   : > { %17242 = vmatprep.mubr.msk.f32.mxu1 %vm22840_vm1, %v30171_v2  ;;  %18458 = vmatprep.mubr.msk.f32.mxu0 %vm22840_vm1, %v30171_v2  ;;  %30335 = vst [vmem:[#allocation126_spill] sm:$0xff] %v24231_v8  ;;  %v1176_v1 = vrot.slane %v24231_v8, 2 }
 0x14d   : > { %v24228_v57 = vsel %vm2419_vm5, %v2459_v37, %v2461_v27 }
 0x14e   : > { %30334 = vst [vmem:[#allocation125_spill] sm:$0xff] %v24228_v57  ;;  %v24244_v37 = vsel %vm1160_vm6, %v1174_v51, %v1176_v1 }
 0x14f   : > { %17243 = vmatmul.mubr.msk.f32.gmra.mrb[10].mxu1 %vm530_vm3, %v24206_v47  ;;  %18459 = vmatmul.mubr.msk.f32.gmra.mrb[36].mxu0 %vm530_vm3, %v24209_v14  ;;  %v2463_v47 = vrot.slane %v23351_v6, 5  ;;  %30336 = vst [vmem:[#allocation127_spill] sm:$0xff] %v24244_v37  ;;  %v24250_v6 = vld [vmem:[%s22973_s24 + $0x48] sm:$0xff] }
 0x150   : > { %17245 = vmatprep.mubr.msk.f32.mxu1 %vm22840_vm1, %v30171_v2  ;;  %18461 = vmatprep.mubr.msk.f32.mxu0 %vm22840_vm1, %v30171_v2  ;;  %30338 = vst [vmem:[#allocation129_spill] sm:$0xff] %v24250_v6  ;;  %v1178_v14 = vrot.slane %v24250_v6, 2 }
 0x151   : > { %v24247_v42 = vsel %vm2419_vm5, %v2461_v27, %v2463_v47 }
 0x152   : > { %30337 = vst [vmem:[#allocation128_spill] sm:$0xff] %v24247_v42  ;;  %v24263_v51 = vsel %vm1160_vm6, %v1176_v1, %v1178_v14 }
 0x153   : > { %17246 = vmatmul.mubr.msk.f32.gmra.mrb[12].mxu1 %vm530_vm3, %v24225_v7  ;;  %18462 = vmatmul.mubr.msk.f32.gmra.mrb[38].mxu0 %vm530_vm3, %v24228_v57  ;;  %v2465_v7 = vrot.slane %v23370_v60, 5  ;;  %30339 = vst [vmem:[#allocation130_spill] sm:$0xff] %v24263_v51  ;;  %v24269_v57 = vld [vmem:[%s22973_s24 + $0x50] sm:$0xff] }
 0x154   : > { %17248 = vmatprep.mubr.msk.f32.mxu1 %vm22840_vm1, %v30171_v2  ;;  %18464 = vmatprep.mubr.msk.f32.mxu0 %vm22840_vm1, %v30171_v2  ;;  %30341 = vst [vmem:[#allocation132_spill] sm:$0xff] %v24269_v57  ;;  %v1180_v32 = vrot.slane %v24269_v57, 2 }
 0x155   : > { %v24266_v27 = vsel %vm2419_vm5, %v2463_v47, %v2465_v7 }
 0x156   : > { %30340 = vst [vmem:[#allocation131_spill] sm:$0xff] %v24266_v27  ;;  %v24282_v1 = vsel %vm1160_vm6, %v1178_v14, %v1180_v32 }
 0x157   : > { %17249 = vmatmul.mubr.msk.f32.gmra.mrb[14].mxu1 %vm530_vm3, %v24244_v37  ;;  %18465 = vmatmul.mubr.msk.f32.gmra.mrb[40].mxu0 %vm530_vm3, %v24247_v42  ;;  %v2467_v37 = vrot.slane %v23408_v63, 5  ;;  %30342 = vst [vmem:[#allocation133_spill] sm:$0xff] %v24282_v1  ;;  %v24288_v63 = vld [vmem:[%s22973_s24 + $0x58] sm:$0xff] }
 0x158   : > { %17251 = vmatprep.mubr.msk.f32.mxu1 %vm22840_vm1, %v30171_v2  ;;  %18467 = vmatprep.mubr.msk.f32.mxu0 %vm22840_vm1, %v30171_v2  ;;  %30344 = vst [vmem:[#allocation135_spill] sm:$0xff] %v24288_v63  ;;  %v1182_v42 = vrot.slane %v24288_v63, 2 }
 0x159   : > { %v24285_v47 = vsel %vm2419_vm5, %v2465_v7, %v2467_v37 }
 0x15a   : > { %30343 = vst [vmem:[#allocation134_spill] sm:$0xff] %v24285_v47  ;;  %v24301_v14 = vsel %vm1160_vm6, %v1180_v32, %v1182_v42 }
 0x15b   : > { %17252 = vmatmul.mubr.msk.f32.gmra.mrb[16].mxu1 %vm530_vm3, %v24263_v51  ;;  %18468 = vmatmul.mubr.msk.f32.gmra.mrb[42].mxu0 %vm530_vm3, %v24266_v27  ;;  %v2469_v51 = vrot.slane %v23432_v53, 5  ;;  %30345 = vst [vmem:[#allocation136_spill] sm:$0xff] %v24301_v14  ;;  %v24307_v53 = vld [vmem:[%s22973_s24 + $0x60] sm:$0xff] }
 0x15c   : > { %17254 = vmatprep.mubr.msk.f32.mxu1 %vm22840_vm1, %v30171_v2  ;;  %18470 = vmatprep.mubr.msk.f32.mxu0 %vm22840_vm1, %v30171_v2  ;;  %v1184_v27 = vrot.slane %v24307_v53, 2 }
 0x15d   : > { %v24304_v7 = vsel %vm2419_vm5, %v2467_v37, %v2469_v51 }
 0x15e   : > { %30346 = vst [vmem:[#allocation137_spill] sm:$0xff] %v24304_v7  ;;  %v24320_v32 = vsel %vm1160_vm6, %v1182_v42, %v1184_v27 }
 0x15f   : > { %17255 = vmatmul.mubr.msk.f32.gmra.mrb[18].mxu1 %vm530_vm3, %v24282_v1  ;;  %18471 = vmatmul.mubr.msk.f32.gmra.mrb[44].mxu0 %vm530_vm3, %v24285_v47  ;;  %v2471_v1 = vrot.slane %v23452_v41, 5  ;;  %30347 = vst [vmem:[#allocation138_spill] sm:$0xff] %v24320_v32  ;;  %v24326_v41 = vld [vmem:[%s22973_s24 + $0x68] sm:$0xff] }
 0x160   : > { %17257 = vmatprep.mubr.msk.f32.mxu1 %vm22840_vm1, %v30171_v2  ;;  %18473 = vmatprep.mubr.msk.f32.mxu0 %vm22840_vm1, %v30171_v2  ;;  %v1186_v47 = vrot.slane %v24326_v41, 2 }
 0x161   : > { %v24323_v37 = vsel %vm2419_vm5, %v2469_v51, %v2471_v1 }
 0x162   : > { %30348 = vst [vmem:[#allocation139_spill] sm:$0xff] %v24323_v37  ;;  %v24339_v42 = vsel %vm1160_vm6, %v1184_v27, %v1186_v47 }
 0x163   : > { %17258 = vmatmul.mubr.msk.f32.gmra.mrb[20].mxu1 %vm530_vm3, %v24301_v14  ;;  %18474 = vmatmul.mubr.msk.f32.gmra.mrb[46].mxu0 %vm530_vm3, %v24304_v7  ;;  %v2473_v14 = vrot.slane %v23472_v38, 5  ;;  %30349 = vst [vmem:[#allocation140_spill] sm:$0xff] %v24339_v42  ;;  %v24345_v38 = vld [vmem:[%s22973_s24 + $0x70] sm:$0xff] }
 0x164   : > { %17260 = vmatprep.mubr.msk.f32.mxu1 %vm22840_vm1, %v30171_v2  ;;  %18476 = vmatprep.mubr.msk.f32.mxu0 %vm22840_vm1, %v30171_v2  ;;  %v1188_v7 = vrot.slane %v24345_v38, 2 }
 0x165   : > { %v24342_v51 = vsel %vm2419_vm5, %v2471_v1, %v2473_v14 }
 0x166   : > { %30350 = vst [vmem:[#allocation141_spill] sm:$0xff] %v24342_v51  ;;  %v24358_v27 = vsel %vm1160_vm6, %v1186_v47, %v1188_v7 }
 0x167   : > { %17261 = vmatmul.mubr.msk.f32.gmra.mrb[22].mxu1 %vm530_vm3, %v24320_v32  ;;  %18477 = vmatmul.mubr.msk.f32.gmra.mrb[48].mxu0 %vm530_vm3, %v24323_v37  ;;  %v2475_v32 = vrot.slane %v23491_v28, 5  ;;  %30351 = vst [vmem:[#allocation142_spill] sm:$0xff] %v24358_v27  ;;  %v24364_v28 = vld [vmem:[%s22973_s24 + $0x78] sm:$0xff] }
 0x168   : > { %17263 = vmatprep.mubr.msk.f32.mxu1 %vm22840_vm1, %v30171_v2  ;;  %18479 = vmatprep.mubr.msk.f32.mxu0 %vm22840_vm1, %v30171_v2  ;;  %v1190_v37 = vrot.slane %v24364_v28, 2 }
 0x169   : > { %v24361_v1 = vsel %vm2419_vm5, %v2473_v14, %v2475_v32 }
 0x16a   : > { %30352 = vst [vmem:[#allocation143_spill] sm:$0xff] %v24361_v1  ;;  %v24377_v47 = vsel %vm1160_vm6, %v1188_v7, %v1190_v37 }
 0x16b   : > { %17264 = vmatmul.mubr.msk.f32.gmra.mrb[24].mxu1 %vm530_vm3, %v24339_v42  ;;  %18480 = vmatmul.mubr.msk.f32.gmra.mrb[50].mxu0 %vm530_vm3, %v24342_v51  ;;  %v2477_v42 = vrot.slane %v23510_v9, 5  ;;  %30353 = vst [vmem:[#allocation144_spill] sm:$0xff] %v24377_v47  ;;  %v24383_v9 = vld [vmem:[%s22973_s24 + $0x80] sm:$0xff] }
 0x16c   : > { %17266 = vmatprep.mubr.msk.f32.mxu1 %vm22840_vm1, %v30171_v2  ;;  %18482 = vmatprep.mubr.msk.f32.mxu0 %vm22840_vm1, %v30171_v2  ;;  %v1192_v51 = vrot.slane %v24383_v9, 2 }
 0x16d   : > { %v24380_v14 = vsel %vm2419_vm5, %v2475_v32, %v2477_v42 }
 0x16e   : > { %30354 = vst [vmem:[#allocation145_spill] sm:$0xff] %v24380_v14  ;;  %v24396_v7 = vsel %vm1160_vm6, %v1190_v37, %v1192_v51 }
 0x16f   : > { %17267 = vmatmul.mubr.msk.f32.gmra.mrb[26].mxu1 %vm530_vm3, %v24358_v27  ;;  %18483 = vmatmul.mubr.msk.f32.gmra.mrb[52].mxu0 %vm530_vm3, %v24361_v1  ;;  %v2479_v27 = vrot.slane %v23529_v46, 5  ;;  %30355 = vst [vmem:[#allocation146_spill] sm:$0xff] %v24396_v7  ;;  %v24402_v46 = vld [vmem:[%s22973_s24 + $0x88] sm:$0xff] }
 0x170   : > { %17269 = vmatprep.mubr.msk.f32.mxu1 %vm22840_vm1, %v30171_v2  ;;  %18485 = vmatprep.mubr.msk.f32.mxu0 %vm22840_vm1, %v30171_v2  ;;  %v1194_v1 = vrot.slane %v24402_v46, 2 }
 0x171   : > { %v24399_v32 = vsel %vm2419_vm5, %v2477_v42, %v2479_v27 }
 0x172   : > { %30356 = vst [vmem:[#allocation147_spill] sm:$0xff] %v24399_v32  ;;  %v24415_v37 = vsel %vm1160_vm6, %v1192_v51, %v1194_v1 }
 0x173   : > { %17270 = vmatmul.mubr.msk.f32.gmra.mrb[28].mxu1 %vm530_vm3, %v24377_v47  ;;  %18486 = vmatmul.mubr.msk.f32.gmra.mrb[54].mxu0 %vm530_vm3, %v24380_v14  ;;  %v2481_v47 = vrot.slane %v23548_v55, 5  ;;  %30357 = vst [vmem:[#allocation148_spill] sm:$0xff] %v24415_v37  ;;  %v24421_v55 = vld [vmem:[%s22973_s24 + $0x90] sm:$0xff] }
 0x174   : > { %17272 = vmatprep.mubr.msk.f32.mxu1 %vm22840_vm1, %v30171_v2  ;;  %18488 = vmatprep.mubr.msk.f32.mxu0 %vm22840_vm1, %v30171_v2  ;;  %v1196_v14 = vrot.slane %v24421_v55, 2 }
 0x175   : > { %v24418_v42 = vsel %vm2419_vm5, %v2479_v27, %v2481_v47 }
 0x176   : > { %30358 = vst [vmem:[#allocation149_spill] sm:$0xff] %v24418_v42  ;;  %v24434_v51 = vsel %vm1160_vm6, %v1194_v1, %v1196_v14 }
 0x177   : > { %17273 = vmatmul.mubr.msk.f32.gmra.mrb[30].mxu1 %vm530_vm3, %v24396_v7  ;;  %18489 = vmatmul.mubr.msk.f32.gmra.mrb[56].mxu0 %vm530_vm3, %v24399_v32  ;;  %v2483_v7 = vrot.slane %v23567_v35, 5  ;;  %30359 = vst [vmem:[#allocation150_spill] sm:$0xff] %v24434_v51  ;;  %v24440_v35 = vld [vmem:[%s22973_s24 + $0x98] sm:$0xff] }
 0x178   : > { %17275 = vmatprep.mubr.msk.f32.mxu1 %vm22840_vm1, %v30171_v2  ;;  %18491 = vmatprep.mubr.msk.f32.mxu0 %vm22840_vm1, %v30171_v2  ;;  %v1198_v32 = vrot.slane %v24440_v35, 2 }
 0x179   : > { %v24437_v27 = vsel %vm2419_vm5, %v2481_v47, %v2483_v7 }
 0x17a   : > { %30360 = vst [vmem:[#allocation151_spill] sm:$0xff] %v24437_v27  ;;  %v24453_v1 = vsel %vm1160_vm6, %v1196_v14, %v1198_v32 }
 0x17b   : > { %17276 = vmatmul.mubr.msk.f32.gmra.mrb[32].mxu1 %vm530_vm3, %v24415_v37  ;;  %18492 = vmatmul.mubr.msk.f32.gmra.mrb[58].mxu0 %vm530_vm3, %v24418_v42  ;;  %v2485_v37 = vrot.slane %v23586_v50, 5  ;;  %30361 = vst [vmem:[#allocation152_spill] sm:$0xff] %v24453_v1  ;;  %v24459_v42 = vld [vmem:[%s22973_s24 + $0xa0] sm:$0xff] }
 0x17c   : > { %17278 = vmatprep.mubr.msk.f32.mxu1 %vm22840_vm1, %v30171_v2  ;;  %18494 = vmatprep.mubr.msk.f32.mxu0 %vm22840_vm1, %v30171_v2  ;;  %v1200_v26 = vrot.slane %v24459_v42, 2 }
 0x17d   : > { %v24456_v47 = vsel %vm2419_vm5, %v2483_v7, %v2485_v37 }
 0x17e   : > { %30362 = vst [vmem:[#allocation153_spill] sm:$0xff] %v24456_v47  ;;  %v24474_v14 = vsel %vm1160_vm6, %v1198_v32, %v1200_v26 }
 0x17f   : > { %17279 = vmatmul.mubr.msk.f32.gmra.mrb[34].mxu1 %vm530_vm3, %v24434_v51  ;;  %18495 = vmatmul.mubr.msk.f32.gmra.mrb[60].mxu0 %vm530_vm3, %v24437_v27  ;;  %v24463_v51 = vrot.slane %v23605_v17, 5  ;;  %30364 = vst [vmem:[#allocation155_spill] sm:$0xff] %v24474_v14  ;;  %v24481_v27 = vld [vmem:[%s22973_s24 + $0xa8] sm:$0xff] }
 0x180   : > { %17281 = vmatprep.mubr.msk.f32.mxu1 %vm22840_vm1, %v30171_v2  ;;  %18497 = vmatprep.mubr.msk.f32.mxu0 %vm22840_vm1, %v30171_v2 }
 0x181   : > { %30363 = vst [vmem:[#allocation154_spill] sm:$0xff] %v24463_v51  ;;  %v24478_v7 = vsel %vm2419_vm5, %v2485_v37, %v24463_v51 }
 0x182   : > { %30365 = vst [vmem:[#allocation156_spill] sm:$0xff] %v24478_v7 }
 0x183   : > { %17282 = vmatmul.mubr.msk.f32.gmra.mrb[36].mxu1 %vm530_vm3, %v24453_v1  ;;  %18498 = vmatmul.mubr.msk.f32.gmra.mrb[62].mxu0 %vm530_vm3, %v24456_v47  ;;  %v1202_v1 = vrot.slane %v24481_v27, 2  ;;  %v24485_v47 = vrot.slane %v23889_v48, 5 }
 0x184   : > { %17284 = vmatprep.mubr.msk.f32.mxu1 %vm22840_vm1, %v30171_v2  ;;  %18500 = vmatprep.mubr.msk.f32.mxu0 %vm22840_vm1, %v30171_v2 }
 0x185   : > { %30366 = vst [vmem:[#allocation157_spill] sm:$0xff] %v24485_v47  ;;  %v24496_v32 = vsel %vm1160_vm6, %v1200_v26, %v1202_v1  ;;  %v24501_v37 = vsel %vm2419_vm5, %v24463_v51, %v24485_v47  ;;  %v24519_v51 = vld [vmem:[%s22973_s24 + $0xb8] sm:$0xff] }
 0x186   : > { %30367 = vst [vmem:[#allocation158_spill] sm:$0xff] %v24496_v32  ;;  %30368 = vst [vmem:[#allocation159_spill] sm:$0xff] %v24501_v37 }
 0x187   : > { %17285 = vmatmul.mubr.msk.f32.gmra.mrb[38].mxu1 %vm530_vm3, %v24474_v14  ;;  %18501 = vmatmul.mubr.msk.f32.gmra.mrb[64].mxu0 %vm530_vm3, %v24478_v7  ;;  %v1204_v14 = vrot.slane %v24504_v21, 2  ;;  %v1206_v7 = vrot.slane %v24519_v51, 2 }
 0x188   : > { %17287 = vmatprep.mubr.msk.f32.mxu1 %vm22840_vm1, %v30171_v2  ;;  %18503 = vmatprep.mubr.msk.f32.mxu0 %vm22840_vm1, %v30171_v2 }
 0x189   : > { %v24516_v26 = vsel %vm1160_vm6, %v1202_v1, %v1204_v14  ;;  %v24533_v1 = vsel %vm1160_vm6, %v1204_v14, %v1206_v7 }
 0x18a   : > { %30369 = vst [vmem:[#allocation160_spill] sm:$0xff] %v24516_v26  ;;  %30370 = vst [vmem:[#allocation161_spill] sm:$0xff] %v24533_v1 }
 0x18b   : > { %17288 = vmatmul.mubr.msk.f32.gmra.mrb[40].mxu1 %vm530_vm3, %v24496_v32  ;;  %18504 = vmatmul.mubr.msk.f32.gmra.mrb[66].mxu0 %vm530_vm3, %v24501_v37  ;;  %v2843_v32 = vrot.slane %v24113_v15, 6 }
 0x18c   : > { %17290 = vmatprep.mubr.msk.f32.mxu1 %vm22840_vm1, %v30171_v2  ;;  %18506 = vmatprep.mubr.msk.f32.mxu0 %vm22840_vm1, %v30171_v2 }
 0x18d   : > { %v24538_v37 = vsel %vm2839_vm7, %v29974_v43, %v2843_v32 }
 0x18e   : > { %30371 = vst [vmem:[#allocation162_spill] sm:$0xff] %v24538_v37 }
 0x18f   : > { %17291 = vmatmul.mubr.msk.f32.gmra.mrb[42].mxu1 %vm530_vm3, %v24516_v26  ;;  %18507 = vmatmul.mubr.msk.f32.gmra.mrb[68].mxu0 %vm530_vm3, %v24485_v47  ;;  %v1208_v26 = vrot.slane %v24541_v30, 2  ;;  %v2845_v47 = vrot.slane %v24131_v62, 6 }
 0x190   : > { %17293 = vmatprep.mubr.msk.f32.mxu1 %vm22840_vm1, %v30171_v2  ;;  %18511 = vmatprep.mubr.msk.f32.mxu0 %vm22840_vm1, %v30171_v2 }
 0x191   : > { %v24556_v14 = vsel %vm1160_vm6, %v1206_v7, %v1208_v26  ;;  %v24559_v43 = vsel %vm2839_vm7, %v2843_v32, %v2845_v47  ;;  %v24584_v32 = vld [vmem:[%s22973_s24 + $0xd0] sm:$0xff] }
 0x192   : > { %30372 = vst [vmem:[#allocation163_spill] sm:$0xff] %v24556_v14  ;;  %30373 = vst [vmem:[#allocation164_spill] sm:$0xff] %v24559_v43 }
 0x193   : > { %17294 = vmatmul.mubr.msk.f32.gmra.mrb[44].mxu1 %vm530_vm3, %v24533_v1  ;;  %18512 = vmatmul.mubr.msk.f32.vlgmr.msra.gmra.mrb[0].mxu0 %vm530_vm3, %v24538_v37  ;;  %v2847_v1 = vrot.slane %v24150_v40, 6  ;;  %v1212_v37 = vrot.slane %v24584_v32, 2 }
 0x194   : > { %18617 = vmatpush3.msk.msra.mxu0 %vm601_vm0, %v14891_v3  ;;  %17296 = vmatprep.mubr.msk.f32.mxu1 %vm22840_vm1, %v30171_v2  ;;  %v24578_v3 = vsel %vm1160_vm6, %v1208_v26, %v1210_v58 }
 0x195   : > { %18514 = vmatprep.mubr.msk.f32.mxu0 %vm22840_vm1, %v30171_v2  ;;  %18723 = vmatprep.subr.mxu0 %v30171_v2  ;;  %30374 = vst [vmem:[#allocation165_spill] sm:$0xff] %v24578_v3  ;;  %v24581_v7 = vsel %vm2839_vm7, %v2845_v47, %v2847_v1  ;;  %v24597_v47 = vsel %vm1160_vm6, %v1210_v58, %v1212_v37 }
 0x196   : > { %30375 = vst [vmem:[#allocation166_spill] sm:$0xff] %v24581_v7  ;;  %30376 = vst [vmem:[#allocation167_spill] sm:$0xff] %v24597_v47 }
 0x197   : > { %17297 = vmatmul.mubr.msk.f32.gmra.mrb[46].mxu1 %vm530_vm3, %v24556_v14  ;;  %18515 = vmatmul.mubr.msk.f32.gmra.mrb[2].mxu0 %vm530_vm3, %v24559_v43  ;;  %v2849_v14 = vrot.slane %v24172_v52, 6  ;;  %v24603_v43 = vld [vmem:[%s22973_s24 + $0xd8] sm:$0xff] }
 0x198   : > { %17299 = vmatprep.mubr.msk.f32.mxu1 %vm22840_vm1, %v30171_v2  ;;  %18517 = vmatprep.mubr.msk.f32.mxu0 %vm22840_vm1, %v30171_v2  ;;  %v1214_v13 = vrot.slane %v24603_v43, 2 }
 0x199   : > { %v24600_v26 = vsel %vm2839_vm7, %v2847_v1, %v2849_v14 }
 0x19a   : > { %30377 = vst [vmem:[#allocation168_spill] sm:$0xff] %v24600_v26  ;;  %v24616_v58 = vsel %vm1160_vm6, %v1212_v37, %v1214_v13 }
 0x19b   : > { %17300 = vmatmul.mubr.msk.f32.gmra.mrb[48].mxu1 %vm530_vm3, %v24578_v3  ;;  %18518 = vmatmul.mubr.msk.f32.gmra.mrb[4].mxu0 %vm530_vm3, %v24581_v7  ;;  %v2851_v3 = vrot.slane %v24193_v10, 6  ;;  %30378 = vst [vmem:[#allocation169_spill] sm:$0xff] %v24616_v58  ;;  %v24622_v7 = vld [vmem:[%s22973_s24 + $0xe0] sm:$0xff] }
 0x19c   : > { %17302 = vmatprep.mubr.msk.f32.mxu1 %vm22840_vm1, %v30171_v2  ;;  %18520 = vmatprep.mubr.msk.f32.mxu0 %vm22840_vm1, %v30171_v2  ;;  %v1216_v22 = vrot.slane %v24622_v7, 2 }
 0x19d   : > { %v24619_v1 = vsel %vm2839_vm7, %v2849_v14, %v2851_v3 }
 0x19e   : > { %30379 = vst [vmem:[#allocation170_spill] sm:$0xff] %v24619_v1  ;;  %v24635_v37 = vsel %vm1160_vm6, %v1214_v13, %v1216_v22 }
 0x19f   : > { %17303 = vmatmul.mubr.msk.f32.gmra.mrb[50].mxu1 %vm530_vm3, %v24597_v47  ;;  %18521 = vmatmul.mubr.msk.f32.gmra.mrb[6].mxu0 %vm530_vm3, %v24600_v26  ;;  %v2853_v47 = vrot.slane %v24212_v25, 6  ;;  %30380 = vst [vmem:[#allocation171_spill] sm:$0xff] %v24635_v37  ;;  %v24641_v26 = vld [vmem:[%s22973_s24 + $0xe8] sm:$0xff] }
 0x1a0   : > { %17305 = vmatprep.mubr.msk.f32.mxu1 %vm22840_vm1, %v30171_v2  ;;  %18523 = vmatprep.mubr.msk.f32.mxu0 %vm22840_vm1, %v30171_v2  ;;  %v1218_v33 = vrot.slane %v24641_v26, 2 }
 0x1a1   : > { %v24638_v14 = vsel %vm2839_vm7, %v2851_v3, %v2853_v47 }
 0x1a2   : > { %30381 = vst [vmem:[#allocation172_spill] sm:$0xff] %v24638_v14  ;;  %v24654_v13 = vsel %vm1160_vm6, %v1216_v22, %v1218_v33 }
 0x1a3   : > { %17306 = vmatmul.mubr.msk.f32.gmra.mrb[52].mxu1 %vm530_vm3, %v24616_v58  ;;  %18524 = vmatmul.mubr.msk.f32.gmra.mrb[8].mxu0 %vm530_vm3, %v24619_v1  ;;  %v2855_v58 = vrot.slane %v24231_v8, 6  ;;  %30382 = vst [vmem:[#allocation173_spill] sm:$0xff] %v24654_v13  ;;  %v24660_v1 = vld [vmem:[%s22973_s24 + $0xf0] sm:$0xff] }
 0x1a4   : > { %17308 = vmatprep.mubr.msk.f32.mxu1 %vm22840_vm1, %v30171_v2  ;;  %18526 = vmatprep.mubr.msk.f32.mxu0 %vm22840_vm1, %v30171_v2  ;;  %v1220_v8 = vrot.slane %v24660_v1, 2 }
 0x1a5   : > { %v24657_v3 = vsel %vm2839_vm7, %v2853_v47, %v2855_v58 }
 0x1a6   : > { %30383 = vst [vmem:[#allocation174_spill] sm:$0xff] %v24657_v3  ;;  %v24673_v22 = vsel %vm1160_vm6, %v1218_v33, %v1220_v8 }
 0x1a7   : > { %17309 = vmatmul.mubr.msk.f32.gmra.mrb[54].mxu1 %vm530_vm3, %v24635_v37  ;;  %18527 = vmatmul.mubr.msk.f32.gmra.mrb[10].mxu0 %vm530_vm3, %v24638_v14  ;;  %v2857_v37 = vrot.slane %v24250_v6, 6  ;;  %30384 = vst [vmem:[#allocation175_spill] sm:$0xff] %v24673_v22  ;;  %v24679_v14 = vld [vmem:[%s22973_s24 + $0xf8] sm:$0xff] }
 0x1a8   : > { %17311 = vmatprep.mubr.msk.f32.mxu1 %vm22840_vm1, %v30171_v2  ;;  %18529 = vmatprep.mubr.msk.f32.mxu0 %vm22840_vm1, %v30171_v2  ;;  %v1222_v6 = vrot.slane %v24679_v14, 2 }
 0x1a9   : > { %v24676_v47 = vsel %vm2839_vm7, %v2855_v58, %v2857_v37 }
 0x1aa   : > { %30385 = vst [vmem:[#allocation176_spill] sm:$0xff] %v24676_v47  ;;  %v24692_v33 = vsel %vm1160_vm6, %v1220_v8, %v1222_v6 }
 0x1ab   : > { %17312 = vmatmul.mubr.msk.f32.gmra.mrb[56].mxu1 %vm530_vm3, %v24654_v13  ;;  %18530 = vmatmul.mubr.msk.f32.gmra.mrb[12].mxu0 %vm530_vm3, %v24657_v3  ;;  %v2859_v13 = vrot.slane %v24269_v57, 6  ;;  %30386 = vst [vmem:[#allocation177_spill] sm:$0xff] %v24692_v33  ;;  %v24698_v3 = vld [vmem:[%s22973_s24 + $0x100] sm:$0xff] }
 0x1ac   : > { %17314 = vmatprep.mubr.msk.f32.mxu1 %vm22840_vm1, %v30171_v2  ;;  %18532 = vmatprep.mubr.msk.f32.mxu0 %vm22840_vm1, %v30171_v2  ;;  %v1224_v57 = vrot.slane %v24698_v3, 2 }
 0x1ad   : > { %v24695_v58 = vsel %vm2839_vm7, %v2857_v37, %v2859_v13 }
 0x1ae   : > { %30387 = vst [vmem:[#allocation178_spill] sm:$0xff] %v24695_v58  ;;  %v24711_v8 = vsel %vm1160_vm6, %v1222_v6, %v1224_v57 }
 0x1af   : > { %17315 = vmatmul.mubr.msk.f32.gmra.mrb[58].mxu1 %vm530_vm3, %v24673_v22  ;;  %18533 = vmatmul.mubr.msk.f32.gmra.mrb[14].mxu0 %vm530_vm3, %v24676_v47  ;;  %v2861_v22 = vrot.slane %v24288_v63, 6  ;;  %30388 = vst [vmem:[#allocation179_spill] sm:$0xff] %v24711_v8  ;;  %v1226_v47 = vrot.slane %v23586_v50, 2  ;;  %v2863_v63 = vrot.slane %v24307_v53, 6  ;;  %v24733_v50 = vrot.slane %v23605_v17, 2 }
 0x1b0   : > { %17317 = vmatprep.mubr.msk.f32.mxu1 %vm22840_vm1, %v30171_v2  ;;  %18535 = vmatprep.mubr.msk.f32.mxu0 %vm22840_vm1, %v30171_v2 }
 0x1b1   : > { %v24714_v37 = vsel %vm2839_vm7, %v2859_v13, %v2861_v22  ;;  %v24727_v6 = vsel %vm1160_vm6, %v1224_v57, %v1226_v47  ;;  %v24730_v13 = vsel %vm2839_vm7, %v2861_v22, %v2863_v63  ;;  %30392 = vst [vmem:[#allocation183_spill] sm:$0xff] %v24733_v50  ;;  %v24746_v57 = vsel %vm1160_vm6, %v1226_v47, %v24733_v50 }
 0x1b2   : > { %30389 = vst [vmem:[#allocation180_spill] sm:$0xff] %v24714_v37  ;;  %30390 = vst [vmem:[#allocation181_spill] sm:$0xff] %v24727_v6  ;;  %v2867_v22 = vrot.slane %v24345_v38, 6 }
 0x1b3   : > { %17318 = vmatmul.mubr.msk.f32.gmra.mrb[60].mxu1 %vm530_vm3, %v24692_v33  ;;  %18536 = vmatmul.mubr.msk.f32.gmra.mrb[16].mxu0 %vm530_vm3, %v24695_v58  ;;  %30391 = vst [vmem:[#allocation182_spill] sm:$0xff] %v24730_v13  ;;  %30393 = vst [vmem:[#allocation184_spill] sm:$0xff] %v24746_v57  ;;  %v2871_v33 = vrot.slane %v24383_v9, 6 }
 0x1b4   : > { %17320 = vmatprep.mubr.msk.f32.mxu1 %vm22840_vm1, %v30171_v2  ;;  %18538 = vmatprep.mubr.msk.f32.mxu0 %vm22840_vm1, %v30171_v2 }
 0x1b7   : > { %17321 = vmatmul.mubr.msk.f32.gmra.mrb[62].mxu1 %vm530_vm3, %v24711_v8  ;;  %18539 = vmatmul.mubr.msk.f32.gmra.mrb[18].mxu0 %vm530_vm3, %v24714_v37  ;;  %v2865_v8 = vrot.slane %v24326_v41, 6 }
 0x1b8   : > { %17323 = vmatprep.mubr.msk.f32.mxu1 %vm22840_vm1, %v30171_v2  ;;  %18541 = vmatprep.mubr.msk.f32.mxu0 %vm22840_vm1, %v30171_v2 }
 0x1b9   : > { %v24749_v17 = vsel %vm2839_vm7, %v2863_v63, %v2865_v8  ;;  %v24761_v47 = vsel %vm2839_vm7, %v2865_v8, %v2867_v22  ;;  %v1581_v63 = vrot.slane %v24092_v5, 3 }
 0x1ba   : > { %30394 = vst [vmem:[#allocation185_spill] sm:$0xff] %v24749_v17  ;;  %30395 = vst [vmem:[#allocation186_spill] sm:$0xff] %v24761_v47 }
 0x1bb   : > { %17324 = vmatmul.mubr.msk.f32.gmra.mrb[64].mxu1 %vm530_vm3, %v24727_v6  ;;  %18542 = vmatmul.mubr.msk.f32.gmra.mrb[20].mxu0 %vm530_vm3, %v24730_v13  ;;  %v2869_v6 = vrot.slane %v24364_v28, 6 }
 0x1bc   : > { %17326 = vmatprep.mubr.msk.f32.mxu1 %vm22840_vm1, %v30171_v2  ;;  %18544 = vmatprep.mubr.msk.f32.mxu0 %vm22840_vm1, %v30171_v2 }
 0x1bd   : > { %v24777_v5 = vsel %vm2839_vm7, %v2867_v22, %v2869_v6 }
 0x1be   : > { %30397 = vst [vmem:[#allocation187_spill] sm:$0xff] %v24777_v5 }
 0x1bf   : > { %17327 = vmatmul.mubr.msk.f32.gmra.mrb[66].mxu1 %vm530_vm3, %v24746_v57  ;;  %18545 = vmatmul.mubr.msk.f32.gmra.mrb[22].mxu0 %vm530_vm3, %v24749_v17  ;;  %v30396_v57 = vrot.slane %v22979_v4, 3 }
 0x1c0   : > { %17329 = vmatprep.mubr.msk.f32.mxu1 %vm22840_vm1, %v30171_v2  ;;  %18547 = vmatprep.mubr.msk.f32.mxu0 %vm22840_vm1, %v30171_v2 }
 0x1c1   : > { %v1583_v8 = vsel %vm1580_vm4, %v1581_v63, %v30396_v57  ;;  %v2873_v57 = vrot.slane %v24402_v46, 6  ;;  %v2877_v63 = vrot.slane %v24440_v35, 6 }
 0x1c3   : > { %17330 = vmatmul.mubr.msk.f32.gmra.mrb[68].mxu1 %vm530_vm3, %v24733_v50  ;;  %18548 = vmatmul.mubr.msk.f32.gmra.mrb[24].mxu0 %vm530_vm3, %v24761_v47  ;;  %v24788_v50 = vsel %vm2839_vm7, %v2869_v6, %v2871_v33  ;;  %v24800_v22 = vsel %vm2839_vm7, %v2871_v33, %v2873_v57  ;;  %v2875_v6 = vrot.slane %v24421_v55, 6 }
 0x1c4   : > { %17334 = vmatprep.mubr.msk.f32.mxu1 %vm22840_vm1, %v30171_v2  ;;  %18550 = vmatprep.mubr.msk.f32.mxu0 %vm22840_vm1, %v30171_v2  ;;  %30398 = vst [vmem:[#allocation188_spill] sm:$0xff] %v24788_v50  ;;  %30399 = vst [vmem:[#allocation189_spill] sm:$0xff] %v24800_v22 }
 0x1c5   : > { %v24815_v33 = vsel %vm2839_vm7, %v2873_v57, %v2875_v6  ;;  %v2879_v57 = vrot.slane %v24459_v42, 6 }
 0x1c6   : > { %30400 = vst [vmem:[#allocation190_spill] sm:$0xff] %v24815_v33 }
 0x1c7   : > { %17335 = vmatmul.mubr.msk.f32.vlgmr.msra.gmra.mrb[0].mxu1 %vm530_vm3, %v1583_v8  ;;  %18551 = vmatmul.mubr.msk.f32.gmra.mrb[26].mxu0 %vm530_vm3, %v24777_v5  ;;  %v24829_v8 = vsel %vm2839_vm7, %v2875_v6, %v2877_v63  ;;  %v2881_v6 = vrot.slane %v24481_v27, 6 }
 0x1c8   : > { %17337 = vmatprep.mubr.msk.f32.mxu1 %vm22840_vm1, %v30171_v2  ;;  %18553 = vmatprep.mubr.msk.f32.mxu0 %vm22840_vm1, %v30171_v2  ;;  %30401 = vst [vmem:[#allocation191_spill] sm:$0xff] %v24829_v8 }
 0x1cb   : > { %17338 = vmatmul.mubr.msk.f32.gmra.mrb[2].mxu1 %vm530_vm3, %v23003_v16  ;;  %18554 = vmatmul.mubr.msk.f32.gmra.mrb[28].mxu0 %vm530_vm3, %v24788_v50  ;;  %v14484_v16 = vld [vmem:[%s29719_s1 + $0x10] sm:$0xf] }
 0x1cc   : > { %17340 = vmatprep.mubr.msk.f32.mxu1 %vm22840_vm1, %v30171_v2  ;;  %18556 = vmatprep.mubr.msk.f32.mxu0 %vm22840_vm1, %v30171_v2 }
 0x1cd   : > { %17440 = vmatpush3.msk.msra.mxu1 %vm601_vm0, %v14484_v16  ;;  %v24841_v16 = vsel %vm2839_vm7, %v2877_v63, %v2879_v57  ;;  %v2883_v63 = vrot.slane %v24504_v21, 6 }
 0x1ce   : > { %17546 = vmatprep.subr.mxu1 %v30171_v2  ;;  %30402 = vst [vmem:[#allocation192_spill] sm:$0xff] %v24841_v16 }
 0x1cf   : > { %17341 = vmatmul.mubr.msk.f32.gmra.mrb[4].mxu1 %vm530_vm3, %v23015_v18  ;;  %18557 = vmatmul.mubr.msk.f32.gmra.mrb[30].mxu0 %vm530_vm3, %v24800_v22 }
 0x1d0   : > { %17343 = vmatprep.mubr.msk.f32.mxu1 %vm22840_vm1, %v30171_v2  ;;  %18559 = vmatprep.mubr.msk.f32.mxu0 %vm22840_vm1, %v30171_v2 }
 0x1d3   : > { %17344 = vmatmul.mubr.msk.f32.gmra.mrb[6].mxu1 %vm530_vm3, %v23037_v23  ;;  %18560 = vmatmul.mubr.msk.f32.gmra.mrb[32].mxu0 %vm530_vm3, %v24815_v33  ;;  %v24988_v23 = vld [vmem:[%s22973_s24 + $0x108] sm:$0xff] }
 0x1d4   : > { %17346 = vmatprep.mubr.msk.f32.mxu1 %vm22840_vm1, %v30171_v2  ;;  %18562 = vmatprep.mubr.msk.f32.mxu0 %vm22840_vm1, %v30171_v2 }
 0x1d7   : > { %17347 = vmatmul.mubr.msk.f32.gmra.mrb[8].mxu1 %vm530_vm3, %v23059_v29  ;;  %18563 = vmatmul.mubr.msk.f32.gmra.mrb[34].mxu0 %vm530_vm3, %v24829_v8  ;;  %v24853_v29 = vsel %vm2839_vm7, %v2879_v57, %v2881_v6  ;;  %v2885_v57 = vrot.slane %v24519_v51, 6 }
 0x1d8   : > { %17349 = vmatprep.mubr.msk.f32.mxu1 %vm22840_vm1, %v30171_v2  ;;  %18565 = vmatprep.mubr.msk.f32.mxu0 %vm22840_vm1, %v30171_v2  ;;  %30403 = vst [vmem:[#allocation193_spill] sm:$0xff] %v24853_v29 }
 0x1db   : > { %17350 = vmatmul.mubr.msk.f32.gmra.mrb[10].mxu1 %vm530_vm3, %v23080_v34  ;;  %18566 = vmatmul.mubr.msk.f32.gmra.mrb[36].mxu0 %vm530_vm3, %v24841_v16  ;;  %v24865_v34 = vsel %vm2839_vm7, %v2881_v6, %v2883_v63  ;;  %v2887_v6 = vrot.slane %v24541_v30, 6 }
 0x1dc   : > { %17352 = vmatprep.mubr.msk.f32.mxu1 %vm22840_vm1, %v30171_v2  ;;  %18568 = vmatprep.mubr.msk.f32.mxu0 %vm22840_vm1, %v30171_v2  ;;  %30404 = vst [vmem:[#allocation194_spill] sm:$0xff] %v24865_v34 }
 0x1df   : > { %17353 = vmatmul.mubr.msk.f32.gmra.mrb[12].mxu1 %vm530_vm3, %v23099_v39  ;;  %18569 = vmatmul.mubr.msk.f32.gmra.mrb[38].mxu0 %vm530_vm3, %v24853_v29  ;;  %v24877_v39 = vsel %vm2839_vm7, %v2883_v63, %v2885_v57  ;;  %v2889_v63 = vrot.slane %v24562_v24, 6 }
 0x1e0   : > { %17355 = vmatprep.mubr.msk.f32.mxu1 %vm22840_vm1, %v30171_v2  ;;  %18571 = vmatprep.mubr.msk.f32.mxu0 %vm22840_vm1, %v30171_v2  ;;  %30405 = vst [vmem:[#allocation195_spill] sm:$0xff] %v24877_v39 }
 0x1e3   : > { %17356 = vmatmul.mubr.msk.f32.gmra.mrb[14].mxu1 %vm530_vm3, %v23118_v44  ;;  %18572 = vmatmul.mubr.msk.f32.gmra.mrb[40].mxu0 %vm530_vm3, %v24865_v34  ;;  %v24889_v44 = vsel %vm2839_vm7, %v2885_v57, %v2887_v6  ;;  %v2891_v57 = vrot.slane %v24584_v32, 6 }
 0x1e4   : > { %17358 = vmatprep.mubr.msk.f32.mxu1 %vm22840_vm1, %v30171_v2  ;;  %18574 = vmatprep.mubr.msk.f32.mxu0 %vm22840_vm1, %v30171_v2  ;;  %30406 = vst [vmem:[#allocation196_spill] sm:$0xff] %v24889_v44 }
 0x1e7   : > { %17359 = vmatmul.mubr.msk.f32.gmra.mrb[16].mxu1 %vm530_vm3, %v23137_v49  ;;  %18575 = vmatmul.mubr.msk.f32.gmra.mrb[42].mxu0 %vm530_vm3, %v24877_v39  ;;  %v24901_v49 = vsel %vm2839_vm7, %v2887_v6, %v2889_v63  ;;  %v2893_v6 = vrot.slane %v24603_v43, 6 }
 0x1e8   : > { %17361 = vmatprep.mubr.msk.f32.mxu1 %vm22840_vm1, %v30171_v2  ;;  %18577 = vmatprep.mubr.msk.f32.mxu0 %vm22840_vm1, %v30171_v2  ;;  %30407 = vst [vmem:[#allocation197_spill] sm:$0xff] %v24901_v49 }
 0x1eb   : > { %17362 = vmatmul.mubr.msk.f32.gmra.mrb[18].mxu1 %vm530_vm3, %v23156_v54  ;;  %18578 = vmatmul.mubr.msk.f32.gmra.mrb[44].mxu0 %vm530_vm3, %v24889_v44  ;;  %v24913_v54 = vsel %vm2839_vm7, %v2889_v63, %v2891_v57  ;;  %v2895_v63 = vrot.slane %v24622_v7, 6 }
 0x1ec   : > { %17364 = vmatprep.mubr.msk.f32.mxu1 %vm22840_vm1, %v30171_v2  ;;  %18580 = vmatprep.mubr.msk.f32.mxu0 %vm22840_vm1, %v30171_v2  ;;  %30408 = vst [vmem:[#allocation198_spill] sm:$0xff] %v24913_v54 }
 0x1ef   : > { %17365 = vmatmul.mubr.msk.f32.gmra.mrb[20].mxu1 %vm530_vm3, %v23175_v59  ;;  %18581 = vmatmul.mubr.msk.f32.gmra.mrb[46].mxu0 %vm530_vm3, %v24901_v49  ;;  %v24925_v59 = vsel %vm2839_vm7, %v2891_v57, %v2893_v6  ;;  %v2897_v57 = vrot.slane %v24641_v26, 6 }
 0x1f0   : > { %17367 = vmatprep.mubr.msk.f32.mxu1 %vm22840_vm1, %v30171_v2  ;;  %18583 = vmatprep.mubr.msk.f32.mxu0 %vm22840_vm1, %v30171_v2  ;;  %30409 = vst [vmem:[#allocation199_spill] sm:$0xff] %v24925_v59 }
 0x1f3   : > { %17368 = vmatmul.mubr.msk.f32.gmra.mrb[22].mxu1 %vm530_vm3, %v23194_v0  ;;  %18584 = vmatmul.mubr.msk.f32.gmra.mrb[48].mxu0 %vm530_vm3, %v24913_v54  ;;  %v24937_v0 = vsel %vm2839_vm7, %v2893_v6, %v2895_v63  ;;  %v2899_v6 = vrot.slane %v24660_v1, 6 }
 0x1f4   : > { %17370 = vmatprep.mubr.msk.f32.mxu1 %vm22840_vm1, %v30171_v2  ;;  %18586 = vmatprep.mubr.msk.f32.mxu0 %vm22840_vm1, %v30171_v2  ;;  %30410 = vst [vmem:[#allocation200_spill] sm:$0xff] %v24937_v0 }
 0x1f7   : > { %17371 = vmatmul.mubr.msk.f32.gmra.mrb[24].mxu1 %vm530_vm3, %v23213_v11  ;;  %18587 = vmatmul.mubr.msk.f32.gmra.mrb[50].mxu0 %vm530_vm3, %v24925_v59  ;;  %v24949_v11 = vsel %vm2839_vm7, %v2895_v63, %v2897_v57  ;;  %v2901_v63 = vrot.slane %v24679_v14, 6 }
 0x1f8   : > { %17373 = vmatprep.mubr.msk.f32.mxu1 %vm22840_vm1, %v30171_v2  ;;  %18589 = vmatprep.mubr.msk.f32.mxu0 %vm22840_vm1, %v30171_v2  ;;  %30411 = vst [vmem:[#allocation201_spill] sm:$0xff] %v24949_v11 }
 0x1fb   : > { %17374 = vmatmul.mubr.msk.f32.gmra.mrb[26].mxu1 %vm530_vm3, %v23232_v20  ;;  %18590 = vmatmul.mubr.msk.f32.gmra.mrb[52].mxu0 %vm530_vm3, %v24937_v0  ;;  %v24961_v20 = vsel %vm2839_vm7, %v2897_v57, %v2899_v6  ;;  %v2903_v57 = vrot.slane %v24698_v3, 6 }
 0x1fc   : > { %17376 = vmatprep.mubr.msk.f32.mxu1 %vm22840_vm1, %v30171_v2  ;;  %18592 = vmatprep.mubr.msk.f32.mxu0 %vm22840_vm1, %v30171_v2  ;;  %30412 = vst [vmem:[#allocation202_spill] sm:$0xff] %v24961_v20 }
 0x1ff   : > { %17377 = vmatmul.mubr.msk.f32.gmra.mrb[28].mxu1 %vm530_vm3, %v23251_v31  ;;  %18593 = vmatmul.mubr.msk.f32.gmra.mrb[54].mxu0 %vm530_vm3, %v24949_v11  ;;  %v24973_v31 = vsel %vm2839_vm7, %v2899_v6, %v2901_v63  ;;  %v2905_v6 = vrot.slane %v24988_v23, 6 }
 0x200   : > { %17379 = vmatprep.mubr.msk.f32.mxu1 %vm22840_vm1, %v30171_v2  ;;  %18595 = vmatprep.mubr.msk.f32.mxu0 %vm22840_vm1, %v30171_v2  ;;  %30413 = vst [vmem:[#allocation203_spill] sm:$0xff] %v24973_v31 }
 0x203   : > { %17380 = vmatmul.mubr.msk.f32.gmra.mrb[30].mxu1 %vm530_vm3, %v23270_v45  ;;  %18596 = vmatmul.mubr.msk.f32.gmra.mrb[56].mxu0 %vm530_vm3, %v24961_v20  ;;  %v24985_v45 = vsel %vm2839_vm7, %v2901_v63, %v2903_v57  ;;  %v25003_v63 = vld [vmem:[%s22973_s24 + $0x110] sm:$0xff] }
 0x204   : > { %17382 = vmatprep.mubr.msk.f32.mxu1 %vm22840_vm1, %v30171_v2  ;;  %18598 = vmatprep.mubr.msk.f32.mxu0 %vm22840_vm1, %v30171_v2  ;;  %30414 = vst [vmem:[#allocation204_spill] sm:$0xff] %v24985_v45  ;;  %v25006_v18 = vrot.slane %v25003_v63, 6 }
 0x206   : > { %30416 = vst [vmem:[#allocation206_spill] sm:$0xff] %v25006_v18 }
 0x207   : > { %17383 = vmatmul.mubr.msk.f32.gmra.mrb[32].mxu1 %vm530_vm3, %v23289_v56  ;;  %18599 = vmatmul.mubr.msk.f32.gmra.mrb[58].mxu0 %vm530_vm3, %v24973_v31  ;;  %v25000_v56 = vsel %vm2839_vm7, %v2903_v57, %v2905_v6  ;;  %v25018_v57 = vsel %vm2839_vm7, %v2905_v6, %v25006_v18 }
 0x208   : > { %17385 = vmatprep.mubr.msk.f32.mxu1 %vm22840_vm1, %v30171_v2  ;;  %18601 = vmatprep.mubr.msk.f32.mxu0 %vm22840_vm1, %v30171_v2  ;;  %30415 = vst [vmem:[#allocation205_spill] sm:$0xff] %v25000_v56  ;;  %30417 = vst [vmem:[#allocation207_spill] sm:$0xff] %v25018_v57 }
 0x20b   : > { %17386 = vmatmul.mubr.msk.f32.gmra.mrb[34].mxu1 %vm530_vm3, %v23308_v12  ;;  %18602 = vmatmul.mubr.msk.f32.gmra.mrb[60].mxu0 %vm530_vm3, %v24985_v45  ;;  %v25021_v12 = vrot.slane %v23889_v48, 6  ;;  %v30050_v48 = vrot.slane %v24096_v19, 7 }
 0x20c   : > { %17388 = vmatprep.mubr.msk.f32.mxu1 %vm22840_vm1, %v30171_v2  ;;  %18604 = vmatprep.mubr.msk.f32.mxu0 %vm22840_vm1, %v30171_v2 }
 0x20d   : > { %30418 = vst [vmem:[#allocation208_spill] sm:$0xff] %v25021_v12  ;;  %v25034_v6 = vsel %vm2839_vm7, %v25006_v18, %v25021_v12 }
 0x20e   : > { %30419 = vst [vmem:[#allocation209_spill] sm:$0xff] %v25034_v6 }
 0x20f   : > { %17389 = vmatmul.mubr.msk.f32.gmra.mrb[36].mxu1 %vm530_vm3, %v23327_v36  ;;  %18605 = vmatmul.mubr.msk.f32.gmra.mrb[62].mxu0 %vm530_vm3, %v25000_v56  ;;  %v30420_v36 = vld [vmem:[#allocation46_spill] sm:$0xff]  ;;  %v1630_v56 = vrot.slane %v24562_v24, 3 }
 0x210   : > { %17391 = vmatprep.mubr.msk.f32.mxu1 %vm22840_vm1, %v30171_v2  ;;  %18607 = vmatprep.mubr.msk.f32.mxu0 %vm22840_vm1, %v30171_v2 }
 0x213   : > { %17392 = vmatmul.mubr.msk.f32.gmra.mrb[38].mxu1 %vm530_vm3, %v23346_v61  ;;  %18608 = vmatmul.mubr.msk.f32.gmra.mrb[64].mxu0 %vm530_vm3, %v25018_v57  ;;  %v3264_v61 = vrot.slane %v24113_v15, 7  ;;  %v30421_v57 = vld [vmem:[#allocation48_spill] sm:$0xff]  ;;  %v1628_v15 = vrot.slane %v24541_v30, 3 }
 0x214   : > { %17394 = vmatprep.mubr.msk.f32.mxu1 %vm22840_vm1, %v30171_v2  ;;  %18610 = vmatprep.mubr.msk.f32.mxu0 %vm22840_vm1, %v30171_v2 }
 0x217   : > { %17395 = vmatmul.mubr.msk.f32.gmra.mrb[40].mxu1 %vm530_vm3, %v30420_v36  ;;  %18611 = vmatmul.mubr.msk.f32.gmra.mrb[66].mxu0 %vm530_vm3, %v25034_v6  ;;  %v25057_v6 = vsel %vm3260_vm8, %v30050_v48, %v3264_v61  ;;  %v3266_v36 = vrot.slane %v24131_v62, 7  ;;  %v30423_v48 = vrot.slane %v23370_v60, 3  ;;  %v25093_v60 = vsel %vm1580_vm4, %v1628_v15, %v1630_v56 }
 0x218   : > { %17397 = vmatprep.mubr.msk.f32.mxu1 %vm22840_vm1, %v30171_v2  ;;  %18613 = vmatprep.mubr.msk.f32.mxu0 %vm22840_vm1, %v30171_v2  ;;  %30426 = vst [vmem:[#allocation212_spill] sm:$0xff] %v25093_v60 }
 0x219   : > { %v25074_v18 = vsel %vm1580_vm4, %v30423_v48, %v1628_v15  ;;  %v25077_v62 = vsel %vm3260_vm8, %v3264_v61, %v3266_v36  ;;  %v3272_v15 = vrot.slane %v24193_v10, 7  ;;  %v1636_v10 = vrot.slane %v24622_v7, 3 }
 0x21a   : > { %30424 = vst [vmem:[#allocation210_spill] sm:$0xff] %v25074_v18  ;;  %30425 = vst [vmem:[#allocation211_spill] sm:$0xff] %v25077_v62 }
 0x21b   : > { %17398 = vmatmul.mubr.msk.f32.gmra.mrb[42].mxu1 %vm530_vm3, %v30421_v57  ;;  %18614 = vmatmul.mubr.msk.f32.gmra.mrb[68].mxu0 %vm530_vm3, %v25021_v12  ;;  %v14928_v57 = vld [vmem:[%s29719_s1 + $0x40] sm:$0xf] }
 0x21c   : > { %17400 = vmatprep.mubr.msk.f32.mxu1 %vm22840_vm1, %v30171_v2  ;;  %18618 = vmatprep.mubr.msk.f32.mxu0 %vm22840_vm1, %v30171_v2  ;;  %v30422_v12 = vld [vmem:[#allocation50_spill] sm:$0xff] }
 0x21f   : > { %17401 = vmatmul.mubr.msk.f32.gmra.mrb[44].mxu1 %vm530_vm3, %v30422_v12  ;;  %18619 = vmatmul.mubr.msk.f32.vlgmr.msra.gmra.mrb[0].mxu0 %vm530_vm3, %v25057_v6  ;;  %v3268_v12 = vrot.slane %v24150_v40, 7  ;;  %v1632_v40 = vrot.slane %v24584_v32, 3 }
 0x220   : > { %18724 = vmatpush3.msk.msra.mxu0 %vm601_vm0, %v14928_v57  ;;  %17403 = vmatprep.mubr.msk.f32.mxu1 %vm22840_vm1, %v30171_v2  ;;  %v3270_v57 = vrot.slane %v24172_v52, 7  ;;  %v1634_v52 = vrot.slane %v24603_v43, 3 }
 0x221   : > { %18621 = vmatprep.mubr.msk.f32.mxu0 %vm22840_vm1, %v30171_v2  ;;  %18830 = vmatprep.subr.mxu0 %v30171_v2  ;;  %v25096_v61 = vsel %vm3260_vm8, %v3266_v36, %v3268_v12  ;;  %v25109_v48 = vsel %vm1580_vm4, %v1630_v56, %v1632_v40 }
 0x222   : > { %30427 = vst [vmem:[#allocation213_spill] sm:$0xff] %v25096_v61  ;;  %30428 = vst [vmem:[#allocation214_spill] sm:$0xff] %v25109_v48  ;;  %v25112_v36 = vsel %vm3260_vm8, %v3268_v12, %v3270_v57  ;;  %v25125_v56 = vsel %vm1580_vm4, %v1632_v40, %v1634_v52  ;;  %v25128_v12 = vsel %vm3260_vm8, %v3270_v57, %v3272_v15 }
 0x223   : > { %17404 = vmatmul.mubr.msk.f32.gmra.mrb[46].mxu1 %vm530_vm3, %v25074_v18  ;;  %18622 = vmatmul.mubr.msk.f32.gmra.mrb[2].mxu0 %vm530_vm3, %v25077_v62  ;;  %30429 = vst [vmem:[#allocation215_spill] sm:$0xff] %v25112_v36  ;;  %30430 = vst [vmem:[#allocation216_spill] sm:$0xff] %v25125_v56  ;;  %v25141_v40 = vsel %vm1580_vm4, %v1634_v52, %v1636_v10 }
 0x224   : > { %17406 = vmatprep.mubr.msk.f32.mxu1 %vm22840_vm1, %v30171_v2  ;;  %18624 = vmatprep.mubr.msk.f32.mxu0 %vm22840_vm1, %v30171_v2  ;;  %30431 = vst [vmem:[#allocation217_spill] sm:$0xff] %v25128_v12  ;;  %30432 = vst [vmem:[#allocation218_spill] sm:$0xff] %v25141_v40 }
 0x227   : > { %17407 = vmatmul.mubr.msk.f32.gmra.mrb[48].mxu1 %vm530_vm3, %v25093_v60  ;;  %18625 = vmatmul.mubr.msk.f32.gmra.mrb[4].mxu0 %vm530_vm3, %v25096_v61  ;;  %v3274_v60 = vrot.slane %v24212_v25, 7  ;;  %v1638_v25 = vrot.slane %v24641_v26, 3 }
 0x228   : > { %17409 = vmatprep.mubr.msk.f32.mxu1 %vm22840_vm1, %v30171_v2  ;;  %18627 = vmatprep.mubr.msk.f32.mxu0 %vm22840_vm1, %v30171_v2 }
 0x229   : > { %v25144_v57 = vsel %vm3260_vm8, %v3272_v15, %v3274_v60  ;;  %v25157_v52 = vsel %vm1580_vm4, %v1636_v10, %v1638_v25 }
 0x22a   : > { %30433 = vst [vmem:[#allocation219_spill] sm:$0xff] %v25144_v57 }
 0x22b   : > { %17410 = vmatmul.mubr.msk.f32.gmra.mrb[50].mxu1 %vm530_vm3, %v25109_v48  ;;  %18628 = vmatmul.mubr.msk.f32.gmra.mrb[6].mxu0 %vm530_vm3, %v25112_v36  ;;  %v30434_v48 = vld [vmem:[#allocation126_spill] sm:$0xff] }
 0x22c   : > { %17412 = vmatprep.mubr.msk.f32.mxu1 %vm22840_vm1, %v30171_v2  ;;  %18630 = vmatprep.mubr.msk.f32.mxu0 %vm22840_vm1, %v30171_v2  ;;  %v3276_v18 = vrot.slane %v30434_v48, 7  ;;  %30435 = vst [vmem:[#allocation126_spill] sm:$0xff] %v25157_v52  ;;  %v1640_v48 = vrot.slane %v24660_v1, 3 }
 0x22e   : > { %v25160_v15 = vsel %vm3260_vm8, %v3274_v60, %v3276_v18  ;;  %v25173_v10 = vsel %vm1580_vm4, %v1638_v25, %v1640_v48 }
 0x22f   : > { %17413 = vmatmul.mubr.msk.f32.gmra.mrb[52].mxu1 %vm530_vm3, %v25125_v56  ;;  %18631 = vmatmul.mubr.msk.f32.gmra.mrb[8].mxu0 %vm530_vm3, %v25128_v12  ;;  %30436 = vst [vmem:[#allocation220_spill] sm:$0xff] %v25160_v15  ;;  %v30437_v56 = vld [vmem:[#allocation129_spill] sm:$0xff] }
 0x230   : > { %17415 = vmatprep.mubr.msk.f32.mxu1 %vm22840_vm1, %v30171_v2  ;;  %18633 = vmatprep.mubr.msk.f32.mxu0 %vm22840_vm1, %v30171_v2  ;;  %v3278_v12 = vrot.slane %v30437_v56, 7  ;;  %30438 = vst [vmem:[#allocation129_spill] sm:$0xff] %v25173_v10  ;;  %v1642_v56 = vrot.slane %v24679_v14, 3 }
 0x232   : > { %v25176_v60 = vsel %vm3260_vm8, %v3276_v18, %v3278_v12  ;;  %v25189_v25 = vsel %vm1580_vm4, %v1640_v48, %v1642_v56 }
 0x233   : > { %17416 = vmatmul.mubr.msk.f32.gmra.mrb[54].mxu1 %vm530_vm3, %v25141_v40  ;;  %18634 = vmatmul.mubr.msk.f32.gmra.mrb[10].mxu0 %vm530_vm3, %v25144_v57  ;;  %30439 = vst [vmem:[#allocation221_spill] sm:$0xff] %v25176_v60  ;;  %v30440_v40 = vld [vmem:[#allocation132_spill] sm:$0xff] }
 0x234   : > { %17418 = vmatprep.mubr.msk.f32.mxu1 %vm22840_vm1, %v30171_v2  ;;  %18636 = vmatprep.mubr.msk.f32.mxu0 %vm22840_vm1, %v30171_v2  ;;  %v3280_v57 = vrot.slane %v30440_v40, 7  ;;  %30441 = vst [vmem:[#allocation132_spill] sm:$0xff] %v25189_v25  ;;  %v1644_v40 = vrot.slane %v24698_v3, 3 }
 0x236   : > { %v25192_v18 = vsel %vm3260_vm8, %v3278_v12, %v3280_v57  ;;  %v25205_v48 = vsel %vm1580_vm4, %v1642_v56, %v1644_v40 }
 0x237   : > { %17419 = vmatmul.mubr.msk.f32.gmra.mrb[56].mxu1 %vm530_vm3, %v25157_v52  ;;  %18637 = vmatmul.mubr.msk.f32.gmra.mrb[12].mxu0 %vm530_vm3, %v25160_v15  ;;  %30442 = vst [vmem:[#allocation222_spill] sm:$0xff] %v25192_v18  ;;  %v30443_v52 = vld [vmem:[#allocation135_spill] sm:$0xff] }
 0x238   : > { %17421 = vmatprep.mubr.msk.f32.mxu1 %vm22840_vm1, %v30171_v2  ;;  %18639 = vmatprep.mubr.msk.f32.mxu0 %vm22840_vm1, %v30171_v2  ;;  %v3282_v15 = vrot.slane %v30443_v52, 7  ;;  %30444 = vst [vmem:[#allocation135_spill] sm:$0xff] %v25205_v48  ;;  %v1646_v52 = vrot.slane %v24988_v23, 3 }
 0x23a   : > { %v25208_v12 = vsel %vm3260_vm8, %v3280_v57, %v3282_v15  ;;  %v25221_v56 = vsel %vm1580_vm4, %v1644_v40, %v1646_v52 }
 0x23b   : > { %17422 = vmatmul.mubr.msk.f32.gmra.mrb[58].mxu1 %vm530_vm3, %v25173_v10  ;;  %18640 = vmatmul.mubr.msk.f32.gmra.mrb[14].mxu0 %vm530_vm3, %v25176_v60  ;;  %30445 = vst [vmem:[#allocation223_spill] sm:$0xff] %v25208_v12  ;;  %v3284_v10 = vrot.slane %v24307_v53, 7  ;;  %30446 = vst [vmem:[#allocation224_spill] sm:$0xff] %v25221_v56  ;;  %v25227_v53 = vrot.slane %v25003_v63, 3 }
 0x23c   : > { %17424 = vmatprep.mubr.msk.f32.mxu1 %vm22840_vm1, %v30171_v2  ;;  %18642 = vmatprep.mubr.msk.f32.mxu0 %vm22840_vm1, %v30171_v2 }
 0x23d   : > { %v25224_v57 = vsel %vm3260_vm8, %v3282_v15, %v3284_v10  ;;  %30448 = vst [vmem:[#allocation226_spill] sm:$0xff] %v25227_v53  ;;  %v25240_v15 = vsel %vm1580_vm4, %v1646_v52, %v25227_v53 }
 0x23e   : > { %30447 = vst [vmem:[#allocation225_spill] sm:$0xff] %v25224_v57  ;;  %30449 = vst [vmem:[#allocation227_spill] sm:$0xff] %v25240_v15 }
 0x23f   : > { %17425 = vmatmul.mubr.msk.f32.gmra.mrb[60].mxu1 %vm530_vm3, %v25189_v25  ;;  %18643 = vmatmul.mubr.msk.f32.gmra.mrb[16].mxu0 %vm530_vm3, %v25192_v18 }
 0x240   : > { %17427 = vmatprep.mubr.msk.f32.mxu1 %vm22840_vm1, %v30171_v2  ;;  %18645 = vmatprep.mubr.msk.f32.mxu0 %vm22840_vm1, %v30171_v2 }
 0x243   : > { %17428 = vmatmul.mubr.msk.f32.gmra.mrb[62].mxu1 %vm530_vm3, %v25205_v48  ;;  %18646 = vmatmul.mubr.msk.f32.gmra.mrb[18].mxu0 %vm530_vm3, %v25208_v12  ;;  %v3286_v48 = vrot.slane %v24326_v41, 7  ;;  %v3288_v41 = vrot.slane %v24345_v38, 7  ;;  %v3290_v38 = vrot.slane %v24364_v28, 7  ;;  %v3292_v28 = vrot.slane %v24383_v9, 7 }
 0x244   : > { %17430 = vmatprep.mubr.msk.f32.mxu1 %vm22840_vm1, %v30171_v2  ;;  %18648 = vmatprep.mubr.msk.f32.mxu0 %vm22840_vm1, %v30171_v2 }
 0x245   : > { %v25243_v40 = vsel %vm3260_vm8, %v3284_v10, %v3286_v48  ;;  %v25255_v52 = vsel %vm3260_vm8, %v3286_v48, %v3288_v41  ;;  %v30452_v48 = vrot.slane %v22979_v4, 4  ;;  %v25274_v25 = vsel %vm3260_vm8, %v3288_v41, %v3290_v38  ;;  %v30455_v41 = vld [vmem:[#allocation52_spill] sm:$0xff] }
 0x246   : > { %30450 = vst [vmem:[#allocation228_spill] sm:$0xff] %v25243_v40  ;;  %30451 = vst [vmem:[#allocation229_spill] sm:$0xff] %v25255_v52 }
 0x247   : > { %17431 = vmatmul.mubr.msk.f32.gmra.mrb[64].mxu1 %vm530_vm3, %v25221_v56  ;;  %18649 = vmatmul.mubr.msk.f32.gmra.mrb[20].mxu0 %vm530_vm3, %v25224_v57  ;;  %v25258_v56 = vld [vmem:[%s22973_s24] sm:$0xff]  ;;  %30453 = vst [vmem:[#allocation230_spill] sm:$0xff] %v25274_v25 }
 0x248   : > { %17433 = vmatprep.mubr.msk.f32.mxu1 %vm22840_vm1, %v30171_v2  ;;  %18651 = vmatprep.mubr.msk.f32.mxu0 %vm22840_vm1, %v30171_v2  ;;  %v2000_v10 = vrot.slane %v25258_v56, 4 }
 0x24b   : > { %17434 = vmatmul.mubr.msk.f32.gmra.mrb[66].mxu1 %vm530_vm3, %v25240_v15  ;;  %18652 = vmatmul.mubr.msk.f32.gmra.mrb[22].mxu0 %vm530_vm3, %v25243_v40  ;;  %v2002_v15 = vsel %vm601_vm0, %v2000_v10, %v30452_v48  ;;  %v3294_v10 = vrot.slane %v24402_v46, 7  ;;  %v14521_v46 = vld [vmem:[%s29719_s1 + $0x14] sm:$0xf] }
 0x24c   : > { %17436 = vmatprep.mubr.msk.f32.mxu1 %vm22840_vm1, %v30171_v2  ;;  %18654 = vmatprep.mubr.msk.f32.mxu0 %vm22840_vm1, %v30171_v2 }
 0x24d   : > { %v25297_v9 = vsel %vm3260_vm8, %v3292_v28, %v3294_v10 }
 0x24e   : > { %30456 = vst [vmem:[#allocation52_spill] sm:$0xff] %v25297_v9 }
 0x24f   : > { %17437 = vmatmul.mubr.msk.f32.gmra.mrb[68].mxu1 %vm530_vm3, %v25227_v53  ;;  %18655 = vmatmul.mubr.msk.f32.gmra.mrb[24].mxu0 %vm530_vm3, %v25255_v52  ;;  %v25285_v53 = vsel %vm3260_vm8, %v3290_v38, %v3292_v28  ;;  %v30457_v38 = vld [vmem:[#allocation54_spill] sm:$0xff]  ;;  %v30459_v28 = vld [vmem:[#allocation56_spill] sm:$0xff] }
 0x250   : > { %17441 = vmatprep.mubr.msk.f32.mxu1 %vm22840_vm1, %v30171_v2  ;;  %18657 = vmatprep.mubr.msk.f32.mxu0 %vm22840_vm1, %v30171_v2  ;;  %30454 = vst [vmem:[#allocation231_spill] sm:$0xff] %v25285_v53 }
 0x253   : > { %17442 = vmatmul.mubr.msk.f32.vlgmr.msra.gmra.mrb[0].mxu1 %vm530_vm3, %v2002_v15  ;;  %18658 = vmatmul.mubr.msk.f32.gmra.mrb[26].mxu0 %vm530_vm3, %v25274_v25  ;;  %v3296_v15 = vrot.slane %v24421_v55, 7  ;;  %v3298_v55 = vrot.slane %v24440_v35, 7  ;;  %v3300_v35 = vrot.slane %v24459_v42, 7 }
 0x254   : > { %17444 = vmatprep.mubr.msk.f32.mxu1 %vm22840_vm1, %v30171_v2  ;;  %18660 = vmatprep.mubr.msk.f32.mxu0 %vm22840_vm1, %v30171_v2 }
 0x255   : > { %v25312_v48 = vsel %vm3260_vm8, %v3294_v10, %v3296_v15  ;;  %17547 = vmatpush3.msk.msra.mxu1 %vm601_vm0, %v14521_v46  ;;  %v25326_v10 = vsel %vm3260_vm8, %v3296_v15, %v3298_v55  ;;  %v25338_v46 = vsel %vm3260_vm8, %v3298_v55, %v3300_v35  ;;  %v3302_v15 = vrot.slane %v24481_v27, 7 }
 0x256   : > { %30458 = vst [vmem:[#allocation232_spill] sm:$0xff] %v25312_v48  ;;  %17653 = vmatprep.subr.mxu1 %v30171_v2  ;;  %30460 = vst [vmem:[#allocation233_spill] sm:$0xff] %v25326_v10  ;;  %v3304_v55 = vrot.slane %v24504_v21, 7 }
 0x257   : > { %17445 = vmatmul.mubr.msk.f32.gmra.mrb[2].mxu1 %vm530_vm3, %v30455_v41  ;;  %18661 = vmatmul.mubr.msk.f32.gmra.mrb[28].mxu0 %vm530_vm3, %v25285_v53  ;;  %v30461_v41 = vld [vmem:[#allocation58_spill] sm:$0xff]  ;;  %30462 = vst [vmem:[#allocation234_spill] sm:$0xff] %v25338_v46  ;;  %v25350_v42 = vsel %vm3260_vm8, %v3300_v35, %v3302_v15  ;;  %v3306_v35 = vrot.slane %v24519_v51, 7 }
 0x258   : > { %17447 = vmatprep.mubr.msk.f32.mxu1 %vm22840_vm1, %v30171_v2  ;;  %18663 = vmatprep.mubr.msk.f32.mxu0 %vm22840_vm1, %v30171_v2  ;;  %30464 = vst [vmem:[#allocation235_spill] sm:$0xff] %v25350_v42  ;;  %v25362_v27 = vsel %vm3260_vm8, %v3302_v15, %v3304_v55  ;;  %v3308_v15 = vrot.slane %v24541_v30, 7 }
 0x259   : > { %30466 = vst [vmem:[#allocation236_spill] sm:$0xff] %v25362_v27  ;;  %v25374_v21 = vsel %vm3260_vm8, %v3304_v55, %v3306_v35  ;;  %v3310_v55 = vrot.slane %v24562_v24, 7 }
 0x25a   : > { %30468 = vst [vmem:[#allocation237_spill] sm:$0xff] %v25374_v21  ;;  %v25386_v51 = vsel %vm3260_vm8, %v3306_v35, %v3308_v15  ;;  %v3312_v35 = vrot.slane %v24584_v32, 7 }
 0x25b   : > { %17448 = vmatmul.mubr.msk.f32.gmra.mrb[4].mxu1 %vm530_vm3, %v30457_v38  ;;  %18664 = vmatmul.mubr.msk.f32.gmra.mrb[30].mxu0 %vm530_vm3, %v25297_v9  ;;  %30470 = vst [vmem:[#allocation238_spill] sm:$0xff] %v25386_v51  ;;  %v25398_v30 = vsel %vm3260_vm8, %v3308_v15, %v3310_v55  ;;  %v3314_v15 = vrot.slane %v24603_v43, 7  ;;  %v25509_v38 = vld [vmem:[%s22973_s24 + $0x118] sm:$0xff] }
 0x25c   : > { %17450 = vmatprep.mubr.msk.f32.mxu1 %vm22840_vm1, %v30171_v2  ;;  %18666 = vmatprep.mubr.msk.f32.mxu0 %vm22840_vm1, %v30171_v2  ;;  %30472 = vst [vmem:[#allocation239_spill] sm:$0xff] %v25398_v30  ;;  %v25410_v24 = vsel %vm3260_vm8, %v3310_v55, %v3312_v35  ;;  %v3316_v55 = vrot.slane %v24622_v7, 7 }
 0x25d   : > { %30474 = vst [vmem:[#allocation240_spill] sm:$0xff] %v25410_v24  ;;  %v25422_v32 = vsel %vm3260_vm8, %v3312_v35, %v3314_v15  ;;  %v3318_v35 = vrot.slane %v24641_v26, 7 }
 0x25e   : > { %30476 = vst [vmem:[#allocation241_spill] sm:$0xff] %v25422_v32  ;;  %v25434_v43 = vsel %vm3260_vm8, %v3314_v15, %v3316_v55  ;;  %v3320_v15 = vrot.slane %v24660_v1, 7 }
 0x25f   : > { %17451 = vmatmul.mubr.msk.f32.gmra.mrb[6].mxu1 %vm530_vm3, %v30459_v28  ;;  %18667 = vmatmul.mubr.msk.f32.gmra.mrb[32].mxu0 %vm530_vm3, %v25312_v48  ;;  %v30463_v28 = vld [vmem:[#allocation60_spill] sm:$0xff]  ;;  %30478 = vst [vmem:[#allocation242_spill] sm:$0xff] %v25434_v43  ;;  %v25446_v7 = vsel %vm3260_vm8, %v3316_v55, %v3318_v35  ;;  %v3322_v55 = vrot.slane %v24679_v14, 7 }
 0x260   : > { %17453 = vmatprep.mubr.msk.f32.mxu1 %vm22840_vm1, %v30171_v2  ;;  %18669 = vmatprep.mubr.msk.f32.mxu0 %vm22840_vm1, %v30171_v2  ;;  %30480 = vst [vmem:[#allocation243_spill] sm:$0xff] %v25446_v7  ;;  %v25458_v26 = vsel %vm3260_vm8, %v3318_v35, %v3320_v15  ;;  %v3324_v35 = vrot.slane %v24698_v3, 7  ;;  %v30487_v3 = vld [vmem:[#allocation80_spill] sm:$0xff] }
 0x261   : > { %30482 = vst [vmem:[#allocation244_spill] sm:$0xff] %v25458_v26  ;;  %v25470_v1 = vsel %vm3260_vm8, %v3320_v15, %v3322_v55  ;;  %v3326_v15 = vrot.slane %v24988_v23, 7 }
 0x262   : > { %30484 = vst [vmem:[#allocation245_spill] sm:$0xff] %v25470_v1  ;;  %v25482_v14 = vsel %vm3260_vm8, %v3322_v55, %v3324_v35  ;;  %v3328_v55 = vrot.slane %v25003_v63, 7 }
 0x263   : > { %17454 = vmatmul.mubr.msk.f32.gmra.mrb[8].mxu1 %vm530_vm3, %v30461_v41  ;;  %18670 = vmatmul.mubr.msk.f32.gmra.mrb[34].mxu0 %vm530_vm3, %v25326_v10  ;;  %v30465_v41 = vld [vmem:[#allocation62_spill] sm:$0xff]  ;;  %30486 = vst [vmem:[#allocation246_spill] sm:$0xff] %v25482_v14 }
 0x264   : > { %17456 = vmatprep.mubr.msk.f32.mxu1 %vm22840_vm1, %v30171_v2  ;;  %18672 = vmatprep.mubr.msk.f32.mxu0 %vm22840_vm1, %v30171_v2 }
 0x267   : > { %17457 = vmatmul.mubr.msk.f32.gmra.mrb[10].mxu1 %vm530_vm3, %v30463_v28  ;;  %18673 = vmatmul.mubr.msk.f32.gmra.mrb[36].mxu0 %vm530_vm3, %v25338_v46  ;;  %v30467_v28 = vld [vmem:[#allocation64_spill] sm:$0xff] }
 0x268   : > { %17459 = vmatprep.mubr.msk.f32.mxu1 %vm22840_vm1, %v30171_v2  ;;  %18675 = vmatprep.mubr.msk.f32.mxu0 %vm22840_vm1, %v30171_v2 }
 0x26b   : > { %17460 = vmatmul.mubr.msk.f32.gmra.mrb[12].mxu1 %vm530_vm3, %v30465_v41  ;;  %18676 = vmatmul.mubr.msk.f32.gmra.mrb[38].mxu0 %vm530_vm3, %v25350_v42  ;;  %v30469_v41 = vld [vmem:[#allocation66_spill] sm:$0xff] }
 0x26c   : > { %17462 = vmatprep.mubr.msk.f32.mxu1 %vm22840_vm1, %v30171_v2  ;;  %18678 = vmatprep.mubr.msk.f32.mxu0 %vm22840_vm1, %v30171_v2 }
 0x26f   : > { %17463 = vmatmul.mubr.msk.f32.gmra.mrb[14].mxu1 %vm530_vm3, %v30467_v28  ;;  %18679 = vmatmul.mubr.msk.f32.gmra.mrb[40].mxu0 %vm530_vm3, %v25362_v27  ;;  %v30471_v28 = vld [vmem:[#allocation68_spill] sm:$0xff] }
 0x270   : > { %17465 = vmatprep.mubr.msk.f32.mxu1 %vm22840_vm1, %v30171_v2  ;;  %18681 = vmatprep.mubr.msk.f32.mxu0 %vm22840_vm1, %v30171_v2 }
 0x273   : > { %17466 = vmatmul.mubr.msk.f32.gmra.mrb[16].mxu1 %vm530_vm3, %v30469_v41  ;;  %18682 = vmatmul.mubr.msk.f32.gmra.mrb[42].mxu0 %vm530_vm3, %v25374_v21  ;;  %v30473_v41 = vld [vmem:[#allocation70_spill] sm:$0xff] }
 0x274   : > { %17468 = vmatprep.mubr.msk.f32.mxu1 %vm22840_vm1, %v30171_v2  ;;  %18684 = vmatprep.mubr.msk.f32.mxu0 %vm22840_vm1, %v30171_v2 }
 0x277   : > { %17469 = vmatmul.mubr.msk.f32.gmra.mrb[18].mxu1 %vm530_vm3, %v30471_v28  ;;  %18685 = vmatmul.mubr.msk.f32.gmra.mrb[44].mxu0 %vm530_vm3, %v25386_v51  ;;  %v30475_v28 = vld [vmem:[#allocation72_spill] sm:$0xff] }
 0x278   : > { %17471 = vmatprep.mubr.msk.f32.mxu1 %vm22840_vm1, %v30171_v2  ;;  %18687 = vmatprep.mubr.msk.f32.mxu0 %vm22840_vm1, %v30171_v2 }
 0x27b   : > { %17472 = vmatmul.mubr.msk.f32.gmra.mrb[20].mxu1 %vm530_vm3, %v30473_v41  ;;  %18688 = vmatmul.mubr.msk.f32.gmra.mrb[46].mxu0 %vm530_vm3, %v25398_v30  ;;  %v30477_v41 = vld [vmem:[#allocation75_spill] sm:$0xff] }
 0x27c   : > { %17474 = vmatprep.mubr.msk.f32.mxu1 %vm22840_vm1, %v30171_v2  ;;  %18690 = vmatprep.mubr.msk.f32.mxu0 %vm22840_vm1, %v30171_v2 }
 0x27f   : > { %17475 = vmatmul.mubr.msk.f32.gmra.mrb[22].mxu1 %vm530_vm3, %v30475_v28  ;;  %18691 = vmatmul.mubr.msk.f32.gmra.mrb[48].mxu0 %vm530_vm3, %v25410_v24  ;;  %v30479_v28 = vld [vmem:[#allocation76_spill] sm:$0xff] }
 0x280   : > { %17477 = vmatprep.mubr.msk.f32.mxu1 %vm22840_vm1, %v30171_v2  ;;  %18693 = vmatprep.mubr.msk.f32.mxu0 %vm22840_vm1, %v30171_v2 }
 0x283   : > { %17478 = vmatmul.mubr.msk.f32.gmra.mrb[24].mxu1 %vm530_vm3, %v30477_v41  ;;  %18694 = vmatmul.mubr.msk.f32.gmra.mrb[50].mxu0 %vm530_vm3, %v25422_v32  ;;  %v30481_v41 = vld [vmem:[#allocation77_spill] sm:$0xff] }
 0x284   : > { %17480 = vmatprep.mubr.msk.f32.mxu1 %vm22840_vm1, %v30171_v2  ;;  %18696 = vmatprep.mubr.msk.f32.mxu0 %vm22840_vm1, %v30171_v2 }
 0x287   : > { %17481 = vmatmul.mubr.msk.f32.gmra.mrb[26].mxu1 %vm530_vm3, %v30479_v28  ;;  %18697 = vmatmul.mubr.msk.f32.gmra.mrb[52].mxu0 %vm530_vm3, %v25434_v43  ;;  %v30483_v28 = vld [vmem:[#allocation78_spill] sm:$0xff] }
 0x288   : > { %17483 = vmatprep.mubr.msk.f32.mxu1 %vm22840_vm1, %v30171_v2  ;;  %18699 = vmatprep.mubr.msk.f32.mxu0 %vm22840_vm1, %v30171_v2 }
 0x28b   : > { %17484 = vmatmul.mubr.msk.f32.gmra.mrb[28].mxu1 %vm530_vm3, %v30481_v41  ;;  %18700 = vmatmul.mubr.msk.f32.gmra.mrb[54].mxu0 %vm530_vm3, %v25446_v7  ;;  %v30485_v41 = vld [vmem:[#allocation79_spill] sm:$0xff] }
 0x28c   : > { %17486 = vmatprep.mubr.msk.f32.mxu1 %vm22840_vm1, %v30171_v2  ;;  %18702 = vmatprep.mubr.msk.f32.mxu0 %vm22840_vm1, %v30171_v2 }
 0x28f   : > { %17487 = vmatmul.mubr.msk.f32.gmra.mrb[30].mxu1 %vm530_vm3, %v30483_v28  ;;  %18703 = vmatmul.mubr.msk.f32.gmra.mrb[56].mxu0 %vm530_vm3, %v25458_v26  ;;  %v30489_v28 = vld [vmem:[#allocation81_spill] sm:$0xff] }
 0x290   : > { %17489 = vmatprep.mubr.msk.f32.mxu1 %vm22840_vm1, %v30171_v2  ;;  %18705 = vmatprep.mubr.msk.f32.mxu0 %vm22840_vm1, %v30171_v2 }
 0x293   : > { %17490 = vmatmul.mubr.msk.f32.gmra.mrb[32].mxu1 %vm530_vm3, %v30485_v41  ;;  %18706 = vmatmul.mubr.msk.f32.gmra.mrb[58].mxu0 %vm530_vm3, %v25470_v1  ;;  %v25494_v41 = vsel %vm3260_vm8, %v3324_v35, %v3326_v15  ;;  %v3330_v35 = vrot.slane %v25509_v38, 7  ;;  %v30492_v1 = vld [vmem:[#allocation82_spill] sm:$0xff] }
 0x294   : > { %17492 = vmatprep.mubr.msk.f32.mxu1 %vm22840_vm1, %v30171_v2  ;;  %18708 = vmatprep.mubr.msk.f32.mxu0 %vm22840_vm1, %v30171_v2  ;;  %30488 = vst [vmem:[#allocation247_spill] sm:$0xff] %v25494_v41 }
 0x297   : > { %17493 = vmatmul.mubr.msk.f32.gmra.mrb[34].mxu1 %vm530_vm3, %v30487_v3  ;;  %18709 = vmatmul.mubr.msk.f32.gmra.mrb[60].mxu0 %vm530_vm3, %v25482_v14  ;;  %v25506_v3 = vsel %vm3260_vm8, %v3326_v15, %v3328_v55  ;;  %v25513_v14 = vld [vmem:[%s22973_s24 + $0x120] sm:$0xff]  ;;  %v25524_v15 = vsel %vm3260_vm8, %v3328_v55, %v3330_v35 }
 0x298   : > { %17495 = vmatprep.mubr.msk.f32.mxu1 %vm22840_vm1, %v30171_v2  ;;  %18711 = vmatprep.mubr.msk.f32.mxu0 %vm22840_vm1, %v30171_v2  ;;  %30490 = vst [vmem:[#allocation248_spill] sm:$0xff] %v25506_v3  ;;  %30491 = vst [vmem:[#allocation249_spill] sm:$0xff] %v25513_v14 }
 0x299   : > { %30493 = vst [vmem:[#allocation250_spill] sm:$0xff] %v25524_v15 }
 0x29b   : > { %17496 = vmatmul.mubr.msk.f32.gmra.mrb[36].mxu1 %vm530_vm3, %v30489_v28  ;;  %18712 = vmatmul.mubr.msk.f32.gmra.mrb[62].mxu0 %vm530_vm3, %v25494_v41  ;;  %v30091_v28 = vrot.slane %v25513_v14, 7  ;;  %v30494_v41 = vld [vmem:[#allocation83_spill] sm:$0xff] }
 0x29c   : > { %17498 = vmatprep.mubr.msk.f32.mxu1 %vm22840_vm1, %v30171_v2  ;;  %18714 = vmatprep.mubr.msk.f32.mxu0 %vm22840_vm1, %v30171_v2 }
 0x29d   : > { %v25538_v55 = vsel %vm3260_vm8, %v3330_v35, %v30091_v28  ;;  %v25554_v35 = vld [vmem:[%s22973_s24 + $0x10] sm:$0xff]  ;;  %v30499_v28 = vld [vmem:[#allocation86_spill] sm:$0xff] }
 0x29e   : > { %30495 = vst [vmem:[#allocation251_spill] sm:$0xff] %v25538_v55  ;;  %30498 = vst [vmem:[#allocation252_spill] sm:$0xff] %v25554_v35 }
 0x29f   : > { %17499 = vmatmul.mubr.msk.f32.gmra.mrb[38].mxu1 %vm530_vm3, %v30492_v1  ;;  %18715 = vmatmul.mubr.msk.f32.gmra.mrb[64].mxu0 %vm530_vm3, %v25506_v3  ;;  %v30496_v1 = vld [vmem:[#allocation84_spill] sm:$0xff] }
 0x2a0   : > { %17501 = vmatprep.mubr.msk.f32.mxu1 %vm22840_vm1, %v30171_v2  ;;  %18717 = vmatprep.mubr.msk.f32.mxu0 %vm22840_vm1, %v30171_v2 }
 0x2a3   : > { %17502 = vmatmul.mubr.msk.f32.gmra.mrb[40].mxu1 %vm530_vm3, %v30494_v41  ;;  %18718 = vmatmul.mubr.msk.f32.gmra.mrb[66].mxu0 %vm530_vm3, %v25524_v15  ;;  %v14965_v41 = vld [vmem:[%s29719_s1 + $0x44] sm:$0xf]  ;;  %v30497_v15 = vld [vmem:[#allocation85_spill] sm:$0xff] }
 0x2a4   : > { %17504 = vmatprep.mubr.msk.f32.mxu1 %vm22840_vm1, %v30171_v2  ;;  %18720 = vmatprep.mubr.msk.f32.mxu0 %vm22840_vm1, %v30171_v2 }
 0x2a7   : > { %17505 = vmatmul.mubr.msk.f32.gmra.mrb[42].mxu1 %vm530_vm3, %v30496_v1  ;;  %18721 = vmatmul.mubr.msk.f32.gmra.mrb[68].mxu0 %vm530_vm3, %v25538_v55  ;;  %v25567_v55 = vld [vmem:[%s22973_s24 + $0x18] sm:$0xff]  ;;  %v25589_v1 = vld [vmem:[%s22973_s24 + $0x28] sm:$0xff] }
 0x2a8   : > { %17507 = vmatprep.mubr.msk.f32.mxu1 %vm22840_vm1, %v30171_v2  ;;  %18725 = vmatprep.mubr.msk.f32.mxu0 %vm22840_vm1, %v30171_v2  ;;  %30500 = vst [vmem:[#allocation253_spill] sm:$0xff] %v25567_v55  ;;  %30504 = vst [vmem:[#allocation255_spill] sm:$0xff] %v25589_v1 }
 0x2ab   : > { %17508 = vmatmul.mubr.msk.f32.gmra.mrb[44].mxu1 %vm530_vm3, %v30497_v15  ;;  %18726 = vmatmul.mubr.msk.f32.vlgmr.msra.gmra.mrb[0].mxu0 %vm530_vm3, %v25554_v35  ;;  %v25578_v15 = vld [vmem:[%s22973_s24 + $0x20] sm:$0xff]  ;;  %v25702_v35 = vld [vmem:[%s22973_s24 + $0x78] sm:$0xff] }
 0x2ac   : > { %18831 = vmatpush3.msk.msra.mxu0 %vm601_vm0, %v14965_v41  ;;  %17510 = vmatprep.mubr.msk.f32.mxu1 %vm22840_vm1, %v30171_v2  ;;  %v30501_v41 = vld [vmem:[#allocation87_spill] sm:$0xff]  ;;  %30502 = vst [vmem:[#allocation254_spill] sm:$0xff] %v25578_v15 }
 0x2ad   : > { %18728 = vmatprep.mubr.msk.f32.mxu0 %vm22840_vm1, %v30171_v2  ;;  %18937 = vmatprep.subr.mxu0 %v30171_v2 }
 0x2af   : > { %17511 = vmatmul.mubr.msk.f32.gmra.mrb[46].mxu1 %vm530_vm3, %v30499_v28  ;;  %18729 = vmatmul.mubr.msk.f32.gmra.mrb[2].mxu0 %vm530_vm3, %v25567_v55  ;;  %v30503_v28 = vld [vmem:[#allocation88_spill] sm:$0xff] }
 0x2b0   : > { %17513 = vmatprep.mubr.msk.f32.mxu1 %vm22840_vm1, %v30171_v2  ;;  %18731 = vmatprep.mubr.msk.f32.mxu0 %vm22840_vm1, %v30171_v2  ;;  %v25689_v55 = vld [vmem:[%s22973_s24 + $0x70] sm:$0xff] }
 0x2b3   : > { %17514 = vmatmul.mubr.msk.f32.gmra.mrb[48].mxu1 %vm530_vm3, %v30501_v41  ;;  %18732 = vmatmul.mubr.msk.f32.gmra.mrb[4].mxu0 %vm530_vm3, %v25578_v15  ;;  %v30505_v41 = vld [vmem:[#allocation89_spill] sm:$0xff]  ;;  %v25600_v15 = vld [vmem:[%s22973_s24 + $0x30] sm:$0xff] }
 0x2b4   : > { %17516 = vmatprep.mubr.msk.f32.mxu1 %vm22840_vm1, %v30171_v2  ;;  %18734 = vmatprep.mubr.msk.f32.mxu0 %vm22840_vm1, %v30171_v2  ;;  %30506 = vst [vmem:[#allocation256_spill] sm:$0xff] %v25600_v15 }
 0x2b7   : > { %17517 = vmatmul.mubr.msk.f32.gmra.mrb[50].mxu1 %vm530_vm3, %v30503_v28  ;;  %18735 = vmatmul.mubr.msk.f32.gmra.mrb[6].mxu0 %vm530_vm3, %v25589_v1  ;;  %v30507_v28 = vld [vmem:[#allocation90_spill] sm:$0xff]  ;;  %v25611_v1 = vld [vmem:[%s22973_s24 + $0x38] sm:$0xff] }
 0x2b8   : > { %17519 = vmatprep.mubr.msk.f32.mxu1 %vm22840_vm1, %v30171_v2  ;;  %18737 = vmatprep.mubr.msk.f32.mxu0 %vm22840_vm1, %v30171_v2  ;;  %30508 = vst [vmem:[#allocation257_spill] sm:$0xff] %v25611_v1 }
 0x2bb   : > { %17520 = vmatmul.mubr.msk.f32.gmra.mrb[52].mxu1 %vm530_vm3, %v30505_v41  ;;  %18738 = vmatmul.mubr.msk.f32.gmra.mrb[8].mxu0 %vm530_vm3, %v25600_v15  ;;  %v30509_v41 = vld [vmem:[#allocation91_spill] sm:$0xff]  ;;  %v25622_v15 = vld [vmem:[%s22973_s24 + $0x40] sm:$0xff] }
 0x2bc   : > { %17522 = vmatprep.mubr.msk.f32.mxu1 %vm22840_vm1, %v30171_v2  ;;  %18740 = vmatprep.mubr.msk.f32.mxu0 %vm22840_vm1, %v30171_v2  ;;  %30510 = vst [vmem:[#allocation258_spill] sm:$0xff] %v25622_v15 }
 0x2bf   : > { %17523 = vmatmul.mubr.msk.f32.gmra.mrb[54].mxu1 %vm530_vm3, %v30507_v28  ;;  %18741 = vmatmul.mubr.msk.f32.gmra.mrb[10].mxu0 %vm530_vm3, %v25611_v1  ;;  %v30511_v28 = vld [vmem:[#allocation92_spill] sm:$0xff]  ;;  %v25633_v1 = vld [vmem:[%s22973_s24 + $0x48] sm:$0xff] }
 0x2c0   : > { %17525 = vmatprep.mubr.msk.f32.mxu1 %vm22840_vm1, %v30171_v2  ;;  %18743 = vmatprep.mubr.msk.f32.mxu0 %vm22840_vm1, %v30171_v2  ;;  %30512 = vst [vmem:[#allocation259_spill] sm:$0xff] %v25633_v1 }
 0x2c3   : > { %17526 = vmatmul.mubr.msk.f32.gmra.mrb[56].mxu1 %vm530_vm3, %v30509_v41  ;;  %18744 = vmatmul.mubr.msk.f32.gmra.mrb[12].mxu0 %vm530_vm3, %v25622_v15  ;;  %v30513_v41 = vld [vmem:[#allocation93_spill] sm:$0xff]  ;;  %v25644_v15 = vld [vmem:[%s22973_s24 + $0x50] sm:$0xff] }
 0x2c4   : > { %17528 = vmatprep.mubr.msk.f32.mxu1 %vm22840_vm1, %v30171_v2  ;;  %18746 = vmatprep.mubr.msk.f32.mxu0 %vm22840_vm1, %v30171_v2  ;;  %30514 = vst [vmem:[#allocation260_spill] sm:$0xff] %v25644_v15 }
 0x2c7   : > { %17529 = vmatmul.mubr.msk.f32.gmra.mrb[58].mxu1 %vm530_vm3, %v30511_v28  ;;  %18747 = vmatmul.mubr.msk.f32.gmra.mrb[14].mxu0 %vm530_vm3, %v25633_v1  ;;  %v30515_v28 = vld [vmem:[#allocation94_spill] sm:$0xff]  ;;  %v25655_v1 = vld [vmem:[%s22973_s24 + $0x58] sm:$0xff] }
 0x2c8   : > { %17531 = vmatprep.mubr.msk.f32.mxu1 %vm22840_vm1, %v30171_v2  ;;  %18749 = vmatprep.mubr.msk.f32.mxu0 %vm22840_vm1, %v30171_v2  ;;  %30516 = vst [vmem:[#allocation261_spill] sm:$0xff] %v25655_v1 }
 0x2cb   : > { %17532 = vmatmul.mubr.msk.f32.gmra.mrb[60].mxu1 %vm530_vm3, %v30513_v41  ;;  %18750 = vmatmul.mubr.msk.f32.gmra.mrb[16].mxu0 %vm530_vm3, %v25644_v15  ;;  %v30517_v41 = vld [vmem:[#allocation95_spill] sm:$0xff]  ;;  %v25666_v15 = vld [vmem:[%s22973_s24 + $0x60] sm:$0xff] }
 0x2cc   : > { %17534 = vmatprep.mubr.msk.f32.mxu1 %vm22840_vm1, %v30171_v2  ;;  %18752 = vmatprep.mubr.msk.f32.mxu0 %vm22840_vm1, %v30171_v2  ;;  %30518 = vst [vmem:[#allocation262_spill] sm:$0xff] %v25666_v15 }
 0x2cf   : > { %17535 = vmatmul.mubr.msk.f32.gmra.mrb[62].mxu1 %vm530_vm3, %v30515_v28  ;;  %18753 = vmatmul.mubr.msk.f32.gmra.mrb[18].mxu0 %vm530_vm3, %v25655_v1  ;;  %v30519_v28 = vld [vmem:[#allocation97_spill] sm:$0xff]  ;;  %v25677_v1 = vld [vmem:[%s22973_s24 + $0x68] sm:$0xff] }
 0x2d0   : > { %17537 = vmatprep.mubr.msk.f32.mxu1 %vm22840_vm1, %v30171_v2  ;;  %18755 = vmatprep.mubr.msk.f32.mxu0 %vm22840_vm1, %v30171_v2  ;;  %30520 = vst [vmem:[#allocation263_spill] sm:$0xff] %v25677_v1 }
 0x2d3   : > { %17538 = vmatmul.mubr.msk.f32.gmra.mrb[64].mxu1 %vm530_vm3, %v30517_v41  ;;  %18756 = vmatmul.mubr.msk.f32.gmra.mrb[20].mxu0 %vm530_vm3, %v25666_v15  ;;  %v2420_v41 = vrot.slane %v25258_v56, 5  ;;  %v30521_v15 = vld [vmem:[#allocation96_spill] sm:$0xff] }
 0x2d4   : > { %17540 = vmatprep.mubr.msk.f32.mxu1 %vm22840_vm1, %v30171_v2  ;;  %18758 = vmatprep.mubr.msk.f32.mxu0 %vm22840_vm1, %v30171_v2 }
 0x2d7   : > { %17541 = vmatmul.mubr.msk.f32.gmra.mrb[66].mxu1 %vm530_vm3, %v30519_v28  ;;  %18759 = vmatmul.mubr.msk.f32.gmra.mrb[22].mxu0 %vm530_vm3, %v25677_v1  ;;  %v30522_v28 = vrot.slane %v22979_v4, 5  ;;  %v25713_v4 = vld [vmem:[%s22973_s24 + $0x80] sm:$0xff] }
 0x2d8   : > { %17543 = vmatprep.mubr.msk.f32.mxu1 %vm22840_vm1, %v30171_v2  ;;  %18761 = vmatprep.mubr.msk.f32.mxu0 %vm22840_vm1, %v30171_v2 }
 0x2d9   : > { %v2422_v1 = vsel %vm2419_vm5, %v2420_v41, %v30522_v28  ;;  %v30524_v28 = vld [vmem:[#allocation101_spill] sm:$0xff] }
 0x2da   : > { %v14558_v41 = vld [vmem:[%s29719_s1 + $0x18] sm:$0xf] }
 0x2db   : > { %17544 = vmatmul.mubr.msk.f32.gmra.mrb[68].mxu1 %vm530_vm3, %v30521_v15  ;;  %18762 = vmatmul.mubr.msk.f32.gmra.mrb[24].mxu0 %vm530_vm3, %v25689_v55  ;;  %v30523_v15 = vld [vmem:[#allocation100_spill] sm:$0xff] }
 0x2dc   : > { %17548 = vmatprep.mubr.msk.f32.mxu1 %vm22840_vm1, %v30171_v2  ;;  %18764 = vmatprep.mubr.msk.f32.mxu0 %vm22840_vm1, %v30171_v2 }
 0x2df   : > { %17549 = vmatmul.mubr.msk.f32.vlgmr.msra.gmra.mrb[0].mxu1 %vm530_vm3, %v2422_v1  ;;  %18765 = vmatmul.mubr.msk.f32.gmra.mrb[26].mxu0 %vm530_vm3, %v25702_v35  ;;  %v25724_v1 = vld [vmem:[%s22973_s24 + $0x88] sm:$0xff] }
 0x2e0   : > { %17551 = vmatprep.mubr.msk.f32.mxu1 %vm22840_vm1, %v30171_v2  ;;  %18767 = vmatprep.mubr.msk.f32.mxu0 %vm22840_vm1, %v30171_v2  ;;  %30525 = vst [vmem:[#allocation96_spill] sm:$0xff] %v25724_v1 }
 0x2e1   : > { %17654 = vmatpush3.msk.msra.mxu1 %vm601_vm0, %v14558_v41  ;;  %v25751_v41 = vld [vmem:[%s22973_s24 + $0x98] sm:$0xff] }
 0x2e2   : > { %17760 = vmatprep.subr.mxu1 %v30171_v2  ;;  %30529 = vst [vmem:[#allocation264_spill] sm:$0xff] %v25751_v41 }
 0x2e3   : > { %17552 = vmatmul.mubr.msk.f32.gmra.mrb[2].mxu1 %vm530_vm3, %v30523_v15  ;;  %18768 = vmatmul.mubr.msk.f32.gmra.mrb[28].mxu0 %vm530_vm3, %v25713_v4  ;;  %v30526_v15 = vld [vmem:[#allocation102_spill] sm:$0xff] }
 0x2e4   : > { %17554 = vmatprep.mubr.msk.f32.mxu1 %vm22840_vm1, %v30171_v2  ;;  %18770 = vmatprep.mubr.msk.f32.mxu0 %vm22840_vm1, %v30171_v2 }
 0x2e7   : > { %17555 = vmatmul.mubr.msk.f32.gmra.mrb[4].mxu1 %vm530_vm3, %v30524_v28  ;;  %18771 = vmatmul.mubr.msk.f32.gmra.mrb[30].mxu0 %vm530_vm3, %v25724_v1  ;;  %v25740_v28 = vld [vmem:[%s22973_s24 + $0x90] sm:$0xff] }
 0x2e8   : > { %17557 = vmatprep.mubr.msk.f32.mxu1 %vm22840_vm1, %v30171_v2  ;;  %18773 = vmatprep.mubr.msk.f32.mxu0 %vm22840_vm1, %v30171_v2  ;;  %30527 = vst [vmem:[#allocation100_spill] sm:$0xff] %v25740_v28  ;;  %v30528_v1 = vld [vmem:[#allocation103_spill] sm:$0xff] }
 0x2eb   : > { %17558 = vmatmul.mubr.msk.f32.gmra.mrb[6].mxu1 %vm530_vm3, %v30526_v15  ;;  %18774 = vmatmul.mubr.msk.f32.gmra.mrb[32].mxu0 %vm530_vm3, %v25740_v28  ;;  %v30530_v15 = vld [vmem:[#allocation104_spill] sm:$0xff]  ;;  %v25762_v28 = vld [vmem:[%s22973_s24 + $0xa0] sm:$0xff] }
 0x2ec   : > { %17560 = vmatprep.mubr.msk.f32.mxu1 %vm22840_vm1, %v30171_v2  ;;  %18776 = vmatprep.mubr.msk.f32.mxu0 %vm22840_vm1, %v30171_v2  ;;  %30531 = vst [vmem:[#allocation265_spill] sm:$0xff] %v25762_v28 }
 0x2ef   : > { %17561 = vmatmul.mubr.msk.f32.gmra.mrb[8].mxu1 %vm530_vm3, %v30528_v1  ;;  %18777 = vmatmul.mubr.msk.f32.gmra.mrb[34].mxu0 %vm530_vm3, %v25751_v41  ;;  %v30532_v1 = vld [vmem:[#allocation105_spill] sm:$0xff]  ;;  %v25773_v41 = vld [vmem:[%s22973_s24 + $0xa8] sm:$0xff] }
 0x2f0   : > { %17563 = vmatprep.mubr.msk.f32.mxu1 %vm22840_vm1, %v30171_v2  ;;  %18779 = vmatprep.mubr.msk.f32.mxu0 %vm22840_vm1, %v30171_v2  ;;  %30533 = vst [vmem:[#allocation266_spill] sm:$0xff] %v25773_v41 }
 0x2f3   : > { %17564 = vmatmul.mubr.msk.f32.gmra.mrb[10].mxu1 %vm530_vm3, %v30530_v15  ;;  %18780 = vmatmul.mubr.msk.f32.gmra.mrb[36].mxu0 %vm530_vm3, %v25762_v28  ;;  %v30534_v15 = vld [vmem:[#allocation106_spill] sm:$0xff]  ;;  %v25784_v28 = vld [vmem:[%s22973_s24 + $0xb0] sm:$0xff] }
 0x2f4   : > { %17566 = vmatprep.mubr.msk.f32.mxu1 %vm22840_vm1, %v30171_v2  ;;  %18782 = vmatprep.mubr.msk.f32.mxu0 %vm22840_vm1, %v30171_v2  ;;  %30535 = vst [vmem:[#allocation267_spill] sm:$0xff] %v25784_v28 }
 0x2f7   : > { %17567 = vmatmul.mubr.msk.f32.gmra.mrb[12].mxu1 %vm530_vm3, %v30532_v1  ;;  %18783 = vmatmul.mubr.msk.f32.gmra.mrb[38].mxu0 %vm530_vm3, %v25773_v41  ;;  %v30536_v1 = vld [vmem:[#allocation107_spill] sm:$0xff]  ;;  %v25795_v41 = vld [vmem:[%s22973_s24 + $0xb8] sm:$0xff] }
 0x2f8   : > { %17569 = vmatprep.mubr.msk.f32.mxu1 %vm22840_vm1, %v30171_v2  ;;  %18785 = vmatprep.mubr.msk.f32.mxu0 %vm22840_vm1, %v30171_v2  ;;  %30537 = vst [vmem:[#allocation268_spill] sm:$0xff] %v25795_v41 }
 0x2fb   : > { %17570 = vmatmul.mubr.msk.f32.gmra.mrb[14].mxu1 %vm530_vm3, %v30534_v15  ;;  %18786 = vmatmul.mubr.msk.f32.gmra.mrb[40].mxu0 %vm530_vm3, %v25784_v28  ;;  %v30538_v15 = vld [vmem:[#allocation108_spill] sm:$0xff]  ;;  %v22717_v28 = vld [vmem:[%s22973_s24 + $0xc0] sm:$0xff] }
 0x2fc   : > { %17572 = vmatprep.mubr.msk.f32.mxu1 %vm22840_vm1, %v30171_v2  ;;  %18788 = vmatprep.mubr.msk.f32.mxu0 %vm22840_vm1, %v30171_v2 }
 0x2ff   : > { %17573 = vmatmul.mubr.msk.f32.gmra.mrb[16].mxu1 %vm530_vm3, %v30536_v1  ;;  %18789 = vmatmul.mubr.msk.f32.gmra.mrb[42].mxu0 %vm530_vm3, %v25795_v41  ;;  %v30539_v1 = vld [vmem:[#allocation109_spill] sm:$0xff]  ;;  %v22718_v41 = vld [vmem:[%s22973_s24 + $0xc8] sm:$0xff] }
 0x300   : > { %17575 = vmatprep.mubr.msk.f32.mxu1 %vm22840_vm1, %v30171_v2  ;;  %18791 = vmatprep.mubr.msk.f32.mxu0 %vm22840_vm1, %v30171_v2 }
 0x303   : > { %17576 = vmatmul.mubr.msk.f32.gmra.mrb[18].mxu1 %vm530_vm3, %v30538_v15  ;;  %18792 = vmatmul.mubr.msk.f32.gmra.mrb[44].mxu0 %vm530_vm3, %v22717_v28  ;;  %v30540_v28 = vld [vmem:[#allocation110_spill] sm:$0xff]  ;;  %v22719_v15 = vld [vmem:[%s22973_s24 + $0xd0] sm:$0xff] }
 0x304   : > { %17578 = vmatprep.mubr.msk.f32.mxu1 %vm22840_vm1, %v30171_v2  ;;  %18794 = vmatprep.mubr.msk.f32.mxu0 %vm22840_vm1, %v30171_v2 }
 0x307   : > { %17579 = vmatmul.mubr.msk.f32.gmra.mrb[20].mxu1 %vm530_vm3, %v30539_v1  ;;  %18795 = vmatmul.mubr.msk.f32.gmra.mrb[46].mxu0 %vm530_vm3, %v22718_v41  ;;  %v30541_v41 = vld [vmem:[#allocation111_spill] sm:$0xff]  ;;  %v22720_v1 = vld [vmem:[%s22973_s24 + $0xd8] sm:$0xff] }
 0x308   : > { %17581 = vmatprep.mubr.msk.f32.mxu1 %vm22840_vm1, %v30171_v2  ;;  %18797 = vmatprep.mubr.msk.f32.mxu0 %vm22840_vm1, %v30171_v2 }
 0x30b   : > { %17582 = vmatmul.mubr.msk.f32.gmra.mrb[22].mxu1 %vm530_vm3, %v30540_v28  ;;  %18798 = vmatmul.mubr.msk.f32.gmra.mrb[48].mxu0 %vm530_vm3, %v22719_v15  ;;  %v30542_v15 = vld [vmem:[#allocation112_spill] sm:$0xff]  ;;  %v22721_v28 = vld [vmem:[%s22973_s24 + $0xe0] sm:$0xff] }
 0x30c   : > { %17584 = vmatprep.mubr.msk.f32.mxu1 %vm22840_vm1, %v30171_v2  ;;  %18800 = vmatprep.mubr.msk.f32.mxu0 %vm22840_vm1, %v30171_v2 }
 0x30f   : > { %17585 = vmatmul.mubr.msk.f32.gmra.mrb[24].mxu1 %vm530_vm3, %v30541_v41  ;;  %18801 = vmatmul.mubr.msk.f32.gmra.mrb[50].mxu0 %vm530_vm3, %v22720_v1  ;;  %v30543_v1 = vld [vmem:[#allocation113_spill] sm:$0xff]  ;;  %v22722_v41 = vld [vmem:[%s22973_s24 + $0xe8] sm:$0xff] }
 0x310   : > { %17587 = vmatprep.mubr.msk.f32.mxu1 %vm22840_vm1, %v30171_v2  ;;  %18803 = vmatprep.mubr.msk.f32.mxu0 %vm22840_vm1, %v30171_v2 }
 0x313   : > { %17588 = vmatmul.mubr.msk.f32.gmra.mrb[26].mxu1 %vm530_vm3, %v30542_v15  ;;  %18804 = vmatmul.mubr.msk.f32.gmra.mrb[52].mxu0 %vm530_vm3, %v22721_v28  ;;  %v30544_v28 = vld [vmem:[#allocation115_spill] sm:$0xff] }
 0x314   : > { %17590 = vmatprep.mubr.msk.f32.mxu1 %vm22840_vm1, %v30171_v2  ;;  %18806 = vmatprep.mubr.msk.f32.mxu0 %vm22840_vm1, %v30171_v2  ;;  %v22723_v15 = vld [vmem:[%s22973_s24 + $0xf0] sm:$0xff] }
 0x317   : > { %17591 = vmatmul.mubr.msk.f32.gmra.mrb[28].mxu1 %vm530_vm3, %v30543_v1  ;;  %18807 = vmatmul.mubr.msk.f32.gmra.mrb[54].mxu0 %vm530_vm3, %v22722_v41  ;;  %v30545_v1 = vld [vmem:[#allocation117_spill] sm:$0xff] }
 0x318   : > { %17593 = vmatprep.mubr.msk.f32.mxu1 %vm22840_vm1, %v30171_v2  ;;  %18809 = vmatprep.mubr.msk.f32.mxu0 %vm22840_vm1, %v30171_v2  ;;  %v22724_v41 = vld [vmem:[%s22973_s24 + $0xf8] sm:$0xff] }
 0x31b   : > { %17594 = vmatmul.mubr.msk.f32.gmra.mrb[30].mxu1 %vm530_vm3, %v30544_v28  ;;  %18810 = vmatmul.mubr.msk.f32.gmra.mrb[56].mxu0 %vm530_vm3, %v22723_v15  ;;  %v30546_v28 = vld [vmem:[#allocation119_spill] sm:$0xff]  ;;  %v22725_v15 = vld [vmem:[%s22973_s24 + $0x100] sm:$0xff] }
 0x31c   : > { %17596 = vmatprep.mubr.msk.f32.mxu1 %vm22840_vm1, %v30171_v2  ;;  %18812 = vmatprep.mubr.msk.f32.mxu0 %vm22840_vm1, %v30171_v2 }
 0x31f   : > { %17597 = vmatmul.mubr.msk.f32.gmra.mrb[32].mxu1 %vm530_vm3, %v30545_v1  ;;  %18813 = vmatmul.mubr.msk.f32.gmra.mrb[58].mxu0 %vm530_vm3, %v22724_v41  ;;  %v30547_v1 = vld [vmem:[#allocation121_spill] sm:$0xff]  ;;  %v30548_v41 = vld [vmem:[#allocation123_spill] sm:$0xff] }
 0x320   : > { %17599 = vmatprep.mubr.msk.f32.mxu1 %vm22840_vm1, %v30171_v2  ;;  %18815 = vmatprep.mubr.msk.f32.mxu0 %vm22840_vm1, %v30171_v2 }
 0x323   : > { %17600 = vmatmul.mubr.msk.f32.gmra.mrb[34].mxu1 %vm530_vm3, %v30546_v28  ;;  %18816 = vmatmul.mubr.msk.f32.gmra.mrb[60].mxu0 %vm530_vm3, %v22725_v15  ;;  %v30549_v15 = vld [vmem:[#allocation125_spill] sm:$0xff] }
 0x324   : > { %17602 = vmatprep.mubr.msk.f32.mxu1 %vm22840_vm1, %v30171_v2  ;;  %18818 = vmatprep.mubr.msk.f32.mxu0 %vm22840_vm1, %v30171_v2  ;;  %v30558_v28 = vld [vmem:[#allocation17_spill] sm:$0xff] }
 0x327   : > { %17603 = vmatmul.mubr.msk.f32.gmra.mrb[36].mxu1 %vm530_vm3, %v30547_v1  ;;  %18819 = vmatmul.mubr.msk.f32.gmra.mrb[62].mxu0 %vm530_vm3, %v24988_v23  ;;  %v30550_v23 = vld [vmem:[#allocation128_spill] sm:$0xff]  ;;  %v30554_v1 = vld [vmem:[#allocation13_spill] sm:$0xff] }
 0x328   : > { %17605 = vmatprep.mubr.msk.f32.mxu1 %vm22840_vm1, %v30171_v2  ;;  %18821 = vmatprep.mubr.msk.f32.mxu0 %vm22840_vm1, %v30171_v2 }
 0x32b   : > { %17606 = vmatmul.mubr.msk.f32.gmra.mrb[38].mxu1 %vm530_vm3, %v30548_v41  ;;  %18822 = vmatmul.mubr.msk.f32.gmra.mrb[64].mxu0 %vm530_vm3, %v25003_v63  ;;  %v15002_v63 = vld [vmem:[%s29719_s1 + $0x48] sm:$0xf] }
 0x32c   : > { %17608 = vmatprep.mubr.msk.f32.mxu1 %vm22840_vm1, %v30171_v2  ;;  %18824 = vmatprep.mubr.msk.f32.mxu0 %vm22840_vm1, %v30171_v2  ;;  %v30552_v41 = vld [vmem:[#allocation11_spill] sm:$0xff] }
 0x32f   : > { %17609 = vmatmul.mubr.msk.f32.gmra.mrb[40].mxu1 %vm530_vm3, %v30549_v15  ;;  %18825 = vmatmul.mubr.msk.f32.gmra.mrb[66].mxu0 %vm530_vm3, %v25509_v38  ;;  %v30551_v15 = vld [vmem:[#allocation131_spill] sm:$0xff] }
 0x330   : > { %17611 = vmatprep.mubr.msk.f32.mxu1 %vm22840_vm1, %v30171_v2  ;;  %18827 = vmatprep.mubr.msk.f32.mxu0 %vm22840_vm1, %v30171_v2 }
 0x333   : > { %17612 = vmatmul.mubr.msk.f32.gmra.mrb[42].mxu1 %vm530_vm3, %v30550_v23  ;;  %18828 = vmatmul.mubr.msk.f32.gmra.mrb[68].mxu0 %vm530_vm3, %v25513_v14  ;;  %v30553_v23 = vld [vmem:[#allocation134_spill] sm:$0xff] }
 0x334   : > { %17614 = vmatprep.mubr.msk.f32.mxu1 %vm22840_vm1, %v30171_v2  ;;  %18832 = vmatprep.mubr.msk.f32.mxu0 %vm22840_vm1, %v30171_v2 }
 0x337   : > { %17615 = vmatmul.mubr.msk.f32.gmra.mrb[44].mxu1 %vm530_vm3, %v30551_v15  ;;  %18833 = vmatmul.mubr.msk.f32.vlgmr.msra.gmra.mrb[0].mxu0 %vm530_vm3, %v30552_v41  ;;  %v30556_v15 = vld [vmem:[#allocation15_spill] sm:$0xff]  ;;  %v30578_v41 = vld [vmem:[#allocation37_spill] sm:$0xff] }
 0x338   : > { %18938 = vmatpush3.msk.msra.mxu0 %vm601_vm0, %v15002_v63  ;;  %17617 = vmatprep.mubr.msk.f32.mxu1 %vm22840_vm1, %v30171_v2  ;;  %v30555_v63 = vld [vmem:[#allocation137_spill] sm:$0xff] }
 0x339   : > { %18835 = vmatprep.mubr.msk.f32.mxu0 %vm22840_vm1, %v30171_v2  ;;  %19044 = vmatprep.subr.mxu0 %v30171_v2 }
 0x33b   : > { %17618 = vmatmul.mubr.msk.f32.gmra.mrb[46].mxu1 %vm530_vm3, %v30553_v23  ;;  %18836 = vmatmul.mubr.msk.f32.gmra.mrb[2].mxu0 %vm530_vm3, %v30554_v1  ;;  %v30557_v23 = vld [vmem:[#allocation139_spill] sm:$0xff] }
 0x33c   : > { %17620 = vmatprep.mubr.msk.f32.mxu1 %vm22840_vm1, %v30171_v2  ;;  %18838 = vmatprep.mubr.msk.f32.mxu0 %vm22840_vm1, %v30171_v2  ;;  %v30576_v1 = vld [vmem:[#allocation35_spill] sm:$0xff] }
 0x33f   : > { %17621 = vmatmul.mubr.msk.f32.gmra.mrb[48].mxu1 %vm530_vm3, %v30555_v63  ;;  %18839 = vmatmul.mubr.msk.f32.gmra.mrb[4].mxu0 %vm530_vm3, %v30556_v15  ;;  %v30559_v63 = vld [vmem:[#allocation141_spill] sm:$0xff]  ;;  %v30560_v15 = vld [vmem:[#allocation19_spill] sm:$0xff] }
 0x340   : > { %17623 = vmatprep.mubr.msk.f32.mxu1 %vm22840_vm1, %v30171_v2  ;;  %18841 = vmatprep.mubr.msk.f32.mxu0 %vm22840_vm1, %v30171_v2 }
 0x343   : > { %17624 = vmatmul.mubr.msk.f32.gmra.mrb[50].mxu1 %vm530_vm3, %v30557_v23  ;;  %18842 = vmatmul.mubr.msk.f32.gmra.mrb[6].mxu0 %vm530_vm3, %v30558_v28  ;;  %v30561_v23 = vld [vmem:[#allocation143_spill] sm:$0xff]  ;;  %v30562_v28 = vld [vmem:[#allocation21_spill] sm:$0xff] }
 0x344   : > { %17626 = vmatprep.mubr.msk.f32.mxu1 %vm22840_vm1, %v30171_v2  ;;  %18844 = vmatprep.mubr.msk.f32.mxu0 %vm22840_vm1, %v30171_v2 }
 0x347   : > { %17627 = vmatmul.mubr.msk.f32.gmra.mrb[52].mxu1 %vm530_vm3, %v30559_v63  ;;  %18845 = vmatmul.mubr.msk.f32.gmra.mrb[8].mxu0 %vm530_vm3, %v30560_v15  ;;  %v30563_v63 = vld [vmem:[#allocation145_spill] sm:$0xff]  ;;  %v30564_v15 = vld [vmem:[#allocation23_spill] sm:$0xff] }
 0x348   : > { %17629 = vmatprep.mubr.msk.f32.mxu1 %vm22840_vm1, %v30171_v2  ;;  %18847 = vmatprep.mubr.msk.f32.mxu0 %vm22840_vm1, %v30171_v2 }
 0x34b   : > { %17630 = vmatmul.mubr.msk.f32.gmra.mrb[54].mxu1 %vm530_vm3, %v30561_v23  ;;  %18848 = vmatmul.mubr.msk.f32.gmra.mrb[10].mxu0 %vm530_vm3, %v30562_v28  ;;  %v30565_v23 = vld [vmem:[#allocation147_spill] sm:$0xff]  ;;  %v30566_v28 = vld [vmem:[#allocation25_spill] sm:$0xff] }
 0x34c   : > { %17632 = vmatprep.mubr.msk.f32.mxu1 %vm22840_vm1, %v30171_v2  ;;  %18850 = vmatprep.mubr.msk.f32.mxu0 %vm22840_vm1, %v30171_v2 }
 0x34f   : > { %17633 = vmatmul.mubr.msk.f32.gmra.mrb[56].mxu1 %vm530_vm3, %v30563_v63  ;;  %18851 = vmatmul.mubr.msk.f32.gmra.mrb[12].mxu0 %vm530_vm3, %v30564_v15  ;;  %v30567_v63 = vld [vmem:[#allocation149_spill] sm:$0xff]  ;;  %v30568_v15 = vld [vmem:[#allocation27_spill] sm:$0xff] }
 0x350   : > { %17635 = vmatprep.mubr.msk.f32.mxu1 %vm22840_vm1, %v30171_v2  ;;  %18853 = vmatprep.mubr.msk.f32.mxu0 %vm22840_vm1, %v30171_v2 }
 0x353   : > { %17636 = vmatmul.mubr.msk.f32.gmra.mrb[58].mxu1 %vm530_vm3, %v30565_v23  ;;  %18854 = vmatmul.mubr.msk.f32.gmra.mrb[14].mxu0 %vm530_vm3, %v30566_v28  ;;  %v30569_v23 = vld [vmem:[#allocation151_spill] sm:$0xff]  ;;  %v30570_v28 = vld [vmem:[#allocation29_spill] sm:$0xff] }
 0x354   : > { %17638 = vmatprep.mubr.msk.f32.mxu1 %vm22840_vm1, %v30171_v2  ;;  %18856 = vmatprep.mubr.msk.f32.mxu0 %vm22840_vm1, %v30171_v2 }
 0x357   : > { %17639 = vmatmul.mubr.msk.f32.gmra.mrb[60].mxu1 %vm530_vm3, %v30567_v63  ;;  %18857 = vmatmul.mubr.msk.f32.gmra.mrb[16].mxu0 %vm530_vm3, %v30568_v15  ;;  %v30571_v63 = vld [vmem:[#allocation153_spill] sm:$0xff]  ;;  %v30572_v15 = vld [vmem:[#allocation31_spill] sm:$0xff] }
 0x358   : > { %17641 = vmatprep.mubr.msk.f32.mxu1 %vm22840_vm1, %v30171_v2  ;;  %18859 = vmatprep.mubr.msk.f32.mxu0 %vm22840_vm1, %v30171_v2 }
 0x35b   : > { %17642 = vmatmul.mubr.msk.f32.gmra.mrb[62].mxu1 %vm530_vm3, %v30569_v23  ;;  %18860 = vmatmul.mubr.msk.f32.gmra.mrb[18].mxu0 %vm530_vm3, %v30570_v28  ;;  %v30573_v23 = vld [vmem:[#allocation156_spill] sm:$0xff]  ;;  %v30574_v28 = vld [vmem:[#allocation33_spill] sm:$0xff] }
 0x35c   : > { %17644 = vmatprep.mubr.msk.f32.mxu1 %vm22840_vm1, %v30171_v2  ;;  %18862 = vmatprep.mubr.msk.f32.mxu0 %vm22840_vm1, %v30171_v2 }
 0x35f   : > { %17645 = vmatmul.mubr.msk.f32.gmra.mrb[64].mxu1 %vm530_vm3, %v30571_v63  ;;  %18863 = vmatmul.mubr.msk.f32.gmra.mrb[20].mxu0 %vm530_vm3, %v30572_v15  ;;  %v2840_v63 = vrot.slane %v25258_v56, 6  ;;  %v30575_v15 = vld [vmem:[#allocation154_spill] sm:$0xff] }
 0x360   : > { %17647 = vmatprep.mubr.msk.f32.mxu1 %vm22840_vm1, %v30171_v2  ;;  %18865 = vmatprep.mubr.msk.f32.mxu0 %vm22840_vm1, %v30171_v2 }
 0x363   : > { %17648 = vmatmul.mubr.msk.f32.gmra.mrb[66].mxu1 %vm530_vm3, %v30573_v23  ;;  %18866 = vmatmul.mubr.msk.f32.gmra.mrb[22].mxu0 %vm530_vm3, %v30574_v28  ;;  %v30577_v23 = vrot.slane %v24096_v19, 6 }
 0x364   : > { %17650 = vmatprep.mubr.msk.f32.mxu1 %vm22840_vm1, %v30171_v2  ;;  %18868 = vmatprep.mubr.msk.f32.mxu0 %vm22840_vm1, %v30171_v2 }
 0x365   : > { %v2842_v28 = vsel %vm2839_vm7, %v2840_v63, %v30577_v23  ;;  %v30582_v23 = vld [vmem:[#allocation41_spill] sm:$0xff] }
 0x366   : > { %v14595_v63 = vld [vmem:[%s29719_s1 + $0x1c] sm:$0xf] }
 0x367   : > { %17651 = vmatmul.mubr.msk.f32.gmra.mrb[68].mxu1 %vm530_vm3, %v30575_v15  ;;  %18869 = vmatmul.mubr.msk.f32.gmra.mrb[24].mxu0 %vm530_vm3, %v30576_v1  ;;  %v30579_v15 = vld [vmem:[#allocation162_spill] sm:$0xff]  ;;  %v30580_v1 = vld [vmem:[#allocation39_spill] sm:$0xff] }
 0x368   : > { %17655 = vmatprep.mubr.msk.f32.mxu1 %vm22840_vm1, %v30171_v2  ;;  %18871 = vmatprep.mubr.msk.f32.mxu0 %vm22840_vm1, %v30171_v2 }
 0x36b   : > { %17656 = vmatmul.mubr.msk.f32.vlgmr.msra.gmra.mrb[0].mxu1 %vm530_vm3, %v2842_v28  ;;  %18872 = vmatmul.mubr.msk.f32.gmra.mrb[26].mxu0 %vm530_vm3, %v30578_v41  ;;  %v30581_v28 = vld [vmem:[#allocation164_spill] sm:$0xff] }
 0x36c   : > { %17658 = vmatprep.mubr.msk.f32.mxu1 %vm22840_vm1, %v30171_v2  ;;  %18874 = vmatprep.mubr.msk.f32.mxu0 %vm22840_vm1, %v30171_v2 }
 0x36d   : > { %17761 = vmatpush3.msk.msra.mxu1 %vm601_vm0, %v14595_v63  ;;  %v30587_v63 = vld [vmem:[#allocation170_spill] sm:$0xff] }
 0x36e   : > { %17867 = vmatprep.subr.mxu1 %v30171_v2 }
 0x36f   : > { %17659 = vmatmul.mubr.msk.f32.gmra.mrb[2].mxu1 %vm530_vm3, %v30579_v15  ;;  %18875 = vmatmul.mubr.msk.f32.gmra.mrb[28].mxu0 %vm530_vm3, %v30580_v1  ;;  %v30583_v15 = vld [vmem:[#allocation166_spill] sm:$0xff]  ;;  %v30586_v1 = vld [vmem:[#allocation45_spill] sm:$0xff] }
 0x370   : > { %17661 = vmatprep.mubr.msk.f32.mxu1 %vm22840_vm1, %v30171_v2  ;;  %18877 = vmatprep.mubr.msk.f32.mxu0 %vm22840_vm1, %v30171_v2 }
 0x373   : > { %17662 = vmatmul.mubr.msk.f32.gmra.mrb[4].mxu1 %vm530_vm3, %v30581_v28  ;;  %18878 = vmatmul.mubr.msk.f32.gmra.mrb[30].mxu0 %vm530_vm3, %v30582_v23  ;;  %v30584_v28 = vld [vmem:[#allocation43_spill] sm:$0xff]  ;;  %v30585_v23 = vld [vmem:[#allocation168_spill] sm:$0xff] }
 0x374   : > { %17664 = vmatprep.mubr.msk.f32.mxu1 %vm22840_vm1, %v30171_v2  ;;  %18880 = vmatprep.mubr.msk.f32.mxu0 %vm22840_vm1, %v30171_v2 }
 0x377   : > { %17665 = vmatmul.mubr.msk.f32.gmra.mrb[6].mxu1 %vm530_vm3, %v30583_v15  ;;  %18881 = vmatmul.mubr.msk.f32.gmra.mrb[32].mxu0 %vm530_vm3, %v30584_v28  ;;  %v30588_v15 = vld [vmem:[#allocation47_spill] sm:$0xff] }
 0x378   : > { %17667 = vmatprep.mubr.msk.f32.mxu1 %vm22840_vm1, %v30171_v2  ;;  %18883 = vmatprep.mubr.msk.f32.mxu0 %vm22840_vm1, %v30171_v2 }
 0x37b   : > { %17668 = vmatmul.mubr.msk.f32.gmra.mrb[8].mxu1 %vm530_vm3, %v30585_v23  ;;  %18884 = vmatmul.mubr.msk.f32.gmra.mrb[34].mxu0 %vm530_vm3, %v30586_v1  ;;  %v30589_v23 = vld [vmem:[#allocation172_spill] sm:$0xff]  ;;  %v30590_v1 = vld [vmem:[#allocation49_spill] sm:$0xff] }
 0x37c   : > { %17670 = vmatprep.mubr.msk.f32.mxu1 %vm22840_vm1, %v30171_v2  ;;  %18886 = vmatprep.mubr.msk.f32.mxu0 %vm22840_vm1, %v30171_v2 }
 0x37f   : > { %17671 = vmatmul.mubr.msk.f32.gmra.mrb[10].mxu1 %vm530_vm3, %v30587_v63  ;;  %18887 = vmatmul.mubr.msk.f32.gmra.mrb[36].mxu0 %vm530_vm3, %v30588_v15  ;;  %v30591_v63 = vld [vmem:[#allocation174_spill] sm:$0xff]  ;;  %v30592_v15 = vld [vmem:[#allocation51_spill] sm:$0xff] }
 0x380   : > { %17673 = vmatprep.mubr.msk.f32.mxu1 %vm22840_vm1, %v30171_v2  ;;  %18889 = vmatprep.mubr.msk.f32.mxu0 %vm22840_vm1, %v30171_v2 }
 0x383   : > { %17674 = vmatmul.mubr.msk.f32.gmra.mrb[12].mxu1 %vm530_vm3, %v30589_v23  ;;  %18890 = vmatmul.mubr.msk.f32.gmra.mrb[38].mxu0 %vm530_vm3, %v30590_v1  ;;  %v30593_v23 = vld [vmem:[#allocation176_spill] sm:$0xff]  ;;  %v30594_v1 = vld [vmem:[#allocation53_spill] sm:$0xff] }
 0x384   : > { %17676 = vmatprep.mubr.msk.f32.mxu1 %vm22840_vm1, %v30171_v2  ;;  %18892 = vmatprep.mubr.msk.f32.mxu0 %vm22840_vm1, %v30171_v2 }
 0x387   : > { %17677 = vmatmul.mubr.msk.f32.gmra.mrb[14].mxu1 %vm530_vm3, %v30591_v63  ;;  %18893 = vmatmul.mubr.msk.f32.gmra.mrb[40].mxu0 %vm530_vm3, %v30592_v15  ;;  %v30595_v63 = vld [vmem:[#allocation55_spill] sm:$0xff] }
 0x388   : > { %17679 = vmatprep.mubr.msk.f32.mxu1 %vm22840_vm1, %v30171_v2  ;;  %18895 = vmatprep.mubr.msk.f32.mxu0 %vm22840_vm1, %v30171_v2 }
 0x38b   : > { %17680 = vmatmul.mubr.msk.f32.gmra.mrb[16].mxu1 %vm530_vm3, %v30593_v23  ;;  %18896 = vmatmul.mubr.msk.f32.gmra.mrb[42].mxu0 %vm530_vm3, %v30594_v1  ;;  %v30596_v23 = vld [vmem:[#allocation57_spill] sm:$0xff] }
 0x38c   : > { %17682 = vmatprep.mubr.msk.f32.mxu1 %vm22840_vm1, %v30171_v2  ;;  %18898 = vmatprep.mubr.msk.f32.mxu0 %vm22840_vm1, %v30171_v2 }
 0x38f   : > { %17683 = vmatmul.mubr.msk.f32.gmra.mrb[18].mxu1 %vm530_vm3, %v24695_v58  ;;  %18899 = vmatmul.mubr.msk.f32.gmra.mrb[44].mxu0 %vm530_vm3, %v30595_v63  ;;  %v30597_v58 = vld [vmem:[#allocation59_spill] sm:$0xff] }
 0x390   : > { %17685 = vmatprep.mubr.msk.f32.mxu1 %vm22840_vm1, %v30171_v2  ;;  %18901 = vmatprep.mubr.msk.f32.mxu0 %vm22840_vm1, %v30171_v2 }
 0x393   : > { %17686 = vmatmul.mubr.msk.f32.gmra.mrb[20].mxu1 %vm530_vm3, %v24714_v37  ;;  %18902 = vmatmul.mubr.msk.f32.gmra.mrb[46].mxu0 %vm530_vm3, %v30596_v23  ;;  %v30598_v37 = vld [vmem:[#allocation61_spill] sm:$0xff] }
 0x394   : > { %17688 = vmatprep.mubr.msk.f32.mxu1 %vm22840_vm1, %v30171_v2  ;;  %18904 = vmatprep.mubr.msk.f32.mxu0 %vm22840_vm1, %v30171_v2 }
 0x397   : > { %17689 = vmatmul.mubr.msk.f32.gmra.mrb[22].mxu1 %vm530_vm3, %v24730_v13  ;;  %18905 = vmatmul.mubr.msk.f32.gmra.mrb[48].mxu0 %vm530_vm3, %v30597_v58  ;;  %v30599_v13 = vld [vmem:[#allocation63_spill] sm:$0xff] }
 0x398   : > { %17691 = vmatprep.mubr.msk.f32.mxu1 %vm22840_vm1, %v30171_v2  ;;  %18907 = vmatprep.mubr.msk.f32.mxu0 %vm22840_vm1, %v30171_v2 }
 0x39b   : > { %17692 = vmatmul.mubr.msk.f32.gmra.mrb[24].mxu1 %vm530_vm3, %v24749_v17  ;;  %18908 = vmatmul.mubr.msk.f32.gmra.mrb[50].mxu0 %vm530_vm3, %v30598_v37  ;;  %v30600_v17 = vld [vmem:[#allocation65_spill] sm:$0xff] }
 0x39c   : > { %17694 = vmatprep.mubr.msk.f32.mxu1 %vm22840_vm1, %v30171_v2  ;;  %18910 = vmatprep.mubr.msk.f32.mxu0 %vm22840_vm1, %v30171_v2 }
 0x39f   : > { %17695 = vmatmul.mubr.msk.f32.gmra.mrb[26].mxu1 %vm530_vm3, %v24761_v47  ;;  %18911 = vmatmul.mubr.msk.f32.gmra.mrb[52].mxu0 %vm530_vm3, %v30599_v13  ;;  %v30601_v47 = vld [vmem:[#allocation67_spill] sm:$0xff] }
 0x3a0   : > { %17697 = vmatprep.mubr.msk.f32.mxu1 %vm22840_vm1, %v30171_v2  ;;  %18913 = vmatprep.mubr.msk.f32.mxu0 %vm22840_vm1, %v30171_v2 }
 0x3a3   : > { %17698 = vmatmul.mubr.msk.f32.gmra.mrb[28].mxu1 %vm530_vm3, %v24777_v5  ;;  %18914 = vmatmul.mubr.msk.f32.gmra.mrb[54].mxu0 %vm530_vm3, %v30600_v17  ;;  %v30602_v5 = vld [vmem:[#allocation69_spill] sm:$0xff] }
 0x3a4   : > { %17700 = vmatprep.mubr.msk.f32.mxu1 %vm22840_vm1, %v30171_v2  ;;  %18916 = vmatprep.mubr.msk.f32.mxu0 %vm22840_vm1, %v30171_v2 }
 0x3a7   : > { %17701 = vmatmul.mubr.msk.f32.gmra.mrb[30].mxu1 %vm530_vm3, %v24788_v50  ;;  %18917 = vmatmul.mubr.msk.f32.gmra.mrb[56].mxu0 %vm530_vm3, %v30601_v47  ;;  %v30603_v50 = vld [vmem:[#allocation71_spill] sm:$0xff]  ;;  %v26185_v47 = vrot.slane %v25513_v14, 1 }
 0x3a8   : > { %17703 = vmatprep.mubr.msk.f32.mxu1 %vm22840_vm1, %v30171_v2  ;;  %18919 = vmatprep.mubr.msk.f32.mxu0 %vm22840_vm1, %v30171_v2 }
 0x3a9   : > { %30607 = vst [vmem:[#allocation162_spill] sm:$0xff] %v26185_v47 }
 0x3ab   : > { %17704 = vmatmul.mubr.msk.f32.gmra.mrb[32].mxu1 %vm530_vm3, %v24800_v22  ;;  %18920 = vmatmul.mubr.msk.f32.gmra.mrb[58].mxu0 %vm530_vm3, %v30602_v5  ;;  %v26169_v22 = vrot.slane %v25509_v38, 1  ;;  %v30604_v5 = vld [vmem:[#allocation74_spill] sm:$0xff] }
 0x3ac   : > { %17706 = vmatprep.mubr.msk.f32.mxu1 %vm22840_vm1, %v30171_v2  ;;  %18922 = vmatprep.mubr.msk.f32.mxu0 %vm22840_vm1, %v30171_v2 }
 0x3af   : > { %17707 = vmatmul.mubr.msk.f32.gmra.mrb[34].mxu1 %vm530_vm3, %v24815_v33  ;;  %18923 = vmatmul.mubr.msk.f32.gmra.mrb[60].mxu0 %vm530_vm3, %v30603_v50  ;;  %v30605_v33 = vld [vmem:[#allocation73_spill] sm:$0xff] }
 0x3b0   : > { %17709 = vmatprep.mubr.msk.f32.mxu1 %vm22840_vm1, %v30171_v2  ;;  %18925 = vmatprep.mubr.msk.f32.mxu0 %vm22840_vm1, %v30171_v2  ;;  %v26182_v50 = vsel %vm460_vm2, %v30605_v33, %v26169_v22  ;;  %v26198_v33 = vsel %vm460_vm2, %v26169_v22, %v26185_v47 }
 0x3b1   : > { %30606 = vst [vmem:[#allocation154_spill] sm:$0xff] %v26182_v50  ;;  %30608 = vst [vmem:[#allocation51_spill] sm:$0xff] %v26198_v33 }
 0x3b3   : > { %17710 = vmatmul.mubr.msk.f32.gmra.mrb[36].mxu1 %vm530_vm3, %v24829_v8  ;;  %18926 = vmatmul.mubr.msk.f32.gmra.mrb[62].mxu0 %vm530_vm3, %v30604_v5  ;;  %v30624_v8 = vld [vmem:[#allocation144_spill] sm:$0xff] }
 0x3b4   : > { %17712 = vmatprep.mubr.msk.f32.mxu1 %vm22840_vm1, %v30171_v2  ;;  %18928 = vmatprep.mubr.msk.f32.mxu0 %vm22840_vm1, %v30171_v2 }
 0x3b7   : > { %17713 = vmatmul.mubr.msk.f32.gmra.mrb[38].mxu1 %vm530_vm3, %v24841_v16  ;;  %18929 = vmatmul.mubr.msk.f32.gmra.mrb[64].mxu0 %vm530_vm3, %v26182_v50  ;;  %v30623_v16 = vld [vmem:[#allocation206_spill] sm:$0xff] }
 0x3b8   : > { %17715 = vmatprep.mubr.msk.f32.mxu1 %vm22840_vm1, %v30171_v2  ;;  %18931 = vmatprep.mubr.msk.f32.mxu0 %vm22840_vm1, %v30171_v2 }
 0x3bb   : > { %17716 = vmatmul.mubr.msk.f32.gmra.mrb[40].mxu1 %vm530_vm3, %v24853_v29  ;;  %18932 = vmatmul.mubr.msk.f32.gmra.mrb[66].mxu0 %vm530_vm3, %v26198_v33  ;;  %v15039_v33 = vld [vmem:[%s29719_s1 + $0x4c] sm:$0xf]  ;;  %v30609_v29 = vld [vmem:[#allocation116_spill] sm:$0xff] }
 0x3bc   : > { %17718 = vmatprep.mubr.msk.f32.mxu1 %vm22840_vm1, %v30171_v2  ;;  %18934 = vmatprep.mubr.msk.f32.mxu0 %vm22840_vm1, %v30171_v2 }
 0x3bf   : > { %17719 = vmatmul.mubr.msk.f32.gmra.mrb[42].mxu1 %vm530_vm3, %v24865_v34  ;;  %18935 = vmatmul.mubr.msk.f32.gmra.mrb[68].mxu0 %vm530_vm3, %v26185_v47  ;;  %v30610_v47 = vld [vmem:[#allocation118_spill] sm:$0xff] }
 0x3c0   : > { %17721 = vmatprep.mubr.msk.f32.mxu1 %vm22840_vm1, %v30171_v2  ;;  %18939 = vmatprep.mubr.msk.f32.mxu0 %vm22840_vm1, %v30171_v2  ;;  %v30622_v34 = vld [vmem:[#allocation142_spill] sm:$0xff] }
 0x3c3   : > { %17722 = vmatmul.mubr.msk.f32.gmra.mrb[44].mxu1 %vm530_vm3, %v24877_v39  ;;  %18940 = vmatmul.mubr.msk.f32.vlgmr.msra.gmra.mrb[0].mxu0 %vm530_vm3, %v30609_v29  ;;  %v30620_v39 = vld [vmem:[#allocation140_spill] sm:$0xff] }
 0x3c4   : > { %19045 = vmatpush3.msk.msra.mxu0 %vm601_vm0, %v15039_v33  ;;  %17724 = vmatprep.mubr.msk.f32.mxu1 %vm22840_vm1, %v30171_v2  ;;  %v30611_v33 = vld [vmem:[#allocation120_spill] sm:$0xff] }
 0x3c5   : > { %18942 = vmatprep.mubr.msk.f32.mxu0 %vm22840_vm1, %v30171_v2  ;;  %19151 = vmatprep.subr.mxu0 %v30171_v2 }
 0x3c7   : > { %17725 = vmatmul.mubr.msk.f32.gmra.mrb[46].mxu1 %vm530_vm3, %v24889_v44  ;;  %18943 = vmatmul.mubr.msk.f32.gmra.mrb[2].mxu0 %vm530_vm3, %v30610_v47  ;;  %v30612_v44 = vld [vmem:[#allocation122_spill] sm:$0xff] }
 0x3c8   : > { %17727 = vmatprep.mubr.msk.f32.mxu1 %vm22840_vm1, %v30171_v2  ;;  %18945 = vmatprep.mubr.msk.f32.mxu0 %vm22840_vm1, %v30171_v2 }
 0x3cb   : > { %17728 = vmatmul.mubr.msk.f32.gmra.mrb[48].mxu1 %vm530_vm3, %v24901_v49  ;;  %18946 = vmatmul.mubr.msk.f32.gmra.mrb[4].mxu0 %vm530_vm3, %v30611_v33  ;;  %v30613_v49 = vld [vmem:[#allocation124_spill] sm:$0xff] }
 0x3cc   : > { %17730 = vmatprep.mubr.msk.f32.mxu1 %vm22840_vm1, %v30171_v2  ;;  %18948 = vmatprep.mubr.msk.f32.mxu0 %vm22840_vm1, %v30171_v2 }
 0x3cf   : > { %17731 = vmatmul.mubr.msk.f32.gmra.mrb[50].mxu1 %vm530_vm3, %v24913_v54  ;;  %18949 = vmatmul.mubr.msk.f32.gmra.mrb[6].mxu0 %vm530_vm3, %v30612_v44  ;;  %v30614_v54 = vld [vmem:[#allocation127_spill] sm:$0xff] }
 0x3d0   : > { %17733 = vmatprep.mubr.msk.f32.mxu1 %vm22840_vm1, %v30171_v2  ;;  %18951 = vmatprep.mubr.msk.f32.mxu0 %vm22840_vm1, %v30171_v2 }
 0x3d3   : > { %17734 = vmatmul.mubr.msk.f32.gmra.mrb[52].mxu1 %vm530_vm3, %v24925_v59  ;;  %18952 = vmatmul.mubr.msk.f32.gmra.mrb[8].mxu0 %vm530_vm3, %v30613_v49  ;;  %v30615_v59 = vld [vmem:[#allocation130_spill] sm:$0xff] }
 0x3d4   : > { %17736 = vmatprep.mubr.msk.f32.mxu1 %vm22840_vm1, %v30171_v2  ;;  %18954 = vmatprep.mubr.msk.f32.mxu0 %vm22840_vm1, %v30171_v2 }
 0x3d7   : > { %17737 = vmatmul.mubr.msk.f32.gmra.mrb[54].mxu1 %vm530_vm3, %v24937_v0  ;;  %18955 = vmatmul.mubr.msk.f32.gmra.mrb[10].mxu0 %vm530_vm3, %v30614_v54  ;;  %v30616_v0 = vld [vmem:[#allocation133_spill] sm:$0xff] }
 0x3d8   : > { %17739 = vmatprep.mubr.msk.f32.mxu1 %vm22840_vm1, %v30171_v2  ;;  %18957 = vmatprep.mubr.msk.f32.mxu0 %vm22840_vm1, %v30171_v2 }
 0x3db   : > { %17740 = vmatmul.mubr.msk.f32.gmra.mrb[56].mxu1 %vm530_vm3, %v24949_v11  ;;  %18958 = vmatmul.mubr.msk.f32.gmra.mrb[12].mxu0 %vm530_vm3, %v30615_v59  ;;  %v30617_v11 = vld [vmem:[#allocation136_spill] sm:$0xff] }
 0x3dc   : > { %17742 = vmatprep.mubr.msk.f32.mxu1 %vm22840_vm1, %v30171_v2  ;;  %18960 = vmatprep.mubr.msk.f32.mxu0 %vm22840_vm1, %v30171_v2 }
 0x3df   : > { %17743 = vmatmul.mubr.msk.f32.gmra.mrb[58].mxu1 %vm530_vm3, %v24961_v20  ;;  %18961 = vmatmul.mubr.msk.f32.gmra.mrb[14].mxu0 %vm530_vm3, %v30616_v0  ;;  %v30618_v20 = vld [vmem:[#allocation138_spill] sm:$0xff] }
 0x3e0   : > { %17745 = vmatprep.mubr.msk.f32.mxu1 %vm22840_vm1, %v30171_v2  ;;  %18963 = vmatprep.mubr.msk.f32.mxu0 %vm22840_vm1, %v30171_v2 }
 0x3e3   : > { %17746 = vmatmul.mubr.msk.f32.gmra.mrb[60].mxu1 %vm530_vm3, %v24973_v31  ;;  %18964 = vmatmul.mubr.msk.f32.gmra.mrb[16].mxu0 %vm530_vm3, %v30617_v11  ;;  %v30619_v31 = vld [vmem:[#allocation205_spill] sm:$0xff] }
 0x3e4   : > { %17748 = vmatprep.mubr.msk.f32.mxu1 %vm22840_vm1, %v30171_v2  ;;  %18966 = vmatprep.mubr.msk.f32.mxu0 %vm22840_vm1, %v30171_v2 }
 0x3e7   : > { %17749 = vmatmul.mubr.msk.f32.gmra.mrb[62].mxu1 %vm530_vm3, %v24985_v45  ;;  %18967 = vmatmul.mubr.msk.f32.gmra.mrb[18].mxu0 %vm530_vm3, %v30618_v20  ;;  %v30621_v45 = vld [vmem:[#allocation207_spill] sm:$0xff] }
 0x3e8   : > { %17751 = vmatprep.mubr.msk.f32.mxu1 %vm22840_vm1, %v30171_v2  ;;  %18969 = vmatprep.mubr.msk.f32.mxu0 %vm22840_vm1, %v30171_v2 }
 0x3eb   : > { %17752 = vmatmul.mubr.msk.f32.gmra.mrb[64].mxu1 %vm530_vm3, %v30619_v31  ;;  %18970 = vmatmul.mubr.msk.f32.gmra.mrb[20].mxu0 %vm530_vm3, %v30620_v39  ;;  %v3261_v31 = vrot.slane %v25258_v56, 7  ;;  %v30626_v39 = vld [vmem:[#allocation146_spill] sm:$0xff] }
 0x3ec   : > { %17754 = vmatprep.mubr.msk.f32.mxu1 %vm22840_vm1, %v30171_v2  ;;  %18972 = vmatprep.mubr.msk.f32.mxu0 %vm22840_vm1, %v30171_v2  ;;  %v30632_v56 = vld [vmem:[#allocation158_spill] sm:$0xff] }
 0x3ef   : > { %17755 = vmatmul.mubr.msk.f32.gmra.mrb[66].mxu1 %vm530_vm3, %v30621_v45  ;;  %18973 = vmatmul.mubr.msk.f32.gmra.mrb[22].mxu0 %vm530_vm3, %v30622_v34  ;;  %v30625_v45 = vrot.slane %v24096_v19, 7  ;;  %v30630_v19 = vld [vmem:[#allocation155_spill] sm:$0xff] }
 0x3f0   : > { %17757 = vmatprep.mubr.msk.f32.mxu1 %vm22840_vm1, %v30171_v2  ;;  %18975 = vmatprep.mubr.msk.f32.mxu0 %vm22840_vm1, %v30171_v2 }
 0x3f1   : > { %v3263_v34 = vsel %vm3260_vm8, %v3261_v31, %v30625_v45  ;;  %v14632_v31 = vld [vmem:[%s29719_s1 + $0x20] sm:$0xf]  ;;  %v30629_v45 = vld [vmem:[#allocation152_spill] sm:$0xff] }
 0x3f3   : > { %17758 = vmatmul.mubr.msk.f32.gmra.mrb[68].mxu1 %vm530_vm3, %v30623_v16  ;;  %18976 = vmatmul.mubr.msk.f32.gmra.mrb[24].mxu0 %vm530_vm3, %v30624_v8  ;;  %v30627_v16 = vld [vmem:[#allocation148_spill] sm:$0xff] }
 0x3f4   : > { %17762 = vmatprep.mubr.msk.f32.mxu1 %vm22840_vm1, %v30171_v2  ;;  %18978 = vmatprep.mubr.msk.f32.mxu0 %vm22840_vm1, %v30171_v2 }
 0x3f7   : > { %17763 = vmatmul.mubr.msk.f32.vlgmr.msra.gmra.mrb[0].mxu1 %vm530_vm3, %v3263_v34  ;;  %18979 = vmatmul.mubr.msk.f32.gmra.mrb[26].mxu0 %vm530_vm3, %v30626_v39  ;;  %v30628_v34 = vld [vmem:[#allocation150_spill] sm:$0xff] }
 0x3f8   : > { %17765 = vmatprep.mubr.msk.f32.mxu1 %vm22840_vm1, %v30171_v2  ;;  %18981 = vmatprep.mubr.msk.f32.mxu0 %vm22840_vm1, %v30171_v2 }
 0x3f9   : > { %17868 = vmatpush3.msk.msra.mxu1 %vm601_vm0, %v14632_v31  ;;  %v30633_v31 = vld [vmem:[#allocation219_spill] sm:$0xff] }
 0x3fa   : > { %17974 = vmatprep.subr.mxu1 %v30171_v2 }
 0x3fb   : > { %17766 = vmatmul.mubr.msk.f32.gmra.mrb[2].mxu1 %vm530_vm3, %v25057_v6  ;;  %18982 = vmatmul.mubr.msk.f32.gmra.mrb[28].mxu0 %vm530_vm3, %v30627_v16  ;;  %v30631_v6 = vld [vmem:[#allocation217_spill] sm:$0xff] }
 0x3fc   : > { %17768 = vmatprep.mubr.msk.f32.mxu1 %vm22840_vm1, %v30171_v2  ;;  %18984 = vmatprep.mubr.msk.f32.mxu0 %vm22840_vm1, %v30171_v2 }
 0x3ff   : > { %17769 = vmatmul.mubr.msk.f32.gmra.mrb[4].mxu1 %vm530_vm3, %v25077_v62  ;;  %18985 = vmatmul.mubr.msk.f32.gmra.mrb[30].mxu0 %vm530_vm3, %v30628_v34  ;;  %v30647_v62 = vld [vmem:[#allocation184_spill] sm:$0xff] }
 0x400   : > { %17771 = vmatprep.mubr.msk.f32.mxu1 %vm22840_vm1, %v30171_v2  ;;  %18987 = vmatprep.mubr.msk.f32.mxu0 %vm22840_vm1, %v30171_v2 }
 0x403   : > { %17772 = vmatmul.mubr.msk.f32.gmra.mrb[6].mxu1 %vm530_vm3, %v25096_v61  ;;  %18988 = vmatmul.mubr.msk.f32.gmra.mrb[32].mxu0 %vm530_vm3, %v30629_v45  ;;  %v30636_v61 = vld [vmem:[#allocation161_spill] sm:$0xff] }
 0x404   : > { %17774 = vmatprep.mubr.msk.f32.mxu1 %vm22840_vm1, %v30171_v2  ;;  %18990 = vmatprep.mubr.msk.f32.mxu0 %vm22840_vm1, %v30171_v2 }
 0x407   : > { %17775 = vmatmul.mubr.msk.f32.gmra.mrb[8].mxu1 %vm530_vm3, %v25112_v36  ;;  %18991 = vmatmul.mubr.msk.f32.gmra.mrb[34].mxu0 %vm530_vm3, %v30630_v19  ;;  %v30634_v36 = vld [vmem:[#allocation160_spill] sm:$0xff] }
 0x408   : > { %17777 = vmatprep.mubr.msk.f32.mxu1 %vm22840_vm1, %v30171_v2  ;;  %18993 = vmatprep.mubr.msk.f32.mxu0 %vm22840_vm1, %v30171_v2 }
 0x40b   : > { %17778 = vmatmul.mubr.msk.f32.gmra.mrb[10].mxu1 %vm530_vm3, %v30631_v6  ;;  %18994 = vmatmul.mubr.msk.f32.gmra.mrb[36].mxu0 %vm530_vm3, %v30632_v56  ;;  %v30635_v6 = vld [vmem:[#allocation220_spill] sm:$0xff] }
 0x40c   : > { %17780 = vmatprep.mubr.msk.f32.mxu1 %vm22840_vm1, %v30171_v2  ;;  %18996 = vmatprep.mubr.msk.f32.mxu0 %vm22840_vm1, %v30171_v2 }
 0x40f   : > { %17781 = vmatmul.mubr.msk.f32.gmra.mrb[12].mxu1 %vm530_vm3, %v30633_v31  ;;  %18997 = vmatmul.mubr.msk.f32.gmra.mrb[38].mxu0 %vm530_vm3, %v30634_v36  ;;  %v30637_v31 = vld [vmem:[#allocation163_spill] sm:$0xff] }
 0x410   : > { %17783 = vmatprep.mubr.msk.f32.mxu1 %vm22840_vm1, %v30171_v2  ;;  %18999 = vmatprep.mubr.msk.f32.mxu0 %vm22840_vm1, %v30171_v2 }
 0x413   : > { %17784 = vmatmul.mubr.msk.f32.gmra.mrb[14].mxu1 %vm530_vm3, %v30635_v6  ;;  %19000 = vmatmul.mubr.msk.f32.gmra.mrb[40].mxu0 %vm530_vm3, %v30636_v61  ;;  %v30638_v6 = vld [vmem:[#allocation165_spill] sm:$0xff] }
 0x414   : > { %17786 = vmatprep.mubr.msk.f32.mxu1 %vm22840_vm1, %v30171_v2  ;;  %19002 = vmatprep.mubr.msk.f32.mxu0 %vm22840_vm1, %v30171_v2 }
 0x417   : > { %17787 = vmatmul.mubr.msk.f32.gmra.mrb[16].mxu1 %vm530_vm3, %v25176_v60  ;;  %19003 = vmatmul.mubr.msk.f32.gmra.mrb[42].mxu0 %vm530_vm3, %v30637_v31  ;;  %v30639_v60 = vld [vmem:[#allocation167_spill] sm:$0xff] }
 0x418   : > { %17789 = vmatprep.mubr.msk.f32.mxu1 %vm22840_vm1, %v30171_v2  ;;  %19005 = vmatprep.mubr.msk.f32.mxu0 %vm22840_vm1, %v30171_v2 }
 0x41b   : > { %17790 = vmatmul.mubr.msk.f32.gmra.mrb[18].mxu1 %vm530_vm3, %v25192_v18  ;;  %19006 = vmatmul.mubr.msk.f32.gmra.mrb[44].mxu0 %vm530_vm3, %v30638_v6  ;;  %v30640_v18 = vld [vmem:[#allocation169_spill] sm:$0xff] }
 0x41c   : > { %17792 = vmatprep.mubr.msk.f32.mxu1 %vm22840_vm1, %v30171_v2  ;;  %19008 = vmatprep.mubr.msk.f32.mxu0 %vm22840_vm1, %v30171_v2 }
 0x41f   : > { %17793 = vmatmul.mubr.msk.f32.gmra.mrb[20].mxu1 %vm530_vm3, %v25208_v12  ;;  %19009 = vmatmul.mubr.msk.f32.gmra.mrb[46].mxu0 %vm530_vm3, %v30639_v60  ;;  %v30641_v12 = vld [vmem:[#allocation171_spill] sm:$0xff] }
 0x420   : > { %17795 = vmatprep.mubr.msk.f32.mxu1 %vm22840_vm1, %v30171_v2  ;;  %19011 = vmatprep.mubr.msk.f32.mxu0 %vm22840_vm1, %v30171_v2 }
 0x423   : > { %17796 = vmatmul.mubr.msk.f32.gmra.mrb[22].mxu1 %vm530_vm3, %v25224_v57  ;;  %19012 = vmatmul.mubr.msk.f32.gmra.mrb[48].mxu0 %vm530_vm3, %v30640_v18  ;;  %v30642_v57 = vld [vmem:[#allocation173_spill] sm:$0xff] }
 0x424   : > { %17798 = vmatprep.mubr.msk.f32.mxu1 %vm22840_vm1, %v30171_v2  ;;  %19014 = vmatprep.mubr.msk.f32.mxu0 %vm22840_vm1, %v30171_v2 }
 0x427   : > { %17799 = vmatmul.mubr.msk.f32.gmra.mrb[24].mxu1 %vm530_vm3, %v25243_v40  ;;  %19015 = vmatmul.mubr.msk.f32.gmra.mrb[50].mxu0 %vm530_vm3, %v30641_v12  ;;  %v30643_v40 = vld [vmem:[#allocation175_spill] sm:$0xff] }
 0x428   : > { %17801 = vmatprep.mubr.msk.f32.mxu1 %vm22840_vm1, %v30171_v2  ;;  %19017 = vmatprep.mubr.msk.f32.mxu0 %vm22840_vm1, %v30171_v2 }
 0x42b   : > { %17802 = vmatmul.mubr.msk.f32.gmra.mrb[26].mxu1 %vm530_vm3, %v25255_v52  ;;  %19018 = vmatmul.mubr.msk.f32.gmra.mrb[52].mxu0 %vm530_vm3, %v30642_v57  ;;  %v30644_v52 = vld [vmem:[#allocation177_spill] sm:$0xff] }
 0x42c   : > { %17804 = vmatprep.mubr.msk.f32.mxu1 %vm22840_vm1, %v30171_v2  ;;  %19020 = vmatprep.mubr.msk.f32.mxu0 %vm22840_vm1, %v30171_v2 }
 0x42f   : > { %17805 = vmatmul.mubr.msk.f32.gmra.mrb[28].mxu1 %vm530_vm3, %v25274_v25  ;;  %19021 = vmatmul.mubr.msk.f32.gmra.mrb[54].mxu0 %vm530_vm3, %v30643_v40  ;;  %v30645_v25 = vld [vmem:[#allocation179_spill] sm:$0xff] }
 0x430   : > { %17807 = vmatprep.mubr.msk.f32.mxu1 %vm22840_vm1, %v30171_v2  ;;  %19023 = vmatprep.mubr.msk.f32.mxu0 %vm22840_vm1, %v30171_v2 }
 0x433   : > { %17808 = vmatmul.mubr.msk.f32.gmra.mrb[30].mxu1 %vm530_vm3, %v25285_v53  ;;  %19024 = vmatmul.mubr.msk.f32.gmra.mrb[56].mxu0 %vm530_vm3, %v30644_v52  ;;  %v30646_v53 = vld [vmem:[#allocation181_spill] sm:$0xff] }
 0x434   : > { %17810 = vmatprep.mubr.msk.f32.mxu1 %vm22840_vm1, %v30171_v2  ;;  %19026 = vmatprep.mubr.msk.f32.mxu0 %vm22840_vm1, %v30171_v2 }
 0x437   : > { %17811 = vmatmul.mubr.msk.f32.gmra.mrb[32].mxu1 %vm530_vm3, %v25297_v9  ;;  %19027 = vmatmul.mubr.msk.f32.gmra.mrb[58].mxu0 %vm530_vm3, %v30645_v25  ;;  %v26478_v9 = vrot.slane %v25509_v38, 2  ;;  %v26494_v38 = vrot.slane %v25513_v14, 2  ;;  %v30651_v14 = vld [vmem:[#allocation10_spill] sm:$0xff] }
 0x438   : > { %17813 = vmatprep.mubr.msk.f32.mxu1 %vm22840_vm1, %v30171_v2  ;;  %19029 = vmatprep.mubr.msk.f32.mxu0 %vm22840_vm1, %v30171_v2 }
 0x439   : > { %30649 = vst [vmem:[#allocation53_spill] sm:$0xff] %v26494_v38 }
 0x43b   : > { %17814 = vmatmul.mubr.msk.f32.gmra.mrb[34].mxu1 %vm530_vm3, %v25312_v48  ;;  %19030 = vmatmul.mubr.msk.f32.gmra.mrb[60].mxu0 %vm530_vm3, %v30646_v53  ;;  %v30648_v48 = vld [vmem:[#allocation183_spill] sm:$0xff] }
 0x43c   : > { %17816 = vmatprep.mubr.msk.f32.mxu1 %vm22840_vm1, %v30171_v2  ;;  %19032 = vmatprep.mubr.msk.f32.mxu0 %vm22840_vm1, %v30171_v2  ;;  %v26491_v53 = vsel %vm1160_vm6, %v30648_v48, %v26478_v9  ;;  %v26507_v48 = vsel %vm1160_vm6, %v26478_v9, %v26494_v38 }
 0x43d   : > { %30650 = vst [vmem:[#allocation55_spill] sm:$0xff] %v26507_v48 }
 0x43f   : > { %17817 = vmatmul.mubr.msk.f32.gmra.mrb[36].mxu1 %vm530_vm3, %v25326_v10  ;;  %19033 = vmatmul.mubr.msk.f32.gmra.mrb[62].mxu0 %vm530_vm3, %v30647_v62  ;;  %v30704_v10 = vld [vmem:[#allocation265_spill] sm:$0xff] }
 0x440   : > { %17819 = vmatprep.mubr.msk.f32.mxu1 %vm22840_vm1, %v30171_v2  ;;  %19035 = vmatprep.mubr.msk.f32.mxu0 %vm22840_vm1, %v30171_v2 }
 0x443   : > { %17820 = vmatmul.mubr.msk.f32.gmra.mrb[38].mxu1 %vm530_vm3, %v25338_v46  ;;  %19036 = vmatmul.mubr.msk.f32.gmra.mrb[64].mxu0 %vm530_vm3, %v26491_v53 }
 0x444   : > { %17822 = vmatprep.mubr.msk.f32.mxu1 %vm22840_vm1, %v30171_v2  ;;  %19038 = vmatprep.mubr.msk.f32.mxu0 %vm22840_vm1, %v30171_v2 }
 0x447   : > { %17823 = vmatmul.mubr.msk.f32.gmra.mrb[40].mxu1 %vm530_vm3, %v25350_v42  ;;  %19039 = vmatmul.mubr.msk.f32.gmra.mrb[66].mxu0 %vm530_vm3, %v26507_v48  ;;  %v15076_v48 = vld [vmem:[%s29719_s1 + $0x50] sm:$0xf]  ;;  %v26803_v42 = vld [vmem:[%s22973_s24 + $0x120] sm:$0xff] }
 0x448   : > { %17825 = vmatprep.mubr.msk.f32.mxu1 %vm22840_vm1, %v30171_v2  ;;  %19041 = vmatprep.mubr.msk.f32.mxu0 %vm22840_vm1, %v30171_v2  ;;  %v6819_v46 = vrot.slane %v26803_v42, 3 }
 0x44b   : > { %17826 = vmatmul.mubr.msk.f32.gmra.mrb[42].mxu1 %vm530_vm3, %v25362_v27  ;;  %19042 = vmatmul.mubr.msk.f32.gmra.mrb[68].mxu0 %vm530_vm3, %v26494_v38  ;;  %v30652_v38 = vld [vmem:[#allocation12_spill] sm:$0xff] }
 0x44c   : > { %17828 = vmatprep.mubr.msk.f32.mxu1 %vm22840_vm1, %v30171_v2  ;;  %19046 = vmatprep.mubr.msk.f32.mxu0 %vm22840_vm1, %v30171_v2 }
 0x44f   : > { %17829 = vmatmul.mubr.msk.f32.gmra.mrb[44].mxu1 %vm530_vm3, %v25374_v21  ;;  %19047 = vmatmul.mubr.msk.f32.vlgmr.msra.gmra.mrb[0].mxu0 %vm530_vm3, %v30651_v14  ;;  %v30653_v14 = vld [vmem:[#allocation14_spill] sm:$0xff]  ;;  %v30702_v21 = vld [vmem:[#allocation227_spill] sm:$0xff] }
 0x450   : > { %19152 = vmatpush3.msk.msra.mxu0 %vm601_vm0, %v15076_v48  ;;  %17831 = vmatprep.mubr.msk.f32.mxu1 %vm22840_vm1, %v30171_v2  ;;  %v30655_v48 = vld [vmem:[#allocation18_spill] sm:$0xff] }
 0x451   : > { %19049 = vmatprep.mubr.msk.f32.mxu0 %vm22840_vm1, %v30171_v2  ;;  %19258 = vmatprep.subr.mxu0 %v30171_v2 }
 0x453   : > { %17832 = vmatmul.mubr.msk.f32.gmra.mrb[46].mxu1 %vm530_vm3, %v25386_v51  ;;  %19050 = vmatmul.mubr.msk.f32.gmra.mrb[2].mxu0 %vm530_vm3, %v30652_v38  ;;  %v30654_v38 = vld [vmem:[#allocation16_spill] sm:$0xff] }
 0x454   : > { %17834 = vmatprep.mubr.msk.f32.mxu1 %vm22840_vm1, %v30171_v2  ;;  %19052 = vmatprep.mubr.msk.f32.mxu0 %vm22840_vm1, %v30171_v2  ;;  %v30701_v51 = vld [vmem:[#allocation264_spill] sm:$0xff] }
 0x457   : > { %17835 = vmatmul.mubr.msk.f32.gmra.mrb[48].mxu1 %vm530_vm3, %v25398_v30  ;;  %19053 = vmatmul.mubr.msk.f32.gmra.mrb[4].mxu0 %vm530_vm3, %v30653_v14  ;;  %v30656_v14 = vld [vmem:[#allocation20_spill] sm:$0xff] }
 0x458   : > { %17837 = vmatprep.mubr.msk.f32.mxu1 %vm22840_vm1, %v30171_v2  ;;  %19055 = vmatprep.mubr.msk.f32.mxu0 %vm22840_vm1, %v30171_v2 }
 0x45b   : > { %17838 = vmatmul.mubr.msk.f32.gmra.mrb[50].mxu1 %vm530_vm3, %v25410_v24  ;;  %19056 = vmatmul.mubr.msk.f32.gmra.mrb[6].mxu0 %vm530_vm3, %v30654_v38  ;;  %v30657_v38 = vld [vmem:[#allocation22_spill] sm:$0xff]  ;;  %v30699_v24 = vld [vmem:[#allocation224_spill] sm:$0xff] }
 0x45c   : > { %17840 = vmatprep.mubr.msk.f32.mxu1 %vm22840_vm1, %v30171_v2  ;;  %19058 = vmatprep.mubr.msk.f32.mxu0 %vm22840_vm1, %v30171_v2 }
 0x45f   : > { %17841 = vmatmul.mubr.msk.f32.gmra.mrb[52].mxu1 %vm530_vm3, %v25422_v32  ;;  %19059 = vmatmul.mubr.msk.f32.gmra.mrb[8].mxu0 %vm530_vm3, %v30655_v48  ;;  %v30658_v48 = vld [vmem:[#allocation24_spill] sm:$0xff]  ;;  %v30697_v32 = vld [vmem:[#allocation135_spill] sm:$0xff] }
 0x460   : > { %17843 = vmatprep.mubr.msk.f32.mxu1 %vm22840_vm1, %v30171_v2  ;;  %19061 = vmatprep.mubr.msk.f32.mxu0 %vm22840_vm1, %v30171_v2 }
 0x463   : > { %17844 = vmatmul.mubr.msk.f32.gmra.mrb[54].mxu1 %vm530_vm3, %v25434_v43  ;;  %19062 = vmatmul.mubr.msk.f32.gmra.mrb[10].mxu0 %vm530_vm3, %v30656_v14  ;;  %v30659_v14 = vld [vmem:[#allocation245_spill] sm:$0xff]  ;;  %v30692_v43 = vld [vmem:[#allocation218_spill] sm:$0xff] }
 0x464   : > { %17846 = vmatprep.mubr.msk.f32.mxu1 %vm22840_vm1, %v30171_v2  ;;  %19064 = vmatprep.mubr.msk.f32.mxu0 %vm22840_vm1, %v30171_v2 }
 0x467   : > { %17847 = vmatmul.mubr.msk.f32.gmra.mrb[56].mxu1 %vm530_vm3, %v25446_v7  ;;  %19065 = vmatmul.mubr.msk.f32.gmra.mrb[12].mxu0 %vm530_vm3, %v30657_v38  ;;  %v30660_v38 = vld [vmem:[#allocation26_spill] sm:$0xff]  ;;  %v30690_v7 = vld [vmem:[#allocation216_spill] sm:$0xff] }
 0x468   : > { %17849 = vmatprep.mubr.msk.f32.mxu1 %vm22840_vm1, %v30171_v2  ;;  %19067 = vmatprep.mubr.msk.f32.mxu0 %vm22840_vm1, %v30171_v2 }
 0x46b   : > { %17850 = vmatmul.mubr.msk.f32.gmra.mrb[58].mxu1 %vm530_vm3, %v25458_v26  ;;  %19068 = vmatmul.mubr.msk.f32.gmra.mrb[14].mxu0 %vm530_vm3, %v30658_v48  ;;  %v30661_v26 = vld [vmem:[#allocation246_spill] sm:$0xff]  ;;  %v30662_v48 = vld [vmem:[#allocation28_spill] sm:$0xff] }
 0x46c   : > { %17852 = vmatprep.mubr.msk.f32.mxu1 %vm22840_vm1, %v30171_v2  ;;  %19070 = vmatprep.mubr.msk.f32.mxu0 %vm22840_vm1, %v30171_v2 }
 0x46f   : > { %17853 = vmatmul.mubr.msk.f32.gmra.mrb[60].mxu1 %vm530_vm3, %v30659_v14  ;;  %19071 = vmatmul.mubr.msk.f32.gmra.mrb[16].mxu0 %vm530_vm3, %v30660_v38  ;;  %v30663_v38 = vld [vmem:[#allocation247_spill] sm:$0xff]  ;;  %v30664_v14 = vld [vmem:[#allocation30_spill] sm:$0xff] }
 0x470   : > { %17855 = vmatprep.mubr.msk.f32.mxu1 %vm22840_vm1, %v30171_v2  ;;  %19073 = vmatprep.mubr.msk.f32.mxu0 %vm22840_vm1, %v30171_v2 }
 0x473   : > { %17856 = vmatmul.mubr.msk.f32.gmra.mrb[62].mxu1 %vm530_vm3, %v30661_v26  ;;  %19074 = vmatmul.mubr.msk.f32.gmra.mrb[18].mxu0 %vm530_vm3, %v30662_v48  ;;  %v30665_v48 = vld [vmem:[#allocation32_spill] sm:$0xff]  ;;  %v14669_v26 = vld [vmem:[%s29719_s1 + $0x24] sm:$0xf] }
 0x474   : > { %17858 = vmatprep.mubr.msk.f32.mxu1 %vm22840_vm1, %v30171_v2  ;;  %19076 = vmatprep.mubr.msk.f32.mxu0 %vm22840_vm1, %v30171_v2 }
 0x477   : > { %17859 = vmatmul.mubr.msk.f32.gmra.mrb[64].mxu1 %vm530_vm3, %v30663_v38  ;;  %19077 = vmatmul.mubr.msk.f32.gmra.mrb[20].mxu0 %vm530_vm3, %v30664_v14  ;;  %v30666_v38 = vld [vmem:[#allocation250_spill] sm:$0xff] }
 0x478   : > { %17861 = vmatprep.mubr.msk.f32.mxu1 %vm22840_vm1, %v30171_v2  ;;  %19079 = vmatprep.mubr.msk.f32.mxu0 %vm22840_vm1, %v30171_v2  ;;  %v30667_v14 = vld [vmem:[#allocation34_spill] sm:$0xff] }
 0x47b   : > { %17862 = vmatmul.mubr.msk.f32.gmra.mrb[66].mxu1 %vm530_vm3, %v25506_v3  ;;  %19080 = vmatmul.mubr.msk.f32.gmra.mrb[22].mxu0 %vm530_vm3, %v30665_v48  ;;  %v22726_v3 = vld [vmem:[%s22973_s24 + $0x8] sm:$0xff]  ;;  %v30668_v48 = vld [vmem:[#allocation36_spill] sm:$0xff] }
 0x47c   : > { %17864 = vmatprep.mubr.msk.f32.mxu1 %vm22840_vm1, %v30171_v2  ;;  %19082 = vmatprep.mubr.msk.f32.mxu0 %vm22840_vm1, %v30171_v2 }
 0x47f   : > { %17865 = vmatmul.mubr.msk.f32.gmra.mrb[68].mxu1 %vm530_vm3, %v30666_v38  ;;  %19083 = vmatmul.mubr.msk.f32.gmra.mrb[24].mxu0 %vm530_vm3, %v30667_v14  ;;  %v30669_v38 = vld [vmem:[#allocation252_spill] sm:$0xff]  ;;  %v30670_v14 = vld [vmem:[#allocation38_spill] sm:$0xff] }
 0x480   : > { %17869 = vmatprep.mubr.msk.f32.mxu1 %vm22840_vm1, %v30171_v2  ;;  %19085 = vmatprep.mubr.msk.f32.mxu0 %vm22840_vm1, %v30171_v2 }
 0x483   : > { %17870 = vmatmul.mubr.msk.f32.vlgmr.msra.gmra.mrb[0].mxu1 %vm530_vm3, %v22726_v3  ;;  %19086 = vmatmul.mubr.msk.f32.gmra.mrb[26].mxu0 %vm530_vm3, %v30668_v48  ;;  %v30671_v3 = vld [vmem:[#allocation253_spill] sm:$0xff]  ;;  %v30672_v48 = vld [vmem:[#allocation40_spill] sm:$0xff] }
 0x484   : > { %17872 = vmatprep.mubr.msk.f32.mxu1 %vm22840_vm1, %v30171_v2  ;;  %19088 = vmatprep.mubr.msk.f32.mxu0 %vm22840_vm1, %v30171_v2 }
 0x485   : > { %17975 = vmatpush3.msk.msra.mxu1 %vm601_vm0, %v14669_v26  ;;  %v30677_v26 = vld [vmem:[#allocation256_spill] sm:$0xff] }
 0x486   : > { %18081 = vmatprep.subr.mxu1 %v30171_v2 }
 0x487   : > { %17873 = vmatmul.mubr.msk.f32.gmra.mrb[2].mxu1 %vm530_vm3, %v30669_v38  ;;  %19089 = vmatmul.mubr.msk.f32.gmra.mrb[28].mxu0 %vm530_vm3, %v30670_v14  ;;  %v30673_v38 = vld [vmem:[#allocation254_spill] sm:$0xff] }
 0x488   : > { %17875 = vmatprep.mubr.msk.f32.mxu1 %vm22840_vm1, %v30171_v2  ;;  %19091 = vmatprep.mubr.msk.f32.mxu0 %vm22840_vm1, %v30171_v2  ;;  %v30674_v14 = vld [vmem:[#allocation42_spill] sm:$0xff] }
 0x48b   : > { %17876 = vmatmul.mubr.msk.f32.gmra.mrb[4].mxu1 %vm530_vm3, %v30671_v3  ;;  %19092 = vmatmul.mubr.msk.f32.gmra.mrb[30].mxu0 %vm530_vm3, %v30672_v48  ;;  %v30675_v3 = vld [vmem:[#allocation255_spill] sm:$0xff]  ;;  %v30676_v48 = vld [vmem:[#allocation44_spill] sm:$0xff] }
 0x48c   : > { %17878 = vmatprep.mubr.msk.f32.mxu1 %vm22840_vm1, %v30171_v2  ;;  %19094 = vmatprep.mubr.msk.f32.mxu0 %vm22840_vm1, %v30171_v2 }
 0x48f   : > { %17879 = vmatmul.mubr.msk.f32.gmra.mrb[6].mxu1 %vm530_vm3, %v30673_v38  ;;  %19095 = vmatmul.mubr.msk.f32.gmra.mrb[32].mxu0 %vm530_vm3, %v30674_v14  ;;  %v30678_v38 = vld [vmem:[#allocation46_spill] sm:$0xff]  ;;  %v30679_v14 = vld [vmem:[#allocation257_spill] sm:$0xff] }
 0x490   : > { %17881 = vmatprep.mubr.msk.f32.mxu1 %vm22840_vm1, %v30171_v2  ;;  %19097 = vmatprep.mubr.msk.f32.mxu0 %vm22840_vm1, %v30171_v2 }
 0x493   : > { %17882 = vmatmul.mubr.msk.f32.gmra.mrb[8].mxu1 %vm530_vm3, %v30675_v3  ;;  %19098 = vmatmul.mubr.msk.f32.gmra.mrb[34].mxu0 %vm530_vm3, %v30676_v48  ;;  %v30680_v3 = vld [vmem:[#allocation48_spill] sm:$0xff]  ;;  %v30681_v48 = vld [vmem:[#allocation258_spill] sm:$0xff] }
 0x494   : > { %17884 = vmatprep.mubr.msk.f32.mxu1 %vm22840_vm1, %v30171_v2  ;;  %19100 = vmatprep.mubr.msk.f32.mxu0 %vm22840_vm1, %v30171_v2 }
 0x497   : > { %17885 = vmatmul.mubr.msk.f32.gmra.mrb[10].mxu1 %vm530_vm3, %v30677_v26  ;;  %19101 = vmatmul.mubr.msk.f32.gmra.mrb[36].mxu0 %vm530_vm3, %v30678_v38  ;;  %v30682_v26 = vld [vmem:[#allocation50_spill] sm:$0xff]  ;;  %v30683_v38 = vld [vmem:[#allocation259_spill] sm:$0xff] }
 0x498   : > { %17887 = vmatprep.mubr.msk.f32.mxu1 %vm22840_vm1, %v30171_v2  ;;  %19103 = vmatprep.mubr.msk.f32.mxu0 %vm22840_vm1, %v30171_v2 }
 0x49b   : > { %17888 = vmatmul.mubr.msk.f32.gmra.mrb[12].mxu1 %vm530_vm3, %v30679_v14  ;;  %19104 = vmatmul.mubr.msk.f32.gmra.mrb[38].mxu0 %vm530_vm3, %v30680_v3  ;;  %v30684_v14 = vld [vmem:[#allocation210_spill] sm:$0xff]  ;;  %v30685_v3 = vld [vmem:[#allocation260_spill] sm:$0xff] }
 0x49c   : > { %17890 = vmatprep.mubr.msk.f32.mxu1 %vm22840_vm1, %v30171_v2  ;;  %19106 = vmatprep.mubr.msk.f32.mxu0 %vm22840_vm1, %v30171_v2 }
 0x49f   : > { %17891 = vmatmul.mubr.msk.f32.gmra.mrb[14].mxu1 %vm530_vm3, %v30681_v48  ;;  %19107 = vmatmul.mubr.msk.f32.gmra.mrb[40].mxu0 %vm530_vm3, %v30682_v26  ;;  %v30686_v48 = vld [vmem:[#allocation212_spill] sm:$0xff]  ;;  %v30687_v26 = vld [vmem:[#allocation261_spill] sm:$0xff] }
 0x4a0   : > { %17893 = vmatprep.mubr.msk.f32.mxu1 %vm22840_vm1, %v30171_v2  ;;  %19109 = vmatprep.mubr.msk.f32.mxu0 %vm22840_vm1, %v30171_v2 }
 0x4a3   : > { %17894 = vmatmul.mubr.msk.f32.gmra.mrb[16].mxu1 %vm530_vm3, %v30683_v38  ;;  %19110 = vmatmul.mubr.msk.f32.gmra.mrb[42].mxu0 %vm530_vm3, %v30684_v14  ;;  %v30688_v38 = vld [vmem:[#allocation214_spill] sm:$0xff] }
 0x4a4   : > { %17896 = vmatprep.mubr.msk.f32.mxu1 %vm22840_vm1, %v30171_v2  ;;  %19112 = vmatprep.mubr.msk.f32.mxu0 %vm22840_vm1, %v30171_v2 }
 0x4a7   : > { %17897 = vmatmul.mubr.msk.f32.gmra.mrb[18].mxu1 %vm530_vm3, %v30685_v3  ;;  %19113 = vmatmul.mubr.msk.f32.gmra.mrb[44].mxu0 %vm530_vm3, %v30686_v48  ;;  %v30689_v3 = vld [vmem:[#allocation262_spill] sm:$0xff] }
 0x4a8   : > { %17899 = vmatprep.mubr.msk.f32.mxu1 %vm22840_vm1, %v30171_v2  ;;  %19115 = vmatprep.mubr.msk.f32.mxu0 %vm22840_vm1, %v30171_v2 }
 0x4ab   : > { %17900 = vmatmul.mubr.msk.f32.gmra.mrb[20].mxu1 %vm530_vm3, %v30687_v26  ;;  %19116 = vmatmul.mubr.msk.f32.gmra.mrb[46].mxu0 %vm530_vm3, %v30688_v38  ;;  %v30691_v26 = vld [vmem:[#allocation263_spill] sm:$0xff] }
 0x4ac   : > { %17902 = vmatprep.mubr.msk.f32.mxu1 %vm22840_vm1, %v30171_v2  ;;  %19118 = vmatprep.mubr.msk.f32.mxu0 %vm22840_vm1, %v30171_v2 }
 0x4af   : > { %17903 = vmatmul.mubr.msk.f32.gmra.mrb[22].mxu1 %vm530_vm3, %v30689_v3  ;;  %19119 = vmatmul.mubr.msk.f32.gmra.mrb[48].mxu0 %vm530_vm3, %v30690_v7  ;;  %v30693_v3 = vld [vmem:[#allocation126_spill] sm:$0xff] }
 0x4b0   : > { %17905 = vmatprep.mubr.msk.f32.mxu1 %vm22840_vm1, %v30171_v2  ;;  %19121 = vmatprep.mubr.msk.f32.mxu0 %vm22840_vm1, %v30171_v2 }
 0x4b3   : > { %17906 = vmatmul.mubr.msk.f32.gmra.mrb[24].mxu1 %vm530_vm3, %v30691_v26  ;;  %19122 = vmatmul.mubr.msk.f32.gmra.mrb[50].mxu0 %vm530_vm3, %v30692_v43  ;;  %v30694_v26 = vld [vmem:[#allocation129_spill] sm:$0xff] }
 0x4b4   : > { %17908 = vmatprep.mubr.msk.f32.mxu1 %vm22840_vm1, %v30171_v2  ;;  %19124 = vmatprep.mubr.msk.f32.mxu0 %vm22840_vm1, %v30171_v2 }
 0x4b7   : > { %17909 = vmatmul.mubr.msk.f32.gmra.mrb[26].mxu1 %vm530_vm3, %v25689_v55  ;;  %19125 = vmatmul.mubr.msk.f32.gmra.mrb[52].mxu0 %vm530_vm3, %v30693_v3  ;;  %v30695_v55 = vld [vmem:[#allocation132_spill] sm:$0xff] }
 0x4b8   : > { %17911 = vmatprep.mubr.msk.f32.mxu1 %vm22840_vm1, %v30171_v2  ;;  %19127 = vmatprep.mubr.msk.f32.mxu0 %vm22840_vm1, %v30171_v2 }
 0x4bb   : > { %17912 = vmatmul.mubr.msk.f32.gmra.mrb[28].mxu1 %vm530_vm3, %v25702_v35  ;;  %19128 = vmatmul.mubr.msk.f32.gmra.mrb[54].mxu0 %vm530_vm3, %v30694_v26  ;;  %v30696_v35 = vld [vmem:[#allocation96_spill] sm:$0xff] }
 0x4bc   : > { %17914 = vmatprep.mubr.msk.f32.mxu1 %vm22840_vm1, %v30171_v2  ;;  %19130 = vmatprep.mubr.msk.f32.mxu0 %vm22840_vm1, %v30171_v2 }
 0x4bf   : > { %17915 = vmatmul.mubr.msk.f32.gmra.mrb[30].mxu1 %vm530_vm3, %v25713_v4  ;;  %19131 = vmatmul.mubr.msk.f32.gmra.mrb[56].mxu0 %vm530_vm3, %v30695_v55  ;;  %v30698_v4 = vld [vmem:[#allocation100_spill] sm:$0xff] }
 0x4c0   : > { %17917 = vmatprep.mubr.msk.f32.mxu1 %vm22840_vm1, %v30171_v2  ;;  %19133 = vmatprep.mubr.msk.f32.mxu0 %vm22840_vm1, %v30171_v2 }
 0x4c3   : > { %17918 = vmatmul.mubr.msk.f32.gmra.mrb[32].mxu1 %vm530_vm3, %v30696_v35  ;;  %19134 = vmatmul.mubr.msk.f32.gmra.mrb[58].mxu0 %vm530_vm3, %v30697_v32  ;;  %v26784_v35 = vld [vmem:[%s22973_s24 + $0x118] sm:$0xff] }
 0x4c4   : > { %17920 = vmatprep.mubr.msk.f32.mxu1 %vm22840_vm1, %v30171_v2  ;;  %19136 = vmatprep.mubr.msk.f32.mxu0 %vm22840_vm1, %v30171_v2  ;;  %v26787_v30 = vrot.slane %v26784_v35, 3 }
 0x4c6   : > { %30700 = vst [vmem:[#allocation57_spill] sm:$0xff] %v26787_v30 }
 0x4c7   : > { %17921 = vmatmul.mubr.msk.f32.gmra.mrb[34].mxu1 %vm530_vm3, %v30698_v4  ;;  %19137 = vmatmul.mubr.msk.f32.gmra.mrb[60].mxu0 %vm530_vm3, %v30699_v24  ;;  %v30703_v4 = vld [vmem:[#allocation226_spill] sm:$0xff] }
 0x4c8   : > { %17923 = vmatprep.mubr.msk.f32.mxu1 %vm22840_vm1, %v30171_v2  ;;  %19139 = vmatprep.mubr.msk.f32.mxu0 %vm22840_vm1, %v30171_v2  ;;  %v26800_v27 = vsel %vm1580_vm4, %v30703_v4, %v26787_v30  ;;  %v30705_v4 = vld [vmem:[#allocation266_spill] sm:$0xff] }
 0x4cb   : > { %17924 = vmatmul.mubr.msk.f32.gmra.mrb[36].mxu1 %vm530_vm3, %v30701_v51  ;;  %19140 = vmatmul.mubr.msk.f32.gmra.mrb[62].mxu0 %vm530_vm3, %v30702_v21  ;;  %v6820_v51 = vsel %vm1580_vm4, %v26787_v30, %v6819_v46  ;;  %v30708_v30 = vld [vmem:[#allocation54_spill] sm:$0xff] }
 0x4cc   : > { %17926 = vmatprep.mubr.msk.f32.mxu1 %vm22840_vm1, %v30171_v2  ;;  %19142 = vmatprep.mubr.msk.f32.mxu0 %vm22840_vm1, %v30171_v2 }
 0x4cf   : > { %17927 = vmatmul.mubr.msk.f32.gmra.mrb[38].mxu1 %vm530_vm3, %v30704_v10  ;;  %19143 = vmatmul.mubr.msk.f32.gmra.mrb[64].mxu0 %vm530_vm3, %v26800_v27  ;;  %v30706_v10 = vld [vmem:[#allocation267_spill] sm:$0xff] }
 0x4d0   : > { %17929 = vmatprep.mubr.msk.f32.mxu1 %vm22840_vm1, %v30171_v2  ;;  %19145 = vmatprep.mubr.msk.f32.mxu0 %vm22840_vm1, %v30171_v2 }
 0x4d3   : > { %17930 = vmatmul.mubr.msk.f32.gmra.mrb[40].mxu1 %vm530_vm3, %v30705_v4  ;;  %19146 = vmatmul.mubr.msk.f32.gmra.mrb[66].mxu0 %vm530_vm3, %v6820_v51  ;;  %v15113_v51 = vld [vmem:[%s29719_s1 + $0x54] sm:$0xf] }
 0x4d4   : > { %17932 = vmatprep.mubr.msk.f32.mxu1 %vm22840_vm1, %v30171_v2  ;;  %19148 = vmatprep.mubr.msk.f32.mxu0 %vm22840_vm1, %v30171_v2  ;;  %v30707_v4 = vld [vmem:[#allocation268_spill] sm:$0xff] }
 0x4d7   : > { %17933 = vmatmul.mubr.msk.f32.gmra.mrb[42].mxu1 %vm530_vm3, %v30706_v10  ;;  %19149 = vmatmul.mubr.msk.f32.gmra.mrb[68].mxu0 %vm530_vm3, %v6819_v46  ;;  %v22729_v46 = vld [vmem:[%s22973_s24 + $0xc0] sm:$0xff]  ;;  %v30709_v10 = vld [vmem:[#allocation56_spill] sm:$0xff] }
 0x4d8   : > { %17935 = vmatprep.mubr.msk.f32.mxu1 %vm22840_vm1, %v30171_v2  ;;  %19153 = vmatprep.mubr.msk.f32.mxu0 %vm22840_vm1, %v30171_v2 }
 0x4db   : > { %17936 = vmatmul.mubr.msk.f32.gmra.mrb[44].mxu1 %vm530_vm3, %v30707_v4  ;;  %19154 = vmatmul.mubr.msk.f32.vlgmr.msra.gmra.mrb[0].mxu0 %vm530_vm3, %v30708_v30  ;;  %v22730_v30 = vld [vmem:[%s22973_s24 + $0xc8] sm:$0xff]  ;;  %v22731_v4 = vld [vmem:[%s22973_s24 + $0xd0] sm:$0xff] }
 0x4dc   : > { %19259 = vmatpush3.msk.msra.mxu0 %vm601_vm0, %v15113_v51  ;;  %17938 = vmatprep.mubr.msk.f32.mxu1 %vm22840_vm1, %v30171_v2  ;;  %v30710_v51 = vld [vmem:[#allocation58_spill] sm:$0xff] }
 0x4dd   : > { %19156 = vmatprep.mubr.msk.f32.mxu0 %vm22840_vm1, %v30171_v2  ;;  %19365 = vmatprep.subr.mxu0 %v30171_v2 }
 0x4df   : > { %17939 = vmatmul.mubr.msk.f32.gmra.mrb[46].mxu1 %vm530_vm3, %v22729_v46  ;;  %19157 = vmatmul.mubr.msk.f32.gmra.mrb[2].mxu0 %vm530_vm3, %v30709_v10  ;;  %v30711_v46 = vld [vmem:[#allocation60_spill] sm:$0xff] }
 0x4e0   : > { %17941 = vmatprep.mubr.msk.f32.mxu1 %vm22840_vm1, %v30171_v2  ;;  %19159 = vmatprep.mubr.msk.f32.mxu0 %vm22840_vm1, %v30171_v2  ;;  %v22732_v10 = vld [vmem:[%s22973_s24 + $0xd8] sm:$0xff] }
 0x4e3   : > { %17942 = vmatmul.mubr.msk.f32.gmra.mrb[48].mxu1 %vm530_vm3, %v22730_v30  ;;  %19160 = vmatmul.mubr.msk.f32.gmra.mrb[4].mxu0 %vm530_vm3, %v30710_v51  ;;  %v30712_v30 = vld [vmem:[#allocation62_spill] sm:$0xff] }
 0x4e4   : > { %17944 = vmatprep.mubr.msk.f32.mxu1 %vm22840_vm1, %v30171_v2  ;;  %19162 = vmatprep.mubr.msk.f32.mxu0 %vm22840_vm1, %v30171_v2  ;;  %v22733_v51 = vld [vmem:[%s22973_s24 + $0xe0] sm:$0xff] }
 0x4e7   : > { %17945 = vmatmul.mubr.msk.f32.gmra.mrb[50].mxu1 %vm530_vm3, %v22731_v4  ;;  %19163 = vmatmul.mubr.msk.f32.gmra.mrb[6].mxu0 %vm530_vm3, %v30711_v46  ;;  %v30713_v4 = vld [vmem:[#allocation64_spill] sm:$0xff]  ;;  %v22734_v46 = vld [vmem:[%s22973_s24 + $0xe8] sm:$0xff] }
 0x4e8   : > { %17947 = vmatprep.mubr.msk.f32.mxu1 %vm22840_vm1, %v30171_v2  ;;  %19165 = vmatprep.mubr.msk.f32.mxu0 %vm22840_vm1, %v30171_v2 }
 0x4eb   : > { %17948 = vmatmul.mubr.msk.f32.gmra.mrb[52].mxu1 %vm530_vm3, %v22732_v10  ;;  %19166 = vmatmul.mubr.msk.f32.gmra.mrb[8].mxu0 %vm530_vm3, %v30712_v30  ;;  %v30714_v10 = vld [vmem:[#allocation66_spill] sm:$0xff]  ;;  %v22735_v30 = vld [vmem:[%s22973_s24 + $0xf0] sm:$0xff] }
 0x4ec   : > { %17950 = vmatprep.mubr.msk.f32.mxu1 %vm22840_vm1, %v30171_v2  ;;  %19168 = vmatprep.mubr.msk.f32.mxu0 %vm22840_vm1, %v30171_v2 }
 0x4ef   : > { %17951 = vmatmul.mubr.msk.f32.gmra.mrb[54].mxu1 %vm530_vm3, %v22733_v51  ;;  %19169 = vmatmul.mubr.msk.f32.gmra.mrb[10].mxu0 %vm530_vm3, %v30713_v4  ;;  %v30715_v51 = vld [vmem:[#allocation68_spill] sm:$0xff] }
 0x4f0   : > { %17953 = vmatprep.mubr.msk.f32.mxu1 %vm22840_vm1, %v30171_v2  ;;  %19171 = vmatprep.mubr.msk.f32.mxu0 %vm22840_vm1, %v30171_v2  ;;  %v22736_v4 = vld [vmem:[%s22973_s24 + $0xf8] sm:$0xff] }
 0x4f3   : > { %17954 = vmatmul.mubr.msk.f32.gmra.mrb[56].mxu1 %vm530_vm3, %v22734_v46  ;;  %19172 = vmatmul.mubr.msk.f32.gmra.mrb[12].mxu0 %vm530_vm3, %v30714_v10  ;;  %v30716_v46 = vld [vmem:[#allocation70_spill] sm:$0xff] }
 0x4f4   : > { %17956 = vmatprep.mubr.msk.f32.mxu1 %vm22840_vm1, %v30171_v2  ;;  %19174 = vmatprep.mubr.msk.f32.mxu0 %vm22840_vm1, %v30171_v2  ;;  %v22737_v10 = vld [vmem:[%s22973_s24 + $0x100] sm:$0xff] }
 0x4f7   : > { %17957 = vmatmul.mubr.msk.f32.gmra.mrb[58].mxu1 %vm530_vm3, %v22735_v30  ;;  %19175 = vmatmul.mubr.msk.f32.gmra.mrb[14].mxu0 %vm530_vm3, %v30715_v51  ;;  %v30717_v30 = vld [vmem:[#allocation72_spill] sm:$0xff]  ;;  %v22738_v51 = vld [vmem:[%s22973_s24 + $0x108] sm:$0xff] }
 0x4f8   : > { %17959 = vmatprep.mubr.msk.f32.mxu1 %vm22840_vm1, %v30171_v2  ;;  %19177 = vmatprep.mubr.msk.f32.mxu0 %vm22840_vm1, %v30171_v2 }
 0x4fb   : > { %17960 = vmatmul.mubr.msk.f32.gmra.mrb[60].mxu1 %vm530_vm3, %v22736_v4  ;;  %19178 = vmatmul.mubr.msk.f32.gmra.mrb[16].mxu0 %vm530_vm3, %v30716_v46  ;;  %v30718_v4 = vld [vmem:[#allocation75_spill] sm:$0xff] }
 0x4fc   : > { %17962 = vmatprep.mubr.msk.f32.mxu1 %vm22840_vm1, %v30171_v2  ;;  %19180 = vmatprep.mubr.msk.f32.mxu0 %vm22840_vm1, %v30171_v2  ;;  %v22739_v46 = vld [vmem:[%s22973_s24 + $0x110] sm:$0xff] }
 0x4ff   : > { %17963 = vmatmul.mubr.msk.f32.gmra.mrb[62].mxu1 %vm530_vm3, %v22737_v10  ;;  %19181 = vmatmul.mubr.msk.f32.gmra.mrb[18].mxu0 %vm530_vm3, %v30717_v30  ;;  %v30719_v10 = vld [vmem:[#allocation76_spill] sm:$0xff]  ;;  %v30720_v30 = vld [vmem:[#allocation77_spill] sm:$0xff] }
 0x500   : > { %17965 = vmatprep.mubr.msk.f32.mxu1 %vm22840_vm1, %v30171_v2  ;;  %19183 = vmatprep.mubr.msk.f32.mxu0 %vm22840_vm1, %v30171_v2 }
 0x503   : > { %17966 = vmatmul.mubr.msk.f32.gmra.mrb[64].mxu1 %vm530_vm3, %v22738_v51  ;;  %19184 = vmatmul.mubr.msk.f32.gmra.mrb[20].mxu0 %vm530_vm3, %v30718_v4  ;;  %v30721_v51 = vld [vmem:[#allocation9_spill] sm:$0xff]  ;;  %v30722_v4 = vld [vmem:[#allocation78_spill] sm:$0xff] }
 0x504   : > { %17968 = vmatprep.mubr.msk.f32.mxu1 %vm22840_vm1, %v30171_v2  ;;  %19186 = vmatprep.mubr.msk.f32.mxu0 %vm22840_vm1, %v30171_v2 }
 0x507   : > { %17969 = vmatmul.mubr.msk.f32.gmra.mrb[66].mxu1 %vm530_vm3, %v22739_v46  ;;  %19187 = vmatmul.mubr.msk.f32.gmra.mrb[22].mxu0 %vm530_vm3, %v30719_v10  ;;  %v30724_v46 = vld [vmem:[#allocation79_spill] sm:$0xff]  ;;  %v30725_v10 = vld [vmem:[#allocation13_spill] sm:$0xff] }
 0x508   : > { %17971 = vmatprep.mubr.msk.f32.mxu1 %vm22840_vm1, %v30171_v2  ;;  %19189 = vmatprep.mubr.msk.f32.mxu0 %vm22840_vm1, %v30171_v2 }
 0x50b   : > { %17972 = vmatmul.mubr.msk.f32.gmra.mrb[68].mxu1 %vm530_vm3, %v26784_v35  ;;  %19190 = vmatmul.mubr.msk.f32.gmra.mrb[24].mxu0 %vm530_vm3, %v30720_v30  ;;  %v30723_v35 = vld [vmem:[#allocation11_spill] sm:$0xff]  ;;  %v30726_v30 = vld [vmem:[#allocation80_spill] sm:$0xff] }
 0x50c   : > { %17976 = vmatprep.mubr.msk.f32.mxu1 %vm22840_vm1, %v30171_v2  ;;  %19192 = vmatprep.mubr.msk.f32.mxu0 %vm22840_vm1, %v30171_v2 }
 0x50f   : > { %17977 = vmatmul.mubr.msk.f32.vlgmr.msra.gmra.mrb[0].mxu1 %vm530_vm3, %v30721_v51  ;;  %19193 = vmatmul.mubr.msk.f32.gmra.mrb[26].mxu0 %vm530_vm3, %v30722_v4  ;;  %v14706_v51 = vld [vmem:[%s29719_s1 + $0x28] sm:$0xf] }
 0x510   : > { %17979 = vmatprep.mubr.msk.f32.mxu1 %vm22840_vm1, %v30171_v2  ;;  %19195 = vmatprep.mubr.msk.f32.mxu0 %vm22840_vm1, %v30171_v2  ;;  %v30727_v4 = vld [vmem:[#allocation15_spill] sm:$0xff] }
 0x511   : > { %18082 = vmatpush3.msk.msra.mxu1 %vm601_vm0, %v14706_v51  ;;  %v30731_v51 = vld [vmem:[#allocation19_spill] sm:$0xff] }
 0x512   : > { %20566 = vmatprep.subr.mxu1 %v30171_v2 }
 0x513   : > { %17980 = vmatmul.mubr.msk.f32.gmra.mrb[2].mxu1 %vm530_vm3, %v30723_v35  ;;  %19196 = vmatmul.mubr.msk.f32.gmra.mrb[28].mxu0 %vm530_vm3, %v30724_v46  ;;  %v30728_v35 = vld [vmem:[#allocation81_spill] sm:$0xff] }
 0x514   : > { %17982 = vmatprep.mubr.msk.f32.mxu1 %vm22840_vm1, %v30171_v2  ;;  %19198 = vmatprep.mubr.msk.f32.mxu0 %vm22840_vm1, %v30171_v2  ;;  %v30729_v46 = vld [vmem:[#allocation17_spill] sm:$0xff] }
 0x517   : > { %17983 = vmatmul.mubr.msk.f32.gmra.mrb[4].mxu1 %vm530_vm3, %v30725_v10  ;;  %19199 = vmatmul.mubr.msk.f32.gmra.mrb[30].mxu0 %vm530_vm3, %v30726_v30  ;;  %v30730_v30 = vld [vmem:[#allocation82_spill] sm:$0xff] }
 0x518   : > { %17985 = vmatprep.mubr.msk.f32.mxu1 %vm22840_vm1, %v30171_v2  ;;  %19201 = vmatprep.mubr.msk.f32.mxu0 %vm22840_vm1, %v30171_v2 }
 0x51b   : > { %17986 = vmatmul.mubr.msk.f32.gmra.mrb[6].mxu1 %vm530_vm3, %v30727_v4  ;;  %19202 = vmatmul.mubr.msk.f32.gmra.mrb[32].mxu0 %vm530_vm3, %v30728_v35  ;;  %v30732_v35 = vld [vmem:[#allocation83_spill] sm:$0xff] }
 0x51c   : > { %17988 = vmatprep.mubr.msk.f32.mxu1 %vm22840_vm1, %v30171_v2  ;;  %19204 = vmatprep.mubr.msk.f32.mxu0 %vm22840_vm1, %v30171_v2 }
 0x51f   : > { %17989 = vmatmul.mubr.msk.f32.gmra.mrb[8].mxu1 %vm530_vm3, %v30729_v46  ;;  %19205 = vmatmul.mubr.msk.f32.gmra.mrb[34].mxu0 %vm530_vm3, %v30730_v30  ;;  %v30733_v46 = vld [vmem:[#allocation21_spill] sm:$0xff]  ;;  %v30734_v30 = vld [vmem:[#allocation84_spill] sm:$0xff] }
 0x520   : > { %17991 = vmatprep.mubr.msk.f32.mxu1 %vm22840_vm1, %v30171_v2  ;;  %19207 = vmatprep.mubr.msk.f32.mxu0 %vm22840_vm1, %v30171_v2 }
 0x523   : > { %17992 = vmatmul.mubr.msk.f32.gmra.mrb[10].mxu1 %vm530_vm3, %v30731_v51  ;;  %19208 = vmatmul.mubr.msk.f32.gmra.mrb[36].mxu0 %vm530_vm3, %v30732_v35  ;;  %v30735_v51 = vld [vmem:[#allocation23_spill] sm:$0xff]  ;;  %v30736_v35 = vld [vmem:[#allocation85_spill] sm:$0xff] }
 0x524   : > { %17994 = vmatprep.mubr.msk.f32.mxu1 %vm22840_vm1, %v30171_v2  ;;  %19210 = vmatprep.mubr.msk.f32.mxu0 %vm22840_vm1, %v30171_v2 }
 0x527   : > { %17995 = vmatmul.mubr.msk.f32.gmra.mrb[12].mxu1 %vm530_vm3, %v30733_v46  ;;  %19211 = vmatmul.mubr.msk.f32.gmra.mrb[38].mxu0 %vm530_vm3, %v30734_v30  ;;  %v30737_v46 = vld [vmem:[#allocation25_spill] sm:$0xff]  ;;  %v30738_v30 = vld [vmem:[#allocation86_spill] sm:$0xff] }
 0x528   : > { %17997 = vmatprep.mubr.msk.f32.mxu1 %vm22840_vm1, %v30171_v2  ;;  %19213 = vmatprep.mubr.msk.f32.mxu0 %vm22840_vm1, %v30171_v2 }
 0x52b   : > { %17998 = vmatmul.mubr.msk.f32.gmra.mrb[14].mxu1 %vm530_vm3, %v30735_v51  ;;  %19214 = vmatmul.mubr.msk.f32.gmra.mrb[40].mxu0 %vm530_vm3, %v30736_v35  ;;  %v30739_v51 = vld [vmem:[#allocation27_spill] sm:$0xff] }
 0x52c   : > { %18000 = vmatprep.mubr.msk.f32.mxu1 %vm22840_vm1, %v30171_v2  ;;  %19216 = vmatprep.mubr.msk.f32.mxu0 %vm22840_vm1, %v30171_v2  ;;  %v30740_v35 = vld [vmem:[#allocation87_spill] sm:$0xff] }
 0x52f   : > { %18001 = vmatmul.mubr.msk.f32.gmra.mrb[16].mxu1 %vm530_vm3, %v30737_v46  ;;  %19217 = vmatmul.mubr.msk.f32.gmra.mrb[42].mxu0 %vm530_vm3, %v30738_v30  ;;  %v30741_v46 = vld [vmem:[#allocation29_spill] sm:$0xff]  ;;  %v30742_v30 = vld [vmem:[#allocation88_spill] sm:$0xff] }
 0x530   : > { %18003 = vmatprep.mubr.msk.f32.mxu1 %vm22840_vm1, %v30171_v2  ;;  %19219 = vmatprep.mubr.msk.f32.mxu0 %vm22840_vm1, %v30171_v2 }
 0x533   : > { %18004 = vmatmul.mubr.msk.f32.gmra.mrb[18].mxu1 %vm530_vm3, %v30739_v51  ;;  %19220 = vmatmul.mubr.msk.f32.gmra.mrb[44].mxu0 %vm530_vm3, %v30740_v35  ;;  %v30743_v51 = vld [vmem:[#allocation31_spill] sm:$0xff]  ;;  %v30744_v35 = vld [vmem:[#allocation89_spill] sm:$0xff] }
 0x534   : > { %18006 = vmatprep.mubr.msk.f32.mxu1 %vm22840_vm1, %v30171_v2  ;;  %19222 = vmatprep.mubr.msk.f32.mxu0 %vm22840_vm1, %v30171_v2 }
 0x537   : > { %18007 = vmatmul.mubr.msk.f32.gmra.mrb[20].mxu1 %vm530_vm3, %v30741_v46  ;;  %19223 = vmatmul.mubr.msk.f32.gmra.mrb[46].mxu0 %vm530_vm3, %v30742_v30  ;;  %v30745_v46 = vld [vmem:[#allocation33_spill] sm:$0xff]  ;;  %v30746_v30 = vld [vmem:[#allocation90_spill] sm:$0xff] }
 0x538   : > { %18009 = vmatprep.mubr.msk.f32.mxu1 %vm22840_vm1, %v30171_v2  ;;  %19225 = vmatprep.mubr.msk.f32.mxu0 %vm22840_vm1, %v30171_v2 }
 0x53b   : > { %18010 = vmatmul.mubr.msk.f32.gmra.mrb[22].mxu1 %vm530_vm3, %v30743_v51  ;;  %19226 = vmatmul.mubr.msk.f32.gmra.mrb[48].mxu0 %vm530_vm3, %v30744_v35  ;;  %v30747_v51 = vld [vmem:[#allocation35_spill] sm:$0xff] }
 0x53c   : > { %18012 = vmatprep.mubr.msk.f32.mxu1 %vm22840_vm1, %v30171_v2  ;;  %19228 = vmatprep.mubr.msk.f32.mxu0 %vm22840_vm1, %v30171_v2  ;;  %v30748_v35 = vld [vmem:[#allocation91_spill] sm:$0xff] }
 0x53f   : > { %18013 = vmatmul.mubr.msk.f32.gmra.mrb[24].mxu1 %vm530_vm3, %v30745_v46  ;;  %19229 = vmatmul.mubr.msk.f32.gmra.mrb[50].mxu0 %vm530_vm3, %v30746_v30  ;;  %v30749_v30 = vld [vmem:[#allocation92_spill] sm:$0xff]  ;;  %v30760_v46 = vld [vmem:[#allocation49_spill] sm:$0xff] }
 0x540   : > { %18015 = vmatprep.mubr.msk.f32.mxu1 %vm22840_vm1, %v30171_v2  ;;  %19231 = vmatprep.mubr.msk.f32.mxu0 %vm22840_vm1, %v30171_v2 }
 0x543   : > { %18016 = vmatmul.mubr.msk.f32.gmra.mrb[26].mxu1 %vm530_vm3, %v30747_v51  ;;  %19232 = vmatmul.mubr.msk.f32.gmra.mrb[52].mxu0 %vm530_vm3, %v30748_v35  ;;  %v30750_v51 = vld [vmem:[#allocation39_spill] sm:$0xff]  ;;  %v30751_v35 = vld [vmem:[#allocation93_spill] sm:$0xff] }
 0x544   : > { %18018 = vmatprep.mubr.msk.f32.mxu1 %vm22840_vm1, %v30171_v2  ;;  %19234 = vmatprep.mubr.msk.f32.mxu0 %vm22840_vm1, %v30171_v2 }
 0x547   : > { %18019 = vmatmul.mubr.msk.f32.gmra.mrb[28].mxu1 %vm530_vm3, %v30578_v41  ;;  %19235 = vmatmul.mubr.msk.f32.gmra.mrb[54].mxu0 %vm530_vm3, %v30749_v30  ;;  %v30752_v41 = vld [vmem:[#allocation41_spill] sm:$0xff]  ;;  %v30753_v30 = vld [vmem:[#allocation94_spill] sm:$0xff] }
 0x548   : > { %18021 = vmatprep.mubr.msk.f32.mxu1 %vm22840_vm1, %v30171_v2  ;;  %19237 = vmatprep.mubr.msk.f32.mxu0 %vm22840_vm1, %v30171_v2 }
 0x54b   : > { %18022 = vmatmul.mubr.msk.f32.gmra.mrb[30].mxu1 %vm530_vm3, %v30750_v51  ;;  %19238 = vmatmul.mubr.msk.f32.gmra.mrb[56].mxu0 %vm530_vm3, %v30751_v35  ;;  %v30754_v35 = vld [vmem:[#allocation95_spill] sm:$0xff] }
 0x54c   : > { %18024 = vmatprep.mubr.msk.f32.mxu1 %vm22840_vm1, %v30171_v2  ;;  %19240 = vmatprep.mubr.msk.f32.mxu0 %vm22840_vm1, %v30171_v2  ;;  %v30758_v51 = vld [vmem:[#allocation99_spill] sm:$0xff] }
 0x54f   : > { %18025 = vmatmul.mubr.msk.f32.gmra.mrb[32].mxu1 %vm530_vm3, %v30752_v41  ;;  %19241 = vmatmul.mubr.msk.f32.gmra.mrb[58].mxu0 %vm530_vm3, %v30753_v30  ;;  %v30755_v41 = vld [vmem:[#allocation45_spill] sm:$0xff] }
 0x550   : > { %18027 = vmatprep.mubr.msk.f32.mxu1 %vm22840_vm1, %v30171_v2  ;;  %19243 = vmatprep.mubr.msk.f32.mxu0 %vm22840_vm1, %v30171_v2  ;;  %v30756_v30 = vld [vmem:[#allocation97_spill] sm:$0xff] }
 0x553   : > { %18028 = vmatmul.mubr.msk.f32.gmra.mrb[34].mxu1 %vm530_vm3, %v30584_v28  ;;  %19244 = vmatmul.mubr.msk.f32.gmra.mrb[60].mxu0 %vm530_vm3, %v30754_v35  ;;  %v7105_v35 = vrot.slane %v26803_v42, 4  ;;  %v30757_v28 = vld [vmem:[#allocation47_spill] sm:$0xff] }
 0x554   : > { %18030 = vmatprep.mubr.msk.f32.mxu1 %vm22840_vm1, %v30171_v2  ;;  %19246 = vmatprep.mubr.msk.f32.mxu0 %vm22840_vm1, %v30171_v2 }
 0x557   : > { %18031 = vmatmul.mubr.msk.f32.gmra.mrb[36].mxu1 %vm530_vm3, %v30755_v41  ;;  %19247 = vmatmul.mubr.msk.f32.gmra.mrb[62].mxu0 %vm530_vm3, %v30756_v30  ;;  %v30759_v30 = vld [vmem:[#allocation98_spill] sm:$0xff] }
 0x558   : > { %18033 = vmatprep.mubr.msk.f32.mxu1 %vm22840_vm1, %v30171_v2  ;;  %19249 = vmatprep.mubr.msk.f32.mxu0 %vm22840_vm1, %v30171_v2  ;;  %v7106_v41 = vsel %vm601_vm0, %v30759_v30, %v7105_v35  ;;  %v30763_v30 = vld [vmem:[#allocation103_spill] sm:$0xff] }
 0x55b   : > { %18034 = vmatmul.mubr.msk.f32.gmra.mrb[38].mxu1 %vm530_vm3, %v30757_v28  ;;  %19250 = vmatmul.mubr.msk.f32.gmra.mrb[64].mxu0 %vm530_vm3, %v30758_v51  ;;  %v30761_v51 = vld [vmem:[#allocation101_spill] sm:$0xff] }
 0x55c   : > { %18036 = vmatprep.mubr.msk.f32.mxu1 %vm22840_vm1, %v30171_v2  ;;  %19252 = vmatprep.mubr.msk.f32.mxu0 %vm22840_vm1, %v30171_v2 }
 0x55f   : > { %18037 = vmatmul.mubr.msk.f32.gmra.mrb[40].mxu1 %vm530_vm3, %v30760_v46  ;;  %19253 = vmatmul.mubr.msk.f32.gmra.mrb[66].mxu0 %vm530_vm3, %v7106_v41  ;;  %v15150_v41 = vld [vmem:[%s29719_s1 + $0x58] sm:$0xf] }
 0x560   : > { %18039 = vmatprep.mubr.msk.f32.mxu1 %vm22840_vm1, %v30171_v2  ;;  %19255 = vmatprep.mubr.msk.f32.mxu0 %vm22840_vm1, %v30171_v2 }
 0x563   : > { %18040 = vmatmul.mubr.msk.f32.gmra.mrb[42].mxu1 %vm530_vm3, %v30592_v15  ;;  %19256 = vmatmul.mubr.msk.f32.gmra.mrb[68].mxu0 %vm530_vm3, %v7105_v35  ;;  %v30762_v35 = vld [vmem:[#allocation102_spill] sm:$0xff] }
 0x564   : > { %18042 = vmatprep.mubr.msk.f32.mxu1 %vm22840_vm1, %v30171_v2  ;;  %19260 = vmatprep.mubr.msk.f32.mxu0 %vm22840_vm1, %v30171_v2 }
 0x567   : > { %18043 = vmatmul.mubr.msk.f32.gmra.mrb[44].mxu1 %vm530_vm3, %v30594_v1  ;;  %19261 = vmatmul.mubr.msk.f32.vlgmr.msra.gmra.mrb[0].mxu0 %vm530_vm3, %v30761_v51  ;;  %v30765_v51 = vld [vmem:[#allocation105_spill] sm:$0xff] }
 0x568   : > { %19366 = vmatpush3.msk.msra.mxu0 %vm601_vm0, %v15150_v41  ;;  %18045 = vmatprep.mubr.msk.f32.mxu1 %vm22840_vm1, %v30171_v2  ;;  %v30764_v41 = vld [vmem:[#allocation104_spill] sm:$0xff] }
 0x569   : > { %19263 = vmatprep.mubr.msk.f32.mxu0 %vm22840_vm1, %v30171_v2  ;;  %19472 = vmatprep.subr.mxu0 %v30171_v2 }
 0x56b   : > { %18046 = vmatmul.mubr.msk.f32.gmra.mrb[46].mxu1 %vm530_vm3, %v30595_v63  ;;  %19264 = vmatmul.mubr.msk.f32.gmra.mrb[2].mxu0 %vm530_vm3, %v30762_v35  ;;  %v30766_v35 = vld [vmem:[#allocation106_spill] sm:$0xff] }
 0x56c   : > { %18048 = vmatprep.mubr.msk.f32.mxu1 %vm22840_vm1, %v30171_v2  ;;  %19266 = vmatprep.mubr.msk.f32.mxu0 %vm22840_vm1, %v30171_v2 }
 0x56f   : > { %18049 = vmatmul.mubr.msk.f32.gmra.mrb[48].mxu1 %vm530_vm3, %v30596_v23  ;;  %19267 = vmatmul.mubr.msk.f32.gmra.mrb[4].mxu0 %vm530_vm3, %v30763_v30  ;;  %v30767_v30 = vld [vmem:[#allocation107_spill] sm:$0xff] }
 0x570   : > { %18051 = vmatprep.mubr.msk.f32.mxu1 %vm22840_vm1, %v30171_v2  ;;  %19269 = vmatprep.mubr.msk.f32.mxu0 %vm22840_vm1, %v30171_v2 }
 0x573   : > { %18052 = vmatmul.mubr.msk.f32.gmra.mrb[50].mxu1 %vm530_vm3, %v30597_v58  ;;  %19270 = vmatmul.mubr.msk.f32.gmra.mrb[6].mxu0 %vm530_vm3, %v30764_v41  ;;  %v30768_v41 = vld [vmem:[#allocation67_spill] sm:$0xff] }
 0x574   : > { %18054 = vmatprep.mubr.msk.f32.mxu1 %vm22840_vm1, %v30171_v2  ;;  %19272 = vmatprep.mubr.msk.f32.mxu0 %vm22840_vm1, %v30171_v2 }
 0x577   : > { %18055 = vmatmul.mubr.msk.f32.gmra.mrb[52].mxu1 %vm530_vm3, %v30598_v37  ;;  %19273 = vmatmul.mubr.msk.f32.gmra.mrb[8].mxu0 %vm530_vm3, %v30765_v51  ;;  %v30769_v51 = vld [vmem:[#allocation108_spill] sm:$0xff] }
 0x578   : > { %18057 = vmatprep.mubr.msk.f32.mxu1 %vm22840_vm1, %v30171_v2  ;;  %19275 = vmatprep.mubr.msk.f32.mxu0 %vm22840_vm1, %v30171_v2 }
 0x57b   : > { %18058 = vmatmul.mubr.msk.f32.gmra.mrb[54].mxu1 %vm530_vm3, %v30599_v13  ;;  %19276 = vmatmul.mubr.msk.f32.gmra.mrb[10].mxu0 %vm530_vm3, %v30766_v35  ;;  %v30770_v35 = vld [vmem:[#allocation69_spill] sm:$0xff] }
 0x57c   : > { %18060 = vmatprep.mubr.msk.f32.mxu1 %vm22840_vm1, %v30171_v2  ;;  %19278 = vmatprep.mubr.msk.f32.mxu0 %vm22840_vm1, %v30171_v2 }
 0x57f   : > { %18061 = vmatmul.mubr.msk.f32.gmra.mrb[56].mxu1 %vm530_vm3, %v30600_v17  ;;  %19279 = vmatmul.mubr.msk.f32.gmra.mrb[12].mxu0 %vm530_vm3, %v30767_v30  ;;  %v30771_v30 = vld [vmem:[#allocation109_spill] sm:$0xff] }
 0x580   : > { %18063 = vmatprep.mubr.msk.f32.mxu1 %vm22840_vm1, %v30171_v2  ;;  %19281 = vmatprep.mubr.msk.f32.mxu0 %vm22840_vm1, %v30171_v2 }
 0x583   : > { %18064 = vmatmul.mubr.msk.f32.gmra.mrb[58].mxu1 %vm530_vm3, %v30768_v41  ;;  %19282 = vmatmul.mubr.msk.f32.gmra.mrb[14].mxu0 %vm530_vm3, %v30769_v51  ;;  %v30772_v41 = vld [vmem:[#allocation71_spill] sm:$0xff]  ;;  %v30773_v51 = vld [vmem:[#allocation110_spill] sm:$0xff] }
 0x584   : > { %18066 = vmatprep.mubr.msk.f32.mxu1 %vm22840_vm1, %v30171_v2  ;;  %19284 = vmatprep.mubr.msk.f32.mxu0 %vm22840_vm1, %v30171_v2 }
 0x587   : > { %18067 = vmatmul.mubr.msk.f32.gmra.mrb[60].mxu1 %vm530_vm3, %v30770_v35  ;;  %19285 = vmatmul.mubr.msk.f32.gmra.mrb[16].mxu0 %vm530_vm3, %v30771_v30  ;;  %v30774_v30 = vld [vmem:[#allocation111_spill] sm:$0xff] }
 0x588   : > { %18069 = vmatprep.mubr.msk.f32.mxu1 %vm22840_vm1, %v30171_v2  ;;  %19287 = vmatprep.mubr.msk.f32.mxu0 %vm22840_vm1, %v30171_v2 }
 0x58b   : > { %18070 = vmatmul.mubr.msk.f32.gmra.mrb[62].mxu1 %vm530_vm3, %v30772_v41  ;;  %19288 = vmatmul.mubr.msk.f32.gmra.mrb[18].mxu0 %vm530_vm3, %v30773_v51  ;;  %v30775_v51 = vld [vmem:[#allocation112_spill] sm:$0xff] }
 0x58c   : > { %18072 = vmatprep.mubr.msk.f32.mxu1 %vm22840_vm1, %v30171_v2  ;;  %19290 = vmatprep.mubr.msk.f32.mxu0 %vm22840_vm1, %v30171_v2 }
 0x58f   : > { %18073 = vmatmul.mubr.msk.f32.gmra.mrb[64].mxu1 %vm530_vm3, %v30604_v5  ;;  %19291 = vmatmul.mubr.msk.f32.gmra.mrb[20].mxu0 %vm530_vm3, %v30774_v30  ;;  %v30776_v30 = vld [vmem:[#allocation113_spill] sm:$0xff] }
 0x590   : > { %18075 = vmatprep.mubr.msk.f32.mxu1 %vm22840_vm1, %v30171_v2  ;;  %19293 = vmatprep.mubr.msk.f32.mxu0 %vm22840_vm1, %v30171_v2 }
 0x593   : > { %18076 = vmatmul.mubr.msk.f32.gmra.mrb[66].mxu1 %vm530_vm3, %v26182_v50  ;;  %19294 = vmatmul.mubr.msk.f32.gmra.mrb[22].mxu0 %vm530_vm3, %v30775_v51  ;;  %v30777_v50 = vld [vmem:[#allocation114_spill] sm:$0xff]  ;;  %v30778_v51 = vld [vmem:[#allocation115_spill] sm:$0xff] }
 0x594   : > { %18078 = vmatprep.mubr.msk.f32.mxu1 %vm22840_vm1, %v30171_v2  ;;  %19296 = vmatprep.mubr.msk.f32.mxu0 %vm22840_vm1, %v30171_v2 }
 0x597   : > { %18079 = vmatmul.mubr.msk.f32.gmra.mrb[68].mxu1 %vm530_vm3, %v26169_v22  ;;  %19297 = vmatmul.mubr.msk.f32.gmra.mrb[24].mxu0 %vm530_vm3, %v30776_v30  ;;  %v22740_v22 = vld [vmem:[%s29719_s1 + $0x2c] sm:$0xf]  ;;  %v30779_v30 = vld [vmem:[#allocation117_spill] sm:$0xff] }
 0x598   : > { %18083 = vmatprep.mubr.msk.f32.mxu1 %vm22840_vm1, %v30171_v2  ;;  %19299 = vmatprep.mubr.msk.f32.mxu0 %vm22840_vm1, %v30171_v2 }
 0x59b   : > { %18084 = vmatmul.mubr.msk.f32.vlgmr.msra.gmra.mrb[0].mxu1 %vm530_vm3, %v30777_v50  ;;  %19300 = vmatmul.mubr.msk.f32.gmra.mrb[26].mxu0 %vm530_vm3, %v30778_v51  ;;  %v30780_v50 = vld [vmem:[#allocation119_spill] sm:$0xff] }
 0x59c   : > { %18086 = vmatprep.mubr.msk.f32.mxu1 %vm22840_vm1, %v30171_v2  ;;  %19302 = vmatprep.mubr.msk.f32.mxu0 %vm22840_vm1, %v30171_v2  ;;  %v30782_v51 = vld [vmem:[#allocation123_spill] sm:$0xff] }
 0x59d   : > { %20567 = vmatpush3.msk.msra.mxu1 %vm601_vm0, %v22740_v22  ;;  %v30783_v22 = vld [vmem:[#allocation125_spill] sm:$0xff] }
 0x59f   : > { %18087 = vmatmul.mubr.msk.f32.gmra.mrb[2].mxu1 %vm530_vm3, %v30609_v29  ;;  %19303 = vmatmul.mubr.msk.f32.gmra.mrb[28].mxu0 %vm530_vm3, %v30779_v30  ;;  %v30781_v29 = vld [vmem:[#allocation121_spill] sm:$0xff]  ;;  %v30784_v30 = vld [vmem:[#allocation128_spill] sm:$0xff] }
 0x5a0   : > { %18089 = vmatprep.mubr.msk.f32.mxu1 %vm22840_vm1, %v30171_v2  ;;  %19305 = vmatprep.mubr.msk.f32.mxu0 %vm22840_vm1, %v30171_v2 }
 0x5a3   : > { %18090 = vmatmul.mubr.msk.f32.gmra.mrb[4].mxu1 %vm530_vm3, %v30610_v47  ;;  %19306 = vmatmul.mubr.msk.f32.gmra.mrb[30].mxu0 %vm530_vm3, %v30780_v50  ;;  %v30785_v50 = vld [vmem:[#allocation131_spill] sm:$0xff] }
 0x5a4   : > { %18092 = vmatprep.mubr.msk.f32.mxu1 %vm22840_vm1, %v30171_v2  ;;  %19308 = vmatprep.mubr.msk.f32.mxu0 %vm22840_vm1, %v30171_v2 }
 0x5a7   : > { %18093 = vmatmul.mubr.msk.f32.gmra.mrb[6].mxu1 %vm530_vm3, %v30611_v33  ;;  %19309 = vmatmul.mubr.msk.f32.gmra.mrb[32].mxu0 %vm530_vm3, %v30781_v29  ;;  %v30786_v29 = vld [vmem:[#allocation134_spill] sm:$0xff] }
 0x5a8   : > { %18095 = vmatprep.mubr.msk.f32.mxu1 %vm22840_vm1, %v30171_v2  ;;  %19311 = vmatprep.mubr.msk.f32.mxu0 %vm22840_vm1, %v30171_v2 }
 0x5ab   : > { %18096 = vmatmul.mubr.msk.f32.gmra.mrb[8].mxu1 %vm530_vm3, %v30612_v44  ;;  %19312 = vmatmul.mubr.msk.f32.gmra.mrb[34].mxu0 %vm530_vm3, %v30782_v51  ;;  %v30787_v51 = vld [vmem:[#allocation137_spill] sm:$0xff] }
 0x5ac   : > { %18098 = vmatprep.mubr.msk.f32.mxu1 %vm22840_vm1, %v30171_v2  ;;  %19314 = vmatprep.mubr.msk.f32.mxu0 %vm22840_vm1, %v30171_v2 }
 0x5af   : > { %18099 = vmatmul.mubr.msk.f32.gmra.mrb[10].mxu1 %vm530_vm3, %v30613_v49  ;;  %19315 = vmatmul.mubr.msk.f32.gmra.mrb[36].mxu0 %vm530_vm3, %v30783_v22  ;;  %v30788_v22 = vld [vmem:[#allocation139_spill] sm:$0xff] }
 0x5b0   : > { %18101 = vmatprep.mubr.msk.f32.mxu1 %vm22840_vm1, %v30171_v2  ;;  %19317 = vmatprep.mubr.msk.f32.mxu0 %vm22840_vm1, %v30171_v2 }
 0x5b3   : > { %18102 = vmatmul.mubr.msk.f32.gmra.mrb[12].mxu1 %vm530_vm3, %v30614_v54  ;;  %19318 = vmatmul.mubr.msk.f32.gmra.mrb[38].mxu0 %vm530_vm3, %v30784_v30  ;;  %v30789_v30 = vld [vmem:[#allocation140_spill] sm:$0xff] }
 0x5b4   : > { %18104 = vmatprep.mubr.msk.f32.mxu1 %vm22840_vm1, %v30171_v2  ;;  %19320 = vmatprep.mubr.msk.f32.mxu0 %vm22840_vm1, %v30171_v2 }
 0x5b7   : > { %18105 = vmatmul.mubr.msk.f32.gmra.mrb[14].mxu1 %vm530_vm3, %v30615_v59  ;;  %19321 = vmatmul.mubr.msk.f32.gmra.mrb[40].mxu0 %vm530_vm3, %v30785_v50  ;;  %v30790_v50 = vld [vmem:[#allocation141_spill] sm:$0xff] }
 0x5b8   : > { %18107 = vmatprep.mubr.msk.f32.mxu1 %vm22840_vm1, %v30171_v2  ;;  %19323 = vmatprep.mubr.msk.f32.mxu0 %vm22840_vm1, %v30171_v2 }
 0x5bb   : > { %18108 = vmatmul.mubr.msk.f32.gmra.mrb[16].mxu1 %vm530_vm3, %v30616_v0  ;;  %19324 = vmatmul.mubr.msk.f32.gmra.mrb[42].mxu0 %vm530_vm3, %v30786_v29  ;;  %v30791_v29 = vld [vmem:[#allocation142_spill] sm:$0xff] }
 0x5bc   : > { %18110 = vmatprep.mubr.msk.f32.mxu1 %vm22840_vm1, %v30171_v2  ;;  %19326 = vmatprep.mubr.msk.f32.mxu0 %vm22840_vm1, %v30171_v2 }
 0x5bf   : > { %18111 = vmatmul.mubr.msk.f32.gmra.mrb[18].mxu1 %vm530_vm3, %v30617_v11  ;;  %19327 = vmatmul.mubr.msk.f32.gmra.mrb[44].mxu0 %vm530_vm3, %v30787_v51  ;;  %v30792_v51 = vld [vmem:[#allocation143_spill] sm:$0xff] }
 0x5c0   : > { %18113 = vmatprep.mubr.msk.f32.mxu1 %vm22840_vm1, %v30171_v2  ;;  %19329 = vmatprep.mubr.msk.f32.mxu0 %vm22840_vm1, %v30171_v2 }
 0x5c3   : > { %18114 = vmatmul.mubr.msk.f32.gmra.mrb[20].mxu1 %vm530_vm3, %v30618_v20  ;;  %19330 = vmatmul.mubr.msk.f32.gmra.mrb[46].mxu0 %vm530_vm3, %v30788_v22  ;;  %v30793_v22 = vld [vmem:[#allocation145_spill] sm:$0xff] }
 0x5c4   : > { %18116 = vmatprep.mubr.msk.f32.mxu1 %vm22840_vm1, %v30171_v2  ;;  %19332 = vmatprep.mubr.msk.f32.mxu0 %vm22840_vm1, %v30171_v2 }
 0x5c7   : > { %18117 = vmatmul.mubr.msk.f32.gmra.mrb[22].mxu1 %vm530_vm3, %v30789_v30  ;;  %19333 = vmatmul.mubr.msk.f32.gmra.mrb[48].mxu0 %vm530_vm3, %v30790_v50  ;;  %v30794_v50 = vld [vmem:[#allocation147_spill] sm:$0xff] }
 0x5c8   : > { %18119 = vmatprep.mubr.msk.f32.mxu1 %vm22840_vm1, %v30171_v2  ;;  %19335 = vmatprep.mubr.msk.f32.mxu0 %vm22840_vm1, %v30171_v2 }
 0x5cb   : > { %18120 = vmatmul.mubr.msk.f32.gmra.mrb[24].mxu1 %vm530_vm3, %v30791_v29  ;;  %19336 = vmatmul.mubr.msk.f32.gmra.mrb[50].mxu0 %vm530_vm3, %v30792_v51  ;;  %v30795_v51 = vld [vmem:[#allocation149_spill] sm:$0xff] }
 0x5cc   : > { %18122 = vmatprep.mubr.msk.f32.mxu1 %vm22840_vm1, %v30171_v2  ;;  %19338 = vmatprep.mubr.msk.f32.mxu0 %vm22840_vm1, %v30171_v2 }
 0x5cf   : > { %18123 = vmatmul.mubr.msk.f32.gmra.mrb[26].mxu1 %vm530_vm3, %v30624_v8  ;;  %19339 = vmatmul.mubr.msk.f32.gmra.mrb[52].mxu0 %vm530_vm3, %v30793_v22  ;;  %v30796_v22 = vld [vmem:[#allocation151_spill] sm:$0xff] }
 0x5d0   : > { %18125 = vmatprep.mubr.msk.f32.mxu1 %vm22840_vm1, %v30171_v2  ;;  %19341 = vmatprep.mubr.msk.f32.mxu0 %vm22840_vm1, %v30171_v2 }
 0x5d3   : > { %18126 = vmatmul.mubr.msk.f32.gmra.mrb[28].mxu1 %vm530_vm3, %v30626_v39  ;;  %19342 = vmatmul.mubr.msk.f32.gmra.mrb[54].mxu0 %vm530_vm3, %v30794_v50  ;;  %v30797_v50 = vld [vmem:[#allocation153_spill] sm:$0xff] }
 0x5d4   : > { %18128 = vmatprep.mubr.msk.f32.mxu1 %vm22840_vm1, %v30171_v2  ;;  %19344 = vmatprep.mubr.msk.f32.mxu0 %vm22840_vm1, %v30171_v2 }
 0x5d7   : > { %18129 = vmatmul.mubr.msk.f32.gmra.mrb[30].mxu1 %vm530_vm3, %v30627_v16  ;;  %19345 = vmatmul.mubr.msk.f32.gmra.mrb[56].mxu0 %vm530_vm3, %v30795_v51  ;;  %v30798_v51 = vld [vmem:[#allocation156_spill] sm:$0xff] }
 0x5d8   : > { %18131 = vmatprep.mubr.msk.f32.mxu1 %vm22840_vm1, %v30171_v2  ;;  %19347 = vmatprep.mubr.msk.f32.mxu0 %vm22840_vm1, %v30171_v2 }
 0x5db   : > { %18132 = vmatmul.mubr.msk.f32.gmra.mrb[32].mxu1 %vm530_vm3, %v30628_v34  ;;  %19348 = vmatmul.mubr.msk.f32.gmra.mrb[58].mxu0 %vm530_vm3, %v30796_v22  ;;  %v7391_v22 = vrot.slane %v26803_v42, 5 }
 0x5dc   : > { %18134 = vmatprep.mubr.msk.f32.mxu1 %vm22840_vm1, %v30171_v2  ;;  %19350 = vmatprep.mubr.msk.f32.mxu0 %vm22840_vm1, %v30171_v2 }
 0x5df   : > { %18135 = vmatmul.mubr.msk.f32.gmra.mrb[34].mxu1 %vm530_vm3, %v30629_v45  ;;  %19351 = vmatmul.mubr.msk.f32.gmra.mrb[60].mxu0 %vm530_vm3, %v30797_v50  ;;  %v30799_v50 = vld [vmem:[#allocation159_spill] sm:$0xff] }
 0x5e0   : > { %18137 = vmatprep.mubr.msk.f32.mxu1 %vm22840_vm1, %v30171_v2  ;;  %19353 = vmatprep.mubr.msk.f32.mxu0 %vm22840_vm1, %v30171_v2 }
 0x5e3   : > { %18138 = vmatmul.mubr.msk.f32.gmra.mrb[36].mxu1 %vm530_vm3, %v30630_v19  ;;  %19354 = vmatmul.mubr.msk.f32.gmra.mrb[62].mxu0 %vm530_vm3, %v30798_v51  ;;  %v30800_v51 = vld [vmem:[#allocation157_spill] sm:$0xff] }
 0x5e4   : > { %18140 = vmatprep.mubr.msk.f32.mxu1 %vm22840_vm1, %v30171_v2  ;;  %19356 = vmatprep.mubr.msk.f32.mxu0 %vm22840_vm1, %v30171_v2  ;;  %v7392_v19 = vsel %vm2419_vm5, %v30800_v51, %v7391_v22  ;;  %v30803_v51 = vld [vmem:[#allocation168_spill] sm:$0xff] }
 0x5e7   : > { %18141 = vmatmul.mubr.msk.f32.gmra.mrb[38].mxu1 %vm530_vm3, %v30632_v56  ;;  %19357 = vmatmul.mubr.msk.f32.gmra.mrb[64].mxu0 %vm530_vm3, %v30799_v50  ;;  %v30801_v50 = vld [vmem:[#allocation164_spill] sm:$0xff] }
 0x5e8   : > { %18143 = vmatprep.mubr.msk.f32.mxu1 %vm22840_vm1, %v30171_v2  ;;  %19359 = vmatprep.mubr.msk.f32.mxu0 %vm22840_vm1, %v30171_v2 }
 0x5eb   : > { %18144 = vmatmul.mubr.msk.f32.gmra.mrb[40].mxu1 %vm530_vm3, %v30634_v36  ;;  %19360 = vmatmul.mubr.msk.f32.gmra.mrb[66].mxu0 %vm530_vm3, %v7392_v19  ;;  %v15187_v19 = vld [vmem:[%s29719_s1 + $0x5c] sm:$0xf] }
 0x5ec   : > { %18146 = vmatprep.mubr.msk.f32.mxu1 %vm22840_vm1, %v30171_v2  ;;  %19362 = vmatprep.mubr.msk.f32.mxu0 %vm22840_vm1, %v30171_v2 }
 0x5ef   : > { %18147 = vmatmul.mubr.msk.f32.gmra.mrb[42].mxu1 %vm530_vm3, %v30636_v61  ;;  %19363 = vmatmul.mubr.msk.f32.gmra.mrb[68].mxu0 %vm530_vm3, %v7391_v22  ;;  %v30802_v22 = vld [vmem:[#allocation166_spill] sm:$0xff] }
 0x5f0   : > { %18149 = vmatprep.mubr.msk.f32.mxu1 %vm22840_vm1, %v30171_v2  ;;  %19367 = vmatprep.mubr.msk.f32.mxu0 %vm22840_vm1, %v30171_v2 }
 0x5f3   : > { %18150 = vmatmul.mubr.msk.f32.gmra.mrb[44].mxu1 %vm530_vm3, %v30637_v31  ;;  %19368 = vmatmul.mubr.msk.f32.vlgmr.msra.gmra.mrb[0].mxu0 %vm530_vm3, %v30801_v50  ;;  %v30805_v50 = vld [vmem:[#allocation172_spill] sm:$0xff] }
 0x5f4   : > { %19473 = vmatpush3.msk.msra.mxu0 %vm601_vm0, %v15187_v19  ;;  %18152 = vmatprep.mubr.msk.f32.mxu1 %vm22840_vm1, %v30171_v2  ;;  %v30804_v19 = vld [vmem:[#allocation170_spill] sm:$0xff] }
 0x5f5   : > { %19370 = vmatprep.mubr.msk.f32.mxu0 %vm22840_vm1, %v30171_v2  ;;  %19579 = vmatprep.subr.mxu0 %v30171_v2 }
 0x5f7   : > { %18153 = vmatmul.mubr.msk.f32.gmra.mrb[46].mxu1 %vm530_vm3, %v30638_v6  ;;  %19371 = vmatmul.mubr.msk.f32.gmra.mrb[2].mxu0 %vm530_vm3, %v30802_v22  ;;  %v30806_v22 = vld [vmem:[#allocation174_spill] sm:$0xff] }
 0x5f8   : > { %18155 = vmatprep.mubr.msk.f32.mxu1 %vm22840_vm1, %v30171_v2  ;;  %19373 = vmatprep.mubr.msk.f32.mxu0 %vm22840_vm1, %v30171_v2 }
 0x5fb   : > { %18156 = vmatmul.mubr.msk.f32.gmra.mrb[48].mxu1 %vm530_vm3, %v30639_v60  ;;  %19374 = vmatmul.mubr.msk.f32.gmra.mrb[4].mxu0 %vm530_vm3, %v30803_v51  ;;  %v30807_v51 = vld [vmem:[#allocation176_spill] sm:$0xff] }
 0x5fc   : > { %18158 = vmatprep.mubr.msk.f32.mxu1 %vm22840_vm1, %v30171_v2  ;;  %19376 = vmatprep.mubr.msk.f32.mxu0 %vm22840_vm1, %v30171_v2 }
 0x5ff   : > { %18159 = vmatmul.mubr.msk.f32.gmra.mrb[50].mxu1 %vm530_vm3, %v30640_v18  ;;  %19377 = vmatmul.mubr.msk.f32.gmra.mrb[6].mxu0 %vm530_vm3, %v30804_v19  ;;  %v30808_v19 = vld [vmem:[#allocation178_spill] sm:$0xff] }
 0x600   : > { %18161 = vmatprep.mubr.msk.f32.mxu1 %vm22840_vm1, %v30171_v2  ;;  %19379 = vmatprep.mubr.msk.f32.mxu0 %vm22840_vm1, %v30171_v2 }
 0x603   : > { %18162 = vmatmul.mubr.msk.f32.gmra.mrb[52].mxu1 %vm530_vm3, %v30641_v12  ;;  %19380 = vmatmul.mubr.msk.f32.gmra.mrb[8].mxu0 %vm530_vm3, %v30805_v50  ;;  %v30809_v50 = vld [vmem:[#allocation180_spill] sm:$0xff] }
 0x604   : > { %18164 = vmatprep.mubr.msk.f32.mxu1 %vm22840_vm1, %v30171_v2  ;;  %19382 = vmatprep.mubr.msk.f32.mxu0 %vm22840_vm1, %v30171_v2 }
 0x607   : > { %18165 = vmatmul.mubr.msk.f32.gmra.mrb[54].mxu1 %vm530_vm3, %v30642_v57  ;;  %19383 = vmatmul.mubr.msk.f32.gmra.mrb[10].mxu0 %vm530_vm3, %v30806_v22  ;;  %v30810_v22 = vld [vmem:[#allocation181_spill] sm:$0xff] }
 0x608   : > { %18167 = vmatprep.mubr.msk.f32.mxu1 %vm22840_vm1, %v30171_v2  ;;  %19385 = vmatprep.mubr.msk.f32.mxu0 %vm22840_vm1, %v30171_v2 }
 0x60b   : > { %18168 = vmatmul.mubr.msk.f32.gmra.mrb[56].mxu1 %vm530_vm3, %v30643_v40  ;;  %19386 = vmatmul.mubr.msk.f32.gmra.mrb[12].mxu0 %vm530_vm3, %v30807_v51  ;;  %v30811_v51 = vld [vmem:[#allocation182_spill] sm:$0xff] }
 0x60c   : > { %18170 = vmatprep.mubr.msk.f32.mxu1 %vm22840_vm1, %v30171_v2  ;;  %19388 = vmatprep.mubr.msk.f32.mxu0 %vm22840_vm1, %v30171_v2 }
 0x60f   : > { %18171 = vmatmul.mubr.msk.f32.gmra.mrb[58].mxu1 %vm530_vm3, %v30644_v52  ;;  %19389 = vmatmul.mubr.msk.f32.gmra.mrb[14].mxu0 %vm530_vm3, %v30808_v19  ;;  %v30812_v19 = vld [vmem:[#allocation185_spill] sm:$0xff] }
 0x610   : > { %18173 = vmatprep.mubr.msk.f32.mxu1 %vm22840_vm1, %v30171_v2  ;;  %19391 = vmatprep.mubr.msk.f32.mxu0 %vm22840_vm1, %v30171_v2 }
 0x613   : > { %18174 = vmatmul.mubr.msk.f32.gmra.mrb[60].mxu1 %vm530_vm3, %v30645_v25  ;;  %19392 = vmatmul.mubr.msk.f32.gmra.mrb[16].mxu0 %vm530_vm3, %v30809_v50  ;;  %v30813_v50 = vld [vmem:[#allocation186_spill] sm:$0xff] }
 0x614   : > { %18176 = vmatprep.mubr.msk.f32.mxu1 %vm22840_vm1, %v30171_v2  ;;  %19394 = vmatprep.mubr.msk.f32.mxu0 %vm22840_vm1, %v30171_v2 }
 0x617   : > { %18177 = vmatmul.mubr.msk.f32.gmra.mrb[62].mxu1 %vm530_vm3, %v30810_v22  ;;  %19395 = vmatmul.mubr.msk.f32.gmra.mrb[18].mxu0 %vm530_vm3, %v30811_v51  ;;  %v30814_v51 = vld [vmem:[#allocation187_spill] sm:$0xff] }
 0x618   : > { %18179 = vmatprep.mubr.msk.f32.mxu1 %vm22840_vm1, %v30171_v2  ;;  %19397 = vmatprep.mubr.msk.f32.mxu0 %vm22840_vm1, %v30171_v2 }
 0x61b   : > { %18180 = vmatmul.mubr.msk.f32.gmra.mrb[64].mxu1 %vm530_vm3, %v30647_v62  ;;  %19398 = vmatmul.mubr.msk.f32.gmra.mrb[20].mxu0 %vm530_vm3, %v30812_v19  ;;  %v30815_v19 = vld [vmem:[#allocation188_spill] sm:$0xff] }
 0x61c   : > { %18182 = vmatprep.mubr.msk.f32.mxu1 %vm22840_vm1, %v30171_v2  ;;  %19400 = vmatprep.mubr.msk.f32.mxu0 %vm22840_vm1, %v30171_v2 }
 0x61f   : > { %18183 = vmatmul.mubr.msk.f32.gmra.mrb[66].mxu1 %vm530_vm3, %v26491_v53  ;;  %19401 = vmatmul.mubr.msk.f32.gmra.mrb[22].mxu0 %vm530_vm3, %v30813_v50  ;;  %v30828_v50 = vld [vmem:[#allocation200_spill] sm:$0xff] }
 0x620   : > { %18185 = vmatprep.mubr.msk.f32.mxu1 %vm22840_vm1, %v30171_v2  ;;  %19403 = vmatprep.mubr.msk.f32.mxu0 %vm22840_vm1, %v30171_v2 }
 0x623   : > { %18186 = vmatmul.mubr.msk.f32.gmra.mrb[68].mxu1 %vm530_vm3, %v26478_v9  ;;  %19404 = vmatmul.mubr.msk.f32.gmra.mrb[24].mxu0 %vm530_vm3, %v30814_v51  ;;  %v30816_v9 = vld [vmem:[#allocation189_spill] sm:$0xff] }
 0x624   : > { %18256 = vmatprep.mubr.msk.f32.mxu1 %vm22840_vm1, %v30171_v2  ;;  %19406 = vmatprep.mubr.msk.f32.mxu0 %vm22840_vm1, %v30171_v2  ;;  %v30829_v51 = vld [vmem:[#allocation201_spill] sm:$0xff] }
 0x627   : > { %18257 = vmatmul.mubr.msk.f32.vlgmr.msra.gmra.mrb[44].mxu1 %vm530_vm3, %v30684_v14  ;;  %19407 = vmatmul.mubr.msk.f32.gmra.mrb[26].mxu0 %vm530_vm3, %v30815_v19  ;;  %v30817_v14 = vld [vmem:[#allocation190_spill] sm:$0xff]  ;;  %v30831_v19 = vld [vmem:[#allocation203_spill] sm:$0xff] }
 0x628   : > { %18259 = vmatprep.mubr.msk.f32.mxu1 %vm22840_vm1, %v30171_v2  ;;  %19409 = vmatprep.mubr.msk.f32.mxu0 %vm22840_vm1, %v30171_v2 }
 0x62b   : > { %18260 = vmatmul.mubr.msk.f32.gmra.mrb[46].mxu1 %vm530_vm3, %v30686_v48  ;;  %19410 = vmatmul.mubr.msk.f32.gmra.mrb[28].mxu0 %vm530_vm3, %v30816_v9  ;;  %v30818_v48 = vld [vmem:[#allocation191_spill] sm:$0xff]  ;;  %v30832_v9 = vld [vmem:[#allocation204_spill] sm:$0xff] }
 0x62c   : > { %18262 = vmatprep.mubr.msk.f32.mxu1 %vm22840_vm1, %v30171_v2  ;;  %19412 = vmatprep.mubr.msk.f32.mxu0 %vm22840_vm1, %v30171_v2 }
 0x62f   : > { %18263 = vmatmul.mubr.msk.f32.gmra.mrb[48].mxu1 %vm530_vm3, %v30688_v38  ;;  %19413 = vmatmul.mubr.msk.f32.gmra.mrb[30].mxu0 %vm530_vm3, %v30817_v14  ;;  %v30819_v38 = vld [vmem:[#allocation192_spill] sm:$0xff]  ;;  %v30833_v14 = vld [vmem:[#allocation205_spill] sm:$0xff] }
 0x630   : > { %18265 = vmatprep.mubr.msk.f32.mxu1 %vm22840_vm1, %v30171_v2  ;;  %19415 = vmatprep.mubr.msk.f32.mxu0 %vm22840_vm1, %v30171_v2 }
 0x633   : > { %18266 = vmatmul.mubr.msk.f32.gmra.mrb[50].mxu1 %vm530_vm3, %v30690_v7  ;;  %19416 = vmatmul.mubr.msk.f32.gmra.mrb[32].mxu0 %vm530_vm3, %v30818_v48  ;;  %v30820_v7 = vld [vmem:[#allocation193_spill] sm:$0xff] }
 0x634   : > { %18268 = vmatprep.mubr.msk.f32.mxu1 %vm22840_vm1, %v30171_v2  ;;  %19418 = vmatprep.mubr.msk.f32.mxu0 %vm22840_vm1, %v30171_v2 }
 0x637   : > { %18269 = vmatmul.mubr.msk.f32.gmra.mrb[52].mxu1 %vm530_vm3, %v30692_v43  ;;  %19419 = vmatmul.mubr.msk.f32.gmra.mrb[34].mxu0 %vm530_vm3, %v30819_v38  ;;  %v30821_v43 = vld [vmem:[#allocation194_spill] sm:$0xff] }
 0x638   : > { %18271 = vmatprep.mubr.msk.f32.mxu1 %vm22840_vm1, %v30171_v2  ;;  %19421 = vmatprep.mubr.msk.f32.mxu0 %vm22840_vm1, %v30171_v2 }
 0x63b   : > { %18272 = vmatmul.mubr.msk.f32.gmra.mrb[54].mxu1 %vm530_vm3, %v30693_v3  ;;  %19422 = vmatmul.mubr.msk.f32.gmra.mrb[36].mxu0 %vm530_vm3, %v30820_v7  ;;  %v30822_v3 = vld [vmem:[#allocation195_spill] sm:$0xff] }
 0x63c   : > { %18274 = vmatprep.mubr.msk.f32.mxu1 %vm22840_vm1, %v30171_v2  ;;  %19424 = vmatprep.mubr.msk.f32.mxu0 %vm22840_vm1, %v30171_v2  ;;  %v30834_v7 = vld [vmem:[#allocation207_spill] sm:$0xff] }
 0x63f   : > { %18275 = vmatmul.mubr.msk.f32.gmra.mrb[56].mxu1 %vm530_vm3, %v30694_v26  ;;  %19425 = vmatmul.mubr.msk.f32.gmra.mrb[38].mxu0 %vm530_vm3, %v30821_v43  ;;  %v30823_v26 = vld [vmem:[#allocation196_spill] sm:$0xff]  ;;  %v7677_v43 = vrot.slane %v26803_v42, 6 }
 0x640   : > { %18277 = vmatprep.mubr.msk.f32.mxu1 %vm22840_vm1, %v30171_v2  ;;  %19427 = vmatprep.mubr.msk.f32.mxu0 %vm22840_vm1, %v30171_v2 }
 0x643   : > { %18278 = vmatmul.mubr.msk.f32.gmra.mrb[58].mxu1 %vm530_vm3, %v30695_v55  ;;  %19428 = vmatmul.mubr.msk.f32.gmra.mrb[40].mxu0 %vm530_vm3, %v30822_v3  ;;  %v30824_v55 = vld [vmem:[#allocation197_spill] sm:$0xff] }
 0x644   : > { %18280 = vmatprep.mubr.msk.f32.mxu1 %vm22840_vm1, %v30171_v2  ;;  %19430 = vmatprep.mubr.msk.f32.mxu0 %vm22840_vm1, %v30171_v2 }
 0x647   : > { %18281 = vmatmul.mubr.msk.f32.gmra.mrb[60].mxu1 %vm530_vm3, %v30697_v32  ;;  %19431 = vmatmul.mubr.msk.f32.gmra.mrb[42].mxu0 %vm530_vm3, %v30823_v26  ;;  %v30825_v32 = vld [vmem:[#allocation198_spill] sm:$0xff] }
 0x648   : > { %18283 = vmatprep.mubr.msk.f32.mxu1 %vm22840_vm1, %v30171_v2  ;;  %19433 = vmatprep.mubr.msk.f32.mxu0 %vm22840_vm1, %v30171_v2 }
 0x64b   : > { %18284 = vmatmul.mubr.msk.f32.gmra.mrb[62].mxu1 %vm530_vm3, %v30699_v24  ;;  %19434 = vmatmul.mubr.msk.f32.gmra.mrb[44].mxu0 %vm530_vm3, %v30824_v55  ;;  %v30826_v24 = vld [vmem:[#allocation199_spill] sm:$0xff]  ;;  %v30835_v55 = vld [vmem:[#allocation209_spill] sm:$0xff] }
 0x64c   : > { %18286 = vmatprep.mubr.msk.f32.mxu1 %vm22840_vm1, %v30171_v2  ;;  %19436 = vmatprep.mubr.msk.f32.mxu0 %vm22840_vm1, %v30171_v2 }
 0x64f   : > { %18287 = vmatmul.mubr.msk.f32.gmra.mrb[64].mxu1 %vm530_vm3, %v30702_v21  ;;  %19437 = vmatmul.mubr.msk.f32.gmra.mrb[46].mxu0 %vm530_vm3, %v30825_v32  ;;  %v30827_v21 = vld [vmem:[#allocation57_spill] sm:$0xff]  ;;  %v30836_v32 = vld [vmem:[#allocation208_spill] sm:$0xff] }
 0x650   : > { %18289 = vmatprep.mubr.msk.f32.mxu1 %vm22840_vm1, %v30171_v2  ;;  %19439 = vmatprep.mubr.msk.f32.mxu0 %vm22840_vm1, %v30171_v2 }
 0x653   : > { %18290 = vmatmul.mubr.msk.f32.gmra.mrb[66].mxu1 %vm530_vm3, %v26800_v27  ;;  %19440 = vmatmul.mubr.msk.f32.gmra.mrb[48].mxu0 %vm530_vm3, %v30826_v24  ;;  %v30830_v27 = vld [vmem:[#allocation202_spill] sm:$0xff]  ;;  %v7678_v24 = vsel %vm2839_vm7, %v30836_v32, %v7677_v43  ;;  %v30839_v32 = vld [vmem:[#allocation215_spill] sm:$0xff] }
 0x654   : > { %18292 = vmatprep.mubr.msk.f32.mxu1 %vm22840_vm1, %v30171_v2  ;;  %19442 = vmatprep.mubr.msk.f32.mxu0 %vm22840_vm1, %v30171_v2 }
 0x657   : > { %18293 = vmatmul.mubr.msk.f32.gmra.mrb[68].mxu1 %vm530_vm3, %v30827_v21  ;;  %19443 = vmatmul.mubr.msk.f32.gmra.mrb[50].mxu0 %vm530_vm3, %v30828_v50 }
 0x658   : > { %19445 = vmatprep.mubr.msk.f32.mxu0 %vm22840_vm1, %v30171_v2 }
 0x65b   : > { %19446 = vmatmul.mubr.msk.f32.gmra.mrb[52].mxu0 %vm530_vm3, %v30829_v51 }
 0x65c   : > { %19448 = vmatprep.mubr.msk.f32.mxu0 %vm22840_vm1, %v30171_v2 }
 0x65f   : > { %19449 = vmatmul.mubr.msk.f32.gmra.mrb[54].mxu0 %vm530_vm3, %v30830_v27  ;;  %v15224_v27 = vld [vmem:[%s29719_s1 + $0x60] sm:$0xf] }
 0x660   : > { %19451 = vmatprep.mubr.msk.f32.mxu0 %vm22840_vm1, %v30171_v2 }
 0x663   : > { %19452 = vmatmul.mubr.msk.f32.gmra.mrb[56].mxu0 %vm530_vm3, %v30831_v19 }
 0x664   : > { %19454 = vmatprep.mubr.msk.f32.mxu0 %vm22840_vm1, %v30171_v2 }
 0x667   : > { %19455 = vmatmul.mubr.msk.f32.gmra.mrb[58].mxu0 %vm530_vm3, %v30832_v9 }
 0x668   : > { %19457 = vmatprep.mubr.msk.f32.mxu0 %vm22840_vm1, %v30171_v2 }
 0x66b   : > { %19458 = vmatmul.mubr.msk.f32.gmra.mrb[60].mxu0 %vm530_vm3, %v30833_v14  ;;  %v30837_v14 = vld [vmem:[#allocation211_spill] sm:$0xff] }
 0x66c   : > { %19460 = vmatprep.mubr.msk.f32.mxu0 %vm22840_vm1, %v30171_v2 }
 0x66e   : > { %v27642_v48 = vpop.f32.mrb[0].mxu1 }
 0x66f   : > { %v18085_v38 = vpop.f32.mrb[1].mxu1  ;;  %19461 = vmatmul.mubr.msk.f32.gmra.mrb[62].mxu0 %vm530_vm3, %v30834_v7 }
 0x670   : > { %19463 = vmatprep.mubr.msk.f32.mxu0 %vm22840_vm1, %v30171_v2 }
 0x672   : > { %v27649_v3 = vpop.f32.mrb[2].mxu1 }
 0x673   : > { %v18088_v26 = vpop.f32.mrb[3].mxu1  ;;  %19464 = vmatmul.mubr.msk.f32.gmra.mrb[64].mxu0 %vm530_vm3, %v30835_v55 }
 0x674   : > { %19466 = vmatprep.mubr.msk.f32.mxu0 %vm22840_vm1, %v30171_v2 }
 0x676   : > { %v27657_v21 = vpop.f32.mrb[4].mxu1 }
 0x677   : > { %v18091_v50 = vpop.f32.mrb[5].mxu1  ;;  %19467 = vmatmul.mubr.msk.f32.gmra.mrb[66].mxu0 %vm530_vm3, %v7678_v24 }
 0x678   : > { %19469 = vmatprep.mubr.msk.f32.mxu0 %vm22840_vm1, %v30171_v2 }
 0x67a   : > { %v27662_v42 = vpop.f32.mrb[6].mxu1 }
 0x67b   : > { %v18094_v51 = vpop.f32.mrb[7].mxu1  ;;  %19470 = vmatmul.mubr.msk.f32.gmra.mrb[68].mxu0 %vm530_vm3, %v7677_v43  ;;  %v30838_v43 = vld [vmem:[#allocation213_spill] sm:$0xff] }
 0x67c   : > { %19474 = vmatprep.mubr.msk.f32.mxu0 %vm22840_vm1, %v30171_v2  ;;  %v30841_v51 = vld [vmem:[#allocation217_spill] sm:$0xff] }
 0x67e   : > { %v27670_v19 = vpop.f32.mrb[8].mxu1 }
 0x67f   : > { %v18097_v9 = vpop.f32.mrb[9].mxu1  ;;  %19475 = vmatmul.mubr.msk.f32.vlgmr.msra.gmra.mrb[0].mxu0 %vm530_vm3, %v30837_v14  ;;  %v30843_v14 = vld [vmem:[#allocation219_spill] sm:$0xff] }
 0x680   : > { %19580 = vmatpush3.msk.msra.mxu0 %vm601_vm0, %v15224_v27  ;;  %19477 = vmatprep.mubr.msk.f32.mxu0 %vm22840_vm1, %v30171_v2 }
 0x681   : > { %19686 = vmatprep.subr.mxu0 %v30171_v2 }
 0x682   : > { %v27678_v38 = vpop.f32.mrb[10].mxu1 }
 0x683   : > { %v18100_v7 = vpop.f32.mrb[11].mxu1  ;;  %19478 = vmatmul.mubr.msk.f32.gmra.mrb[2].mxu0 %vm530_vm3, %v30838_v43 }
 0x684   : > { %19480 = vmatprep.mubr.msk.f32.mxu0 %vm22840_vm1, %v30171_v2 }
 0x686   : > { %v27684_v26 = vpop.f32.mrb[12].mxu1 }
 0x687   : > { %v18103_v55 = vpop.f32.mrb[13].mxu1  ;;  %19481 = vmatmul.mubr.msk.f32.gmra.mrb[4].mxu0 %vm530_vm3, %v30839_v32 }
 0x688   : > { %19483 = vmatprep.mubr.msk.f32.mxu0 %vm22840_vm1, %v30171_v2  ;;  %v30845_v55 = vld [vmem:[#allocation220_spill] sm:$0xff] }
 0x68a   : > { %v27690_v24 = vpop.f32.mrb[14].mxu1 }
 0x68b   : > { %30840 = vst [vmem:[#allocation59_spill] sm:$0xff] %v27690_v24  ;;  %v18106_v50 = vpop.f32.mrb[15].mxu1  ;;  %19484 = vmatmul.mubr.msk.f32.gmra.mrb[6].mxu0 %vm530_vm3, %v30841_v51  ;;  %v30847_v51 = vld [vmem:[#allocation221_spill] sm:$0xff] }
 0x68c   : > { %19486 = vmatprep.mubr.msk.f32.mxu0 %vm22840_vm1, %v30171_v2 }
 0x68e   : > { %v27696_v27 = vpop.f32.mrb[16].mxu1 }
 0x68f   : > { %30842 = vst [vmem:[#allocation61_spill] sm:$0xff] %v27696_v27  ;;  %v18109_v9 = vpop.f32.mrb[17].mxu1  ;;  %19487 = vmatmul.mubr.msk.f32.gmra.mrb[8].mxu0 %vm530_vm3, %v30843_v14 }
 0x690   : > { %19489 = vmatprep.mubr.msk.f32.mxu0 %vm22840_vm1, %v30171_v2 }
 0x692   : > { %v27702_v7 = vpop.f32.mrb[18].mxu1 }
 0x693   : > { %30844 = vst [vmem:[#allocation63_spill] sm:$0xff] %v27702_v7  ;;  %v18112_v43 = vpop.f32.mrb[19].mxu1  ;;  %19490 = vmatmul.mubr.msk.f32.gmra.mrb[10].mxu0 %vm530_vm3, %v30845_v55  ;;  %v30849_v7 = vld [vmem:[#allocation222_spill] sm:$0xff] }
 0x694   : > { %19492 = vmatprep.mubr.msk.f32.mxu0 %vm22840_vm1, %v30171_v2 }
 0x696   : > { %v27708_v32 = vpop.f32.mrb[20].mxu1 }
 0x697   : > { %30846 = vst [vmem:[#allocation65_spill] sm:$0xff] %v27708_v32  ;;  %v18115_v50 = vpop.f32.mrb[21].mxu1  ;;  %19493 = vmatmul.mubr.msk.f32.gmra.mrb[12].mxu0 %vm530_vm3, %v30847_v51  ;;  %v30851_v32 = vld [vmem:[#allocation223_spill] sm:$0xff] }
 0x698   : > { %19495 = vmatprep.mubr.msk.f32.mxu0 %vm22840_vm1, %v30171_v2 }
 0x69a   : > { %v27714_v9 = vpop.f32.mrb[22].mxu1 }
 0x69b   : > { %30848 = vst [vmem:[#allocation74_spill] sm:$0xff] %v27714_v9  ;;  %v18118_v14 = vpop.f32.mrb[23].mxu1  ;;  %19496 = vmatmul.mubr.msk.f32.gmra.mrb[14].mxu0 %vm530_vm3, %v30849_v7  ;;  %v30853_v9 = vld [vmem:[#allocation225_spill] sm:$0xff] }
 0x69c   : > { %19498 = vmatprep.mubr.msk.f32.mxu0 %vm22840_vm1, %v30171_v2 }
 0x69e   : > { %v27720_v43 = vpop.f32.mrb[24].mxu1 }
 0x69f   : > { %30850 = vst [vmem:[#allocation73_spill] sm:$0xff] %v27720_v43  ;;  %v18121_v55 = vpop.f32.mrb[25].mxu1  ;;  %19499 = vmatmul.mubr.msk.f32.gmra.mrb[16].mxu0 %vm530_vm3, %v30851_v32  ;;  %v30855_v43 = vld [vmem:[#allocation228_spill] sm:$0xff] }
 0x6a0   : > { %19501 = vmatprep.mubr.msk.f32.mxu0 %vm22840_vm1, %v30171_v2 }
 0x6a2   : > { %v27726_v50 = vpop.f32.mrb[26].mxu1 }
 0x6a3   : > { %30852 = vst [vmem:[#allocation116_spill] sm:$0xff] %v27726_v50  ;;  %v18124_v51 = vpop.f32.mrb[27].mxu1  ;;  %19502 = vmatmul.mubr.msk.f32.gmra.mrb[18].mxu0 %vm530_vm3, %v30853_v9  ;;  %v30857_v50 = vld [vmem:[#allocation229_spill] sm:$0xff] }
 0x6a4   : > { %19504 = vmatprep.mubr.msk.f32.mxu0 %vm22840_vm1, %v30171_v2 }
 0x6a6   : > { %v27732_v7 = vpop.f32.mrb[28].mxu1 }
 0x6a7   : > { %30854 = vst [vmem:[#allocation118_spill] sm:$0xff] %v27732_v7  ;;  %v18127_v14 = vpop.f32.mrb[29].mxu1  ;;  %19505 = vmatmul.mubr.msk.f32.gmra.mrb[20].mxu0 %vm530_vm3, %v30855_v43  ;;  %v30859_v7 = vld [vmem:[#allocation230_spill] sm:$0xff] }
 0x6a8   : > { %19507 = vmatprep.mubr.msk.f32.mxu0 %vm22840_vm1, %v30171_v2 }
 0x6aa   : > { %v27738_v32 = vpop.f32.mrb[30].mxu1 }
 0x6ab   : > { %30856 = vst [vmem:[#allocation120_spill] sm:$0xff] %v27738_v32  ;;  %v18130_v55 = vpop.f32.mrb[31].mxu1  ;;  %19508 = vmatmul.mubr.msk.f32.gmra.mrb[22].mxu0 %vm530_vm3, %v30857_v50  ;;  %v30861_v32 = vld [vmem:[#allocation231_spill] sm:$0xff] }
 0x6ac   : > { %19510 = vmatprep.mubr.msk.f32.mxu0 %vm22840_vm1, %v30171_v2 }
 0x6ae   : > { %v27744_v9 = vpop.f32.mrb[32].mxu1 }
 0x6af   : > { %30858 = vst [vmem:[#allocation122_spill] sm:$0xff] %v27744_v9  ;;  %v18133_v51 = vpop.f32.mrb[33].mxu1  ;;  %19511 = vmatmul.mubr.msk.f32.gmra.mrb[24].mxu0 %vm530_vm3, %v30859_v7  ;;  %v30863_v9 = vld [vmem:[#allocation52_spill] sm:$0xff] }
 0x6b0   : > { %19513 = vmatprep.mubr.msk.f32.mxu0 %vm22840_vm1, %v30171_v2 }
 0x6b2   : > { %v27750_v43 = vpop.f32.mrb[34].mxu1 }
 0x6b3   : > { %30860 = vst [vmem:[#allocation124_spill] sm:$0xff] %v27750_v43  ;;  %v18136_v14 = vpop.f32.mrb[35].mxu1  ;;  %19514 = vmatmul.mubr.msk.f32.gmra.mrb[26].mxu0 %vm530_vm3, %v30861_v32  ;;  %v30865_v43 = vld [vmem:[#allocation232_spill] sm:$0xff] }
 0x6b4   : > { %19516 = vmatprep.mubr.msk.f32.mxu0 %vm22840_vm1, %v30171_v2 }
 0x6b6   : > { %v27756_v50 = vpop.f32.mrb[36].mxu1 }
 0x6b7   : > { %30862 = vst [vmem:[#allocation127_spill] sm:$0xff] %v27756_v50  ;;  %v18139_v55 = vpop.f32.mrb[37].mxu1  ;;  %19517 = vmatmul.mubr.msk.f32.gmra.mrb[28].mxu0 %vm530_vm3, %v30863_v9  ;;  %v30867_v50 = vld [vmem:[#allocation233_spill] sm:$0xff] }
 0x6b8   : > { %19519 = vmatprep.mubr.msk.f32.mxu0 %vm22840_vm1, %v30171_v2 }
 0x6ba   : > { %v27762_v7 = vpop.f32.mrb[38].mxu1 }
 0x6bb   : > { %30864 = vst [vmem:[#allocation130_spill] sm:$0xff] %v27762_v7  ;;  %v18142_v51 = vpop.f32.mrb[39].mxu1  ;;  %19520 = vmatmul.mubr.msk.f32.gmra.mrb[30].mxu0 %vm530_vm3, %v30865_v43  ;;  %v30869_v7 = vld [vmem:[#allocation234_spill] sm:$0xff]  ;;  %v30870_v43 = vld [vmem:[#allocation235_spill] sm:$0xff] }
 0x6bc   : > { %19522 = vmatprep.mubr.msk.f32.mxu0 %vm22840_vm1, %v30171_v2  ;;  %v30871_v51 = vld [vmem:[#allocation236_spill] sm:$0xff] }
 0x6be   : > { %v27768_v32 = vpop.f32.mrb[40].mxu1 }
 0x6bf   : > { %30866 = vst [vmem:[#allocation133_spill] sm:$0xff] %v27768_v32  ;;  %v18145_v14 = vpop.f32.mrb[41].mxu1  ;;  %19523 = vmatmul.mubr.msk.f32.gmra.mrb[32].mxu0 %vm530_vm3, %v30867_v50  ;;  %v30872_v50 = vld [vmem:[#allocation237_spill] sm:$0xff]  ;;  %v30886_v32 = vld [vmem:[#allocation250_spill] sm:$0xff] }
 0x6c0   : > { %19525 = vmatprep.mubr.msk.f32.mxu0 %vm22840_vm1, %v30171_v2  ;;  %v30874_v14 = vld [vmem:[#allocation239_spill] sm:$0xff] }
 0x6c2   : > { %v27774_v9 = vpop.f32.mrb[42].mxu1 }
 0x6c3   : > { %30868 = vst [vmem:[#allocation136_spill] sm:$0xff] %v27774_v9  ;;  %v18148_v55 = vpop.f32.mrb[43].mxu1  ;;  %19526 = vmatmul.mubr.msk.f32.gmra.mrb[34].mxu0 %vm530_vm3, %v30869_v7  ;;  %v30873_v7 = vld [vmem:[#allocation238_spill] sm:$0xff] }
 0x6c4   : > { %19528 = vmatprep.mubr.msk.f32.mxu0 %vm22840_vm1, %v30171_v2  ;;  %v30875_v55 = vld [vmem:[#allocation240_spill] sm:$0xff] }
 0x6c7   : > { %19529 = vmatmul.mubr.msk.f32.gmra.mrb[36].mxu0 %vm530_vm3, %v30870_v43  ;;  %v30876_v43 = vld [vmem:[#allocation241_spill] sm:$0xff] }
 0x6c8   : > { %19531 = vmatprep.mubr.msk.f32.mxu0 %vm22840_vm1, %v30171_v2 }
 0x6cb   : > { %19532 = vmatmul.mubr.msk.f32.gmra.mrb[38].mxu0 %vm530_vm3, %v30871_v51  ;;  %v30877_v51 = vld [vmem:[#allocation242_spill] sm:$0xff] }
 0x6cc   : > { %19534 = vmatprep.mubr.msk.f32.mxu0 %vm22840_vm1, %v30171_v2 }
 0x6cf   : > { %19535 = vmatmul.mubr.msk.f32.gmra.mrb[40].mxu0 %vm530_vm3, %v30872_v50  ;;  %v30878_v50 = vld [vmem:[#allocation243_spill] sm:$0xff] }
 0x6d0   : > { %19537 = vmatprep.mubr.msk.f32.mxu0 %vm22840_vm1, %v30171_v2 }
 0x6d3   : > { %19538 = vmatmul.mubr.msk.f32.gmra.mrb[42].mxu0 %vm530_vm3, %v30873_v7  ;;  %v30879_v7 = vld [vmem:[#allocation244_spill] sm:$0xff] }
 0x6d4   : > { %19540 = vmatprep.mubr.msk.f32.mxu0 %vm22840_vm1, %v30171_v2 }
 0x6d7   : > { %19541 = vmatmul.mubr.msk.f32.gmra.mrb[44].mxu0 %vm530_vm3, %v30874_v14  ;;  %v30880_v14 = vld [vmem:[#allocation245_spill] sm:$0xff] }
 0x6d8   : > { %19543 = vmatprep.mubr.msk.f32.mxu0 %vm22840_vm1, %v30171_v2 }
 0x6db   : > { %19544 = vmatmul.mubr.msk.f32.gmra.mrb[46].mxu0 %vm530_vm3, %v30875_v55  ;;  %v30881_v55 = vld [vmem:[#allocation246_spill] sm:$0xff] }
 0x6dc   : > { %19546 = vmatprep.mubr.msk.f32.mxu0 %vm22840_vm1, %v30171_v2 }
 0x6df   : > { %19547 = vmatmul.mubr.msk.f32.gmra.mrb[48].mxu0 %vm530_vm3, %v30876_v43  ;;  %v30882_v43 = vld [vmem:[#allocation247_spill] sm:$0xff] }
 0x6e0   : > { %19549 = vmatprep.mubr.msk.f32.mxu0 %vm22840_vm1, %v30171_v2 }
 0x6e3   : > { %19550 = vmatmul.mubr.msk.f32.gmra.mrb[50].mxu0 %vm530_vm3, %v30877_v51 }
 0x6e4   : > { %19552 = vmatprep.mubr.msk.f32.mxu0 %vm22840_vm1, %v30171_v2 }
 0x6e7   : > { %19553 = vmatmul.mubr.msk.f32.gmra.mrb[52].mxu0 %vm530_vm3, %v30878_v50 }
 0x6e8   : > { %19555 = vmatprep.mubr.msk.f32.mxu0 %vm22840_vm1, %v30171_v2 }
 0x6eb   : > { %19556 = vmatmul.mubr.msk.f32.gmra.mrb[54].mxu0 %vm530_vm3, %v30879_v7  ;;  %v30884_v7 = vld [vmem:[#allocation248_spill] sm:$0xff] }
 0x6ec   : > { %19558 = vmatprep.mubr.msk.f32.mxu0 %vm22840_vm1, %v30171_v2 }
 0x6ef   : > { %19559 = vmatmul.mubr.msk.f32.gmra.mrb[56].mxu0 %vm530_vm3, %v30880_v14  ;;  %v27839_v14 = vld [vmem:[%s22973_s24 + $0x128] sm:$0xf] }
 0x6f0   : > { %19561 = vmatprep.mubr.msk.f32.mxu0 %vm22840_vm1, %v30171_v2 }
 0x6f3   : > { %19562 = vmatmul.mubr.msk.f32.gmra.mrb[58].mxu0 %vm530_vm3, %v30881_v55 }
 0x6f4   : > { %19564 = vmatprep.mubr.msk.f32.mxu0 %vm22840_vm1, %v30171_v2 }
 0x6f7   : > { %19565 = vmatmul.mubr.msk.f32.gmra.mrb[60].mxu0 %vm530_vm3, %v30882_v43  ;;  %v7964_v43 = vrot.slane %v27839_v14, 7 }
 0x6f8   : > { %19567 = vmatprep.mubr.msk.f32.mxu0 %vm22840_vm1, %v30171_v2 }
 0x6fa   : > { %v27832_v51 = vpop.f32.mrb[44].mxu1 }
 0x6fb   : > { %30883 = vst [vmem:[#allocation138_spill] sm:$0xff] %v27832_v51  ;;  %v18258_v50 = vpop.f32.mrb[45].mxu1  ;;  %19568 = vmatmul.mubr.msk.f32.gmra.mrb[62].mxu0 %vm530_vm3, %v30884_v7  ;;  %v30888_v51 = vld [vmem:[#allocation251_spill] sm:$0xff] }
 0x6fc   : > { %19570 = vmatprep.mubr.msk.f32.mxu0 %vm22840_vm1, %v30171_v2 }
 0x6fe   : > { %v27841_v55 = vpop.f32.mrb[46].mxu1 }
 0x6ff   : > { %30885 = vst [vmem:[#allocation206_spill] sm:$0xff] %v27841_v55  ;;  %v18261_v9 = vpop.f32.mrb[47].mxu1  ;;  %19571 = vmatmul.mubr.msk.f32.gmra.mrb[64].mxu0 %vm530_vm3, %v30886_v32  ;;  %v30889_v55 = vld [vmem:[#allocation249_spill] sm:$0xff] }
 0x700   : > { %19573 = vmatprep.mubr.msk.f32.mxu0 %vm22840_vm1, %v30171_v2  ;;  %v30890_v9 = vrot.slane %v30889_v55, 7  ;;  %v22741_v55 = vld [vmem:[%s22973_s24 + $0x18] sm:$0xff] }
 0x702   : > { %v27848_v50 = vpop.f32.mrb[48].mxu1  ;;  %v7965_v27 = vsel %vm3260_vm8, %v30890_v9, %v7964_v43  ;;  %v22742_v43 = vld [vmem:[%s22973_s24 + $0x20] sm:$0xff] }
 0x703   : > { %30887 = vst [vmem:[#allocation144_spill] sm:$0xff] %v27848_v50  ;;  %v18264_v7 = vpop.f32.mrb[49].mxu1  ;;  %19574 = vmatmul.mubr.msk.f32.gmra.mrb[66].mxu0 %vm530_vm3, %v30888_v51  ;;  %v15261_v51 = vld [vmem:[%s29719_s1 + $0x64] sm:$0xf] }
 0x704   : > { %19576 = vmatprep.mubr.msk.f32.mxu0 %vm22840_vm1, %v30171_v2 }
 0x706   : > { %v27857_v32 = vpop.f32.mrb[50].mxu1 }
 0x707   : > { %v18267_v24 = vpop.f32.mrb[51].mxu1  ;;  %19577 = vmatmul.mubr.msk.f32.gmra.mrb[68].mxu0 %vm530_vm3, %v7965_v27 }
 0x708   : > { %19581 = vmatprep.mubr.msk.f32.mxu0 %vm22840_vm1, %v30171_v2 }
 0x70a   : > { %v27865_v7 = vpop.f32.mrb[52].mxu1 }
 0x70b   : > { %v18270_v50 = vpop.f32.mrb[53].mxu1  ;;  %19582 = vmatmul.mubr.msk.f32.vlgmr.msra.gmra.mrb[0].mxu0 %vm530_vm3, %v22741_v55 }
 0x70c   : > { %19687 = vmatpush3.msk.msra.mxu0 %vm601_vm0, %v15261_v51  ;;  %19584 = vmatprep.mubr.msk.f32.mxu0 %vm22840_vm1, %v30171_v2  ;;  %v22743_v51 = vld [vmem:[%s22973_s24 + $0x28] sm:$0xff] }
 0x70d   : > { %19793 = vmatprep.subr.mxu0 %v30171_v2 }
 0x70e   : > { %v27873_v24 = vpop.f32.mrb[54].mxu1 }
 0x70f   : > { %30891 = vst [vmem:[#allocation146_spill] sm:$0xff] %v27873_v24  ;;  %v18273_v27 = vpop.f32.mrb[55].mxu1  ;;  %19585 = vmatmul.mubr.msk.f32.gmra.mrb[2].mxu0 %vm530_vm3, %v22742_v43  ;;  %v22744_v24 = vld [vmem:[%s22973_s24 + $0x30] sm:$0xff] }
 0x710   : > { %19587 = vmatprep.mubr.msk.f32.mxu0 %vm22840_vm1, %v30171_v2 }
 0x712   : > { %v27879_v50 = vpop.f32.mrb[56].mxu1 }
 0x713   : > { %30892 = vst [vmem:[#allocation148_spill] sm:$0xff] %v27879_v50  ;;  %v18276_v9 = vpop.f32.mrb[57].mxu1  ;;  %19588 = vmatmul.mubr.msk.f32.gmra.mrb[4].mxu0 %vm530_vm3, %v22743_v51  ;;  %v22745_v50 = vld [vmem:[%s22973_s24 + $0x38] sm:$0xff] }
 0x714   : > { %19590 = vmatprep.mubr.msk.f32.mxu0 %vm22840_vm1, %v30171_v2 }
 0x716   : > { %v27885_v55 = vpop.f32.mrb[58].mxu1 }
 0x717   : > { %30893 = vst [vmem:[#allocation150_spill] sm:$0xff] %v27885_v55  ;;  %v18279_v27 = vpop.f32.mrb[59].mxu1  ;;  %19591 = vmatmul.mubr.msk.f32.gmra.mrb[6].mxu0 %vm530_vm3, %v22744_v24  ;;  %v22746_v55 = vld [vmem:[%s22973_s24 + $0x40] sm:$0xff] }
 0x718   : > { %19593 = vmatprep.mubr.msk.f32.mxu0 %vm22840_vm1, %v30171_v2 }
 0x71a   : > { %v27891_v43 = vpop.f32.mrb[60].mxu1 }
 0x71b   : > { %30894 = vst [vmem:[#allocation152_spill] sm:$0xff] %v27891_v43  ;;  %v18282_v9 = vpop.f32.mrb[61].mxu1  ;;  %19594 = vmatmul.mubr.msk.f32.gmra.mrb[8].mxu0 %vm530_vm3, %v22745_v50  ;;  %v22747_v43 = vld [vmem:[%s22973_s24 + $0x48] sm:$0xff] }
 0x71c   : > { %19596 = vmatprep.mubr.msk.f32.mxu0 %vm22840_vm1, %v30171_v2 }
 0x71e   : > { %v27897_v51 = vpop.f32.mrb[62].mxu1 }
 0x71f   : > { %30895 = vst [vmem:[#allocation158_spill] sm:$0xff] %v27897_v51  ;;  %v18285_v27 = vpop.f32.mrb[63].mxu1  ;;  %19597 = vmatmul.mubr.msk.f32.gmra.mrb[10].mxu0 %vm530_vm3, %v22746_v55  ;;  %v22748_v51 = vld [vmem:[%s22973_s24 + $0x50] sm:$0xff] }
 0x720   : > { %19599 = vmatprep.mubr.msk.f32.mxu0 %vm22840_vm1, %v30171_v2 }
 0x722   : > { %v27903_v24 = vpop.f32.mrb[64].mxu1 }
 0x723   : > { %30896 = vst [vmem:[#allocation160_spill] sm:$0xff] %v27903_v24  ;;  %v18288_v9 = vpop.f32.mrb[65].mxu1  ;;  %19600 = vmatmul.mubr.msk.f32.gmra.mrb[12].mxu0 %vm530_vm3, %v22747_v43  ;;  %v22749_v24 = vld [vmem:[%s22973_s24 + $0x58] sm:$0xff]  ;;  %v22750_v43 = vld [vmem:[%s22973_s24 + $0x60] sm:$0xff] }
 0x724   : > { %19602 = vmatprep.mubr.msk.f32.mxu0 %vm22840_vm1, %v30171_v2 }
 0x726   : > { %v27909_v50 = vpop.f32.mrb[66].mxu1 }
 0x727   : > { %v18291_v27 = vpop.f32.mrb[67].mxu1  ;;  %19603 = vmatmul.mubr.msk.f32.gmra.mrb[14].mxu0 %vm530_vm3, %v22748_v51  ;;  %v22751_v51 = vld [vmem:[%s22973_s24 + $0x68] sm:$0xff] }
 0x728   : > { %19605 = vmatprep.mubr.msk.f32.mxu0 %vm22840_vm1, %v30171_v2  ;;  %v22752_v27 = vld [vmem:[%s22973_s24 + $0x70] sm:$0xff] }
 0x72a   : > { %v27915_v55 = vpop.f32.mrb[68].mxu1 }
 0x72b   : > { %v18294_v9 = vpop.f32.mrb[69].mxu1  ;;  %19606 = vmatmul.mubr.msk.f32.gmra.mrb[16].mxu0 %vm530_vm3, %v22749_v24  ;;  %v22753_v24 = vld [vmem:[%s22973_s24 + $0x78] sm:$0xff] }
 0x72c   : > { %19608 = vmatprep.mubr.msk.f32.mxu0 %vm22840_vm1, %v30171_v2  ;;  %v22754_v9 = vld [vmem:[%s22973_s24 + $0x80] sm:$0xff] }
 0x72f   : > { %19609 = vmatmul.mubr.msk.f32.gmra.mrb[18].mxu0 %vm530_vm3, %v22750_v43  ;;  %v22755_v43 = vld [vmem:[%s22973_s24 + $0x88] sm:$0xff] }
 0x730   : > { %19611 = vmatprep.mubr.msk.f32.mxu0 %vm22840_vm1, %v30171_v2 }
 0x733   : > { %19612 = vmatmul.mubr.msk.f32.gmra.mrb[20].mxu0 %vm530_vm3, %v22751_v51  ;;  %v22756_v51 = vld [vmem:[%s22973_s24 + $0x90] sm:$0xff] }
 0x734   : > { %19614 = vmatprep.mubr.msk.f32.mxu0 %vm22840_vm1, %v30171_v2 }
 0x737   : > { %19615 = vmatmul.mubr.msk.f32.gmra.mrb[22].mxu0 %vm530_vm3, %v22752_v27  ;;  %v22757_v27 = vld [vmem:[%s22973_s24 + $0x98] sm:$0xff] }
 0x738   : > { %19617 = vmatprep.mubr.msk.f32.mxu0 %vm22840_vm1, %v30171_v2 }
 0x73b   : > { %19618 = vmatmul.mubr.msk.f32.gmra.mrb[24].mxu0 %vm530_vm3, %v22753_v24  ;;  %v22758_v24 = vld [vmem:[%s22973_s24 + $0xa0] sm:$0xff] }
 0x73c   : > { %19620 = vmatprep.mubr.msk.f32.mxu0 %vm22840_vm1, %v30171_v2 }
 0x73f   : > { %19621 = vmatmul.mubr.msk.f32.gmra.mrb[26].mxu0 %vm530_vm3, %v22754_v9  ;;  %v22759_v9 = vld [vmem:[%s22973_s24 + $0xa8] sm:$0xff] }
 0x740   : > { %19623 = vmatprep.mubr.msk.f32.mxu0 %vm22840_vm1, %v30171_v2 }
 0x743   : > { %19624 = vmatmul.mubr.msk.f32.gmra.mrb[28].mxu0 %vm530_vm3, %v22755_v43  ;;  %v22760_v43 = vld [vmem:[%s22973_s24 + $0xb0] sm:$0xff] }
 0x744   : > { %19626 = vmatprep.mubr.msk.f32.mxu0 %vm22840_vm1, %v30171_v2 }
 0x747   : > { %19627 = vmatmul.mubr.msk.f32.gmra.mrb[30].mxu0 %vm530_vm3, %v22756_v51  ;;  %v22761_v51 = vld [vmem:[%s22973_s24 + $0xb8] sm:$0xff] }
 0x748   : > { %19629 = vmatprep.mubr.msk.f32.mxu0 %vm22840_vm1, %v30171_v2 }
 0x74b   : > { %19630 = vmatmul.mubr.msk.f32.gmra.mrb[32].mxu0 %vm530_vm3, %v22757_v27  ;;  %v22762_v27 = vld [vmem:[%s22973_s24 + $0xc0] sm:$0xff] }
 0x74c   : > { %19632 = vmatprep.mubr.msk.f32.mxu0 %vm22840_vm1, %v30171_v2 }
 0x74f   : > { %19633 = vmatmul.mubr.msk.f32.gmra.mrb[34].mxu0 %vm530_vm3, %v22758_v24  ;;  %v22763_v24 = vld [vmem:[%s22973_s24 + $0xc8] sm:$0xff] }
 0x750   : > { %19635 = vmatprep.mubr.msk.f32.mxu0 %vm22840_vm1, %v30171_v2 }
 0x753   : > { %19636 = vmatmul.mubr.msk.f32.gmra.mrb[36].mxu0 %vm530_vm3, %v22759_v9  ;;  %v22764_v9 = vld [vmem:[%s22973_s24 + $0xd0] sm:$0xff] }
 0x754   : > { %19638 = vmatprep.mubr.msk.f32.mxu0 %vm22840_vm1, %v30171_v2 }
 0x757   : > { %19639 = vmatmul.mubr.msk.f32.gmra.mrb[38].mxu0 %vm530_vm3, %v22760_v43  ;;  %v22765_v43 = vld [vmem:[%s22973_s24 + $0xd8] sm:$0xff] }
 0x758   : > { %19641 = vmatprep.mubr.msk.f32.mxu0 %vm22840_vm1, %v30171_v2 }
 0x75b   : > { %19642 = vmatmul.mubr.msk.f32.gmra.mrb[40].mxu0 %vm530_vm3, %v22761_v51  ;;  %v22766_v51 = vld [vmem:[%s22973_s24 + $0xe0] sm:$0xff] }
 0x75c   : > { %19644 = vmatprep.mubr.msk.f32.mxu0 %vm22840_vm1, %v30171_v2 }
 0x75f   : > { %19645 = vmatmul.mubr.msk.f32.gmra.mrb[42].mxu0 %vm530_vm3, %v22762_v27  ;;  %v22767_v27 = vld [vmem:[%s22973_s24 + $0xe8] sm:$0xff] }
 0x760   : > { %19647 = vmatprep.mubr.msk.f32.mxu0 %vm22840_vm1, %v30171_v2 }
 0x763   : > { %19648 = vmatmul.mubr.msk.f32.gmra.mrb[44].mxu0 %vm530_vm3, %v22763_v24  ;;  %v22768_v24 = vld [vmem:[%s22973_s24 + $0xf0] sm:$0xff] }
 0x764   : > { %19650 = vmatprep.mubr.msk.f32.mxu0 %vm22840_vm1, %v30171_v2 }
 0x767   : > { %19651 = vmatmul.mubr.msk.f32.gmra.mrb[46].mxu0 %vm530_vm3, %v22764_v9  ;;  %v22769_v9 = vld [vmem:[%s22973_s24 + $0xf8] sm:$0xff] }
 0x768   : > { %19653 = vmatprep.mubr.msk.f32.mxu0 %vm22840_vm1, %v30171_v2 }
 0x76b   : > { %19654 = vmatmul.mubr.msk.f32.gmra.mrb[48].mxu0 %vm530_vm3, %v22765_v43  ;;  %v22770_v43 = vld [vmem:[%s22973_s24 + $0x100] sm:$0xff] }
 0x76c   : > { %19656 = vmatprep.mubr.msk.f32.mxu0 %vm22840_vm1, %v30171_v2 }
 0x76f   : > { %19657 = vmatmul.mubr.msk.f32.gmra.mrb[50].mxu0 %vm530_vm3, %v22766_v51  ;;  %v22771_v51 = vld [vmem:[%s22973_s24 + $0x108] sm:$0xff] }
 0x770   : > { %19659 = vmatprep.mubr.msk.f32.mxu0 %vm22840_vm1, %v30171_v2 }
 0x773   : > { %19660 = vmatmul.mubr.msk.f32.gmra.mrb[52].mxu0 %vm530_vm3, %v22767_v27  ;;  %v22772_v27 = vld [vmem:[%s22973_s24 + $0x110] sm:$0xff] }
 0x774   : > { %19662 = vmatprep.mubr.msk.f32.mxu0 %vm22840_vm1, %v30171_v2 }
 0x777   : > { %19663 = vmatmul.mubr.msk.f32.gmra.mrb[54].mxu0 %vm530_vm3, %v22768_v24  ;;  %v22773_v24 = vld [vmem:[%s22973_s24 + $0x118] sm:$0xff] }
 0x778   : > { %19665 = vmatprep.mubr.msk.f32.mxu0 %vm22840_vm1, %v30171_v2 }
 0x77b   : > { %19666 = vmatmul.mubr.msk.f32.gmra.mrb[56].mxu0 %vm530_vm3, %v22769_v9  ;;  %v22774_v9 = vld [vmem:[%s22973_s24 + $0x120] sm:$0xff] }
 0x77c   : > { %19668 = vmatprep.mubr.msk.f32.mxu0 %vm22840_vm1, %v30171_v2 }
 0x77f   : > { %19669 = vmatmul.mubr.msk.f32.gmra.mrb[58].mxu0 %vm530_vm3, %v22770_v43  ;;  %v15298_v43 = vld [vmem:[%s29719_s1 + $0x68] sm:$0xf] }
 0x780   : > { %19671 = vmatprep.mubr.msk.f32.mxu0 %vm22840_vm1, %v30171_v2 }
 0x783   : > { %19672 = vmatmul.mubr.msk.f32.gmra.mrb[60].mxu0 %vm530_vm3, %v22771_v51  ;;  %v30897_v51 = vld [vmem:[#allocation17_spill] sm:$0xff] }
 0x784   : > { %19674 = vmatprep.mubr.msk.f32.mxu0 %vm22840_vm1, %v30171_v2 }
 0x787   : > { %19675 = vmatmul.mubr.msk.f32.gmra.mrb[62].mxu0 %vm530_vm3, %v22772_v27  ;;  %v30898_v27 = vld [vmem:[#allocation19_spill] sm:$0xff] }
 0x788   : > { %19677 = vmatprep.mubr.msk.f32.mxu0 %vm22840_vm1, %v30171_v2 }
 0x78b   : > { %19678 = vmatmul.mubr.msk.f32.gmra.mrb[64].mxu0 %vm530_vm3, %v22773_v24  ;;  %v30901_v24 = vld [vmem:[#allocation25_spill] sm:$0xff] }
 0x78c   : > { %19680 = vmatprep.mubr.msk.f32.mxu0 %vm22840_vm1, %v30171_v2 }
 0x78f   : > { %19681 = vmatmul.mubr.msk.f32.gmra.mrb[66].mxu0 %vm530_vm3, %v22774_v9  ;;  %v30902_v9 = vld [vmem:[#allocation27_spill] sm:$0xff] }
 0x790   : > { %19683 = vmatprep.mubr.msk.f32.mxu0 %vm22840_vm1, %v30171_v2 }
 0x793   : > { %19684 = vmatmul.mubr.msk.f32.gmra.mrb[68].mxu0 %vm530_vm3, %v27839_v14 }
 0x794   : > { %19688 = vmatprep.mubr.msk.f32.mxu0 %vm22840_vm1, %v30171_v2 }
 0x797   : > { %19689 = vmatmul.mubr.msk.f32.vlgmr.msra.gmra.mrb[0].mxu0 %vm530_vm3, %v30725_v10  ;;  %v30899_v10 = vld [vmem:[#allocation21_spill] sm:$0xff] }
 0x798   : > { %19794 = vmatpush3.msk.msra.mxu0 %vm601_vm0, %v15298_v43  ;;  %19691 = vmatprep.mubr.msk.f32.mxu0 %vm22840_vm1, %v30171_v2  ;;  %v30903_v43 = vld [vmem:[#allocation29_spill] sm:$0xff] }
 0x79b   : > { %19692 = vmatmul.mubr.msk.f32.gmra.mrb[2].mxu0 %vm530_vm3, %v30727_v4  ;;  %v30900_v4 = vld [vmem:[#allocation23_spill] sm:$0xff] }
 0x79c   : > { %19694 = vmatprep.mubr.msk.f32.mxu0 %vm22840_vm1, %v30171_v2 }
 0x79f   : > { %19695 = vmatmul.mubr.msk.f32.gmra.mrb[4].mxu0 %vm530_vm3, %v30897_v51  ;;  %v30904_v51 = vld [vmem:[#allocation31_spill] sm:$0xff] }
 0x7a0   : > { %19697 = vmatprep.mubr.msk.f32.mxu0 %vm22840_vm1, %v30171_v2 }
 0x7a3   : > { %19698 = vmatmul.mubr.msk.f32.gmra.mrb[6].mxu0 %vm530_vm3, %v30898_v27  ;;  %v30905_v27 = vld [vmem:[#allocation33_spill] sm:$0xff] }
 0x7a4   : > { %19700 = vmatprep.mubr.msk.f32.mxu0 %vm22840_vm1, %v30171_v2 }
 0x7a7   : > { %19701 = vmatmul.mubr.msk.f32.gmra.mrb[8].mxu0 %vm530_vm3, %v30899_v10  ;;  %v30906_v10 = vld [vmem:[#allocation35_spill] sm:$0xff] }
 0x7a8   : > { %19703 = vmatprep.mubr.msk.f32.mxu0 %vm22840_vm1, %v30171_v2 }
 0x7ab   : > { %19704 = vmatmul.mubr.msk.f32.gmra.mrb[10].mxu0 %vm530_vm3, %v30900_v4  ;;  %v30907_v4 = vld [vmem:[#allocation37_spill] sm:$0xff] }
 0x7ac   : > { %19706 = vmatprep.mubr.msk.f32.mxu0 %vm22840_vm1, %v30171_v2 }
 0x7af   : > { %19707 = vmatmul.mubr.msk.f32.gmra.mrb[12].mxu0 %vm530_vm3, %v30901_v24  ;;  %v30908_v24 = vld [vmem:[#allocation39_spill] sm:$0xff] }
 0x7b0   : > { %19709 = vmatprep.mubr.msk.f32.mxu0 %vm22840_vm1, %v30171_v2 }
 0x7b3   : > { %19710 = vmatmul.mubr.msk.f32.gmra.mrb[14].mxu0 %vm530_vm3, %v30902_v9  ;;  %v30909_v9 = vld [vmem:[#allocation41_spill] sm:$0xff] }
 0x7b4   : > { %19712 = vmatprep.mubr.msk.f32.mxu0 %vm22840_vm1, %v30171_v2 }
 0x7b7   : > { %19713 = vmatmul.mubr.msk.f32.gmra.mrb[16].mxu0 %vm530_vm3, %v30903_v43  ;;  %v30910_v43 = vld [vmem:[#allocation43_spill] sm:$0xff] }
 0x7b8   : > { %19715 = vmatprep.mubr.msk.f32.mxu0 %vm22840_vm1, %v30171_v2 }
 0x7bb   : > { %19716 = vmatmul.mubr.msk.f32.gmra.mrb[18].mxu0 %vm530_vm3, %v30904_v51  ;;  %v30911_v51 = vld [vmem:[#allocation45_spill] sm:$0xff] }
 0x7bc   : > { %19718 = vmatprep.mubr.msk.f32.mxu0 %vm22840_vm1, %v30171_v2 }
 0x7bf   : > { %19719 = vmatmul.mubr.msk.f32.gmra.mrb[20].mxu0 %vm530_vm3, %v30905_v27 }
 0x7c0   : > { %19721 = vmatprep.mubr.msk.f32.mxu0 %vm22840_vm1, %v30171_v2 }
 0x7c3   : > { %19722 = vmatmul.mubr.msk.f32.gmra.mrb[22].mxu0 %vm530_vm3, %v30906_v10 }
 0x7c4   : > { %19724 = vmatprep.mubr.msk.f32.mxu0 %vm22840_vm1, %v30171_v2 }
 0x7c7   : > { %19725 = vmatmul.mubr.msk.f32.gmra.mrb[24].mxu0 %vm530_vm3, %v30907_v4 }
 0x7c8   : > { %19727 = vmatprep.mubr.msk.f32.mxu0 %vm22840_vm1, %v30171_v2 }
 0x7cb   : > { %19728 = vmatmul.mubr.msk.f32.gmra.mrb[26].mxu0 %vm530_vm3, %v30908_v24 }
 0x7cc   : > { %19730 = vmatprep.mubr.msk.f32.mxu0 %vm22840_vm1, %v30171_v2 }
 0x7cf   : > { %19731 = vmatmul.mubr.msk.f32.gmra.mrb[28].mxu0 %vm530_vm3, %v30909_v9 }
 0x7d0   : > { %19733 = vmatprep.mubr.msk.f32.mxu0 %vm22840_vm1, %v30171_v2 }
 0x7d3   : > { %19734 = vmatmul.mubr.msk.f32.gmra.mrb[30].mxu0 %vm530_vm3, %v30910_v43 }
 0x7d4   : > { %19736 = vmatprep.mubr.msk.f32.mxu0 %vm22840_vm1, %v30171_v2 }
 0x7d7   : > { %19737 = vmatmul.mubr.msk.f32.gmra.mrb[32].mxu0 %vm530_vm3, %v30911_v51 }
 0x7d8   : > { %19739 = vmatprep.mubr.msk.f32.mxu0 %vm22840_vm1, %v30171_v2 }
 0x7db   : > { %19740 = vmatmul.mubr.msk.f32.gmra.mrb[34].mxu0 %vm530_vm3, %v30757_v28 }
 0x7dc   : > { %19742 = vmatprep.mubr.msk.f32.mxu0 %vm22840_vm1, %v30171_v2 }
 0x7df   : > { %19743 = vmatmul.mubr.msk.f32.gmra.mrb[36].mxu0 %vm530_vm3, %v30760_v46 }
 0x7e0   : > { %19745 = vmatprep.mubr.msk.f32.mxu0 %vm22840_vm1, %v30171_v2 }
 0x7e3   : > { %19746 = vmatmul.mubr.msk.f32.gmra.mrb[38].mxu0 %vm530_vm3, %v30592_v15 }
 0x7e4   : > { %19748 = vmatprep.mubr.msk.f32.mxu0 %vm22840_vm1, %v30171_v2 }
 0x7e7   : > { %19749 = vmatmul.mubr.msk.f32.gmra.mrb[40].mxu0 %vm530_vm3, %v30594_v1  ;;  %v30915_v1 = vld [vmem:[#allocation162_spill] sm:$0xff] }
 0x7e8   : > { %19751 = vmatprep.mubr.msk.f32.mxu0 %vm22840_vm1, %v30171_v2 }
 0x7eb   : > { %19752 = vmatmul.mubr.msk.f32.gmra.mrb[42].mxu0 %vm530_vm3, %v30595_v63 }
 0x7ec   : > { %19754 = vmatprep.mubr.msk.f32.mxu0 %vm22840_vm1, %v30171_v2 }
 0x7ef   : > { %19755 = vmatmul.mubr.msk.f32.gmra.mrb[44].mxu0 %vm530_vm3, %v30596_v23 }
 0x7f0   : > { %19757 = vmatprep.mubr.msk.f32.mxu0 %vm22840_vm1, %v30171_v2 }
 0x7f3   : > { %19758 = vmatmul.mubr.msk.f32.gmra.mrb[46].mxu0 %vm530_vm3, %v30597_v58  ;;  %v30912_v58 = vld [vmem:[#allocation67_spill] sm:$0xff] }
 0x7f4   : > { %19760 = vmatprep.mubr.msk.f32.mxu0 %vm22840_vm1, %v30171_v2 }
 0x7f7   : > { %19761 = vmatmul.mubr.msk.f32.gmra.mrb[48].mxu0 %vm530_vm3, %v30598_v37  ;;  %v30913_v37 = vld [vmem:[#allocation154_spill] sm:$0xff] }
 0x7f8   : > { %19763 = vmatprep.mubr.msk.f32.mxu0 %vm22840_vm1, %v30171_v2 }
 0x7fb   : > { %19764 = vmatmul.mubr.msk.f32.gmra.mrb[50].mxu0 %vm530_vm3, %v30599_v13  ;;  %v8530_v13 = vrot.slane %v27839_v14, 1 }
 0x7fc   : > { %19766 = vmatprep.mubr.msk.f32.mxu0 %vm22840_vm1, %v30171_v2 }
 0x7ff   : > { %19767 = vmatmul.mubr.msk.f32.gmra.mrb[52].mxu0 %vm530_vm3, %v30600_v17  ;;  %v30914_v17 = vld [vmem:[#allocation51_spill] sm:$0xff] }
 0x800   : > { %19769 = vmatprep.mubr.msk.f32.mxu0 %vm22840_vm1, %v30171_v2 }
 0x803   : > { %19770 = vmatmul.mubr.msk.f32.gmra.mrb[54].mxu0 %vm530_vm3, %v30912_v58  ;;  %v30920_v58 = vld [vmem:[#allocation61_spill] sm:$0xff] }
 0x804   : > { %19772 = vmatprep.mubr.msk.f32.mxu0 %vm22840_vm1, %v30171_v2 }
 0x807   : > { %19773 = vmatmul.mubr.msk.f32.gmra.mrb[56].mxu0 %vm530_vm3, %v30770_v35 }
 0x808   : > { %19775 = vmatprep.mubr.msk.f32.mxu0 %vm22840_vm1, %v30171_v2 }
 0x80b   : > { %19776 = vmatmul.mubr.msk.f32.gmra.mrb[58].mxu0 %vm530_vm3, %v30772_v41 }
 0x80c   : > { %19778 = vmatprep.mubr.msk.f32.mxu0 %vm22840_vm1, %v30171_v2 }
 0x80f   : > { %19779 = vmatmul.mubr.msk.f32.gmra.mrb[60].mxu0 %vm530_vm3, %v30604_v5  ;;  %v8531_v5 = vsel %vm460_vm2, %v30915_v1, %v8530_v13 }
 0x810   : > { %19781 = vmatprep.mubr.msk.f32.mxu0 %vm22840_vm1, %v30171_v2 }
 0x813   : > { %19782 = vmatmul.mubr.msk.f32.gmra.mrb[62].mxu0 %vm530_vm3, %v30913_v37 }
 0x814   : > { %19784 = vmatprep.mubr.msk.f32.mxu0 %vm22840_vm1, %v30171_v2 }
 0x817   : > { %19785 = vmatmul.mubr.msk.f32.gmra.mrb[64].mxu0 %vm530_vm3, %v30914_v17 }
 0x818   : > { %19787 = vmatprep.mubr.msk.f32.mxu0 %vm22840_vm1, %v30171_v2 }
 0x81b   : > { %19788 = vmatmul.mubr.msk.f32.gmra.mrb[66].mxu0 %vm530_vm3, %v8531_v5 }
 0x81c   : > { %19790 = vmatprep.mubr.msk.f32.mxu0 %vm22840_vm1, %v30171_v2 }
 0x81f   : > { %19791 = vmatmul.mubr.msk.f32.gmra.mrb[68].mxu0 %vm530_vm3, %v8530_v13 }
 0x820   : > { %19795 = vmatprep.mubr.msk.f32.mxu0 %vm22840_vm1, %v30171_v2 }
 0x823   : > { %19796 = vmatmul.mubr.msk.f32.vlgmr.msra.gmra.mrb[0].mxu0 %vm530_vm3, %v30610_v47 }
 0x824   : > { %19798 = vmatprep.mubr.msk.f32.mxu0 %vm22840_vm1, %v30171_v2 }
 0x827   : > { %19799 = vmatmul.mubr.msk.f32.gmra.mrb[2].mxu0 %vm530_vm3, %v30611_v33 }
 0x828   : > { %19801 = vmatprep.mubr.msk.f32.mxu0 %vm22840_vm1, %v30171_v2 }
 0x82b   : > { %19802 = vmatmul.mubr.msk.f32.gmra.mrb[4].mxu0 %vm530_vm3, %v30612_v44  ;;  %v15335_v44 = vld [vmem:[%s29720_s2 + $0x4] sm:$0x7] }
 0x82c   : > { %19804 = vmatprep.mubr.msk.f32.mxu0 %vm22840_vm1, %v30171_v2  ;;  %19900 = vmatprep.subr.msk.mxu1 %vm2419_vm5, %v15335_v44 }
 0x82d   : > { %19901 = vmatpush3.msk.msra.mxu1 %vm2419_vm5, %v15335_v44 }
 0x82f   : > { %19805 = vmatmul.mubr.msk.f32.gmra.mrb[6].mxu0 %vm530_vm3, %v30613_v49  ;;  %v8816_v49 = vrot.slane %v27839_v14, 2  ;;  %v30919_v14 = vld [vmem:[#allocation59_spill] sm:$0xff] }
 0x830   : > { %19807 = vmatprep.mubr.msk.f32.mxu0 %vm22840_vm1, %v30171_v2 }
 0x833   : > { %19808 = vmatmul.mubr.msk.f32.gmra.mrb[8].mxu0 %vm530_vm3, %v30614_v54  ;;  %v30917_v54 = vld [vmem:[#allocation55_spill] sm:$0xff] }
 0x834   : > { %19810 = vmatprep.mubr.msk.f32.mxu0 %vm22840_vm1, %v30171_v2 }
 0x837   : > { %19811 = vmatmul.mubr.msk.f32.gmra.mrb[10].mxu0 %vm530_vm3, %v30615_v59  ;;  %v30918_v59 = vld [vmem:[#allocation53_spill] sm:$0xff] }
 0x838   : > { %19813 = vmatprep.mubr.msk.f32.mxu0 %vm22840_vm1, %v30171_v2 }
 0x83b   : > { %19814 = vmatmul.mubr.msk.f32.gmra.mrb[12].mxu0 %vm530_vm3, %v30616_v0  ;;  %v8817_v0 = vsel %vm1160_vm6, %v30918_v59, %v8816_v49  ;;  %v28357_v59 = vld [vmem:[%s29720_s2 + $0x8] sm:$0x7] }
 0x83c   : > { %19816 = vmatprep.mubr.msk.f32.mxu0 %vm22840_vm1, %v30171_v2 }
 0x83f   : > { %19817 = vmatmul.mubr.msk.f32.gmra.mrb[14].mxu0 %vm530_vm3, %v30617_v11  ;;  %v28317_v11 = vld [vmem:[%s29720_s2] sm:$0x7] }
 0x840   : > { %19819 = vmatprep.mubr.msk.f32.mxu0 %vm22840_vm1, %v30171_v2  ;;  %19926 = vmatprep.subr.msk.mxu1 %vm2419_vm5, %v28317_v11 }
 0x843   : > { %19820 = vmatmul.mubr.msk.f32.gmra.mrb[16].mxu0 %vm530_vm3, %v30618_v20 }
 0x844   : > { %19822 = vmatprep.mubr.msk.f32.mxu0 %vm22840_vm1, %v30171_v2 }
 0x847   : > { %19823 = vmatmul.mubr.msk.f32.gmra.mrb[18].mxu0 %vm530_vm3, %v30789_v30 }
 0x848   : > { %19825 = vmatprep.mubr.msk.f32.mxu0 %vm22840_vm1, %v30171_v2 }
 0x84b   : > { %19826 = vmatmul.mubr.msk.f32.gmra.mrb[20].mxu0 %vm530_vm3, %v30791_v29 }
 0x84c   : > { %19828 = vmatprep.mubr.msk.f32.mxu0 %vm22840_vm1, %v30171_v2 }
 0x84f   : > { %19829 = vmatmul.mubr.msk.f32.gmra.mrb[22].mxu0 %vm530_vm3, %v30624_v8 }
 0x850   : > { %19831 = vmatprep.mubr.msk.f32.mxu0 %vm22840_vm1, %v30171_v2 }
 0x853   : > { %19832 = vmatmul.mubr.msk.f32.gmra.mrb[24].mxu0 %vm530_vm3, %v30626_v39  ;;  %v30916_v39 = vld [vmem:[#allocation155_spill] sm:$0xff] }
 0x854   : > { %19834 = vmatprep.mubr.msk.f32.mxu0 %vm22840_vm1, %v30171_v2 }
 0x857   : > { %19835 = vmatmul.mubr.msk.f32.gmra.mrb[26].mxu0 %vm530_vm3, %v30627_v16 }
 0x858   : > { %19837 = vmatprep.mubr.msk.f32.mxu0 %vm22840_vm1, %v30171_v2 }
 0x85b   : > { %19838 = vmatmul.mubr.msk.f32.gmra.mrb[28].mxu0 %vm530_vm3, %v30628_v34 }
 0x85c   : > { %19840 = vmatprep.mubr.msk.f32.mxu0 %vm22840_vm1, %v30171_v2 }
 0x85f   : > { %19841 = vmatmul.mubr.msk.f32.gmra.mrb[30].mxu0 %vm530_vm3, %v30629_v45 }
 0x860   : > { %19843 = vmatprep.mubr.msk.f32.mxu0 %vm22840_vm1, %v30171_v2 }
 0x863   : > { %19844 = vmatmul.mubr.msk.f32.gmra.mrb[32].mxu0 %vm530_vm3, %v30916_v39  ;;  %v30921_v39 = vld [vmem:[#allocation63_spill] sm:$0xff] }
 0x864   : > { %19846 = vmatprep.mubr.msk.f32.mxu0 %vm22840_vm1, %v30171_v2 }
 0x867   : > { %19847 = vmatmul.mubr.msk.f32.gmra.mrb[34].mxu0 %vm530_vm3, %v30632_v56 }
 0x868   : > { %19849 = vmatprep.mubr.msk.f32.mxu0 %vm22840_vm1, %v30171_v2 }
 0x86b   : > { %19850 = vmatmul.mubr.msk.f32.gmra.mrb[36].mxu0 %vm530_vm3, %v30634_v36 }
 0x86c   : > { %19852 = vmatprep.mubr.msk.f32.mxu0 %vm22840_vm1, %v30171_v2 }
 0x86f   : > { %19853 = vmatmul.mubr.msk.f32.gmra.mrb[38].mxu0 %vm530_vm3, %v30636_v61 }
 0x870   : > { %19855 = vmatprep.mubr.msk.f32.mxu0 %vm22840_vm1, %v30171_v2 }
 0x873   : > { %19856 = vmatmul.mubr.msk.f32.gmra.mrb[40].mxu0 %vm530_vm3, %v30637_v31 }
 0x874   : > { %19858 = vmatprep.mubr.msk.f32.mxu0 %vm22840_vm1, %v30171_v2 }
 0x877   : > { %19859 = vmatmul.mubr.msk.f32.gmra.mrb[42].mxu0 %vm530_vm3, %v30638_v6 }
 0x878   : > { %19861 = vmatprep.mubr.msk.f32.mxu0 %vm22840_vm1, %v30171_v2 }
 0x87b   : > { %19862 = vmatmul.mubr.msk.f32.gmra.mrb[44].mxu0 %vm530_vm3, %v30639_v60 }
 0x87c   : > { %19864 = vmatprep.mubr.msk.f32.mxu0 %vm22840_vm1, %v30171_v2 }
 0x87f   : > { %19865 = vmatmul.mubr.msk.f32.gmra.mrb[46].mxu0 %vm530_vm3, %v30640_v18 }
 0x880   : > { %19867 = vmatprep.mubr.msk.f32.mxu0 %vm22840_vm1, %v30171_v2 }
 0x883   : > { %19868 = vmatmul.mubr.msk.f32.gmra.mrb[48].mxu0 %vm530_vm3, %v30641_v12 }
 0x884   : > { %19870 = vmatprep.mubr.msk.f32.mxu0 %vm22840_vm1, %v30171_v2 }
 0x887   : > { %19871 = vmatmul.mubr.msk.f32.gmra.mrb[50].mxu0 %vm530_vm3, %v30642_v57 }
 0x888   : > { %19873 = vmatprep.mubr.msk.f32.mxu0 %vm22840_vm1, %v30171_v2 }
 0x88b   : > { %19874 = vmatmul.mubr.msk.f32.gmra.mrb[52].mxu0 %vm530_vm3, %v30643_v40 }
 0x88c   : > { %19876 = vmatprep.mubr.msk.f32.mxu0 %vm22840_vm1, %v30171_v2 }
 0x88f   : > { %19877 = vmatmul.mubr.msk.f32.gmra.mrb[54].mxu0 %vm530_vm3, %v30644_v52 }
 0x890   : > { %19879 = vmatprep.mubr.msk.f32.mxu0 %vm22840_vm1, %v30171_v2 }
 0x893   : > { %19880 = vmatmul.mubr.msk.f32.gmra.mrb[56].mxu0 %vm530_vm3, %v30645_v25 }
 0x894   : > { %19882 = vmatprep.mubr.msk.f32.mxu0 %vm22840_vm1, %v30171_v2 }
 0x897   : > { %19883 = vmatmul.mubr.msk.f32.gmra.mrb[58].mxu0 %vm530_vm3, %v30810_v22 }
 0x898   : > { %19885 = vmatprep.mubr.msk.f32.mxu0 %vm22840_vm1, %v30171_v2 }
 0x89b   : > { %19886 = vmatmul.mubr.msk.f32.gmra.mrb[60].mxu0 %vm530_vm3, %v30647_v62 }
 0x89c   : > { %19888 = vmatprep.mubr.msk.f32.mxu0 %vm22840_vm1, %v30171_v2 }
 0x89f   : > { %19889 = vmatmul.mubr.msk.f32.gmra.mrb[62].mxu0 %vm530_vm3, %v26491_v53 }
 0x8a0   : > { %19891 = vmatprep.mubr.msk.f32.mxu0 %vm22840_vm1, %v30171_v2 }
 0x8a3   : > { %19892 = vmatmul.mubr.msk.f32.gmra.mrb[64].mxu0 %vm530_vm3, %v30917_v54 }
 0x8a4   : > { %19894 = vmatprep.mubr.msk.f32.mxu0 %vm22840_vm1, %v30171_v2 }
 0x8a7   : > { %19895 = vmatmul.mubr.msk.f32.gmra.mrb[66].mxu0 %vm530_vm3, %v8817_v0 }
 0x8a8   : > { %19897 = vmatprep.mubr.msk.f32.mxu0 %vm22840_vm1, %v30171_v2 }
 0x8ab   : > { %19898 = vmatmul.mubr.msk.f32.gmra.mrb[68].mxu0 %vm530_vm3, %v8816_v49 }
 0x8f6   : > { %v8891_v20 = vpop.f32.mrb[0].mxu0 }
 0x8f7   : > { %v20568_v47 = vadd.f32 %v8891_v20, %v27642_v48  ;;  %v19797_v8 = vpop.f32.mrb[1].mxu0 }
 0x8f9   : > { %v9100_v62 = vmax.f32 %v20568_v47, 0.0 }
 0x8fa   : > { %v8896_v61 = vpop.f32.mrb[2].mxu0 }
 0x8fb   : > { %9136 = vst.msk [vmem:[#allocation2] sm:$0xff] %vm9135_vm9, %v9100_v62  ;;  %v20569_v36 = vadd.f32 %v8896_v61, %v27649_v3  ;;  %v19800_v60 = vpop.f32.mrb[3].mxu0  ;;  %v30922_v61 = vld [vmem:[#allocation65_spill] sm:$0xff] }
 0x8fd   : > { %v9101_v25 = vmax.f32 %v20569_v36, 0.0 }
 0x8fe   : > { %v8901_v18 = vpop.f32.mrb[4].mxu0 }
 0x8ff   : > { %9137 = vst.msk [vmem:[#allocation2 + $0x8] sm:$0xff] %vm9135_vm9, %v9101_v25  ;;  %v20570_v12 = vadd.f32 %v8901_v18, %v27657_v21  ;;  %v19803_v57 = vpop.f32.mrb[5].mxu0 }
 0x901   : > { %v9102_v53 = vmax.f32 %v20570_v12, 0.0 }
 0x902   : > { %v8906_v40 = vpop.f32.mrb[6].mxu0 }
 0x903   : > { %9138 = vst.msk [vmem:[#allocation2 + $0x10] sm:$0xff] %vm9135_vm9, %v9102_v53  ;;  %v20571_v52 = vadd.f32 %v8906_v40, %v27662_v42  ;;  %v19806_v28 = vpop.f32.mrb[7].mxu0 }
 0x905   : > { %v9103_v23 = vmax.f32 %v20571_v52, 0.0 }
 0x906   : > { %v8911_v15 = vpop.f32.mrb[8].mxu0  ;;  %v9172_v34 = vld [vmem:[#allocation2] ss:$2 sm:$0xff]  ;;  %v9208_v45 = vld [vmem:[#allocation2 + $0x1] ss:$2 sm:$0xff] }
 0x907   : > { %9139 = vst.msk [vmem:[#allocation2 + $0x18] sm:$0xff] %vm9135_vm9, %v9103_v23  ;;  %v20572_v63 = vadd.f32 %v8911_v15, %v27670_v19  ;;  %v19809_v33 = vpop.f32.mrb[9].mxu0  ;;  %v28332_v46 = vmax.f32 %v9172_v34, %v9208_v45 }
 0x908   : > { %v30924_v33 = vld [vmem:[#allocation73_spill] sm:$0xff] }
 0x909   : > { %v9104_v16 = vmax.f32 %v20572_v63, 0.0  ;;  %v9280_v42 = vrot.slane %v28332_v46, 1 }
 0x90a   : > { %v8916_v6 = vpop.f32.mrb[10].mxu0 }
 0x90b   : > { %9140 = vst.msk [vmem:[#allocation2 + $0x20] sm:$0xff] %vm9135_vm9, %v9104_v16  ;;  %v20573_v56 = vadd.f32 %v8916_v6, %v27678_v38  ;;  %v19812_v31 = vpop.f32.mrb[11].mxu0 }
 0x90c   : > { %v30925_v31 = vld [vmem:[#allocation116_spill] sm:$0xff] }
 0x90d   : > { %v9105_v41 = vmax.f32 %v20573_v56, 0.0 }
 0x90e   : > { %v9174_v35 = vld [vmem:[#allocation2 + $0x10] ss:$2 sm:$0xff]  ;;  %v9210_v30 = vld [vmem:[#allocation2 + $0x11] ss:$2 sm:$0xff]  ;;  %v8921_v29 = vpop.f32.mrb[12].mxu0 }
 0x90f   : > { %v28334_v22 = vmax.f32 %v9174_v35, %v9210_v30  ;;  %9141 = vst.msk [vmem:[#allocation2 + $0x28] sm:$0xff] %vm9135_vm9, %v9105_v41  ;;  %v20574_v48 = vadd.f32 %v8921_v29, %v27684_v26  ;;  %v19815_v3 = vpop.f32.mrb[13].mxu0 }
 0x911   : > { %v9106_v21 = vmax.f32 %v20574_v48, 0.0  ;;  %v9281_v19 = vrot.slane %v28334_v22, 1 }
 0x912   : > { %v8926_v38 = vpop.f32.mrb[14].mxu0 }
 0x913   : > { %9142 = vst.msk [vmem:[#allocation2 + $0x30] sm:$0xff] %vm9135_vm9, %v9106_v21  ;;  %v20575_v27 = vadd.f32 %v8926_v38, %v30919_v14  ;;  %v19818_v10 = vpop.f32.mrb[15].mxu0  ;;  %v9282_v4 = vsel %vm460_vm2, %v9280_v42, %v9281_v19 }
 0x914   : > { %19902 = vmatprep.mubr.msk.f32.mxu1 %vm9135_vm9, %v9282_v4 }
 0x915   : > { %v9107_v24 = vmax.f32 %v20575_v27, 0.0 }
 0x916   : > { %v9176_v9 = vld [vmem:[#allocation2 + $0x20] ss:$2 sm:$0xff]  ;;  %v9212_v43 = vld [vmem:[#allocation2 + $0x21] ss:$2 sm:$0xff]  ;;  %v8931_v26 = vpop.f32.mrb[16].mxu0 }
 0x917   : > { %v28344_v51 = vmax.f32 %v9176_v9, %v9212_v43  ;;  %9143 = vst.msk [vmem:[#allocation2 + $0x38] sm:$0xff] %vm9135_vm9, %v9107_v24  ;;  %v20576_v37 = vadd.f32 %v8931_v26, %v30920_v58  ;;  %v19821_v13 = vpop.f32.mrb[17].mxu0  ;;  %v30927_v24 = vld [vmem:[#allocation120_spill] sm:$0xff] }
 0x919   : > { %v9108_v17 = vmax.f32 %v20576_v37, 0.0  ;;  %v9283_v1 = vrot.slane %v28344_v51, 1 }
 0x91a   : > { %v8936_v5 = vpop.f32.mrb[18].mxu0 }
 0x91b   : > { %9144 = vst.msk [vmem:[#allocation2 + $0x40] sm:$0xff] %vm9135_vm9, %v9108_v17  ;;  %v20577_v44 = vadd.f32 %v8936_v5, %v30921_v39  ;;  %v19824_v49 = vpop.f32.mrb[19].mxu0  ;;  %v28352_v54 = vsel %vm460_vm2, %v9281_v19, %v9283_v1  ;;  %v30926_v19 = vld [vmem:[#allocation118_spill] sm:$0xff] }
 0x91c   : > { %19903 = vmatmul.mubr.msk.f32.vlgmr.msra.gmra.mrb[70].mxu1 %vm9135_vm9, %v28352_v54  ;;  %v30928_v5 = vld [vmem:[#allocation122_spill] sm:$0xff] }
 0x91d   : > { %v9109_v0 = vmax.f32 %v20577_v44, 0.0  ;;  %19927 = vmatpush3.msk.msra.mxu1 %vm2419_vm5, %v28317_v11  ;;  %v30923_v11 = vld [vmem:[#allocation74_spill] sm:$0xff] }
 0x91e   : > { %v9178_v20 = vld [vmem:[#allocation2 + $0x30] ss:$2 sm:$0xff]  ;;  %v9214_v47 = vld [vmem:[#allocation2 + $0x31] ss:$2 sm:$0xff]  ;;  %v8941_v8 = vpop.f32.mrb[20].mxu0  ;;  %19952 = vmatprep.subr.msk.mxu1 %vm2419_vm5, %v28357_v59 }
 0x91f   : > { %v28365_v62 = vmax.f32 %v9178_v20, %v9214_v47  ;;  %9145 = vst.msk [vmem:[#allocation2 + $0x48] sm:$0xff] %vm9135_vm9, %v9109_v0  ;;  %v20578_v36 = vadd.f32 %v8941_v8, %v30922_v61  ;;  %v19827_v60 = vpop.f32.mrb[21].mxu0  ;;  %v30929_v47 = vld [vmem:[#allocation124_spill] sm:$0xff] }
 0x921   : > { %v9110_v25 = vmax.f32 %v20578_v36, 0.0  ;;  %v9285_v18 = vrot.slane %v28365_v62, 1 }
 0x922   : > { %v8946_v12 = vpop.f32.mrb[22].mxu0 }
 0x923   : > { %9146 = vst.msk [vmem:[#allocation2 + $0x50] sm:$0xff] %vm9135_vm9, %v9110_v25  ;;  %v20579_v57 = vadd.f32 %v8946_v12, %v30923_v11  ;;  %v19830_v53 = vpop.f32.mrb[23].mxu0  ;;  %v28373_v40 = vsel %vm460_vm2, %v9283_v1, %v9285_v18 }
 0x924   : > { %19905 = vmatprep.mubr.msk.f32.mxu1 %vm9135_vm9, %v28373_v40 }
 0x925   : > { %v9111_v52 = vmax.f32 %v20579_v57, 0.0  ;;  %v30930_v57 = vld [vmem:[#allocation127_spill] sm:$0xff] }
 0x926   : > { %v9180_v28 = vld [vmem:[#allocation2 + $0x40] ss:$2 sm:$0xff]  ;;  %v9216_v23 = vld [vmem:[#allocation2 + $0x41] ss:$2 sm:$0xff]  ;;  %v8951_v15 = vpop.f32.mrb[24].mxu0 }
 0x927   : > { %v28377_v63 = vmax.f32 %v9180_v28, %v9216_v23  ;;  %9147 = vst.msk [vmem:[#allocation2 + $0x58] sm:$0xff] %vm9135_vm9, %v9111_v52  ;;  %v20580_v16 = vadd.f32 %v8951_v15, %v30924_v33  ;;  %v19833_v34 = vpop.f32.mrb[25].mxu0  ;;  %v30931_v33 = vld [vmem:[#allocation130_spill] sm:$0xff] }
 0x929   : > { %v9112_v45 = vmax.f32 %v20580_v16, 0.0  ;;  %v9287_v6 = vrot.slane %v28377_v63, 1 }
 0x92a   : > { %v8956_v56 = vpop.f32.mrb[26].mxu0 }
 0x92b   : > { %9148 = vst.msk [vmem:[#allocation2 + $0x60] sm:$0xff] %vm9135_vm9, %v9112_v45  ;;  %v20581_v41 = vadd.f32 %v8956_v56, %v30925_v31  ;;  %v19836_v35 = vpop.f32.mrb[27].mxu0  ;;  %v28385_v30 = vsel %vm460_vm2, %v9285_v18, %v9287_v6 }
 0x92c   : > { %19906 = vmatmul.mubr.msk.f32.gmra.mrb[72].mxu1 %vm9135_vm9, %v28385_v30 }
 0x92d   : > { %v9113_v29 = vmax.f32 %v20581_v41, 0.0 }
 0x92e   : > { %v9182_v48 = vld [vmem:[#allocation2 + $0x50] ss:$2 sm:$0xff]  ;;  %v9218_v3 = vld [vmem:[#allocation2 + $0x51] ss:$2 sm:$0xff]  ;;  %v8961_v21 = vpop.f32.mrb[28].mxu0 }
 0x92f   : > { %v28389_v42 = vmax.f32 %v9182_v48, %v9218_v3  ;;  %9149 = vst.msk [vmem:[#allocation2 + $0x68] sm:$0xff] %vm9135_vm9, %v9113_v29  ;;  %v20582_v38 = vadd.f32 %v8961_v21, %v30926_v19  ;;  %v19839_v14 = vpop.f32.mrb[29].mxu0  ;;  %v30932_v29 = vld [vmem:[#allocation133_spill] sm:$0xff] }
 0x930   : > { %v30933_v14 = vld [vmem:[#allocation136_spill] sm:$0xff] }
 0x931   : > { %v9114_v27 = vmax.f32 %v20582_v38, 0.0  ;;  %v9289_v10 = vrot.slane %v28389_v42, 1 }
 0x932   : > { %v8966_v4 = vpop.f32.mrb[30].mxu0 }
 0x933   : > { %9150 = vst.msk [vmem:[#allocation2 + $0x70] sm:$0xff] %vm9135_vm9, %v9114_v27  ;;  %v20583_v9 = vadd.f32 %v8966_v4, %v30927_v24  ;;  %v19842_v43 = vpop.f32.mrb[31].mxu0  ;;  %v28397_v26 = vsel %vm460_vm2, %v9287_v6, %v9289_v10 }
 0x934   : > { %19908 = vmatprep.mubr.msk.f32.mxu1 %vm9135_vm9, %v28397_v26 }
 0x935   : > { %v9115_v58 = vmax.f32 %v20583_v9, 0.0 }
 0x936   : > { %v9184_v37 = vld [vmem:[#allocation2 + $0x60] ss:$2 sm:$0xff]  ;;  %v9220_v13 = vld [vmem:[#allocation2 + $0x61] ss:$2 sm:$0xff]  ;;  %v8971_v17 = vpop.f32.mrb[32].mxu0 }
 0x937   : > { %v28401_v1 = vmax.f32 %v9184_v37, %v9220_v13  ;;  %9151 = vst.msk [vmem:[#allocation2 + $0x78] sm:$0xff] %vm9135_vm9, %v9115_v58  ;;  %v20584_v39 = vadd.f32 %v8971_v17, %v30928_v5  ;;  %v19845_v44 = vpop.f32.mrb[33].mxu0  ;;  %v30934_v13 = vld [vmem:[#allocation138_spill] sm:$0xff] }
 0x939   : > { %v9116_v49 = vmax.f32 %v20584_v39, 0.0  ;;  %v9291_v0 = vrot.slane %v28401_v1, 1 }
 0x93a   : > { %v8976_v20 = vpop.f32.mrb[34].mxu0 }
 0x93b   : > { %9152 = vst.msk [vmem:[#allocation2 + $0x80] sm:$0xff] %vm9135_vm9, %v9116_v49  ;;  %v20585_v8 = vadd.f32 %v8976_v20, %v30929_v47  ;;  %v19848_v61 = vpop.f32.mrb[35].mxu0  ;;  %v28409_v36 = vsel %vm460_vm2, %v9289_v10, %v9291_v0 }
 0x93c   : > { %19909 = vmatmul.mubr.msk.f32.gmra.mrb[74].mxu1 %vm9135_vm9, %v28409_v36 }
 0x93d   : > { %v9117_v60 = vmax.f32 %v20585_v8, 0.0 }
 0x93e   : > { %v9186_v25 = vld [vmem:[#allocation2 + $0x70] ss:$2 sm:$0xff]  ;;  %v9222_v18 = vld [vmem:[#allocation2 + $0x71] ss:$2 sm:$0xff]  ;;  %v8981_v12 = vpop.f32.mrb[36].mxu0 }
 0x93f   : > { %v28413_v11 = vmax.f32 %v9186_v25, %v9222_v18  ;;  %9153 = vst.msk [vmem:[#allocation2 + $0x88] sm:$0xff] %vm9135_vm9, %v9117_v60  ;;  %v20586_v53 = vadd.f32 %v8981_v12, %v30930_v57  ;;  %v19851_v52 = vpop.f32.mrb[37].mxu0  ;;  %v30936_v57 = vld [vmem:[#allocation144_spill] sm:$0xff] }
 0x941   : > { %v9118_v28 = vmax.f32 %v20586_v53, 0.0  ;;  %v9293_v23 = vrot.slane %v28413_v11, 1 }
 0x942   : > { %v8986_v15 = vpop.f32.mrb[38].mxu0 }
 0x943   : > { %9154 = vst.msk [vmem:[#allocation2 + $0x90] sm:$0xff] %vm9135_vm9, %v9118_v28  ;;  %v20587_v16 = vadd.f32 %v8986_v15, %v30931_v33  ;;  %v19854_v34 = vpop.f32.mrb[39].mxu0  ;;  %v28421_v45 = vsel %vm460_vm2, %v9291_v0, %v9293_v23  ;;  %v30935_v0 = vld [vmem:[#allocation206_spill] sm:$0xff] }
 0x944   : > { %19911 = vmatprep.mubr.msk.f32.mxu1 %vm9135_vm9, %v28421_v45 }
 0x945   : > { %v9119_v6 = vmax.f32 %v20587_v16, 0.0 }
 0x946   : > { %v9188_v56 = vld [vmem:[#allocation2 + $0x80] ss:$2 sm:$0xff]  ;;  %v9224_v31 = vld [vmem:[#allocation2 + $0x81] ss:$2 sm:$0xff]  ;;  %v8991_v41 = vpop.f32.mrb[40].mxu0 }
 0x947   : > { %v28425_v35 = vmax.f32 %v9188_v56, %v9224_v31  ;;  %9155 = vst.msk [vmem:[#allocation2 + $0x98] sm:$0xff] %vm9135_vm9, %v9119_v6  ;;  %v20588_v48 = vadd.f32 %v8991_v41, %v30932_v29  ;;  %v19857_v3 = vpop.f32.mrb[41].mxu0 }
 0x949   : > { %v9120_v21 = vmax.f32 %v20588_v48, 0.0  ;;  %v9295_v19 = vrot.slane %v28425_v35, 1 }
 0x94a   : > { %v8996_v38 = vpop.f32.mrb[42].mxu0 }
 0x94b   : > { %9156 = vst.msk [vmem:[#allocation2 + $0xa0] sm:$0xff] %vm9135_vm9, %v9120_v21  ;;  %v20589_v27 = vadd.f32 %v8996_v38, %v30933_v14  ;;  %v19860_v10 = vpop.f32.mrb[43].mxu0  ;;  %v28433_v4 = vsel %vm460_vm2, %v9293_v23, %v9295_v19  ;;  %v30937_v38 = vld [vmem:[#allocation146_spill] sm:$0xff] }
 0x94c   : > { %19912 = vmatmul.mubr.msk.f32.gmra.mrb[76].mxu1 %vm9135_vm9, %v28433_v4 }
 0x94d   : > { %v9121_v24 = vmax.f32 %v20589_v27, 0.0 }
 0x94e   : > { %v9190_v9 = vld [vmem:[#allocation2 + $0x90] ss:$2 sm:$0xff]  ;;  %v9226_v43 = vld [vmem:[#allocation2 + $0x91] ss:$2 sm:$0xff]  ;;  %v9001_v58 = vpop.f32.mrb[44].mxu0 }
 0x94f   : > { %v28437_v37 = vmax.f32 %v9190_v9, %v9226_v43  ;;  %9157 = vst.msk [vmem:[#allocation2 + $0xa8] sm:$0xff] %vm9135_vm9, %v9121_v24  ;;  %v20590_v17 = vadd.f32 %v9001_v58, %v30934_v13  ;;  %v19863_v5 = vpop.f32.mrb[45].mxu0  ;;  %v30938_v13 = vld [vmem:[#allocation148_spill] sm:$0xff] }
 0x951   : > { %v9122_v39 = vmax.f32 %v20590_v17, 0.0  ;;  %v9297_v44 = vrot.slane %v28437_v37, 1 }
 0x952   : > { %v9006_v49 = vpop.f32.mrb[46].mxu0 }
 0x953   : > { %9158 = vst.msk [vmem:[#allocation2 + $0xb0] sm:$0xff] %vm9135_vm9, %v9122_v39  ;;  %v20591_v20 = vadd.f32 %v9006_v49, %v30935_v0  ;;  %v19866_v47 = vpop.f32.mrb[47].mxu0  ;;  %v28445_v8 = vsel %vm460_vm2, %v9295_v19, %v9297_v44  ;;  %v30939_v0 = vld [vmem:[#allocation150_spill] sm:$0xff] }
 0x954   : > { %19914 = vmatprep.mubr.msk.f32.mxu1 %vm9135_vm9, %v28445_v8 }
 0x955   : > { %v9123_v61 = vmax.f32 %v20591_v20, 0.0 }
 0x956   : > { %v9192_v60 = vld [vmem:[#allocation2 + $0xa0] ss:$2 sm:$0xff]  ;;  %v9228_v25 = vld [vmem:[#allocation2 + $0xa1] ss:$2 sm:$0xff]  ;;  %v9011_v18 = vpop.f32.mrb[48].mxu0 }
 0x957   : > { %v28449_v12 = vmax.f32 %v9192_v60, %v9228_v25  ;;  %9159 = vst.msk [vmem:[#allocation2 + $0xb8] sm:$0xff] %vm9135_vm9, %v9123_v61  ;;  %v20592_v53 = vadd.f32 %v9011_v18, %v30936_v57  ;;  %v19869_v52 = vpop.f32.mrb[49].mxu0 }
 0x958   : > { %v30940_v52 = vld [vmem:[#allocation152_spill] sm:$0xff] }
 0x959   : > { %v9124_v28 = vmax.f32 %v20592_v53, 0.0  ;;  %v9299_v23 = vrot.slane %v28449_v12, 1 }
 0x95a   : > { %v9016_v15 = vpop.f32.mrb[50].mxu0 }
 0x95b   : > { %9160 = vst.msk [vmem:[#allocation2 + $0xc0] sm:$0xff] %vm9135_vm9, %v9124_v28  ;;  %v20593_v33 = vadd.f32 %v9016_v15, %v27857_v32  ;;  %v19872_v16 = vpop.f32.mrb[51].mxu0  ;;  %v28457_v34 = vsel %vm460_vm2, %v9297_v44, %v9299_v23 }
 0x95c   : > { %19915 = vmatmul.mubr.msk.f32.gmra.mrb[78].mxu1 %vm9135_vm9, %v28457_v34 }
 0x95d   : > { %v9125_v6 = vmax.f32 %v20593_v33, 0.0 }
 0x95e   : > { %v9194_v56 = vld [vmem:[#allocation2 + $0xb0] ss:$2 sm:$0xff]  ;;  %v9230_v31 = vld [vmem:[#allocation2 + $0xb1] ss:$2 sm:$0xff]  ;;  %v9021_v41 = vpop.f32.mrb[52].mxu0 }
 0x95f   : > { %v28461_v29 = vmax.f32 %v9194_v56, %v9230_v31  ;;  %9161 = vst.msk [vmem:[#allocation2 + $0xc8] sm:$0xff] %vm9135_vm9, %v9125_v6  ;;  %v20594_v48 = vadd.f32 %v9021_v41, %v27865_v7  ;;  %v19875_v3 = vpop.f32.mrb[53].mxu0  ;;  %v30941_v6 = vld [vmem:[#allocation158_spill] sm:$0xff] }
 0x961   : > { %v9126_v21 = vmax.f32 %v20594_v48, 0.0  ;;  %v9301_v32 = vrot.slane %v28461_v29, 1 }
 0x962   : > { %v9026_v19 = vpop.f32.mrb[54].mxu0 }
 0x963   : > { %9162 = vst.msk [vmem:[#allocation2 + $0xd0] sm:$0xff] %vm9135_vm9, %v9126_v21  ;;  %v20595_v14 = vadd.f32 %v9026_v19, %v30937_v38  ;;  %v19878_v27 = vpop.f32.mrb[55].mxu0  ;;  %v28469_v10 = vsel %vm460_vm2, %v9299_v23, %v9301_v32  ;;  %v30942_v38 = vld [vmem:[#allocation160_spill] sm:$0xff] }
 0x964   : > { %19917 = vmatprep.mubr.msk.f32.mxu1 %vm9135_vm9, %v28469_v10 }
 0x965   : > { %v9127_v24 = vmax.f32 %v20595_v14, 0.0 }
 0x966   : > { %v9196_v9 = vld [vmem:[#allocation2 + $0xc0] ss:$2 sm:$0xff]  ;;  %v9232_v43 = vld [vmem:[#allocation2 + $0xc1] ss:$2 sm:$0xff]  ;;  %v9031_v7 = vpop.f32.mrb[56].mxu0 }
 0x967   : > { %v28473_v58 = vmax.f32 %v9196_v9, %v9232_v43  ;;  %9163 = vst.msk [vmem:[#allocation2 + $0xd8] sm:$0xff] %vm9135_vm9, %v9127_v24  ;;  %v20596_v17 = vadd.f32 %v9031_v7, %v30938_v13  ;;  %v19881_v5 = vpop.f32.mrb[57].mxu0 }
 0x969   : > { %v9128_v39 = vmax.f32 %v20596_v17, 0.0  ;;  %v9303_v44 = vrot.slane %v28473_v58, 1 }
 0x96a   : > { %v9036_v49 = vpop.f32.mrb[58].mxu0 }
 0x96b   : > { %9164 = vst.msk [vmem:[#allocation2 + $0xe0] sm:$0xff] %vm9135_vm9, %v9128_v39  ;;  %v20597_v20 = vadd.f32 %v9036_v49, %v30939_v0  ;;  %v19884_v47 = vpop.f32.mrb[59].mxu0  ;;  %v28481_v61 = vsel %vm460_vm2, %v9301_v32, %v9303_v44 }
 0x96c   : > { %19918 = vmatmul.mubr.msk.f32.gmra.mrb[80].mxu1 %vm9135_vm9, %v28481_v61 }
 0x96d   : > { %v9129_v60 = vmax.f32 %v20597_v20, 0.0 }
 0x96e   : > { %v9198_v25 = vld [vmem:[#allocation2 + $0xd0] ss:$2 sm:$0xff]  ;;  %v9234_v18 = vld [vmem:[#allocation2 + $0xd1] ss:$2 sm:$0xff]  ;;  %v9041_v57 = vpop.f32.mrb[60].mxu0 }
 0x96f   : > { %v28485_v53 = vmax.f32 %v9198_v25, %v9234_v18  ;;  %9165 = vst.msk [vmem:[#allocation2 + $0xe8] sm:$0xff] %vm9135_vm9, %v9129_v60  ;;  %v20598_v28 = vadd.f32 %v9041_v57, %v30940_v52  ;;  %v19887_v23 = vpop.f32.mrb[61].mxu0  ;;  %v9673_v18 = vrot.slane %v28332_v46, 2  ;;  %v9676_v57 = vrot.slane %v28344_v51, 2 }
 0x971   : > { %v9130_v15 = vmax.f32 %v20598_v28, 0.0  ;;  %v9305_v33 = vrot.slane %v28485_v53, 1  ;;  %v9678_v28 = vrot.slane %v28365_v62, 2 }
 0x972   : > { %v9046_v16 = vpop.f32.mrb[62].mxu0 }
 0x973   : > { %9166 = vst.msk [vmem:[#allocation2 + $0xf0] sm:$0xff] %vm9135_vm9, %v9130_v15  ;;  %v20599_v56 = vadd.f32 %v9046_v16, %v30941_v6  ;;  %v19890_v31 = vpop.f32.mrb[63].mxu0  ;;  %v28493_v41 = vsel %vm460_vm2, %v9303_v44, %v9305_v33  ;;  %v9680_v15 = vrot.slane %v28377_v63, 2  ;;  %v28578_v16 = vsel %vm1160_vm6, %v9676_v57, %v9678_v28 }
 0x974   : > { %19920 = vmatprep.mubr.msk.f32.mxu1 %vm9135_vm9, %v28493_v41  ;;  %v9682_v6 = vrot.slane %v28389_v42, 2  ;;  %v9684_v31 = vrot.slane %v28401_v1, 2 }
 0x975   : > { %v9131_v48 = vmax.f32 %v20599_v56, 0.0  ;;  %v28586_v56 = vsel %vm1160_vm6, %v9678_v28, %v9680_v15  ;;  %v9907_v28 = vrot.slane %v28365_v62, 3 }
 0x976   : > { %v9200_v3 = vld [vmem:[#allocation2 + $0xe0] ss:$2 sm:$0xff]  ;;  %v9236_v21 = vld [vmem:[#allocation2 + $0xe1] ss:$2 sm:$0xff]  ;;  %v9051_v32 = vpop.f32.mrb[64].mxu0 }
 0x977   : > { %v28497_v19 = vmax.f32 %v9200_v3, %v9236_v21  ;;  %9167 = vst.msk [vmem:[#allocation2 + $0xf8] sm:$0xff] %vm9135_vm9, %v9131_v48  ;;  %v20600_v14 = vadd.f32 %v9051_v32, %v30942_v38  ;;  %v19893_v27 = vpop.f32.mrb[65].mxu0  ;;  %v28592_v48 = vsel %vm1160_vm6, %v9680_v15, %v9682_v6  ;;  %v9686_v3 = vrot.slane %v28413_v11, 2 }
 0x978   : > { %v28598_v21 = vsel %vm1160_vm6, %v9682_v6, %v9684_v31  ;;  %v9688_v32 = vrot.slane %v28425_v35, 2  ;;  %v9909_v6 = vrot.slane %v28377_v63, 3 }
 0x979   : > { %v9132_v24 = vmax.f32 %v20600_v14, 0.0  ;;  %v9307_v9 = vrot.slane %v28497_v19, 1  ;;  %v28604_v38 = vsel %vm1160_vm6, %v9684_v31, %v9686_v3  ;;  %v9690_v14 = vrot.slane %v28437_v37, 2  ;;  %v15424_v31 = vld [vmem:[%s29720_s2 + $0x14] sm:$0x7] }
 0x97a   : > { %v9056_v43 = vpop.f32.mrb[66].mxu0  ;;  %v28610_v27 = vsel %vm1160_vm6, %v9686_v3, %v9688_v32  ;;  %v9929_v2 = vrot.slane %v28497_v19, 3 }
 0x97b   : > { %9168 = vst.msk [vmem:[#allocation2 + $0x100] sm:$0xff] %vm9135_vm9, %v9132_v24  ;;  %v20601_v7 = vadd.f32 %v9056_v43, %v27909_v50  ;;  %v19896_v13 = vpop.f32.mrb[67].mxu0  ;;  %v28505_v17 = vsel %vm460_vm2, %v9305_v33, %v9307_v9  ;;  %v15406_v33 = vld [vmem:[%s29720_s2 + $0x10] sm:$0x7]  ;;  %v9692_v24 = vrot.slane %v28449_v12, 2  ;;  %v9694_v43 = vrot.slane %v28461_v29, 2 }
 0x97c   : > { %19921 = vmatmul.mubr.msk.f32.gmra.mrb[82].mxu1 %vm9135_vm9, %v28505_v17  ;;  %v9696_v13 = vrot.slane %v28473_v58, 2 }
 0x97d   : > { %v9133_v5 = vmax.f32 %v20601_v7, 0.0  ;;  %v28622_v7 = vsel %vm1160_vm6, %v9690_v14, %v9692_v24 }
 0x97e   : > { %v9202_v39 = vld [vmem:[#allocation2 + $0xf0] ss:$2 sm:$0xff]  ;;  %v9238_v44 = vld [vmem:[#allocation2 + $0xf1] ss:$2 sm:$0xff]  ;;  %v9061_v49 = vpop.f32.mrb[68].mxu0 }
 0x97f   : > { %v28509_v0 = vmax.f32 %v9202_v39, %v9238_v44  ;;  %9169 = vst.msk [vmem:[#allocation2 + $0x108] sm:$0xff] %vm9135_vm9, %v9133_v5  ;;  %v20602_v20 = vadd.f32 %v9061_v49, %v27915_v55  ;;  %v19899_v47 = vpop.f32.mrb[69].mxu0  ;;  %v15388_v55 = vld [vmem:[%s29720_s2 + $0xc] sm:$0x7]  ;;  %v28628_v5 = vsel %vm1160_vm6, %v9692_v24, %v9694_v43  ;;  %v9698_v39 = vrot.slane %v28485_v53, 2 }
 0x980   : > { %v28634_v44 = vsel %vm1160_vm6, %v9694_v43, %v9696_v13  ;;  %v9700_v49 = vrot.slane %v28497_v19, 2  ;;  %v9913_v24 = vrot.slane %v28401_v1, 3 }
 0x981   : > { %v9134_v50 = vmax.f32 %v20602_v20, 0.0  ;;  %v28514_v60 = vrot.slane %v28509_v0, 1  ;;  %v28640_v20 = vsel %vm1160_vm6, %v9696_v13, %v9698_v39  ;;  %v28643_v47 = vrot.slane %v28509_v0, 2 }
 0x982   : > { %v9915_v13 = vrot.slane %v28413_v11, 3 }
 0x983   : > { %9171 = vst.msk [vmem:[#allocation2 + $0x110] sm:$0x3] %vm9170_vm10, %v9134_v50  ;;  %v28518_v25 = vsel %vm460_vm2, %v9307_v9, %v28514_v60  ;;  %v28616_v9 = vsel %vm1160_vm6, %v9688_v32, %v9690_v14  ;;  %v28648_v50 = vsel %vm1160_vm6, %v9698_v39, %v9700_v49  ;;  %v9911_v32 = vrot.slane %v28389_v42, 3 }
 0x984   : > { %19923 = vmatprep.mubr.msk.f32.mxu1 %vm9135_vm9, %v28518_v25  ;;  %v28684_v14 = vsel %vm1580_vm4, %v9907_v28, %v9909_v6  ;;  %v9917_v39 = vrot.slane %v28425_v35, 3 }
 0x985   : > { %19924 = vmatmul.mubr.msk.f32.gmra.mrb[84].mxu1 %vm9135_vm9, %v28514_v60  ;;  %v28690_v43 = vsel %vm1580_vm4, %v9909_v6, %v9911_v32 }
 0x986   : > { %19928 = vmatprep.mubr.msk.f32.mxu1 %vm9135_vm9, %v28332_v46 }
 0x989   : > { %19929 = vmatmul.mubr.msk.f32.vlgmr.msra.gmra.mrb[70].mxu1 %vm9135_vm9, %v28334_v22 }
 0x98a   : > { %19953 = vmatpush3.msk.msra.mxu1 %vm2419_vm5, %v28357_v59  ;;  %19931 = vmatprep.mubr.msk.f32.mxu1 %vm9135_vm9, %v28344_v51  ;;  %v9674_v59 = vrot.slane %v28334_v22, 2 }
 0x98b   : > { %19978 = vmatprep.subr.msk.mxu1 %vm2419_vm5, %v15388_v55 }
 0x98c   : > { %v9675_v52 = vsel %vm1160_vm6, %v9673_v18, %v9674_v59  ;;  %v28569_v23 = vsel %vm1160_vm6, %v9674_v59, %v9676_v57  ;;  %v9903_v59 = vrot.slane %v28334_v22, 3  ;;  %v9902_v18 = vrot.slane %v28332_v46, 3 }
 0x98d   : > { %19932 = vmatmul.mubr.msk.f32.gmra.mrb[72].mxu1 %vm9135_vm9, %v28365_v62  ;;  %v9905_v57 = vrot.slane %v28344_v51, 3 }
 0x98e   : > { %19934 = vmatprep.mubr.msk.f32.mxu1 %vm9135_vm9, %v28377_v63 }
 0x98f   : > { %v28667_v15 = vsel %vm1580_vm4, %v9903_v59, %v9905_v57  ;;  %v28676_v3 = vsel %vm1580_vm4, %v9905_v57, %v9907_v28  ;;  %v9921_v57 = vrot.slane %v28449_v12, 3  ;;  %v9923_v28 = vrot.slane %v28461_v29, 3 }
 0x991   : > { %19935 = vmatmul.mubr.msk.f32.gmra.mrb[74].mxu1 %vm9135_vm9, %v28389_v42 }
 0x992   : > { %19937 = vmatprep.mubr.msk.f32.mxu1 %vm9135_vm9, %v28401_v1 }
 0x995   : > { %19938 = vmatmul.mubr.msk.f32.gmra.mrb[76].mxu1 %vm9135_vm9, %v28413_v11 }
 0x996   : > { %19940 = vmatprep.mubr.msk.f32.mxu1 %vm9135_vm9, %v28425_v35 }
 0x999   : > { %19941 = vmatmul.mubr.msk.f32.gmra.mrb[78].mxu1 %vm9135_vm9, %v28437_v37 }
 0x99a   : > { %19943 = vmatprep.mubr.msk.f32.mxu1 %vm9135_vm9, %v28449_v12 }
 0x99d   : > { %19944 = vmatmul.mubr.msk.f32.gmra.mrb[80].mxu1 %vm9135_vm9, %v28461_v29 }
 0x99e   : > { %19946 = vmatprep.mubr.msk.f32.mxu1 %vm9135_vm9, %v28473_v58 }
 0x9a1   : > { %19947 = vmatmul.mubr.msk.f32.gmra.mrb[82].mxu1 %vm9135_vm9, %v28485_v53 }
 0x9a2   : > { %19949 = vmatprep.mubr.msk.f32.mxu1 %vm9135_vm9, %v28497_v19 }
 0x9a5   : > { %19950 = vmatmul.mubr.msk.f32.gmra.mrb[84].mxu1 %vm9135_vm9, %v28509_v0 }
 0x9a6   : > { %19954 = vmatprep.mubr.msk.f32.mxu1 %vm9135_vm9, %v9675_v52  ;;  %v9904_v52 = vsel %vm1580_vm4, %v9902_v18, %v9903_v59  ;;  %v9919_v59 = vrot.slane %v28437_v37, 3  ;;  %v28708_v18 = vsel %vm1580_vm4, %v9915_v13, %v9917_v39 }
 0x9a7   : > { %30944 = vst [vmem:[#allocation163_spill] sm:$0xff] %v28708_v18 }
 0x9a8   : > { %v28720_v6 = vsel %vm1580_vm4, %v9919_v59, %v9921_v57 }
 0x9a9   : > { %19955 = vmatmul.mubr.msk.f32.vlgmr.msra.gmra.mrb[70].mxu1 %vm9135_vm9, %v28569_v23  ;;  %30946 = vst [vmem:[#allocation167_spill] sm:$0xff] %v28720_v6 }
 0x9aa   : > { %19979 = vmatpush3.msk.msra.mxu1 %vm2419_vm5, %v15388_v55  ;;  %19957 = vmatprep.mubr.msk.f32.mxu1 %vm9135_vm9, %v28578_v16  ;;  %v28654_v55 = vsel %vm1160_vm6, %v9700_v49, %v28643_v47  ;;  %v28702_v49 = vsel %vm1580_vm4, %v9913_v24, %v9915_v13  ;;  %v9927_v13 = vrot.slane %v28485_v53, 3 }
 0x9ab   : > { %20004 = vmatprep.subr.msk.mxu1 %vm2419_vm5, %v15406_v33  ;;  %30943 = vst [vmem:[#allocation161_spill] sm:$0xff] %v28702_v49 }
 0x9ad   : > { %19958 = vmatmul.mubr.msk.f32.gmra.mrb[72].mxu1 %vm9135_vm9, %v28586_v56 }
 0x9ae   : > { %19960 = vmatprep.mubr.msk.f32.mxu1 %vm9135_vm9, %v28592_v48 }
 0x9b1   : > { %19961 = vmatmul.mubr.msk.f32.gmra.mrb[74].mxu1 %vm9135_vm9, %v28598_v21 }
 0x9b2   : > { %19963 = vmatprep.mubr.msk.f32.mxu1 %vm9135_vm9, %v28604_v38 }
 0x9b5   : > { %19964 = vmatmul.mubr.msk.f32.gmra.mrb[76].mxu1 %vm9135_vm9, %v28610_v27 }
 0x9b6   : > { %19966 = vmatprep.mubr.msk.f32.mxu1 %vm9135_vm9, %v28616_v9 }
 0x9b9   : > { %19967 = vmatmul.mubr.msk.f32.gmra.mrb[78].mxu1 %vm9135_vm9, %v28622_v7 }
 0x9ba   : > { %19969 = vmatprep.mubr.msk.f32.mxu1 %vm9135_vm9, %v28628_v5 }
 0x9bd   : > { %19970 = vmatmul.mubr.msk.f32.gmra.mrb[80].mxu1 %vm9135_vm9, %v28634_v44 }
 0x9be   : > { %19972 = vmatprep.mubr.msk.f32.mxu1 %vm9135_vm9, %v28640_v20 }
 0x9c1   : > { %19973 = vmatmul.mubr.msk.f32.gmra.mrb[82].mxu1 %vm9135_vm9, %v28648_v50 }
 0x9c2   : > { %19975 = vmatprep.mubr.msk.f32.mxu1 %vm9135_vm9, %v28654_v55 }
 0x9c5   : > { %19976 = vmatmul.mubr.msk.f32.gmra.mrb[84].mxu1 %vm9135_vm9, %v28643_v47 }
 0x9c6   : > { %19980 = vmatprep.mubr.msk.f32.mxu1 %vm9135_vm9, %v9904_v52  ;;  %v28714_v52 = vsel %vm1580_vm4, %v9917_v39, %v9919_v59 }
 0x9c7   : > { %30945 = vst [vmem:[#allocation165_spill] sm:$0xff] %v28714_v52 }
 0x9c9   : > { %19981 = vmatmul.mubr.msk.f32.vlgmr.msra.gmra.mrb[70].mxu1 %vm9135_vm9, %v28667_v15 }
 0x9ca   : > { %20005 = vmatpush3.msk.msra.mxu1 %vm2419_vm5, %v15406_v33  ;;  %19983 = vmatprep.mubr.msk.f32.mxu1 %vm9135_vm9, %v28676_v3  ;;  %v28696_v33 = vsel %vm1580_vm4, %v9911_v32, %v9913_v24  ;;  %v9925_v32 = vrot.slane %v28473_v58, 3  ;;  %v28726_v24 = vsel %vm1580_vm4, %v9921_v57, %v9923_v28  ;;  %v28746_v57 = vsel %vm1580_vm4, %v9927_v13, %v9929_v2 }
 0x9cb   : > { %20030 = vmatprep.subr.msk.mxu1 %vm2419_vm5, %v15424_v31  ;;  %30947 = vst [vmem:[#allocation169_spill] sm:$0xff] %v28726_v24  ;;  %30951 = vst [vmem:[#allocation177_spill] sm:$0xff] %v28746_v57 }
 0x9cc   : > { %v28732_v39 = vsel %vm1580_vm4, %v9923_v28, %v9925_v32  ;;  %v28738_v59 = vsel %vm1580_vm4, %v9925_v32, %v9927_v13  ;;  %v10131_v32 = vrot.slane %v28332_v46, 4 }
 0x9cd   : > { %19984 = vmatmul.mubr.msk.f32.gmra.mrb[72].mxu1 %vm9135_vm9, %v28684_v14  ;;  %30948 = vst [vmem:[#allocation171_spill] sm:$0xff] %v28732_v39  ;;  %30949 = vst [vmem:[#allocation173_spill] sm:$0xff] %v28738_v59 }
 0x9ce   : > { %19986 = vmatprep.mubr.msk.f32.mxu1 %vm9135_vm9, %v28690_v43 }
 0x9d1   : > { %19987 = vmatmul.mubr.msk.f32.gmra.mrb[74].mxu1 %vm9135_vm9, %v28696_v33 }
 0x9d2   : > { %19989 = vmatprep.mubr.msk.f32.mxu1 %vm9135_vm9, %v28702_v49  ;;  %v10826_v49 = vrot.slane %v28344_v51, 7 }
 0x9d5   : > { %19990 = vmatmul.mubr.msk.f32.gmra.mrb[76].mxu1 %vm9135_vm9, %v28708_v18 }
 0x9d6   : > { %19992 = vmatprep.mubr.msk.f32.mxu1 %vm9135_vm9, %v28714_v52  ;;  %v9240_v52 = vld [vmem:[#allocation2 + $0x101] ss:$2 sm:$0xff] }
 0x9d9   : > { %19993 = vmatmul.mubr.msk.f32.gmra.mrb[78].mxu1 %vm9135_vm9, %v28720_v6  ;;  %v28741_v6 = vrot.slane %v28509_v0, 3 }
 0x9da   : > { %19995 = vmatprep.mubr.msk.f32.mxu1 %vm9135_vm9, %v28726_v24  ;;  %v10134_v24 = vrot.slane %v28344_v51, 4 }
 0x9db   : > { %30950 = vst [vmem:[#allocation175_spill] sm:$0xff] %v28741_v6  ;;  %v28752_v28 = vsel %vm1580_vm4, %v9929_v2, %v28741_v6 }
 0x9dc   : > { %30952 = vst [vmem:[#allocation179_spill] sm:$0xff] %v28752_v28 }
 0x9dd   : > { %19996 = vmatmul.mubr.msk.f32.gmra.mrb[80].mxu1 %vm9135_vm9, %v28732_v39  ;;  %v10132_v39 = vrot.slane %v28334_v22, 4 }
 0x9de   : > { %19998 = vmatprep.mubr.msk.f32.mxu1 %vm9135_vm9, %v28738_v59  ;;  %v10138_v59 = vrot.slane %v28377_v63, 4 }
 0x9df   : > { %v10133_v13 = vsel %vm601_vm0, %v10131_v32, %v10132_v39  ;;  %v28765_v2 = vsel %vm601_vm0, %v10132_v39, %v10134_v24  ;;  %v10140_v32 = vrot.slane %v28389_v42, 4 }
 0x9e0   : > { %30953 = vst [vmem:[#allocation184_spill] sm:$0xff] %v28765_v2 }
 0x9e1   : > { %19999 = vmatmul.mubr.msk.f32.gmra.mrb[82].mxu1 %vm9135_vm9, %v28746_v57  ;;  %v10136_v57 = vrot.slane %v28365_v62, 4 }
 0x9e2   : > { %20001 = vmatprep.mubr.msk.f32.mxu1 %vm9135_vm9, %v28752_v28  ;;  %v15442_v28 = vld [vmem:[%s29720_s2 + $0x18] sm:$0x7] }
 0x9e3   : > { %v28782_v39 = vsel %vm601_vm0, %v10136_v57, %v10138_v59 }
 0x9e4   : > { %30955 = vst [vmem:[#allocation10_spill] sm:$0xff] %v28782_v39 }
 0x9e5   : > { %20002 = vmatmul.mubr.msk.f32.gmra.mrb[84].mxu1 %vm9135_vm9, %v28741_v6  ;;  %v28774_v6 = vsel %vm601_vm0, %v10134_v24, %v10136_v57  ;;  %v28788_v24 = vsel %vm601_vm0, %v10138_v59, %v10140_v32 }
 0x9e6   : > { %20006 = vmatprep.mubr.msk.f32.mxu1 %vm9135_vm9, %v10133_v13  ;;  %30954 = vst [vmem:[#allocation183_spill] sm:$0xff] %v28774_v6  ;;  %v10142_v13 = vrot.slane %v28401_v1, 4  ;;  %30956 = vst [vmem:[#allocation12_spill] sm:$0xff] %v28788_v24 }
 0x9e9   : > { %20007 = vmatmul.mubr.msk.f32.vlgmr.msra.gmra.mrb[70].mxu1 %vm9135_vm9, %v28765_v2  ;;  %v10144_v2 = vrot.slane %v28413_v11, 4 }
 0x9ea   : > { %20031 = vmatpush3.msk.msra.mxu1 %vm2419_vm5, %v15424_v31  ;;  %20009 = vmatprep.mubr.msk.f32.mxu1 %vm9135_vm9, %v28774_v6  ;;  %v28794_v31 = vsel %vm601_vm0, %v10140_v32, %v10142_v13  ;;  %v10146_v6 = vrot.slane %v28425_v35, 4 }
 0x9eb   : > { %20056 = vmatprep.subr.msk.mxu1 %vm2419_vm5, %v15442_v28  ;;  %30957 = vst [vmem:[#allocation14_spill] sm:$0xff] %v28794_v31  ;;  %v28800_v57 = vsel %vm601_vm0, %v10142_v13, %v10144_v2 }
 0x9ec   : > { %30958 = vst [vmem:[#allocation16_spill] sm:$0xff] %v28800_v57  ;;  %v28806_v59 = vsel %vm601_vm0, %v10144_v2, %v10146_v6 }
 0x9ed   : > { %20010 = vmatmul.mubr.msk.f32.gmra.mrb[72].mxu1 %vm9135_vm9, %v28782_v39  ;;  %v10148_v39 = vrot.slane %v28437_v37, 4  ;;  %30959 = vst [vmem:[#allocation18_spill] sm:$0xff] %v28806_v59 }
 0x9ee   : > { %20012 = vmatprep.mubr.msk.f32.mxu1 %vm9135_vm9, %v28788_v24  ;;  %v10150_v24 = vrot.slane %v28449_v12, 4 }
 0x9ef   : > { %v28812_v32 = vsel %vm601_vm0, %v10146_v6, %v10148_v39 }
 0x9f0   : > { %30960 = vst [vmem:[#allocation20_spill] sm:$0xff] %v28812_v32  ;;  %v28818_v13 = vsel %vm601_vm0, %v10148_v39, %v10150_v24 }
 0x9f1   : > { %20013 = vmatmul.mubr.msk.f32.gmra.mrb[74].mxu1 %vm9135_vm9, %v28794_v31  ;;  %v10152_v31 = vrot.slane %v28461_v29, 4  ;;  %30961 = vst [vmem:[#allocation22_spill] sm:$0xff] %v28818_v13 }
 0x9f2   : > { %20015 = vmatprep.mubr.msk.f32.mxu1 %vm9135_vm9, %v28800_v57  ;;  %v10154_v57 = vrot.slane %v28473_v58, 4 }
 0x9f3   : > { %v28824_v2 = vsel %vm601_vm0, %v10150_v24, %v10152_v31 }
 0x9f4   : > { %30962 = vst [vmem:[#allocation24_spill] sm:$0xff] %v28824_v2  ;;  %v28830_v6 = vsel %vm601_vm0, %v10152_v31, %v10154_v57 }
 0x9f5   : > { %20016 = vmatmul.mubr.msk.f32.gmra.mrb[76].mxu1 %vm9135_vm9, %v28806_v59  ;;  %v10156_v59 = vrot.slane %v28485_v53, 4  ;;  %30963 = vst [vmem:[#allocation26_spill] sm:$0xff] %v28830_v6 }
 0x9f6   : > { %20018 = vmatprep.mubr.msk.f32.mxu1 %vm9135_vm9, %v28812_v32  ;;  %v10158_v32 = vrot.slane %v28497_v19, 4 }
 0x9f7   : > { %v28836_v39 = vsel %vm601_vm0, %v10154_v57, %v10156_v59  ;;  %v10361_v57 = vrot.slane %v28332_v46, 5 }
 0x9f8   : > { %30964 = vst [vmem:[#allocation28_spill] sm:$0xff] %v28836_v39  ;;  %v28844_v24 = vsel %vm601_vm0, %v10156_v59, %v10158_v32 }
 0x9f9   : > { %20019 = vmatmul.mubr.msk.f32.gmra.mrb[78].mxu1 %vm9135_vm9, %v28818_v13  ;;  %v28839_v13 = vrot.slane %v28509_v0, 4  ;;  %30966 = vst [vmem:[#allocation32_spill] sm:$0xff] %v28844_v24 }
 0x9fa   : > { %20021 = vmatprep.mubr.msk.f32.mxu1 %vm9135_vm9, %v28824_v2  ;;  %v10364_v2 = vrot.slane %v28344_v51, 5 }
 0x9fb   : > { %30965 = vst [vmem:[#allocation30_spill] sm:$0xff] %v28839_v13  ;;  %v28850_v31 = vsel %vm601_vm0, %v10158_v32, %v28839_v13 }
 0x9fc   : > { %30967 = vst [vmem:[#allocation34_spill] sm:$0xff] %v28850_v31 }
 0x9fd   : > { %20022 = vmatmul.mubr.msk.f32.gmra.mrb[80].mxu1 %vm9135_vm9, %v28830_v6  ;;  %v10362_v6 = vrot.slane %v28334_v22, 5 }
 0x9fe   : > { %20024 = vmatprep.mubr.msk.f32.mxu1 %vm9135_vm9, %v28836_v39  ;;  %v10368_v39 = vrot.slane %v28377_v63, 5 }
 0x9ff   : > { %v10363_v59 = vsel %vm2419_vm5, %v10361_v57, %v10362_v6  ;;  %v28863_v32 = vsel %vm2419_vm5, %v10362_v6, %v10364_v2  ;;  %v10370_v57 = vrot.slane %v28389_v42, 5 }
 0xa00   : > { %30968 = vst [vmem:[#allocation36_spill] sm:$0xff] %v28863_v32 }
 0xa01   : > { %20025 = vmatmul.mubr.msk.f32.gmra.mrb[82].mxu1 %vm9135_vm9, %v28844_v24  ;;  %v10366_v24 = vrot.slane %v28365_v62, 5 }
 0xa02   : > { %20027 = vmatprep.mubr.msk.f32.mxu1 %vm9135_vm9, %v28850_v31  ;;  %v15460_v31 = vld [vmem:[%s29720_s2 + $0x1c] sm:$0x7] }
 0xa03   : > { %v28880_v6 = vsel %vm2419_vm5, %v10366_v24, %v10368_v39 }
 0xa04   : > { %30970 = vst [vmem:[#allocation38_spill] sm:$0xff] %v28880_v6 }
 0xa05   : > { %20028 = vmatmul.mubr.msk.f32.gmra.mrb[84].mxu1 %vm9135_vm9, %v28839_v13  ;;  %v28872_v13 = vsel %vm2419_vm5, %v10364_v2, %v10366_v24  ;;  %v28886_v2 = vsel %vm2419_vm5, %v10368_v39, %v10370_v57 }
 0xa06   : > { %20032 = vmatprep.mubr.msk.f32.mxu1 %vm9135_vm9, %v10363_v59  ;;  %30969 = vst [vmem:[#allocation252_spill] sm:$0xff] %v28872_v13  ;;  %v10372_v59 = vrot.slane %v28401_v1, 5  ;;  %30971 = vst [vmem:[#allocation253_spill] sm:$0xff] %v28886_v2 }
 0xa09   : > { %20033 = vmatmul.mubr.msk.f32.vlgmr.msra.gmra.mrb[70].mxu1 %vm9135_vm9, %v28863_v32  ;;  %v10374_v32 = vrot.slane %v28413_v11, 5 }
 0xa0a   : > { %20057 = vmatpush3.msk.msra.mxu1 %vm2419_vm5, %v15442_v28  ;;  %20035 = vmatprep.mubr.msk.f32.mxu1 %vm9135_vm9, %v28872_v13  ;;  %v28892_v28 = vsel %vm2419_vm5, %v10370_v57, %v10372_v59  ;;  %v10376_v13 = vrot.slane %v28425_v35, 5 }
 0xa0b   : > { %20082 = vmatprep.subr.msk.mxu1 %vm2419_vm5, %v15460_v31  ;;  %30972 = vst [vmem:[#allocation40_spill] sm:$0xff] %v28892_v28  ;;  %v28898_v24 = vsel %vm2419_vm5, %v10372_v59, %v10374_v32 }
 0xa0c   : > { %30973 = vst [vmem:[#allocation254_spill] sm:$0xff] %v28898_v24  ;;  %v28904_v39 = vsel %vm2419_vm5, %v10374_v32, %v10376_v13  ;;  %v9204_v32 = vld [vmem:[#allocation2 + $0x100] ss:$2 sm:$0xff] }
 0xa0d   : > { %20036 = vmatmul.mubr.msk.f32.gmra.mrb[72].mxu1 %vm9135_vm9, %v28880_v6  ;;  %v10378_v6 = vrot.slane %v28437_v37, 5  ;;  %30974 = vst [vmem:[#allocation42_spill] sm:$0xff] %v28904_v39  ;;  %v28927_v18 = vmax.f32 %v9204_v32, %v9240_v52  ;;  %v10593_v32 = vrot.slane %v28334_v22, 6 }
 0xa0e   : > { %20038 = vmatprep.mubr.msk.f32.mxu1 %vm9135_vm9, %v28886_v2  ;;  %v10380_v2 = vrot.slane %v28449_v12, 5 }
 0xa0f   : > { %v28910_v57 = vsel %vm2419_vm5, %v10376_v13, %v10378_v6  ;;  %v10386_v13 = vrot.slane %v28485_v53, 5  ;;  %v30211_v52 = vrot.slane %v28927_v18, 5 }
 0xa10   : > { %30975 = vst [vmem:[#allocation255_spill] sm:$0xff] %v28910_v57  ;;  %v28916_v59 = vsel %vm2419_vm5, %v10378_v6, %v10380_v2 }
 0xa11   : > { %20039 = vmatmul.mubr.msk.f32.gmra.mrb[74].mxu1 %vm9135_vm9, %v28892_v28  ;;  %v10382_v28 = vrot.slane %v28461_v29, 5  ;;  %30976 = vst [vmem:[#allocation44_spill] sm:$0xff] %v28916_v59 }
 0xa12   : > { %20041 = vmatprep.mubr.msk.f32.mxu1 %vm9135_vm9, %v28898_v24  ;;  %v10384_v24 = vrot.slane %v28473_v58, 5 }
 0xa14   : > { %v28930_v6 = vsel %vm2419_vm5, %v10382_v28, %v10384_v24 }
 0xa15   : > { %20042 = vmatmul.mubr.msk.f32.gmra.mrb[76].mxu1 %vm9135_vm9, %v28904_v39  ;;  %v28922_v39 = vsel %vm2419_vm5, %v10380_v2, %v10382_v28  ;;  %30978 = vst [vmem:[#allocation46_spill] sm:$0xff] %v28930_v6  ;;  %v10390_v2 = vrot.slane %v28509_v0, 5 }
 0xa16   : > { %20044 = vmatprep.mubr.msk.f32.mxu1 %vm9135_vm9, %v28910_v57  ;;  %30977 = vst [vmem:[#allocation256_spill] sm:$0xff] %v28922_v39  ;;  %v10388_v57 = vrot.slane %v28497_v19, 5 }
 0xa18   : > { %v28948_v28 = vsel %vm2419_vm5, %v10388_v57, %v10390_v2 }
 0xa19   : > { %20045 = vmatmul.mubr.msk.f32.gmra.mrb[78].mxu1 %vm9135_vm9, %v28916_v59  ;;  %v28936_v59 = vsel %vm2419_vm5, %v10384_v24, %v10386_v13  ;;  %30981 = vst [vmem:[#allocation258_spill] sm:$0xff] %v28948_v28  ;;  %v10592_v24 = vrot.slane %v28332_v46, 6 }
 0xa1a   : > { %20047 = vmatprep.mubr.msk.f32.mxu1 %vm9135_vm9, %v28922_v39  ;;  %30979 = vst [vmem:[#allocation257_spill] sm:$0xff] %v28936_v59  ;;  %v28942_v39 = vsel %vm2419_vm5, %v10386_v13, %v10388_v57  ;;  %v28957_v13 = vsel %vm2419_vm5, %v10390_v2, %v30211_v52  ;;  %v15478_v2 = vld [vmem:[%s29720_s2 + $0x20] sm:$0x7] }
 0xa1b   : > { %30980 = vst [vmem:[#allocation48_spill] sm:$0xff] %v28942_v39  ;;  %30982 = vst [vmem:[#allocation50_spill] sm:$0xff] %v28957_v13  ;;  %v10594_v57 = vsel %vm2839_vm7, %v10592_v24, %v10593_v32  ;;  %v10603_v24 = vrot.slane %v28401_v1, 6 }
 0xa1d   : > { %20048 = vmatmul.mubr.msk.f32.gmra.mrb[80].mxu1 %vm9135_vm9, %v28930_v6  ;;  %v10599_v6 = vrot.slane %v28377_v63, 6 }
 0xa1e   : > { %20050 = vmatprep.mubr.msk.f32.mxu1 %vm9135_vm9, %v28936_v59  ;;  %v10595_v59 = vrot.slane %v28344_v51, 6 }
 0xa21   : > { %20051 = vmatmul.mubr.msk.f32.gmra.mrb[82].mxu1 %vm9135_vm9, %v28942_v39  ;;  %v10597_v39 = vrot.slane %v28365_v62, 6 }
 0xa22   : > { %20053 = vmatprep.mubr.msk.f32.mxu1 %vm9135_vm9, %v28948_v28  ;;  %v10596_v28 = vsel %vm2839_vm7, %v10593_v32, %v10595_v59 }
 0xa23   : > { %v10598_v52 = vsel %vm2839_vm7, %v10595_v59, %v10597_v39  ;;  %v10600_v32 = vsel %vm2839_vm7, %v10597_v39, %v10599_v6  ;;  %v10609_v39 = vrot.slane %v28437_v37, 6 }
 0xa25   : > { %20054 = vmatmul.mubr.msk.f32.gmra.mrb[84].mxu1 %vm9135_vm9, %v28957_v13  ;;  %v10601_v13 = vrot.slane %v28389_v42, 6 }
 0xa26   : > { %20058 = vmatprep.mubr.msk.f32.mxu1 %vm9135_vm9, %v10594_v57 }
 0xa27   : > { %v10602_v57 = vsel %vm2839_vm7, %v10599_v6, %v10601_v13  ;;  %v10604_v59 = vsel %vm2839_vm7, %v10601_v13, %v10603_v24  ;;  %v10611_v6 = vrot.slane %v28449_v12, 6  ;;  %v10613_v13 = vrot.slane %v28461_v29, 6 }
 0xa29   : > { %20059 = vmatmul.mubr.msk.f32.vlgmr.msra.gmra.mrb[70].mxu1 %vm9135_vm9, %v10596_v28  ;;  %v10605_v28 = vrot.slane %v28413_v11, 6 }
 0xa2a   : > { %20083 = vmatpush3.msk.msra.mxu1 %vm2419_vm5, %v15460_v31  ;;  %20061 = vmatprep.mubr.msk.f32.mxu1 %vm9135_vm9, %v10598_v52  ;;  %v10607_v31 = vrot.slane %v28425_v35, 6 }
 0xa2b   : > { %20108 = vmatprep.subr.msk.mxu1 %vm2419_vm5, %v15478_v2  ;;  %v10606_v52 = vsel %vm2839_vm7, %v10603_v24, %v10605_v28  ;;  %v10615_v24 = vrot.slane %v28473_v58, 6 }
 0xa2d   : > { %20062 = vmatmul.mubr.msk.f32.gmra.mrb[72].mxu1 %vm9135_vm9, %v10600_v32  ;;  %v10608_v32 = vsel %vm2839_vm7, %v10605_v28, %v10607_v31  ;;  %v10617_v28 = vrot.slane %v28485_v53, 6 }
 0xa2e   : > { %20064 = vmatprep.mubr.msk.f32.mxu1 %vm9135_vm9, %v10602_v57  ;;  %v10610_v57 = vsel %vm2839_vm7, %v10607_v31, %v10609_v39  ;;  %v10619_v31 = vrot.slane %v28497_v19, 6 }
 0xa31   : > { %20065 = vmatmul.mubr.msk.f32.gmra.mrb[74].mxu1 %vm9135_vm9, %v10604_v59  ;;  %v10612_v59 = vsel %vm2839_vm7, %v10609_v39, %v10611_v6  ;;  %v10621_v39 = vrot.slane %v28509_v0, 6 }
 0xa32   : > { %20067 = vmatprep.mubr.msk.f32.mxu1 %vm9135_vm9, %v10606_v52  ;;  %v10614_v52 = vsel %vm2839_vm7, %v10611_v6, %v10613_v13  ;;  %v10623_v6 = vrot.slane %v28927_v18, 6 }
 0xa35   : > { %20068 = vmatmul.mubr.msk.f32.gmra.mrb[76].mxu1 %vm9135_vm9, %v10608_v32  ;;  %v10616_v32 = vsel %vm2839_vm7, %v10613_v13, %v10615_v24  ;;  %v10824_v13 = vrot.slane %v28334_v22, 7 }
 0xa36   : > { %20070 = vmatprep.mubr.msk.f32.mxu1 %vm9135_vm9, %v10610_v57  ;;  %v10618_v57 = vsel %vm2839_vm7, %v10615_v24, %v10617_v28  ;;  %v10624_v24 = vsel %vm2839_vm7, %v10621_v39, %v10623_v6  ;;  %v10832_v6 = vrot.slane %v28389_v42, 7 }
 0xa39   : > { %20071 = vmatmul.mubr.msk.f32.gmra.mrb[78].mxu1 %vm9135_vm9, %v10612_v59  ;;  %v10620_v59 = vsel %vm2839_vm7, %v10617_v28, %v10619_v31 }
 0xa3a   : > { %20073 = vmatprep.mubr.msk.f32.mxu1 %vm9135_vm9, %v10614_v52  ;;  %v10622_v52 = vsel %vm2839_vm7, %v10619_v31, %v10621_v39  ;;  %v10827_v31 = vsel %vm3260_vm8, %v10824_v13, %v10826_v49 }
 0xa3d   : > { %20074 = vmatmul.mubr.msk.f32.gmra.mrb[80].mxu1 %vm9135_vm9, %v10616_v32  ;;  %v10823_v32 = vrot.slane %v28332_v46, 7  ;;  %v15496_v46 = vld [vmem:[%s29720_s2 + $0x24] sm:$0x7] }
 0xa3e   : > { %20076 = vmatprep.mubr.msk.f32.mxu1 %vm9135_vm9, %v10618_v57  ;;  %v10828_v57 = vrot.slane %v28365_v62, 7 }
 0xa3f   : > { %v10825_v28 = vsel %vm3260_vm8, %v10823_v32, %v10824_v13  ;;  %v10834_v13 = vrot.slane %v28401_v1, 7 }
 0xa40   : > { %v10829_v39 = vsel %vm3260_vm8, %v10826_v49, %v10828_v57 }
 0xa41   : > { %20077 = vmatmul.mubr.msk.f32.gmra.mrb[82].mxu1 %vm9135_vm9, %v10620_v59  ;;  %v10830_v59 = vrot.slane %v28377_v63, 7  ;;  %v10835_v49 = vsel %vm3260_vm8, %v10832_v6, %v10834_v13 }
 0xa42   : > { %20079 = vmatprep.mubr.msk.f32.mxu1 %vm9135_vm9, %v10622_v52 }
 0xa43   : > { %v10831_v52 = vsel %vm3260_vm8, %v10828_v57, %v10830_v59  ;;  %v10833_v32 = vsel %vm3260_vm8, %v10830_v59, %v10832_v6  ;;  %v10840_v57 = vrot.slane %v28437_v37, 7  ;;  %v10842_v59 = vrot.slane %v28449_v12, 7 }
 0xa44   : > { %v10844_v6 = vrot.slane %v28461_v29, 7 }
 0xa45   : > { %20080 = vmatmul.mubr.msk.f32.gmra.mrb[84].mxu1 %vm9135_vm9, %v10624_v24  ;;  %v10836_v24 = vrot.slane %v28413_v11, 7 }
 0xa46   : > { %20084 = vmatprep.mubr.msk.f32.mxu1 %vm9135_vm9, %v10825_v28 }
 0xa47   : > { %v10837_v28 = vsel %vm3260_vm8, %v10834_v13, %v10836_v24  ;;  %v10846_v13 = vrot.slane %v28473_v58, 7 }
 0xa49   : > { %20085 = vmatmul.mubr.msk.f32.vlgmr.msra.gmra.mrb[70].mxu1 %vm9135_vm9, %v10827_v31 }
 0xa4a   : > { %20109 = vmatpush3.msk.msra.mxu1 %vm2419_vm5, %v15478_v2  ;;  %20087 = vmatprep.mubr.msk.f32.mxu1 %vm9135_vm9, %v10829_v39  ;;  %v10838_v2 = vrot.slane %v28425_v35, 7 }
 0xa4b   : > { %20134 = vmatprep.subr.msk.mxu1 %vm2419_vm5, %v15496_v46 }
 0xa4c   : > { %v10839_v31 = vsel %vm3260_vm8, %v10836_v24, %v10838_v2  ;;  %v10841_v39 = vsel %vm3260_vm8, %v10838_v2, %v10840_v57  ;;  %v10848_v24 = vrot.slane %v28485_v53, 7  ;;  %v10850_v2 = vrot.slane %v28497_v19, 7 }
 0xa4d   : > { %20088 = vmatmul.mubr.msk.f32.gmra.mrb[72].mxu1 %vm9135_vm9, %v10831_v52  ;;  %v10843_v52 = vsel %vm3260_vm8, %v10840_v57, %v10842_v59  ;;  %v10852_v57 = vrot.slane %v28509_v0, 7 }
 0xa4e   : > { %20090 = vmatprep.mubr.msk.f32.mxu1 %vm9135_vm9, %v10833_v32  ;;  %v10845_v32 = vsel %vm3260_vm8, %v10842_v59, %v10844_v6  ;;  %v10854_v59 = vrot.slane %v28927_v18, 7 }
 0xa51   : > { %20091 = vmatmul.mubr.msk.f32.gmra.mrb[74].mxu1 %vm9135_vm9, %v10835_v49  ;;  %v10847_v49 = vsel %vm3260_vm8, %v10844_v6, %v10846_v13  ;;  %v10855_v6 = vsel %vm3260_vm8, %v10852_v57, %v10854_v59 }
 0xa52   : > { %20093 = vmatprep.mubr.msk.f32.mxu1 %vm9135_vm9, %v10837_v28  ;;  %v10849_v28 = vsel %vm3260_vm8, %v10846_v13, %v10848_v24  ;;  %v31020_v13 = vld [vmem:[#allocation48_spill] sm:$0xff] }
 0xa55   : > { %20094 = vmatmul.mubr.msk.f32.gmra.mrb[76].mxu1 %vm9135_vm9, %v10839_v31  ;;  %v10851_v31 = vsel %vm3260_vm8, %v10848_v24, %v10850_v2  ;;  %v31021_v24 = vld [vmem:[#allocation258_spill] sm:$0xff] }
 0xa56   : > { %20096 = vmatprep.mubr.msk.f32.mxu1 %vm9135_vm9, %v10841_v39  ;;  %v10853_v39 = vsel %vm3260_vm8, %v10850_v2, %v10852_v57  ;;  %v31023_v2 = vrot.slane %v28927_v18, 5  ;;  %v15586_v57 = vld [vmem:[%s29721_s3 + $0x10] sm:$0xff] }
 0xa59   : > { %20097 = vmatmul.mubr.msk.f32.gmra.mrb[78].mxu1 %vm9135_vm9, %v10843_v52  ;;  %v15514_v52 = vld [vmem:[%s29720_s2 + $0x28] sm:$0x7] }
 0xa5a   : > { %20099 = vmatprep.mubr.msk.f32.mxu1 %vm9135_vm9, %v10845_v32 }
 0xa5d   : > { %20100 = vmatmul.mubr.msk.f32.gmra.mrb[80].mxu1 %vm9135_vm9, %v10847_v49  ;;  %v31022_v49 = vld [vmem:[#allocation50_spill] sm:$0xff] }
 0xa5e   : > { %20102 = vmatprep.mubr.msk.f32.mxu1 %vm9135_vm9, %v10849_v28 }
 0xa61   : > { %20103 = vmatmul.mubr.msk.f32.gmra.mrb[82].mxu1 %vm9135_vm9, %v10851_v31  ;;  %v15587_v31 = vld [vmem:[%s29721_s3 + $0x18] sm:$0x3] }
 0xa62   : > { %20105 = vmatprep.mubr.msk.f32.mxu1 %vm9135_vm9, %v10853_v39  ;;  %v20461_v59 = vpack.c.bf16 %v15587_v31, %v15586_v57 }
 0xa65   : > { %20106 = vmatmul.mubr.msk.f32.gmra.mrb[84].mxu1 %vm9135_vm9, %v10855_v6  ;;  %v12153_v6 = vld [vmem:[%s29721_s3 + $0x8] sm:$0x3] }
 0xa66   : > { %20110 = vmatprep.mubr.msk.f32.mxu1 %vm9135_vm9, %v28334_v22  ;;  %v15532_v22 = vld [vmem:[%s29720_s2 + $0x2c] sm:$0x7] }
 0xa69   : > { %20111 = vmatmul.mubr.msk.f32.vlgmr.msra.gmra.mrb[70].mxu1 %vm9135_vm9, %v28344_v51  ;;  %v11222_v51 = vrot.slane %v28927_v18, 1 }
 0xa6a   : > { %20135 = vmatpush3.msk.msra.mxu1 %vm2419_vm5, %v15496_v46  ;;  %20113 = vmatprep.mubr.msk.f32.mxu1 %vm9135_vm9, %v28365_v62  ;;  %v15550_v62 = vld [vmem:[%s29720_s2 + $0x30] sm:$0x7]  ;;  %v31019_v46 = vld [vmem:[#allocation257_spill] sm:$0xff] }
 0xa6b   : > { %20160 = vmatprep.subr.msk.mxu1 %vm2419_vm5, %v15514_v52 }
 0xa6d   : > { %20114 = vmatmul.mubr.msk.f32.gmra.mrb[72].mxu1 %vm9135_vm9, %v28377_v63 }
 0xa6e   : > { %20116 = vmatprep.mubr.msk.f32.mxu1 %vm9135_vm9, %v28389_v42  ;;  %v30983_v42 = vld [vmem:[#allocation161_spill] sm:$0xff] }
 0xa71   : > { %20117 = vmatmul.mubr.msk.f32.gmra.mrb[74].mxu1 %vm9135_vm9, %v28401_v1  ;;  %v30985_v1 = vld [vmem:[#allocation165_spill] sm:$0xff] }
 0xa72   : > { %20119 = vmatprep.mubr.msk.f32.mxu1 %vm9135_vm9, %v28413_v11  ;;  %v30987_v11 = vld [vmem:[#allocation169_spill] sm:$0xff] }
 0xa75   : > { %20120 = vmatmul.mubr.msk.f32.gmra.mrb[76].mxu1 %vm9135_vm9, %v28425_v35  ;;  %v30989_v35 = vld [vmem:[#allocation173_spill] sm:$0xff] }
 0xa76   : > { %20122 = vmatprep.mubr.msk.f32.mxu1 %vm9135_vm9, %v28437_v37  ;;  %v30990_v37 = vld [vmem:[#allocation177_spill] sm:$0xff] }
 0xa79   : > { %20123 = vmatmul.mubr.msk.f32.gmra.mrb[78].mxu1 %vm9135_vm9, %v28449_v12  ;;  %v30992_v12 = vld [vmem:[#allocation175_spill] sm:$0xff] }
 0xa7a   : > { %20125 = vmatprep.mubr.msk.f32.mxu1 %vm9135_vm9, %v28461_v29  ;;  %v30993_v29 = vld [vmem:[#allocation184_spill] sm:$0xff] }
 0xa7d   : > { %20126 = vmatmul.mubr.msk.f32.gmra.mrb[80].mxu1 %vm9135_vm9, %v28473_v58  ;;  %v30995_v58 = vld [vmem:[#allocation10_spill] sm:$0xff] }
 0xa7e   : > { %20128 = vmatprep.mubr.msk.f32.mxu1 %vm9135_vm9, %v28485_v53  ;;  %v30997_v53 = vld [vmem:[#allocation14_spill] sm:$0xff] }
 0xa81   : > { %20129 = vmatmul.mubr.msk.f32.gmra.mrb[82].mxu1 %vm9135_vm9, %v28497_v19  ;;  %v30999_v19 = vld [vmem:[#allocation18_spill] sm:$0xff] }
 0xa82   : > { %20131 = vmatprep.mubr.msk.f32.mxu1 %vm9135_vm9, %v28509_v0  ;;  %v31001_v0 = vld [vmem:[#allocation22_spill] sm:$0xff] }
 0xa85   : > { %20132 = vmatmul.mubr.msk.f32.gmra.mrb[84].mxu1 %vm9135_vm9, %v28927_v18 }
 0xa86   : > { %20136 = vmatprep.mubr.msk.f32.mxu1 %vm9135_vm9, %v28352_v54  ;;  %v11223_v54 = vsel %vm460_vm2, %v28514_v60, %v11222_v51  ;;  %v31002_v60 = vld [vmem:[#allocation24_spill] sm:$0xff] }
 0xa89   : > { %20137 = vmatmul.mubr.msk.f32.vlgmr.msra.gmra.mrb[70].mxu1 %vm9135_vm9, %v28373_v40  ;;  %v11394_v40 = vrot.slane %v28927_v18, 2 }
 0xa8a   : > { %20161 = vmatpush3.msk.msra.mxu1 %vm2419_vm5, %v15514_v52  ;;  %20139 = vmatprep.mubr.msk.f32.mxu1 %vm9135_vm9, %v28385_v30  ;;  %v15568_v30 = vld [vmem:[%s29720_s2 + $0x34] sm:$0x7] }
 0xa8b   : > { %20186 = vmatprep.subr.msk.mxu1 %vm2419_vm5, %v15532_v22  ;;  %v11395_v63 = vsel %vm1160_vm6, %v28643_v47, %v11394_v40  ;;  %v31014_v47 = vld [vmem:[#allocation42_spill] sm:$0xff] }
 0xa8d   : > { %20140 = vmatmul.mubr.msk.f32.gmra.mrb[72].mxu1 %vm9135_vm9, %v28397_v26  ;;  %v30984_v26 = vld [vmem:[#allocation163_spill] sm:$0xff] }
 0xa8e   : > { %20142 = vmatprep.mubr.msk.f32.mxu1 %vm9135_vm9, %v28409_v36  ;;  %v30986_v36 = vld [vmem:[#allocation167_spill] sm:$0xff] }
 0xa91   : > { %20143 = vmatmul.mubr.msk.f32.gmra.mrb[74].mxu1 %vm9135_vm9, %v28421_v45  ;;  %v30988_v45 = vld [vmem:[#allocation171_spill] sm:$0xff] }
 0xa92   : > { %20145 = vmatprep.mubr.msk.f32.mxu1 %vm9135_vm9, %v28433_v4  ;;  %v11566_v4 = vrot.slane %v28927_v18, 3 }
 0xa95   : > { %20146 = vmatmul.mubr.msk.f32.gmra.mrb[76].mxu1 %vm9135_vm9, %v28445_v8  ;;  %v30991_v8 = vld [vmem:[#allocation179_spill] sm:$0xff] }
 0xa96   : > { %20148 = vmatprep.mubr.msk.f32.mxu1 %vm9135_vm9, %v28457_v34  ;;  %v11567_v34 = vsel %vm1580_vm4, %v30992_v12, %v11566_v4 }
 0xa99   : > { %20149 = vmatmul.mubr.msk.f32.gmra.mrb[78].mxu1 %vm9135_vm9, %v28469_v10  ;;  %v30994_v10 = vld [vmem:[#allocation183_spill] sm:$0xff] }
 0xa9a   : > { %20151 = vmatprep.mubr.msk.f32.mxu1 %vm9135_vm9, %v28481_v61  ;;  %v30996_v61 = vld [vmem:[#allocation12_spill] sm:$0xff] }
 0xa9d   : > { %20152 = vmatmul.mubr.msk.f32.gmra.mrb[80].mxu1 %vm9135_vm9, %v28493_v41  ;;  %v30998_v41 = vld [vmem:[#allocation16_spill] sm:$0xff] }
 0xa9e   : > { %20154 = vmatprep.mubr.msk.f32.mxu1 %vm9135_vm9, %v28505_v17  ;;  %v31000_v17 = vld [vmem:[#allocation20_spill] sm:$0xff] }
 0xaa1   : > { %20155 = vmatmul.mubr.msk.f32.gmra.mrb[82].mxu1 %vm9135_vm9, %v28518_v25  ;;  %v31003_v25 = vld [vmem:[#allocation26_spill] sm:$0xff] }
 0xaa2   : > { %20157 = vmatprep.mubr.msk.f32.mxu1 %vm9135_vm9, %v11223_v54 }
 0xaa5   : > { %20158 = vmatmul.mubr.msk.f32.gmra.mrb[84].mxu1 %vm9135_vm9, %v11222_v51 }
 0xaa6   : > { %20162 = vmatprep.mubr.msk.f32.mxu1 %vm9135_vm9, %v28569_v23  ;;  %v31004_v23 = vld [vmem:[#allocation28_spill] sm:$0xff] }
 0xaa9   : > { %20163 = vmatmul.mubr.msk.f32.vlgmr.msra.gmra.mrb[70].mxu1 %vm9135_vm9, %v28578_v16  ;;  %v11738_v16 = vrot.slane %v28927_v18, 4  ;;  %v12152_v18 = vld [vmem:[%s29721_s3] sm:$0xff] }
 0xaaa   : > { %20187 = vmatpush3.msk.msra.mxu1 %vm2419_vm5, %v15532_v22  ;;  %20165 = vmatprep.mubr.msk.f32.mxu1 %vm9135_vm9, %v28586_v56  ;;  %v31005_v56 = vld [vmem:[#allocation32_spill] sm:$0xff]  ;;  %v29308_v52 = vpack.c.bf16 %v12153_v6, %v12152_v18 }
 0xaab   : > { %20212 = vmatprep.subr.msk.mxu1 %vm2419_vm5, %v15550_v62 }
 0xaad   : > { %20166 = vmatmul.mubr.msk.f32.gmra.mrb[72].mxu1 %vm9135_vm9, %v28592_v48  ;;  %v31006_v48 = vld [vmem:[#allocation34_spill] sm:$0xff] }
 0xaae   : > { %20168 = vmatprep.mubr.msk.f32.mxu1 %vm9135_vm9, %v28598_v21  ;;  %v31007_v21 = vld [vmem:[#allocation30_spill] sm:$0xff] }
 0xab1   : > { %20169 = vmatmul.mubr.msk.f32.gmra.mrb[74].mxu1 %vm9135_vm9, %v28604_v38  ;;  %v11739_v38 = vsel %vm601_vm0, %v31007_v21, %v11738_v16  ;;  %v15607_v21 = vld [vmem:[%s29721_s3 + $0x28] sm:$0x3]  ;;  %vm20560_vm0 = vmpackc.low %vm1160_vm6, %vm22841_vm11 }
 0xab2   : > { %20171 = vmatprep.mubr.msk.f32.mxu1 %vm9135_vm9, %v28610_v27  ;;  %v31008_v27 = vld [vmem:[#allocation36_spill] sm:$0xff] }
 0xab5   : > { %20172 = vmatmul.mubr.msk.f32.gmra.mrb[76].mxu1 %vm9135_vm9, %v28616_v9  ;;  %v31009_v9 = vld [vmem:[#allocation252_spill] sm:$0xff] }
 0xab6   : > { %20174 = vmatprep.mubr.msk.f32.mxu1 %vm9135_vm9, %v28622_v7  ;;  %v31010_v7 = vld [vmem:[#allocation38_spill] sm:$0xff] }
 0xab9   : > { %20175 = vmatmul.mubr.msk.f32.gmra.mrb[78].mxu1 %vm9135_vm9, %v28628_v5  ;;  %v31011_v5 = vld [vmem:[#allocation253_spill] sm:$0xff] }
 0xaba   : > { %20177 = vmatprep.mubr.msk.f32.mxu1 %vm9135_vm9, %v28634_v44  ;;  %v31012_v44 = vld [vmem:[#allocation40_spill] sm:$0xff] }
 0xabd   : > { %20178 = vmatmul.mubr.msk.f32.gmra.mrb[80].mxu1 %vm9135_vm9, %v28640_v20  ;;  %v31013_v20 = vld [vmem:[#allocation254_spill] sm:$0xff] }
 0xabe   : > { %20180 = vmatprep.mubr.msk.f32.mxu1 %vm9135_vm9, %v28648_v50  ;;  %v31015_v50 = vld [vmem:[#allocation255_spill] sm:$0xff] }
 0xac1   : > { %20181 = vmatmul.mubr.msk.f32.gmra.mrb[82].mxu1 %vm9135_vm9, %v28654_v55  ;;  %v31016_v55 = vld [vmem:[#allocation44_spill] sm:$0xff] }
 0xac2   : > { %20183 = vmatprep.mubr.msk.f32.mxu1 %vm9135_vm9, %v11395_v63 }
 0xac5   : > { %20184 = vmatmul.mubr.msk.f32.gmra.mrb[84].mxu1 %vm9135_vm9, %v11394_v40 }
 0xac6   : > { %20188 = vmatprep.mubr.msk.f32.mxu1 %vm9135_vm9, %v28667_v15  ;;  %v31017_v15 = vld [vmem:[#allocation256_spill] sm:$0xff] }
 0xac9   : > { %20189 = vmatmul.mubr.msk.f32.vlgmr.msra.gmra.mrb[70].mxu1 %vm9135_vm9, %v28676_v3  ;;  %v9206_v3 = vld [vmem:[#allocation2 + $0x110] ss:$2 sm:$0x1] }
 0xaca   : > { %20213 = vmatpush3.msk.msra.mxu1 %vm2419_vm5, %v15550_v62  ;;  %20191 = vmatprep.mubr.msk.f32.mxu1 %vm9135_vm9, %v28684_v14  ;;  %v9242_v14 = vld [vmem:[#allocation2 + $0x111] ss:$2 sm:$0x1] }
 0xacb   : > { %20238 = vmatprep.subr.msk.mxu1 %vm2419_vm5, %v15568_v30 }
 0xacd   : > { %20192 = vmatmul.mubr.msk.f32.gmra.mrb[72].mxu1 %vm9135_vm9, %v28690_v43  ;;  %v31018_v43 = vld [vmem:[#allocation46_spill] sm:$0xff] }
 0xace   : > { %20194 = vmatprep.mubr.msk.f32.mxu1 %vm9135_vm9, %v28696_v33  ;;  %v9260_v33 = vmax.f32 %v9206_v3, %v9242_v14 }
 0xad0   : > { %v11911_v32 = vrot.slane %v9260_v33, 5 }
 0xad1   : > { %20195 = vmatmul.mubr.msk.f32.gmra.mrb[74].mxu1 %vm9135_vm9, %v30983_v42 }
 0xad2   : > { %20197 = vmatprep.mubr.msk.f32.mxu1 %vm9135_vm9, %v30984_v26  ;;  %v11912_v28 = vsel %vm2419_vm5, %v31023_v2, %v11911_v32 }
 0xad5   : > { %20198 = vmatmul.mubr.msk.f32.gmra.mrb[76].mxu1 %vm9135_vm9, %v30985_v1 }
 0xad6   : > { %20200 = vmatprep.mubr.msk.f32.mxu1 %vm9135_vm9, %v30986_v36 }
 0xad9   : > { %20201 = vmatmul.mubr.msk.f32.gmra.mrb[78].mxu1 %vm9135_vm9, %v30987_v11 }
 0xada   : > { %20203 = vmatprep.mubr.msk.f32.mxu1 %vm9135_vm9, %v30988_v45 }
 0xadd   : > { %20204 = vmatmul.mubr.msk.f32.gmra.mrb[80].mxu1 %vm9135_vm9, %v30989_v35 }
 0xade   : > { %20206 = vmatprep.mubr.msk.f32.mxu1 %vm9135_vm9, %v30990_v37 }
 0xae1   : > { %20207 = vmatmul.mubr.msk.f32.gmra.mrb[82].mxu1 %vm9135_vm9, %v30991_v8 }
 0xae2   : > { %20209 = vmatprep.mubr.msk.f32.mxu1 %vm9135_vm9, %v11567_v34 }
 0xae5   : > { %20210 = vmatmul.mubr.msk.f32.gmra.mrb[84].mxu1 %vm9135_vm9, %v11566_v4 }
 0xae6   : > { %20214 = vmatprep.mubr.msk.f32.mxu1 %vm9135_vm9, %v30993_v29 }
 0xae9   : > { %20215 = vmatmul.mubr.msk.f32.vlgmr.msra.gmra.mrb[70].mxu1 %vm9135_vm9, %v30994_v10 }
 0xaea   : > { %20239 = vmatpush3.msk.msra.mxu1 %vm2419_vm5, %v15568_v30  ;;  %20217 = vmatprep.mubr.msk.f32.mxu1 %vm9135_vm9, %v30995_v58 }
 0xaeb   : > { %20463 = vmatprep.subr.msk.bf16.mxu1 %vm29294_vm12, %v20461_v59 }
 0xaed   : > { %20218 = vmatmul.mubr.msk.f32.gmra.mrb[72].mxu1 %vm9135_vm9, %v30996_v61 }
 0xaee   : > { %20220 = vmatprep.mubr.msk.f32.mxu1 %vm9135_vm9, %v30997_v53 }
 0xaf1   : > { %20221 = vmatmul.mubr.msk.f32.gmra.mrb[74].mxu1 %vm9135_vm9, %v30998_v41 }
 0xaf2   : > { %20223 = vmatprep.mubr.msk.f32.mxu1 %vm9135_vm9, %v30999_v19 }
 0xaf5   : > { %20224 = vmatmul.mubr.msk.f32.gmra.mrb[76].mxu1 %vm9135_vm9, %v31000_v17 }
 0xaf6   : > { %20226 = vmatprep.mubr.msk.f32.mxu1 %vm9135_vm9, %v31001_v0 }
 0xaf9   : > { %20227 = vmatmul.mubr.msk.f32.gmra.mrb[78].mxu1 %vm9135_vm9, %v31002_v60 }
 0xafa   : > { %20229 = vmatprep.mubr.msk.f32.mxu1 %vm9135_vm9, %v31003_v25 }
 0xafd   : > { %20230 = vmatmul.mubr.msk.f32.gmra.mrb[80].mxu1 %vm9135_vm9, %v31004_v23 }
 0xafe   : > { %20232 = vmatprep.mubr.msk.f32.mxu1 %vm9135_vm9, %v31005_v56 }
 0xb01   : > { %20233 = vmatmul.mubr.msk.f32.gmra.mrb[82].mxu1 %vm9135_vm9, %v31006_v48  ;;  %v15606_v48 = vld [vmem:[%s29721_s3 + $0x20] sm:$0xff] }
 0xb02   : > { %20235 = vmatprep.mubr.msk.f32.mxu1 %vm9135_vm9, %v11739_v38 }
 0xb05   : > { %20236 = vmatmul.mubr.msk.f32.gmra.mrb[84].mxu1 %vm9135_vm9, %v11738_v16 }
 0xb06   : > { %20240 = vmatprep.mubr.msk.f32.mxu1 %vm9135_vm9, %v31008_v27 }
 0xb09   : > { %20241 = vmatmul.mubr.msk.f32.vlgmr.msra.gmra.mrb[70].mxu1 %vm9135_vm9, %v31009_v9 }
 0xb0a   : > { %20243 = vmatprep.mubr.msk.f32.mxu1 %vm9135_vm9, %v31010_v7  ;;  %20466 = vmatpush3.bf16.msk.msra.mxu1 %vm29294_vm12, %v20461_v59 }
 0xb0b   : > { %20469 = vmatprep.subr.msk.bf16.mxu1 %vm29294_vm12, %v29308_v52 }
 0xb0d   : > { %20244 = vmatmul.mubr.msk.f32.gmra.mrb[72].mxu1 %vm9135_vm9, %v31011_v5 }
 0xb0e   : > { %20246 = vmatprep.mubr.msk.f32.mxu1 %vm9135_vm9, %v31012_v44 }
 0xb11   : > { %20247 = vmatmul.mubr.msk.f32.gmra.mrb[74].mxu1 %vm9135_vm9, %v31013_v20  ;;  %v20473_v20 = vpack.c.bf16 %v15607_v21, %v15606_v48 }
 0xb12   : > { %20249 = vmatprep.mubr.msk.f32.mxu1 %vm9135_vm9, %v31014_v47 }
 0xb15   : > { %20250 = vmatmul.mubr.msk.f32.gmra.mrb[76].mxu1 %vm9135_vm9, %v31015_v50 }
 0xb16   : > { %20252 = vmatprep.mubr.msk.f32.mxu1 %vm9135_vm9, %v31016_v55 }
 0xb19   : > { %20253 = vmatmul.mubr.msk.f32.gmra.mrb[78].mxu1 %vm9135_vm9, %v31017_v15 }
 0xb1a   : > { %20255 = vmatprep.mubr.msk.f32.mxu1 %vm9135_vm9, %v31018_v43 }
 0xb1d   : > { %20256 = vmatmul.mubr.msk.f32.gmra.mrb[80].mxu1 %vm9135_vm9, %v31019_v46 }
 0xb1e   : > { %20258 = vmatprep.mubr.msk.f32.mxu1 %vm9135_vm9, %v31020_v13 }
 0xb21   : > { %20259 = vmatmul.mubr.msk.f32.gmra.mrb[82].mxu1 %vm9135_vm9, %v31021_v24 }
 0xb22   : > { %20261 = vmatprep.mubr.msk.f32.mxu1 %vm9135_vm9, %v31022_v49 }
 0xb25   : > { %20262 = vmatmul.mubr.msk.f32.gmra.mrb[84].mxu1 %vm9135_vm9, %v11912_v28 }
 0xbdc   : > { %v20242_v22 = vpop.f32.mrb[70].mxu1 }
 0xbdd   : > { %v12080_v51 = vmax.f32 %v20242_v22, 0.0  ;;  %v11984_v54 = vpop.f32.mrb[71].mxu1 }
 0xbde   : > { %v12079_v62 = vmax.f32 %v11984_v54, 0.0 }
 0xbdf   : > { %12097 = vst.msk [vmem:[#allocation3 + $0x8] sm:$0xff] %vm12095_vm13, %v12080_v51 }
 0xbe0   : > { %12096 = vst.msk [vmem:[#allocation3] sm:$0xff] %vm12095_vm13, %v12079_v62  ;;  %v20245_v40 = vpop.f32.mrb[72].mxu1 }
 0xbe1   : > { %v12082_v63 = vmax.f32 %v20245_v40, 0.0  ;;  %v11994_v30 = vpop.f32.mrb[73].mxu1 }
 0xbe2   : > { %v12081_v42 = vmax.f32 %v11994_v30, 0.0 }
 0xbe3   : > { %12099 = vst.msk [vmem:[#allocation3 + $0x18] sm:$0xff] %vm12095_vm13, %v12082_v63 }
 0xbe4   : > { %12098 = vst.msk [vmem:[#allocation3 + $0x10] sm:$0xff] %vm12095_vm13, %v12081_v42  ;;  %v20248_v26 = vpop.f32.mrb[74].mxu1 }
 0xbe5   : > { %v12084_v1 = vmax.f32 %v20248_v26, 0.0  ;;  %v12004_v36 = vpop.f32.mrb[75].mxu1 }
 0xbe6   : > { %v12083_v11 = vmax.f32 %v12004_v36, 0.0 }
 0xbe7   : > { %12101 = vst.msk [vmem:[#allocation3 + $0x28] sm:$0xff] %vm12095_vm13, %v12084_v1  ;;  %v12113_v45 = vld [vmem:[#allocation3] ss:$2 sm:$0xff]  ;;  %v12129_v35 = vld [vmem:[#allocation3 + $0x1] ss:$2 sm:$0xff] }
 0xbe8   : > { %12100 = vst.msk [vmem:[#allocation3 + $0x20] sm:$0xff] %vm12095_vm13, %v12083_v11  ;;  %v20251_v4 = vpop.f32.mrb[76].mxu1  ;;  %v29319_v34 = vmax.f32 %v12113_v45, %v12129_v35 }
 0xbe9   : > { %v12086_v37 = vmax.f32 %v20251_v4, 0.0  ;;  %v12014_v8 = vpop.f32.mrb[77].mxu1 }
 0xbea   : > { %v12085_v12 = vmax.f32 %v12014_v8, 0.0  ;;  %v12165_v17 = vrot.slane %v29319_v34, 1  ;;  %v12431_v45 = vrot.slane %v29319_v34, 2 }
 0xbeb   : > { %12103 = vst.msk [vmem:[#allocation3 + $0x38] sm:$0xff] %vm12095_vm13, %v12086_v37  ;;  %v12115_v29 = vld [vmem:[#allocation3 + $0x10] ss:$2 sm:$0xff]  ;;  %v12131_v10 = vld [vmem:[#allocation3 + $0x11] ss:$2 sm:$0xff] }
 0xbec   : > { %12102 = vst.msk [vmem:[#allocation3 + $0x30] sm:$0xff] %vm12095_vm13, %v12085_v12  ;;  %v20254_v58 = vpop.f32.mrb[78].mxu1  ;;  %v29323_v61 = vmax.f32 %v12115_v29, %v12131_v10 }
 0xbed   : > { %v12088_v53 = vmax.f32 %v20254_v58, 0.0  ;;  %v12024_v41 = vpop.f32.mrb[79].mxu1 }
 0xbee   : > { %v12087_v19 = vmax.f32 %v12024_v41, 0.0  ;;  %v12166_v0 = vrot.slane %v29323_v61, 1  ;;  %v12432_v11 = vrot.slane %v29323_v61, 2 }
 0xbef   : > { %12105 = vst.msk [vmem:[#allocation3 + $0x48] sm:$0xff] %vm12095_vm13, %v12088_v53  ;;  %v12117_v60 = vld [vmem:[#allocation3 + $0x20] ss:$2 sm:$0xff]  ;;  %v12133_v25 = vld [vmem:[#allocation3 + $0x21] ss:$2 sm:$0xff] }
 0xbf0   : > { %12104 = vst.msk [vmem:[#allocation3 + $0x40] sm:$0xff] %vm12095_vm13, %v12087_v19  ;;  %v20257_v23 = vpop.f32.mrb[80].mxu1  ;;  %v12167_v16 = vsel %vm460_vm2, %v12165_v17, %v12166_v0  ;;  %v29330_v56 = vmax.f32 %v12117_v60, %v12133_v25  ;;  %v12433_v4 = vsel %vm1160_vm6, %v12431_v45, %v12432_v11  ;;  %v15617_v17 = vld [vmem:[%s29722_s4 + $0x10] sm:$0xff]  ;;  %v12613_v25 = vld [vmem:[%s29722_s4] sm:$0xff] }
 0xbf1   : > { %v12090_v38 = vmax.f32 %v20257_v23, 0.0  ;;  %v12034_v27 = vpop.f32.mrb[81].mxu1  ;;  %20268 = vmatprep.mubr.msk.f32.mxu1 %vm12095_vm13, %v12167_v16  ;;  %v12614_v23 = vld [vmem:[%s29722_s4 + $0x8] sm:$0x3] }
 0xbf2   : > { %v12089_v9 = vmax.f32 %v12034_v27, 0.0  ;;  %v12168_v7 = vrot.slane %v29330_v56, 1  ;;  %v12434_v35 = vrot.slane %v29330_v56, 2  ;;  %v20485_v16 = vpack.c.bf16 %v12614_v23, %v12613_v25 }
 0xbf3   : > { %12107 = vst.msk [vmem:[#allocation3 + $0x58] sm:$0xff] %vm12095_vm13, %v12090_v38  ;;  %v12119_v5 = vld [vmem:[#allocation3 + $0x30] ss:$2 sm:$0xff]  ;;  %v12135_v44 = vld [vmem:[#allocation3 + $0x31] ss:$2 sm:$0xff] }
 0xbf4   : > { %12106 = vst.msk [vmem:[#allocation3 + $0x50] sm:$0xff] %vm12095_vm13, %v12089_v9  ;;  %v20260_v47 = vpop.f32.mrb[82].mxu1  ;;  %v12169_v50 = vsel %vm460_vm2, %v12166_v0, %v12168_v7  ;;  %v29343_v55 = vmax.f32 %v12119_v5, %v12135_v44  ;;  %v12435_v8 = vsel %vm1160_vm6, %v12432_v11, %v12434_v35  ;;  %v15618_v0 = vld [vmem:[%s29722_s4 + $0x18] sm:$0x3] }
 0xbf5   : > { %v12092_v15 = vmax.f32 %v20260_v47, 0.0  ;;  %v12044_v3 = vpop.f32.mrb[83].mxu1  ;;  %20269 = vmatmul.mubr.msk.f32.vlgmr.msra.gmra.mrb[86].mxu1 %vm12095_vm13, %v12169_v50  ;;  %v20479_v60 = vpack.c.bf16 %v15618_v0, %v15617_v17  ;;  %v13061_v17 = vld [vmem:[%s29723_s5 + $0x8] sm:$0x3]  ;;  %v22842_v0 = vmov 0.0|0.0  }
 0xbf6   : > { %v12091_v14 = vmax.f32 %v12044_v3, 0.0  ;;  %v12170_v43 = vrot.slane %v29343_v55, 1  ;;  %20472 = vmatpush3.bf16.msk.msra.mxu1 %vm29294_vm12, %v29308_v52  ;;  %v12436_v37 = vrot.slane %v29343_v55, 2 }
 0xbf7   : > { %12109 = vst.msk [vmem:[#allocation3 + $0x68] sm:$0xff] %vm12095_vm13, %v12092_v15  ;;  %v12121_v33 = vld [vmem:[#allocation3 + $0x40] ss:$2 sm:$0xff]  ;;  %v12137_v46 = vld [vmem:[#allocation3 + $0x41] ss:$2 sm:$0xff]  ;;  %20475 = vmatprep.subr.msk.bf16.mxu1 %vm29294_vm12, %v20473_v20 }
 0xbf8   : > { %12108 = vst.msk [vmem:[#allocation3 + $0x60] sm:$0xff] %vm12095_vm13, %v12091_v14  ;;  %v20263_v13 = vpop.f32.mrb[84].mxu1  ;;  %v12171_v32 = vsel %vm460_vm2, %v12168_v7, %v12170_v43  ;;  %v12148_v24 = vmax.f32 %v12121_v33, %v12137_v46  ;;  %v12437_v29 = vsel %vm1160_vm6, %v12434_v35, %v12436_v37 }
 0xbf9   : > { %v12094_v49 = vmax.f32 %v20263_v13, 0.0  ;;  %v12054_v2 = vpop.f32.mrb[85].mxu1  ;;  %20271 = vmatprep.mubr.msk.f32.mxu1 %vm12095_vm13, %v12171_v32 }
 0xbfa   : > { %v12093_v28 = vmax.f32 %v12054_v2, 0.0  ;;  %v12172_v57 = vrot.slane %v12148_v24, 1  ;;  %v12438_v12 = vrot.slane %v12148_v24, 2 }
 0xbfb   : > { %12112 = vst.msk [vmem:[#allocation3 + $0x78] sm:$0xf] %vm12111_vm14, %v12094_v49  ;;  %v12123_v31 = vld [vmem:[#allocation3 + $0x50] ss:$2 sm:$0xff]  ;;  %v12139_v59 = vld [vmem:[#allocation3 + $0x51] ss:$2 sm:$0xff] }
 0xbfc   : > { %12110 = vst.msk [vmem:[#allocation3 + $0x70] sm:$0xff] %vm12095_vm13, %v12093_v28  ;;  %v12173_v18 = vsel %vm460_vm2, %v12170_v43, %v12172_v57  ;;  %v12149_v6 = vmax.f32 %v12123_v31, %v12139_v59 }
 0xbfd   : > { %20272 = vmatmul.mubr.msk.f32.gmra.mrb[88].mxu1 %vm12095_vm13, %v12173_v18  ;;  %v15629_v18 = vld [vmem:[%s29722_s4 + $0x20] sm:$0xff] }
 0xbfe   : > { %v12174_v52 = vrot.slane %v12149_v6, 1  ;;  %v12440_v10 = vrot.slane %v12149_v6, 2 }
 0xbff   : > { %v12125_v22 = vld [vmem:[#allocation3 + $0x60] ss:$2 sm:$0xff]  ;;  %v12141_v51 = vld [vmem:[#allocation3 + $0x61] ss:$2 sm:$0xff] }
 0xc00   : > { %v12175_v54 = vsel %vm460_vm2, %v12172_v57, %v12174_v52  ;;  %v12150_v62 = vmax.f32 %v12125_v22, %v12141_v51 }
 0xc01   : > { %20274 = vmatprep.mubr.msk.f32.mxu1 %vm12095_vm13, %v12175_v54 }
 0xc02   : > { %v12176_v40 = vrot.slane %v12150_v62, 1  ;;  %v12442_v58 = vrot.slane %v12150_v62, 2 }
 0xc03   : > { %v12127_v63 = vld [vmem:[#allocation3 + $0x70] ss:$2 sm:$0x3f]  ;;  %v12143_v30 = vld [vmem:[#allocation3 + $0x71] ss:$2 sm:$0x3f] }
 0xc04   : > { %v12177_v42 = vsel %vm460_vm2, %v12174_v52, %v12176_v40  ;;  %v12151_v26 = vmax.f32 %v12127_v63, %v12143_v30  ;;  %v12443_v41 = vsel %vm1160_vm6, %v12440_v10, %v12442_v58 }
 0xc05   : > { %20275 = vmatmul.mubr.msk.f32.gmra.mrb[90].mxu1 %vm12095_vm13, %v12177_v42  ;;  %v15636_v42 = vld [vmem:[%s29722_s4 + $0x30] sm:$0xff] }
 0xc06   : > { %v12178_v1 = vrot.slane %v12151_v26, 1  ;;  %v12444_v53 = vrot.slane %v12151_v26, 2 }
 0xc08   : > { %v12179_v36 = vsel %vm460_vm2, %v12176_v40, %v12178_v1  ;;  %v12445_v19 = vsel %vm1160_vm6, %v12442_v58, %v12444_v53 }
 0xc09   : > { %20277 = vmatprep.mubr.msk.f32.mxu1 %vm12095_vm13, %v12179_v36 }
 0xc0a   : > { %20278 = vmatmul.mubr.msk.f32.gmra.mrb[92].mxu1 %vm12095_vm13, %v12178_v1 }
 0xc0b   : > { %20284 = vmatprep.mubr.msk.f32.mxu1 %vm12095_vm13, %v29319_v34  ;;  %v12439_v34 = vsel %vm1160_vm6, %v12436_v37, %v12438_v12 }
 0xc0e   : > { %20285 = vmatmul.mubr.msk.f32.vlgmr.msra.gmra.mrb[86].mxu1 %vm12095_vm13, %v29323_v61  ;;  %v12441_v61 = vsel %vm1160_vm6, %v12438_v12, %v12440_v10 }
 0xc0f   : > { %20478 = vmatpush3.bf16.msk.msra.mxu1 %vm29294_vm12, %v20473_v20  ;;  %20287 = vmatprep.mubr.msk.f32.mxu1 %vm12095_vm13, %v29330_v56 }
 0xc10   : > { %20481 = vmatprep.subr.msk.bf16.mxu1 %vm29294_vm12, %v20479_v60 }
 0xc12   : > { %20288 = vmatmul.mubr.msk.f32.gmra.mrb[88].mxu1 %vm12095_vm13, %v29343_v55 }
 0xc13   : > { %20290 = vmatprep.mubr.msk.f32.mxu1 %vm12095_vm13, %v12148_v24 }
 0xc16   : > { %20291 = vmatmul.mubr.msk.f32.gmra.mrb[90].mxu1 %vm12095_vm13, %v12149_v6  ;;  %v15630_v6 = vld [vmem:[%s29722_s4 + $0x28] sm:$0x3] }
 0xc17   : > { %20293 = vmatprep.mubr.msk.f32.mxu1 %vm12095_vm13, %v12150_v62  ;;  %v20491_v54 = vpack.c.bf16 %v15630_v6, %v15629_v18  ;;  %v15666_v18 = vld [vmem:[%s29723_s5 + $0x68] sm:$0x3] }
 0xc1a   : > { %20294 = vmatmul.mubr.msk.f32.gmra.mrb[92].mxu1 %vm12095_vm13, %v12151_v26  ;;  %v15637_v26 = vld [vmem:[%s29722_s4 + $0x38] sm:$0x3] }
 0xc1b   : > { %20300 = vmatprep.mubr.msk.f32.mxu1 %vm12095_vm13, %v12433_v4  ;;  %v20497_v1 = vpack.c.bf16 %v15637_v26, %v15636_v42  ;;  %v15677_v26 = vld [vmem:[%s29723_s5 + $0x90] sm:$0xff] }
 0xc1e   : > { %20301 = vmatmul.mubr.msk.f32.vlgmr.msra.gmra.mrb[86].mxu1 %vm12095_vm13, %v12435_v8 }
 0xc1f   : > { %20303 = vmatprep.mubr.msk.f32.mxu1 %vm12095_vm13, %v12437_v29  ;;  %20484 = vmatpush3.bf16.msk.msra.mxu1 %vm29294_vm12, %v20479_v60 }
 0xc20   : > { %20487 = vmatprep.subr.msk.bf16.mxu1 %vm29294_vm12, %v20485_v16 }
 0xc22   : > { %20304 = vmatmul.mubr.msk.f32.gmra.mrb[88].mxu1 %vm12095_vm13, %v12439_v34 }
 0xc23   : > { %20306 = vmatprep.mubr.msk.f32.mxu1 %vm12095_vm13, %v12441_v61 }
 0xc26   : > { %20307 = vmatmul.mubr.msk.f32.gmra.mrb[90].mxu1 %vm12095_vm13, %v12443_v41  ;;  %v31026_v41 = vmov 0.0  }
 0xc27   : > { %20309 = vmatprep.mubr.msk.f32.mxu1 %vm12095_vm13, %v12445_v19  ;;  %v13060_v19 = vld [vmem:[%s29723_s5] sm:$0xff] }
 0xc28   : > { %v20504_v60 = vpack.c.bf16 %v13061_v17, %v13060_v19 }
 0xc2a   : > { %20310 = vmatmul.mubr.msk.f32.gmra.mrb[92].mxu1 %vm12095_vm13, %v12444_v53 }
 0xcf1   : > { %v20302_v56 = vpop.f32.mrb[86].mxu1 }
 0xcf2   : > { %v12579_v48 = vmax.f32 %v20302_v56, 0.0  ;;  %v12531_v21 = vpop.f32.mrb[87].mxu1 }
 0xcf3   : > { %v12578_v38 = vmax.f32 %v12531_v21, 0.0 }
 0xcf4   : > { %12587 = vst.msk [vmem:[#allocation4 + $0x8] sm:$0xff] %vm12095_vm13, %v12579_v48 }
 0xcf5   : > { %12586 = vst.msk [vmem:[#allocation4] sm:$0xff] %vm12095_vm13, %v12578_v38  ;;  %v20305_v27 = vpop.f32.mrb[88].mxu1 }
 0xcf6   : > { %v12581_v9 = vmax.f32 %v20305_v27, 0.0  ;;  %v12541_v7 = vpop.f32.mrb[89].mxu1 }
 0xcf7   : > { %v12580_v5 = vmax.f32 %v12541_v7, 0.0  ;;  %v15646_v7 = vld [vmem:[%s29723_s5 + $0x18] sm:$0x3] }
 0xcf8   : > { %12589 = vst.msk [vmem:[#allocation4 + $0x18] sm:$0xff] %vm12095_vm13, %v12581_v9  ;;  %v15645_v9 = vld [vmem:[%s29723_s5 + $0x10] sm:$0xff] }
 0xcf9   : > { %12588 = vst.msk [vmem:[#allocation4 + $0x10] sm:$0xff] %vm12095_vm13, %v12580_v5  ;;  %v20308_v44 = vpop.f32.mrb[90].mxu1 }
 0xcfa   : > { %v12583_v20 = vmax.f32 %v20308_v44, 0.0  ;;  %v12551_v47 = vpop.f32.mrb[91].mxu1 }
 0xcfb   : > { %v12582_v50 = vmax.f32 %v12551_v47, 0.0 }
 0xcfc   : > { %12591 = vst.msk [vmem:[#allocation4 + $0x28] sm:$0xff] %vm12095_vm13, %v12583_v20  ;;  %v12594_v55 = vld [vmem:[#allocation4] ss:$2 sm:$0xff]  ;;  %v12602_v15 = vld [vmem:[#allocation4 + $0x1] ss:$2 sm:$0xff]  ;;  %v20508_v20 = vpack.c.bf16 %v15646_v7, %v15645_v9 }
 0xcfd   : > { %12590 = vst.msk [vmem:[#allocation4 + $0x20] sm:$0xff] %vm12095_vm13, %v12582_v50  ;;  %v20311_v3 = vpop.f32.mrb[92].mxu1  ;;  %v12609_v46 = vmax.f32 %v12594_v55, %v12602_v15  ;;  %v15649_v50 = vld [vmem:[%s29723_s5 + $0x20] sm:$0xff]  ;;  %v15650_v55 = vld [vmem:[%s29723_s5 + $0x28] sm:$0x3] }
 0xcfe   : > { %v12585_v14 = vmax.f32 %v20311_v3, 0.0  ;;  %v12561_v43 = vpop.f32.mrb[93].mxu1  ;;  %v20512_v15 = vpack.c.bf16 %v15650_v55, %v15649_v50 }
 0xcff   : > { %v12584_v33 = vmax.f32 %v12561_v43, 0.0  ;;  %v12622_v49 = vrot.slane %v12609_v46, 1  ;;  %v12824_v11 = vrot.slane %v12609_v46, 2  ;;  %v12934_v29 = vrot.slane %v12609_v46, 3  ;;  %v15654_v43 = vld [vmem:[%s29723_s5 + $0x38] sm:$0x3] }
 0xd00   : > { %12593 = vst.msk [vmem:[#allocation4 + $0x38] sm:$0xf] %vm12111_vm14, %v12585_v14  ;;  %v12596_v13 = vld [vmem:[#allocation4 + $0x10] ss:$2 sm:$0xff]  ;;  %v12604_v32 = vld [vmem:[#allocation4 + $0x11] ss:$2 sm:$0xff] }
 0xd01   : > { %12592 = vst.msk [vmem:[#allocation4 + $0x30] sm:$0xff] %vm12095_vm13, %v12584_v33  ;;  %v12610_v24 = vmax.f32 %v12596_v13, %v12604_v32  ;;  %v15653_v14 = vld [vmem:[%s29723_s5 + $0x30] sm:$0xff]  ;;  %v15657_v13 = vld [vmem:[%s29723_s5 + $0x40] sm:$0xff]  ;;  %v15658_v32 = vld [vmem:[%s29723_s5 + $0x48] sm:$0x3] }
 0xd02   : > { %v20516_v33 = vpack.c.bf16 %v15654_v43, %v15653_v14 }
 0xd03   : > { %v12623_v2 = vrot.slane %v12610_v24, 1  ;;  %v12825_v36 = vrot.slane %v12610_v24, 2  ;;  %v12935_v12 = vrot.slane %v12610_v24, 3 }
 0xd04   : > { %v12598_v28 = vld [vmem:[#allocation4 + $0x20] ss:$2 sm:$0xff]  ;;  %v12606_v57 = vld [vmem:[#allocation4 + $0x21] ss:$2 sm:$0xff] }
 0xd05   : > { %v12624_v31 = vsel %vm460_vm2, %v12622_v49, %v12623_v2  ;;  %v12611_v59 = vmax.f32 %v12598_v28, %v12606_v57  ;;  %v12826_v35 = vsel %vm1160_vm6, %v12824_v11, %v12825_v36  ;;  %v12936_v34 = vsel %vm1580_vm4, %v12934_v29, %v12935_v12  ;;  %v15662_v28 = vld [vmem:[%s29723_s5 + $0x58] sm:$0x3]  ;;  %v15685_v29 = vld [vmem:[%s29723_s5 + $0xb0] sm:$0xff] }
 0xd06   : > { %20316 = vmatprep.mubr.msk.f32.mxu1 %vm12095_vm13, %v12624_v31 }
 0xd07   : > { %v12625_v52 = vrot.slane %v12611_v59, 1  ;;  %v12827_v45 = vrot.slane %v12611_v59, 2  ;;  %v12937_v10 = vrot.slane %v12611_v59, 3 }
 0xd08   : > { %v12600_v22 = vld [vmem:[#allocation4 + $0x30] ss:$2 sm:$0x3f]  ;;  %v12608_v51 = vld [vmem:[#allocation4 + $0x31] ss:$2 sm:$0x3f] }
 0xd09   : > { %v12626_v62 = vsel %vm460_vm2, %v12623_v2, %v12625_v52  ;;  %v12612_v40 = vmax.f32 %v12600_v22, %v12608_v51  ;;  %v12828_v37 = vsel %vm1160_vm6, %v12825_v36, %v12827_v45  ;;  %v12938_v61 = vsel %vm1580_vm4, %v12935_v12, %v12937_v10  ;;  %v15661_v2 = vld [vmem:[%s29723_s5 + $0x50] sm:$0xff]  ;;  %v15670_v51 = vld [vmem:[%s29723_s5 + $0x78] sm:$0x3] }
 0xd0a   : > { %20317 = vmatmul.mubr.msk.f32.vlgmr.msra.gmra.mrb[94].mxu1 %vm12095_vm13, %v12626_v62  ;;  %v20524_v57 = vpack.c.bf16 %v15662_v28, %v15661_v2  ;;  %v15669_v22 = vld [vmem:[%s29723_s5 + $0x70] sm:$0xff] }
 0xd0b   : > { %20490 = vmatpush3.bf16.msk.msra.mxu1 %vm29294_vm12, %v20485_v16  ;;  %v12627_v63 = vrot.slane %v12612_v40, 1  ;;  %v12829_v4 = vrot.slane %v12612_v40, 2  ;;  %v12939_v58 = vrot.slane %v12612_v40, 3 }
 0xd0c   : > { %20493 = vmatprep.subr.msk.bf16.mxu1 %vm29294_vm12, %v20491_v54 }
 0xd0d   : > { %v12628_v30 = vsel %vm460_vm2, %v12625_v52, %v12627_v63  ;;  %v12830_v8 = vsel %vm1160_vm6, %v12827_v45, %v12829_v4  ;;  %v12940_v53 = vsel %vm1580_vm4, %v12937_v10, %v12939_v58  ;;  %v15686_v10 = vld [vmem:[%s29723_s5 + $0xb8] sm:$0x3]  ;;  %vm14105_vm2 = vcmask 244736  }
 0xd0e   : > { %20319 = vmatprep.mubr.msk.f32.mxu1 %vm12095_vm13, %v12628_v30 }
 0xd0f   : > { %20320 = vmatmul.mubr.msk.f32.gmra.mrb[96].mxu1 %vm12095_vm13, %v12627_v63  ;;  %v15674_v63 = vld [vmem:[%s29723_s5 + $0x88] sm:$0x3] }
 0xd10   : > { %20326 = vmatprep.mubr.msk.f32.mxu1 %vm12095_vm13, %v12609_v46 }
 0xd13   : > { %20327 = vmatmul.mubr.msk.f32.vlgmr.msra.gmra.mrb[94].mxu1 %vm12095_vm13, %v12610_v24  ;;  %v20520_v24 = vpack.c.bf16 %v15658_v32, %v15657_v13 }
 0xd14   : > { %20496 = vmatpush3.bf16.msk.msra.mxu1 %vm29294_vm12, %v20491_v54  ;;  %20329 = vmatprep.mubr.msk.f32.mxu1 %vm12095_vm13, %v12611_v59  ;;  %v15665_v59 = vld [vmem:[%s29723_s5 + $0x60] sm:$0xff]  ;;  %v20532_v54 = vpack.c.bf16 %v15670_v51, %v15669_v22 }
 0xd15   : > { %20499 = vmatprep.subr.msk.bf16.mxu1 %vm29294_vm12, %v20497_v1  ;;  %v20528_v6 = vpack.c.bf16 %v15666_v18, %v15665_v59 }
 0xd17   : > { %20330 = vmatmul.mubr.msk.f32.gmra.mrb[96].mxu1 %vm12095_vm13, %v12612_v40  ;;  %v15673_v40 = vld [vmem:[%s29723_s5 + $0x80] sm:$0xff] }
 0xd18   : > { %20336 = vmatprep.mubr.msk.f32.mxu1 %vm12095_vm13, %v12826_v35  ;;  %v20536_v30 = vpack.c.bf16 %v15674_v63, %v15673_v40 }
 0xd1b   : > { %20337 = vmatmul.mubr.msk.f32.vlgmr.msra.gmra.mrb[94].mxu1 %vm12095_vm13, %v12828_v37  ;;  %v15682_v37 = vld [vmem:[%s29723_s5 + $0xa8] sm:$0x3] }
 0xd1c   : > { %20502 = vmatpush3.bf16.msk.msra.mxu1 %vm29294_vm12, %v20497_v1  ;;  %20339 = vmatprep.mubr.msk.f32.mxu1 %vm12095_vm13, %v12830_v8  ;;  %v15678_v1 = vld [vmem:[%s29723_s5 + $0x98] sm:$0x3] }
 0xd1d   : > { %20503 = vmatprep.subr.bf16.mxu1 %v22842_v0  ;;  %v20540_v45 = vpack.c.bf16 %v15678_v1, %v15677_v26 }
 0xd1f   : > { %20340 = vmatmul.mubr.msk.f32.gmra.mrb[96].mxu1 %vm12095_vm13, %v12829_v4  ;;  %v15681_v4 = vld [vmem:[%s29723_s5 + $0xa0] sm:$0xff] }
 0xd20   : > { %20346 = vmatprep.mubr.msk.f32.mxu1 %vm12095_vm13, %v12936_v34  ;;  %v20544_v8 = vpack.c.bf16 %v15682_v37, %v15681_v4  ;;  %v20548_v34 = vpack.c.bf16 %v15686_v10, %v15685_v29 }
 0xd23   : > { %20347 = vmatmul.mubr.msk.f32.vlgmr.msra.gmra.mrb[94].mxu1 %vm12095_vm13, %v12938_v61  ;;  %v15689_v61 = vld [vmem:[%s29723_s5 + $0xc0] sm:$0xff] }
 0xd24   : > { %20349 = vmatprep.mubr.msk.f32.mxu1 %vm12095_vm13, %v12940_v53  ;;  %20506 = vmatpush3.bf16.msk.msra.mxu1 %vm29294_vm12, %v20504_v60  ;;  %v15690_v53 = vld [vmem:[%s29723_s5 + $0xc8] sm:$0x3]  ;;  %v14100_v60 = vld [vmem:[%s29725_s7] sm:$0xff] }
 0xd25   : > { %20507 = vmatprep.subr.bf16.mxu1 %v22842_v0  ;;  %v20552_v19 = vpack.c.bf16 %v15690_v53, %v15689_v61 }
 0xd27   : > { %20350 = vmatmul.mubr.msk.f32.gmra.mrb[96].mxu1 %vm12095_vm13, %v12939_v58 }
 0xd28   : > { %20356 = vmatprep.mubr.msk.f32.mxu1 %vm22840_vm1, %v31026_v41 }
 0xdf6   : > { %v20348_v25 = vpop.f32.mrb[94].mxu1 }
 0xdf7   : > { %v13042_v23 = vmax.f32 %v20348_v25, 0.0  ;;  %v13018_v16 = vpop.f32.mrb[95].mxu1  ;;  %v14101_v25 = vld [vmem:[%s29725_s7 + $0x8] sm:$0xff] }
 0xdf8   : > { %v13041_v56 = vmax.f32 %v13018_v16, 0.0 }
 0xdf9   : > { %13046 = vst.msk [vmem:[#allocation5 + $0x8] sm:$0xff] %vm12095_vm13, %v13042_v23  ;;  %v20556_v23 = vpack.c.bf16 %v14101_v25, %v14100_v60 }
 0xdfa   : > { %13045 = vst.msk [vmem:[#allocation5] sm:$0xff] %vm12095_vm13, %v13041_v56  ;;  %v20351_v48 = vpop.f32.mrb[96].mxu1  ;;  %v14102_v56 = vld [vmem:[%s29725_s7 + $0x10] sm:$0xff] }
 0xdfb   : > { %v13044_v21 = vmax.f32 %v20351_v48, 0.0  ;;  %v13028_v38 = vpop.f32.mrb[97].mxu1  ;;  %v14103_v48 = vld [vmem:[%s29725_s7 + $0x18] sm:$0x3f] }
 0xdfc   : > { %v13043_v27 = vmax.f32 %v13028_v38, 0.0  ;;  %v13059_v38 = vld [vmem:[%s29724_s6] sm:$0x1] }
 0xdfd   : > { %13049 = vst.msk [vmem:[#allocation5 + $0x18] sm:$0x7] %vm13048_vm15, %v13044_v21  ;;  %v20559_v21 = vpack.c.bf16 %v14103_v48, %v14102_v56 }
 0xdfe   : > { %13047 = vst.msk [vmem:[#allocation5 + $0x10] sm:$0xff] %vm12095_vm13, %v13043_v27 }
 0xe01   : > { %v13050_v5 = vld [vmem:[#allocation5] ss:$2 sm:$0xff]  ;;  %v13054_v44 = vld [vmem:[#allocation5 + $0x1] ss:$2 sm:$0xff] }
 0xe02   : > { %v13057_v47 = vmax.f32 %v13050_v5, %v13054_v44  ;;  %v14183_v44 = vld [vmem:[%s29727_s9] sm:$0xff] }
 0xe04   : > { %20357 = vmatmul.mubr.msk.f32.vlgmr.msra.gmra.mrb[98].mxu1 %vm12095_vm13, %v13057_v47  ;;  %v13142_v3 = vrot.slane %v13057_v47, 1  ;;  %v13222_v46 = vrot.slane %v13057_v47, 2  ;;  %v13302_v49 = vrot.slane %v13057_v47, 3  ;;  %v13382_v31 = vrot.slane %v13057_v47, 4 }
 0xe05   : > { %20510 = vmatpush3.bf16.msk.msra.mxu1 %vm29294_vm12, %v20508_v20  ;;  %20363 = vmatprep.mubr.msk.f32.mxu1 %vm22840_vm1, %v31026_v41  ;;  %v13462_v52 = vrot.slane %v13057_v47, 5  ;;  %v13542_v62 = vrot.slane %v13057_v47, 6  ;;  %v13622_v42 = vrot.slane %v13057_v47, 7  ;;  %v13052_v36 = vld [vmem:[#allocation5 + $0x10] ss:$2 sm:$0x1f] }
 0xe06   : > { %20511 = vmatprep.subr.bf16.mxu1 %v22842_v0  ;;  %v13056_v11 = vld [vmem:[#allocation5 + $0x11] ss:$2 sm:$0x1f]  ;;  %v14104_v47 = vld [vmem:[%s29726_s8] sm:$0x1] }
 0xe07   : > { %v13058_v35 = vmax.f32 %v13052_v36, %v13056_v11 }
 0xe09   : > { %v13782_v12 = vrot.slane %v13058_v35, 1  ;;  %v13862_v58 = vrot.slane %v13058_v35, 2  ;;  %v13942_v17 = vrot.slane %v13058_v35, 3  ;;  %v14022_v16 = vrot.slane %v13058_v35, 4 }
 0xe0c   : > { %20364 = vmatmul.mubr.msk.f32.vlgmr.msra.gmra.mrb[98].mxu1 %vm12095_vm13, %v13142_v3  ;;  %v14185_v3 = vld [vmem:[%s29728_s10] sm:$0x1] }
 0xe0d   : > { %20514 = vmatpush3.bf16.msk.msra.mxu1 %vm29294_vm12, %v20512_v15  ;;  %20370 = vmatprep.mubr.msk.f32.mxu1 %vm22840_vm1, %v31026_v41 }
 0xe0e   : > { %20515 = vmatprep.subr.bf16.mxu1 %v22842_v0 }
 0xe14   : > { %20371 = vmatmul.mubr.msk.f32.vlgmr.msra.gmra.mrb[98].mxu1 %vm12095_vm13, %v13222_v46 }
 0xe15   : > { %20518 = vmatpush3.bf16.msk.msra.mxu1 %vm29294_vm12, %v20516_v33  ;;  %20377 = vmatprep.mubr.msk.f32.mxu1 %vm22840_vm1, %v31026_v41 }
 0xe16   : > { %20519 = vmatprep.subr.bf16.mxu1 %v22842_v0 }
 0xe1c   : > { %20378 = vmatmul.mubr.msk.f32.vlgmr.msra.gmra.mrb[98].mxu1 %vm12095_vm13, %v13302_v49 }
 0xe1d   : > { %20522 = vmatpush3.bf16.msk.msra.mxu1 %vm29294_vm12, %v20520_v24  ;;  %20384 = vmatprep.mubr.msk.f32.mxu1 %vm22840_vm1, %v31026_v41 }
 0xe1e   : > { %20523 = vmatprep.subr.bf16.mxu1 %v22842_v0 }
 0xe24   : > { %20385 = vmatmul.mubr.msk.f32.vlgmr.msra.gmra.mrb[98].mxu1 %vm12095_vm13, %v13382_v31 }
 0xe25   : > { %20526 = vmatpush3.bf16.msk.msra.mxu1 %vm29294_vm12, %v20524_v57  ;;  %20391 = vmatprep.mubr.msk.f32.mxu1 %vm22840_vm1, %v31026_v41 }
 0xe26   : > { %20527 = vmatprep.subr.bf16.mxu1 %v22842_v0 }
 0xe2c   : > { %20392 = vmatmul.mubr.msk.f32.vlgmr.msra.gmra.mrb[98].mxu1 %vm12095_vm13, %v13462_v52 }
 0xe2d   : > { %20530 = vmatpush3.bf16.msk.msra.mxu1 %vm29294_vm12, %v20528_v6  ;;  %20398 = vmatprep.mubr.msk.f32.mxu1 %vm22840_vm1, %v31026_v41 }
 0xe2e   : > { %20531 = vmatprep.subr.bf16.mxu1 %v22842_v0 }
 0xe34   : > { %20399 = vmatmul.mubr.msk.f32.vlgmr.msra.gmra.mrb[98].mxu1 %vm12095_vm13, %v13542_v62 }
 0xe35   : > { %20534 = vmatpush3.bf16.msk.msra.mxu1 %vm29294_vm12, %v20532_v54  ;;  %20405 = vmatprep.mubr.msk.f32.mxu1 %vm22840_vm1, %v31026_v41 }
 0xe36   : > { %20535 = vmatprep.subr.bf16.mxu1 %v22842_v0 }
 0xe3c   : > { %20406 = vmatmul.mubr.msk.f32.vlgmr.msra.gmra.mrb[98].mxu1 %vm12095_vm13, %v13622_v42 }
 0xe3d   : > { %20538 = vmatpush3.bf16.msk.msra.mxu1 %vm29294_vm12, %v20536_v30  ;;  %20412 = vmatprep.mubr.msk.f32.mxu1 %vm22840_vm1, %v31026_v41 }
 0xe3e   : > { %20539 = vmatprep.subr.bf16.mxu1 %v22842_v0 }
 0xe44   : > { %20413 = vmatmul.mubr.msk.f32.vlgmr.msra.gmra.mrb[98].mxu1 %vm12095_vm13, %v13058_v35 }
 0xe45   : > { %20542 = vmatpush3.bf16.msk.msra.mxu1 %vm29294_vm12, %v20540_v45  ;;  %20419 = vmatprep.mubr.msk.f32.mxu1 %vm22840_vm1, %v31026_v41 }
 0xe46   : > { %20543 = vmatprep.subr.bf16.mxu1 %v22842_v0 }
 0xe4c   : > { %20420 = vmatmul.mubr.msk.f32.vlgmr.msra.gmra.mrb[98].mxu1 %vm12095_vm13, %v13782_v12 }
 0xe4d   : > { %20546 = vmatpush3.bf16.msk.msra.mxu1 %vm29294_vm12, %v20544_v8  ;;  %20426 = vmatprep.mubr.msk.f32.mxu1 %vm22840_vm1, %v31026_v41 }
 0xe4e   : > { %20547 = vmatprep.subr.bf16.mxu1 %v22842_v0 }
 0xe54   : > { %20427 = vmatmul.mubr.msk.f32.vlgmr.msra.gmra.mrb[98].mxu1 %vm12095_vm13, %v13862_v58 }
 0xe55   : > { %20550 = vmatpush3.bf16.msk.msra.mxu1 %vm29294_vm12, %v20548_v34  ;;  %20433 = vmatprep.mubr.msk.f32.mxu1 %vm22840_vm1, %v31026_v41 }
 0xe56   : > { %20551 = vmatprep.subr.bf16.mxu1 %v22842_v0 }
 0xe5c   : > { %20434 = vmatmul.mubr.msk.f32.vlgmr.msra.gmra.mrb[98].mxu1 %vm12095_vm13, %v13942_v17 }
 0xe5d   : > { %20554 = vmatpush3.bf16.msk.msra.mxu1 %vm29294_vm12, %v20552_v19  ;;  %20440 = vmatprep.mubr.msk.f32.mxu1 %vm22840_vm1, %v31026_v41 }
 0xe5e   : > { %20555 = vmatprep.subr.bf16.mxu1 %v22842_v0 }
 0xe64   : > { %20441 = vmatmul.mubr.msk.f32.vlgmr.msra.gmra.mrb[98].mxu1 %vm12095_vm13, %v14022_v16 }
 0xe65   : > { %20557 = vmatpush3.bf16.msra.mxu1 %v20556_v23  ;;  %20451 = vmatprep.mubr.msk.f32.mxu1 %vm22840_vm1, %v31026_v41 }
 0xe66   : > { %20558 = vmatprep.subr.bf16.mxu1 %v22842_v0 }
 0xe69   : > { %20561 = vmatpush3.bf16.msk.msra.mxu1 %vm20560_vm0, %v20559_v21 }
 0xe6a   : > { %20562 = vmatprep.subr.bf16.mxu1 %v22842_v0  ;;  %v14184_v0 = vld [vmem:[%s29727_s9 + $0x8] sm:$0x3] }
 0xe6b   : > { %v20563_v20 = vpack.c.bf16 %v14184_v0, %v14183_v44 }
 0xf37   : > { %v14094_v27 = vpop.f32.mrb[98].mxu1 }
 0xf38   : > { %v20603_v9 = vadd.f32 %v14094_v27, %v13059_v38  ;;  %v20442_v7 = vpop.f32.mrb[99].mxu1 }
 0xf3a   : > { %v14099_v5 = vmax.f32 %v20603_v9, 0.0 }
 0xf3c   : > { %20452 = vmatmul.mubr.msk.f32.vlgmr.msra.gmra.mrb[100].mxu1 %vm14105_vm2, %v14099_v5 }
 0xf3d   : > { %20458 = vmatprep.mubr.msk.f32.mxu1 %vm22840_vm1, %v31026_v41  ;;  %20565 = vmatpush3.bf16.msk.msra.mxu1 %vm29294_vm12, %v20563_v20  ;;  %vm14262_vm1 = vcmask 32768  }
0x100f   : > { %v14178_v50 = vpop.f32.mrb[100].mxu1 }
0x1010   : > { %v14179_v55 = vadd.f32 %v14178_v50, %v14104_v47  ;;  %v20453_v15 = vpop.f32.mrb[101].mxu1 }
0x1012   : > { %v14182_v41 = vmax.f32 %v14179_v55, 0.0 }
0x1014   : > { %20459 = vmatmul.mubr.msk.f32.vlgmr.msra.gmra.mrb[102].mxu1 %vm12095_vm13, %v14182_v41 }
0x10e7   : > { %v14258_v39 = vpop.f32.mrb[102].mxu1 }
0x10e8   : > { %v14259_v14 = vadd.f32 %v14258_v39, %v14185_v3  ;;  %v20460_v43 = vpop.f32.mrb[103].mxu1 }
0x10ea   : > { %14263 = vst.msk [vmem:[%s378_s14] sm:$0x1] %vm14262_vm1, %v14259_v14 }
0x10eb   : > { %22788 = shalt.err (!%p22785_p3)
}
0x10ec   : > { %s22789_s29 = scalar_lea.hbm %s29676_s22, 16  ;;  %s22793_s24 = scalar_lea.hbm %s29729_s11, 32 }
0x10ed   : > { %p22790_p4 = scmp.ne.s32.totalorder %s29676_s22, %s22789_s29  ;;  %p22794_p9 = scmp.lt.u32.totalorder %s29676_s22, %s29729_s11 }
0x10ee   : > { %p22795_p10 = scmp.lt.u32.totalorder %s22793_s24, %s22789_s29  ;;  %p22797_p12 = scmp.lt.u32.totalorder %s22789_s29, %s29676_s22 }
0x10ef   : > { %p22791_p7 = pnand %p22790_p4, %p22942_p5 }
0x10f0   : > { %p22796_p11 = por %p22795_p10, %p22794_p9 }
0x10f1   : > { %p22792_p8 = pneg %p22791_p7 }
0x10f2   : > { %p22798_p13 = por %p22797_p12, %p22796_p11 }
0x10f4   : > { %p22799_p0 = pnand %p22798_p13, %p22792_p8 }
0x10f6   : > { %22802 = shalt.err (!%p22799_p0)
}
0x10f7   : > { %22615 = dma.vmem_to_hbm [thread:$0]  (%p22942_p5), %s29678_s15, 16, %s29676_s22, %s14265_s25  }
0x10f8 PF: > { %p22621_p1 = scmp.ge.s32.totalorder %s22837_s20, 2  ;;  %s14289_s0 = sand.u32 1, %s22825_s17  }
0x10f9   : > { %s14290_s30 = scalar_lea.sflag [#allocation7], %s14289_s0 }
0x10fa   : > { %p22618_p2 = pnand %p22621_p1, %p22946_p6 }
0x10fc   : > { %22820 = dma.done.wait (!%p22618_p2), %s14290_s30, 16  }
0x10fd   : > { %22822 = vsyncadd (!%p22618_p2), %s14290_s30, 4294967280  ;;  %p21_p3 = scmp.ge.s32.totalorder %s22929_s23, 4   ;;  %s31027_s17 = smov %s22829_s18 }
0x10fe   : > { %s31028_s18 = smov %s22833_s19  ;;  %s31029_s19 = smov %s22940_s26 }
0x10ff   : > { %s31030_s20 = smov %s22929_s23  ;;  %23 = sbr.rel (!%p21_p3) target bundleno = 5 (0x5), region = 215 }
0x1106   :  { %14294 = vsyncpa [#allocation7], 1 }
0x1107   :  { %14296 = vsyncpa [#allocation7 + $0x1], 1 }

</bundles_post_ra>
